<compile_context>
chip_gen: v6e
topology: v6e:2x2x1
jax: 0.10.0
libtpu: 0.0.40
codegen_flags: <defaults>
</compile_context>

<pallas_src>
import math
from functools import partial

import numpy as np
import jax
import jax.numpy as jnp
from jax import lax
from jax.experimental import pallas as pl
from jax.experimental.pallas import tpu as pltpu

BN_EPS = 1e-5
ACT_DTYPE = jnp.bfloat16  # inter-layer activation storage dtype


# ------------------------------------------------------------------ small helpers

def _fold_bn(w, b, bn):
    """Fold conv bias + inference BatchNorm into per-out-channel weight scale and shift."""
    if bn is None:
        return w, b
    scale = bn["gamma"] / jnp.sqrt(bn["var"] + BN_EPS)          # (Cout,)
    w = w * scale[:, None, None, None]                          # OIHW
    b = bn["beta"] + (b - bn["mean"]) * scale
    return w, b


def _w_matrix(w):
    """(Cout, Cin, KH, KW) -> (KH*KW*Cin, Cout) matching the im2col feature ordering."""
    cout, cin, kh, kw = w.shape
    return jnp.transpose(w, (2, 3, 1, 0)).reshape(kh * kw * cin, cout)


def _im2col(x, kh, kw, stride, pad):
    """Exact-grid patch extraction (XLA side). x: (N,H,W,C) -> (N,Ho,Wo,KH*KW*C)."""
    n, h, w, c = x.shape
    if pad:
        x = jnp.pad(x, ((0, 0), (pad, pad), (pad, pad), (0, 0)))
    ho = (h + 2 * pad - kh) // stride + 1
    wo = (w + 2 * pad - kw) // stride + 1
    cols = []
    for i in range(kh):
        for j in range(kw):
            cols.append(lax.slice(
                x, (0, i, j, 0),
                (n, i + (ho - 1) * stride + 1, j + (wo - 1) * stride + 1, c),
                (1, stride, stride, 1)))
    return jnp.concatenate(cols, axis=-1), ho, wo


def _cost(flops, in_arrays, out_elems, out_dtype):
    bytes_accessed = out_elems * np.dtype(out_dtype).itemsize
    for a in in_arrays:
        bytes_accessed += a.size * np.dtype(a.dtype).itemsize
    return pl.CostEstimate(flops=int(flops), transcendentals=0,
                           bytes_accessed=int(bytes_accessed))


# ------------------------------------------------------------------ plain conv kernel (stem / final)

def _mm_conv_kernel(x_ref, w_ref, shift_ref, o_ref, *, relu):
    z = jnp.dot(x_ref[0], w_ref[...], preferred_element_type=jnp.float32) + shift_ref[...]
    if relu:
        z = jnp.maximum(z, 0.0)
    o_ref[0] = z.astype(o_ref.dtype)


def conv_block(x, p, *, stride, pad, relu, out_dtype=ACT_DTYPE):
    """Conv + folded bias/BN + optional ReLU as ONE big-K matmul per image."""
    n = x.shape[0]
    cout, _, kh, kw = p["w"].shape
    wf, bf = _fold_bn(p["w"], p["b"], p["bn"])
    wmat = _w_matrix(wf).astype(jnp.bfloat16)
    shift = bf.reshape(1, cout).astype(jnp.float32)

    patches, ho, wo = _im2col(x, kh, kw, stride, pad)
    m = ho * wo
    k = wmat.shape[0]
    patches = patches.reshape(n, m, k).astype(jnp.bfloat16)
    k_pad = -k % 8                    # keep the MXU contraction dim sublane-aligned
    if k_pad:
        patches = jnp.pad(patches, ((0, 0), (0, 0), (0, k_pad)))
        wmat = jnp.pad(wmat, ((0, k_pad), (0, 0)))
        k += k_pad

    out = pl.pallas_call(
        partial(_mm_conv_kernel, relu=relu),
        out_shape=jax.ShapeDtypeStruct((n, m, cout), out_dtype),
        grid=(n,),
        in_specs=[pl.BlockSpec((1, m, k), lambda i: (i, 0, 0)),
                  pl.BlockSpec((k, cout), lambda i: (0, 0)),
                  pl.BlockSpec((1, cout), lambda i: (0, 0))],
        out_specs=pl.BlockSpec((1, m, cout), lambda i: (i, 0, 0)),
        compiler_params=pltpu.CompilerParams(dimension_semantics=("parallel",)),
        cost_estimate=_cost(2 * n * m * k * cout, [patches, wmat, shift],
                            n * m * cout, out_dtype),
    )(patches, wmat, shift)
    return out.reshape(n, ho, wo, cout)


# ------------------------------------------------------------------ fused ResUnit kernel

def _res_unit_kernel(patch_ref, mask_ref, w1_ref, s1_ref, w2_ref, s2_ref, id_ref, *rest,
                     taps, mq, resize):
    """Fused ResUnit: conv1(+BN+ReLU) -> conv2(+BN+ReLU) -> +identity -> ReLU.

    patch_ref: (1, Mp, 9*Cin)   conv1 im2col laid on the zero-padded (Ho+2, Wo+2) output grid
    mask_ref : (Mp, 1)          1 on interior rows of that grid, 0 on the border
    w1_ref   : (9*Cin, Cout)    conv1 weights (BN folded)
    w2_ref   : (9, Cout, Cout)  conv2 per-tap weights (BN folded)
    id_ref   : (1, Mq, Cid)     identity-branch input in the "wide q" row layout
    rest     : [wid_ref (Cid,Cout), sid_ref (1,Cout)]  o_ref (1, Mq, Cout)  y1_ref (Mp, Cout)
    taps     : static flat-row offsets of the 3x3 taps inside the padded grid
    """
    if resize:
        wid_ref, sid_ref, o_ref, y1_ref = rest
    else:
        o_ref, y1_ref = rest

    # conv1 + BN + ReLU; mask zeroes the padded border -> y1_ref holds the padded image
    # of conv1's output in a flat (Hp*Wp, Cout) layout, entirely in VMEM.
    y1 = jnp.dot(patch_ref[0], w1_ref[...], preferred_element_type=jnp.float32)
    y1 = jnp.maximum(y1 + s1_ref[...], 0.0) * mask_ref[...]
    y1_ref[...] = y1.astype(y1_ref.dtype)

    # conv2 (3x3, stride 1, pad 1): constant-offset tap windows of the VMEM-resident
    # padded image, accumulated on the MXU in f32.
    acc = None
    for t, d in enumerate(taps):
        contrib = jnp.dot(y1_ref[d:d + mq, :], w2_ref[t],
                          preferred_element_type=jnp.float32)
        acc = contrib if acc is None else acc + contrib
    z = jnp.maximum(acc + s2_ref[...], 0.0)            # final_body_activation = ReLU

    # identity branch (optional 1x1 stride-s conv + BN), residual add, final ReLU.
    if resize:
        ident = jnp.dot(id_ref[0], wid_ref[...], preferred_element_type=jnp.float32)
        ident = ident + sid_ref[...]
    else:
        ident = id_ref[0].astype(jnp.float32)
    o_ref[0] = jnp.maximum(z + ident, 0.0).astype(o_ref.dtype)


def res_unit_block(x, unit):
    """One fused pallas_call per ResUnit.  x: (N, H, W, Cin) NHWC bf16."""
    n, _, _, cin = x.shape
    s = unit["stride"]
    resize = unit["resize"]
    cout = unit["conv1"]["w"].shape[0]

    w1, b1 = _fold_bn(unit["conv1"]["w"], unit["conv1"]["b"], unit["conv1"]["bn"])
    w2, b2 = _fold_bn(unit["conv2"]["w"], unit["conv2"]["b"], unit["conv2"]["bn"])
    w1m = _w_matrix(w1).astype(jnp.bfloat16)                          # (9*Cin, Cout)
    s1 = b1.reshape(1, cout).astype(jnp.float32)
    w2t = jnp.transpose(w2, (2, 3, 1, 0)).reshape(9, cout, cout).astype(jnp.bfloat16)
    s2 = b2.reshape(1, cout).astype(jnp.float32)

    # conv1 im2col, placed on the zero-padded (Hp, Wp) = (Ho+2, Wo+2) output grid so the
    # in-kernel conv2 reads its 3x3 neighbourhood at constant flat-row offsets.
    patches, ho, wo = _im2col(x, 3, 3, s, 1)                          # (N, Ho, Wo, 9*Cin)
    hp, wp = ho + 2, wo + 2
    mp = hp * wp
    mq = (ho - 1) * wp + wo                                           # wide output rows
    k1 = 9 * cin
    patches = jnp.pad(patches, ((0, 0), (1, 1), (1, 1), (0, 0)))
    patches = patches.reshape(n, mp, k1).astype(jnp.bfloat16)

    hh = jnp.arange(hp)[:, None]
    ww = jnp.arange(wp)[None, :]
    mask = (((hh >= 1) & (hh <= ho) & (ww >= 1) & (ww <= wo))
            .astype(jnp.float32).reshape(mp, 1))

    # identity-branch input laid out so row r*Wp + c holds output pixel (r, c).
    if resize:
        id_src = x[:, ::s, ::s, :][:, :ho, :wo, :]                    # 1x1 stride-s sampling
    else:
        id_src = x                                                    # stride 1, Cin == Cout
    cid = id_src.shape[-1]
    id_q = jnp.pad(id_src, ((0, 0), (0, 2), (0, 2), (0, 0)))
    id_q = id_q.reshape(n, mp, cid)[:, :mq, :].astype(jnp.bfloat16)

    taps = tuple(i * wp + j for i in range(3) for j in range(3))

    inputs = [patches, mask, w1m, s1, w2t, s2, id_q]
    in_specs = [
        pl.BlockSpec((1, mp, k1), lambda i: (i, 0, 0)),
        pl.BlockSpec((mp, 1), lambda i: (0, 0)),
        pl.BlockSpec((k1, cout), lambda i: (0, 0)),
        pl.BlockSpec((1, cout), lambda i: (0, 0)),
        pl.BlockSpec((9, cout, cout), lambda i: (0, 0, 0)),
        pl.BlockSpec((1, cout), lambda i: (0, 0)),
        pl.BlockSpec((1, mq, cid), lambda i: (i, 0, 0)),
    ]
    flops = 2 * n * (mp * k1 * cout + 9 * mq * cout * cout)
    if resize:
        wid, bid = _fold_bn(unit["id"]["w"], unit["id"]["b"], unit["id"]["bn"])
        wid_m = _w_matrix(wid).astype(jnp.bfloat16)                   # (Cin, Cout)
        sid = bid.reshape(1, cout).astype(jnp.float32)
        inputs += [wid_m, sid]
        in_specs += [pl.BlockSpec((cid, cout), lambda i: (0, 0)),
                     pl.BlockSpec((1, cout), lambda i: (0, 0))]
        flops += 2 * n * mq * cid * cout

    out = pl.pallas_call(
        partial(_res_unit_kernel, taps=taps, mq=mq, resize=resize),
        out_shape=jax.ShapeDtypeStruct((n, mq, cout), ACT_DTYPE),
        grid=(n,),
        in_specs=in_specs,
        out_specs=pl.BlockSpec((1, mq, cout), lambda i: (i, 0, 0)),
        scratch_shapes=[pltpu.VMEM((mp, cout), jnp.bfloat16)],
        compiler_params=pltpu.CompilerParams(dimension_semantics=("parallel",)),
        cost_estimate=_cost(flops, inputs, n * mq * cout, ACT_DTYPE),
    )(*inputs)

    # drop the gutter rows of the wide layout -> (N, Ho, Wo, Cout)
    out = jnp.pad(out, ((0, 0), (0, mp - mq), (0, 0)))
    return out.reshape(n, hp, wp, cout)[:, :ho, :wo, :]


# ------------------------------------------------------------------ full encoder forward

def raft_encoder_forward(x, params):
    """x: NCHW tensor, or tuple/list of NCHW tensors (concatenated on batch like PyTorch)."""
    is_list = isinstance(x, (tuple, list))
    if is_list:
        batch_dim = x[0].shape[0]
        x = jnp.concatenate(list(x), axis=0)

    h = jnp.transpose(x, (0, 2, 3, 1)).astype(ACT_DTYPE)              # NCHW -> NHWC, bf16
    h = conv_block(h, params["init"], stride=2, pad=3, relu=True)     # 7x7 s2 + BN + ReLU
    for stage in params["stages"]:
        for unit in stage:
            h = res_unit_block(h, unit)
    h = conv_block(h, params["final"], stride=1, pad=0, relu=False,
                   out_dtype=jnp.float32)                             # final 1x1, bias only
    # TODO(synk): dropout (training-time only, default rate 0.0) not implemented.
    out = jnp.transpose(h, (0, 3, 1, 2))                              # NHWC -> NCHW

    if is_list:
        return out[:batch_dim], out[batch_dim:2 * batch_dim]
    return out


# ------------------------------------------------------------------ deterministic parameters

def _make_conv(key, cin, cout, k, with_bn):
    # kaiming_uniform_(mode='fan_out', nonlinearity='relu'); bias = 0; BN at PyTorch init.
    fan_out = cout * k * k
    bound = math.sqrt(2.0) * math.sqrt(3.0 / fan_out)
    w = jax.random.uniform(key, (cout, cin, k, k), jnp.float32, -bound, bound)
    b = jnp.zeros((cout,), jnp.float32)
    bn = None
    if with_bn:
        bn = {"gamma": jnp.ones((cout,), jnp.float32),
              "beta": jnp.zeros((cout,), jnp.float32),
              "mean": jnp.zeros((cout,), jnp.float32),
              "var": jnp.ones((cout,), jnp.float32)}
    return {"w": w, "b": b, "bn": bn}


def build_params(key, in_channels, init_block_channels, mid_channels, final_block_channels):
    keys = iter(jax.random.split(key, 64))
    params = {"init": _make_conv(next(keys), in_channels, init_block_channels, 7, True)}
    cin = init_block_channels
    stages = []
    for i, channels_per_stage in enumerate(mid_channels):
        units = []
        for j, cout in enumerate(channels_per_stage):
            stride = 2 if (j == 0 and i != 0) else 1
            unit = {"stride": stride,
                    "resize": (cin != cout) or (stride != 1),
                    "conv1": _make_conv(next(keys), cin, cout, 3, True),
                    "conv2": _make_conv(next(keys), cout, cout, 3, True),
                    "id": None}
            if unit["resize"]:
                unit["id"] = _make_conv(next(keys), cin, cout, 1, True)
            units.append(unit)
            cin = cout
        stages.append(units)
    params["stages"] = stages
    params["final"] = _make_conv(next(keys), cin, final_block_channels, 1, False)
    return params


# ------------------------------------------------------------------ pure-XLA f32 reference

def reference_forward(x, params):
    def conv_bn_act(h, p, stride, pad, relu):
        y = lax.conv_general_dilated(h, p["w"], (stride, stride), ((pad, pad), (pad, pad)),
                                     dimension_numbers=("NCHW", "OIHW", "NCHW"))
        y = y + p["b"].reshape(1, -1, 1, 1)
        if p["bn"] is not None:
            bn = p["bn"]
            scale = (bn["gamma"] / jnp.sqrt(bn["var"] + BN_EPS)).reshape(1, -1, 1, 1)
            y = (y - bn["mean"].reshape(1, -1, 1, 1)) * scale + bn["beta"].reshape(1, -1, 1, 1)
        if relu:
            y = jnp.maximum(y, 0.0)
        return y

    h = conv_bn_act(x, params["init"], 2, 3, True)
    for stage in params["stages"]:
        for u in stage:
            s = u["stride"]
            ident = conv_bn_act(h, u["id"], s, 0, False) if u["resize"] else h
            y = conv_bn_act(h, u["conv1"], s, 1, True)
            y = conv_bn_act(y, u["conv2"], 1, 1, True)
            h = jnp.maximum(y + ident, 0.0)
    return conv_bn_act(h, params["final"], 1, 0, False)


# ------------------------------------------------------------------ main

if __name__ == "__main__":
    # Small RAFT-style encoder config (bottleneck=False, basic ResUnits)
    in_channels = 3
    init_block_channels = 16
    mid_channels = [[16, 16], [24, 24], [32, 32]]
    final_block_channels = 64

    key = jax.random.PRNGKey(0)
    kp, kx = jax.random.split(key)
    params = build_params(kp, in_channels, init_block_channels, mid_channels,
                          final_block_channels)

    x = jax.random.normal(kx, (2, in_channels, 32, 32), jnp.float32)

    fwd = jax.jit(lambda inp: raft_encoder_forward(inp, params))
    out = jax.block_until_ready(fwd(x))
    assert out.shape == (2, final_block_channels, 4, 4), out.shape

    # numerical sanity check: bf16 Pallas pipeline vs f32 XLA reference of the same module
    ref = jax.block_until_ready(reference_forward(x, params))
    err = float(jnp.max(jnp.abs(out - ref)) / (jnp.max(jnp.abs(ref)) + 1e-6))
    assert err < 0.1, f"numerical mismatch vs reference: {err}"

    # also exercise the tuple path (RAFT passes (image1, image2))
    o1, o2 = jax.jit(lambda inp: raft_encoder_forward(inp, params))((x, x))
    jax.block_until_ready((o1, o2))
    assert o1.shape == o2.shape == (2, final_block_channels, 4, 4)

    print("KERNEL_OK")
</pallas_src>

<mosaic_0001>
module attributes {stable_mosaic.version = 11 : i64} {
  func.func @_mm_conv_kernel(%arg0: i32, %arg1: memref<1x256x152xbf16, #tpu.memory_space<vmem>>, %arg2: memref<152x16xbf16, #tpu.memory_space<vmem>>, %arg3: memref<1x16xf32, #tpu.memory_space<vmem>>, %arg4: memref<1x256x16xbf16, #tpu.memory_space<vmem>>) attributes {dimension_semantics = [#tpu.dimension_semantics<parallel>], iteration_bounds = array<i64: 2>, scalar_prefetch = 0 : i64, scratch_operands = 0 : i64, tpu.core_type = #tpu.core_type<tc>, window_params = [{transform_indices = @transform_0, window_bounds = array<i64: 1, 256, 152>}, {pipeline_mode = #tpu.pipeline_mode<synchronous>, transform_indices = @transform_1, window_bounds = array<i64: 152, 16>}, {pipeline_mode = #tpu.pipeline_mode<synchronous>, transform_indices = @transform_2, window_bounds = array<i64: 1, 16>}, {transform_indices = @transform_3, window_bounds = array<i64: 1, 256, 16>}]} {
    %c0 = arith.constant 0 : index
    %c0_0 = arith.constant 0 : index
    %c0_1 = arith.constant 0 : index
    %0 = vector.load %arg1[%c0, %c0_0, %c0_1] : memref<1x256x152xbf16, #tpu.memory_space<vmem>>, vector<1x256x152xbf16>
    %1 = vector.shape_cast %0 : vector<1x256x152xbf16> to vector<256x152xbf16>
    %c0_2 = arith.constant 0 : index
    %c0_3 = arith.constant 0 : index
    %2 = vector.load %arg2[%c0_2, %c0_3] : memref<152x16xbf16, #tpu.memory_space<vmem>>, vector<152x16xbf16>
    %cst = arith.constant dense<0.000000e+00> : vector<256x16xf32>
    %3 = tpu.matmul %1, %2, %cst {dimension_numbers = #tpu.dot_dimension_numbers<[1], [0], [0], [1], [0, 0, 1, 1], [], []>} : vector<256x152xbf16>, vector<152x16xbf16>, vector<256x16xf32> -> vector<256x16xf32>
    %c0_4 = arith.constant 0 : index
    %c0_5 = arith.constant 0 : index
    %4 = vector.load %arg3[%c0_4, %c0_5] : memref<1x16xf32, #tpu.memory_space<vmem>>, vector<1x16xf32>
    %5 = vector.broadcast %4 : vector<1x16xf32> to vector<256x16xf32>
    %6 = arith.addf %3, %5 : vector<256x16xf32>
    %cst_6 = arith.constant 0.000000e+00 : f32
    %7 = vector.broadcast %cst_6 : f32 to vector<256x16xf32>
    %8 = arith.maximumf %6, %7 : vector<256x16xf32>
    %9 = arith.truncf %8 : vector<256x16xf32> to vector<256x16xbf16>
    %c0_7 = arith.constant 0 : index
    %c0_8 = arith.constant 0 : index
    %c0_9 = arith.constant 0 : index
    %10 = vector.load %arg4[%c0_7, %c0_8, %c0_9] : memref<1x256x16xbf16, #tpu.memory_space<vmem>>, vector<1x256x16xbf16>
    %11 = vector.shape_cast %10 : vector<1x256x16xbf16> to vector<256x16xbf16>
    %12 = vector.shape_cast %9 : vector<256x16xbf16> to vector<1x256x16xbf16>
    tpu.vector_store %arg4[%c0_7, %c0_8, %c0_9], %12 {strides = array<i32>} : memref<1x256x16xbf16, #tpu.memory_space<vmem>>, vector<1x256x16xbf16>,
    return
  }
  func.func @transform_0(%arg0: i32) -> (i32, i32, i32) {
    %c0_i32 = arith.constant 0 : i32
    %c0_i32_0 = arith.constant 0 : i32
    %c0_i32_1 = arith.constant 0 : i32
    return %arg0, %c0_i32, %c0_i32_0 : i32, i32, i32
  }
  func.func @transform_1(%arg0: i32) -> (i32, i32) {
    %c0_i32 = arith.constant 0 : i32
    %c0_i32_0 = arith.constant 0 : i32
    %c0_i32_1 = arith.constant 0 : i32
    return %c0_i32, %c0_i32_0 : i32, i32
  }
  func.func @transform_2(%arg0: i32) -> (i32, i32) {
    %c0_i32 = arith.constant 0 : i32
    %c0_i32_0 = arith.constant 0 : i32
    %c0_i32_1 = arith.constant 0 : i32
    return %c0_i32, %c0_i32_0 : i32, i32
  }
  func.func @transform_3(%arg0: i32) -> (i32, i32, i32) {
    %c0_i32 = arith.constant 0 : i32
    %c0_i32_0 = arith.constant 0 : i32
    %c0_i32_1 = arith.constant 0 : i32
    return %arg0, %c0_i32, %c0_i32_0 : i32, i32, i32
  }
}

module attributes {stable_mosaic.version = 11 : i64} {
  func.func @_res_unit_kernel(%arg0: i32, %arg1: memref<1x324x144xbf16, #tpu.memory_space<vmem>>, %arg2: memref<324x1xf32, #tpu.memory_space<vmem>>, %arg3: memref<144x16xbf16, #tpu.memory_space<vmem>>, %arg4: memref<1x16xf32, #tpu.memory_space<vmem>>, %arg5: memref<9x16x16xbf16, #tpu.memory_space<vmem>>, %arg6: memref<1x16xf32, #tpu.memory_space<vmem>>, %arg7: memref<1x286x16xbf16, #tpu.memory_space<vmem>>, %arg8: memref<1x286x16xbf16, #tpu.memory_space<vmem>>, %arg9: memref<324x16xbf16, #tpu.memory_space<vmem>>) attributes {dimension_semantics = [#tpu.dimension_semantics<parallel>], iteration_bounds = array<i64: 2>, scalar_prefetch = 0 : i64, scratch_operands = 1 : i64, tpu.core_type = #tpu.core_type<tc>, window_params = [{transform_indices = @transform_0, window_bounds = array<i64: 1, 324, 144>}, {pipeline_mode = #tpu.pipeline_mode<synchronous>, transform_indices = @transform_1, window_bounds = array<i64: 324, 1>}, {pipeline_mode = #tpu.pipeline_mode<synchronous>, transform_indices = @transform_2, window_bounds = array<i64: 144, 16>}, {pipeline_mode = #tpu.pipeline_mode<synchronous>, transform_indices = @transform_3, window_bounds = array<i64: 1, 16>}, {pipeline_mode = #tpu.pipeline_mode<synchronous>, transform_indices = @transform_4, window_bounds = array<i64: 9, 16, 16>}, {pipeline_mode = #tpu.pipeline_mode<synchronous>, transform_indices = @transform_5, window_bounds = array<i64: 1, 16>}, {transform_indices = @transform_6, window_bounds = array<i64: 1, 286, 16>}, {transform_indices = @transform_7, window_bounds = array<i64: 1, 286, 16>}]} {
    %c0 = arith.constant 0 : index
    %c0_0 = arith.constant 0 : index
    %c0_1 = arith.constant 0 : index
    %0 = vector.load %arg1[%c0, %c0_0, %c0_1] : memref<1x324x144xbf16, #tpu.memory_space<vmem>>, vector<1x324x144xbf16>
    %1 = vector.shape_cast %0 : vector<1x324x144xbf16> to vector<324x144xbf16>
    %c0_2 = arith.constant 0 : index
    %c0_3 = arith.constant 0 : index
    %2 = vector.load %arg3[%c0_2, %c0_3] : memref<144x16xbf16, #tpu.memory_space<vmem>>, vector<144x16xbf16>
    %cst = arith.constant dense<0.000000e+00> : vector<324x16xf32>
    %3 = tpu.matmul %1, %2, %cst {dimension_numbers = #tpu.dot_dimension_numbers<[1], [0], [0], [1], [0, 0, 1, 1], [], []>} : vector<324x144xbf16>, vector<144x16xbf16>, vector<324x16xf32> -> vector<324x16xf32>
    %c0_4 = arith.constant 0 : index
    %c0_5 = arith.constant 0 : index
    %4 = vector.load %arg4[%c0_4, %c0_5] : memref<1x16xf32, #tpu.memory_space<vmem>>, vector<1x16xf32>
    %5 = vector.broadcast %4 : vector<1x16xf32> to vector<324x16xf32>
    %6 = arith.addf %3, %5 : vector<324x16xf32>
    %cst_6 = arith.constant 0.000000e+00 : f32
    %7 = vector.broadcast %cst_6 : f32 to vector<324x16xf32>
    %8 = arith.maximumf %6, %7 : vector<324x16xf32>
    %c0_7 = arith.constant 0 : index
    %c0_8 = arith.constant 0 : index
    %9 = vector.load %arg2[%c0_7, %c0_8] : memref<324x1xf32, #tpu.memory_space<vmem>>, vector<324x1xf32>
    %10 = vector.broadcast %9 : vector<324x1xf32> to vector<324x16xf32>
    %11 = arith.mulf %8, %10 : vector<324x16xf32>
    %12 = arith.truncf %11 : vector<324x16xf32> to vector<324x16xbf16>
    %c0_9 = arith.constant 0 : index
    %c0_10 = arith.constant 0 : index
    %13 = vector.load %arg9[%c0_9, %c0_10] : memref<324x16xbf16, #tpu.memory_space<vmem>>, vector<324x16xbf16>
    tpu.vector_store %arg9[%c0_9, %c0_10], %12 {strides = array<i32>} : memref<324x16xbf16, #tpu.memory_space<vmem>>, vector<324x16xbf16>,
    %c0_11 = arith.constant 0 : index
    %c0_12 = arith.constant 0 : index
    %14 = vector.load %arg9[%c0_11, %c0_12] : memref<324x16xbf16, #tpu.memory_space<vmem>>, vector<286x16xbf16>
    %c0_13 = arith.constant 0 : index
    %c0_14 = arith.constant 0 : index
    %c0_15 = arith.constant 0 : index
    %15 = vector.load %arg5[%c0_13, %c0_14, %c0_15] : memref<9x16x16xbf16, #tpu.memory_space<vmem>>, vector<1x16x16xbf16>
    %16 = vector.shape_cast %15 : vector<1x16x16xbf16> to vector<16x16xbf16>
    %cst_16 = arith.constant dense<0.000000e+00> : vector<286x16xf32>
    %17 = tpu.matmul %14, %16, %cst_16 {dimension_numbers = #tpu.dot_dimension_numbers<[1], [0], [0], [1], [0, 0, 1, 1], [], []>} : vector<286x16xbf16>, vector<16x16xbf16>, vector<286x16xf32> -> vector<286x16xf32>
    %c1 = arith.constant 1 : index
    %c0_17 = arith.constant 0 : index
    %18 = vector.load %arg9[%c1, %c0_17] : memref<324x16xbf16, #tpu.memory_space<vmem>>, vector<286x16xbf16>
    %c1_18 = arith.constant 1 : index
    %c0_19 = arith.constant 0 : index
    %c0_20 = arith.constant 0 : index
    %19 = vector.load %arg5[%c1_18, %c0_19, %c0_20] : memref<9x16x16xbf16, #tpu.memory_space<vmem>>, vector<1x16x16xbf16>
    %20 = vector.shape_cast %19 : vector<1x16x16xbf16> to vector<16x16xbf16>
    %cst_21 = arith.constant dense<0.000000e+00> : vector<286x16xf32>
    %21 = tpu.matmul %18, %20, %cst_21 {dimension_numbers = #tpu.dot_dimension_numbers<[1], [0], [0], [1], [0, 0, 1, 1], [], []>} : vector<286x16xbf16>, vector<16x16xbf16>, vector<286x16xf32> -> vector<286x16xf32>
    %22 = arith.addf %17, %21 : vector<286x16xf32>
    %c2 = arith.constant 2 : index
    %c0_22 = arith.constant 0 : index
    %23 = vector.load %arg9[%c2, %c0_22] : memref<324x16xbf16, #tpu.memory_space<vmem>>, vector<286x16xbf16>
    %c2_23 = arith.constant 2 : index
    %c0_24 = arith.constant 0 : index
    %c0_25 = arith.constant 0 : index
    %24 = vector.load %arg5[%c2_23, %c0_24, %c0_25] : memref<9x16x16xbf16, #tpu.memory_space<vmem>>, vector<1x16x16xbf16>
    %25 = vector.shape_cast %24 : vector<1x16x16xbf16> to vector<16x16xbf16>
    %cst_26 = arith.constant dense<0.000000e+00> : vector<286x16xf32>
    %26 = tpu.matmul %23, %25, %cst_26 {dimension_numbers = #tpu.dot_dimension_numbers<[1], [0], [0], [1], [0, 0, 1, 1], [], []>} : vector<286x16xbf16>, vector<16x16xbf16>, vector<286x16xf32> -> vector<286x16xf32>
    %27 = arith.addf %22, %26 : vector<286x16xf32>
    %c18 = arith.constant 18 : index
    %c0_27 = arith.constant 0 : index
    %28 = vector.load %arg9[%c18, %c0_27] : memref<324x16xbf16, #tpu.memory_space<vmem>>, vector<286x16xbf16>
    %c3 = arith.constant 3 : index
    %c0_28 = arith.constant 0 : index
    %c0_29 = arith.constant 0 : index
    %29 = vector.load %arg5[%c3, %c0_28, %c0_29] : memref<9x16x16xbf16, #tpu.memory_space<vmem>>, vector<1x16x16xbf16>
    %30 = vector.shape_cast %29 : vector<1x16x16xbf16> to vector<16x16xbf16>
    %cst_30 = arith.constant dense<0.000000e+00> : vector<286x16xf32>
    %31 = tpu.matmul %28, %30, %cst_30 {dimension_numbers = #tpu.dot_dimension_numbers<[1], [0], [0], [1], [0, 0, 1, 1], [], []>} : vector<286x16xbf16>, vector<16x16xbf16>, vector<286x16xf32> -> vector<286x16xf32>
    %32 = arith.addf %27, %31 : vector<286x16xf32>
    %c19 = arith.constant 19 : index
    %c0_31 = arith.constant 0 : index
    %33 = vector.load %arg9[%c19, %c0_31] : memref<324x16xbf16, #tpu.memory_space<vmem>>, vector<286x16xbf16>
    %c4 = arith.constant 4 : index
    %c0_32 = arith.constant 0 : index
    %c0_33 = arith.constant 0 : index
    %34 = vector.load %arg5[%c4, %c0_32, %c0_33] : memref<9x16x16xbf16, #tpu.memory_space<vmem>>, vector<1x16x16xbf16>
    %35 = vector.shape_cast %34 : vector<1x16x16xbf16> to vector<16x16xbf16>
    %cst_34 = arith.constant dense<0.000000e+00> : vector<286x16xf32>
    %36 = tpu.matmul %33, %35, %cst_34 {dimension_numbers = #tpu.dot_dimension_numbers<[1], [0], [0], [1], [0, 0, 1, 1], [], []>} : vector<286x16xbf16>, vector<16x16xbf16>, vector<286x16xf32> -> vector<286x16xf32>
    %37 = arith.addf %32, %36 : vector<286x16xf32>
    %c20 = arith.constant 20 : index
    %c0_35 = arith.constant 0 : index
    %38 = vector.load %arg9[%c20, %c0_35] : memref<324x16xbf16, #tpu.memory_space<vmem>>, vector<286x16xbf16>
    %c5 = arith.constant 5 : index
    %c0_36 = arith.constant 0 : index
    %c0_37 = arith.constant 0 : index
    %39 = vector.load %arg5[%c5, %c0_36, %c0_37] : memref<9x16x16xbf16, #tpu.memory_space<vmem>>, vector<1x16x16xbf16>
    %40 = vector.shape_cast %39 : vector<1x16x16xbf16> to vector<16x16xbf16>
    %cst_38 = arith.constant dense<0.000000e+00> : vector<286x16xf32>
    %41 = tpu.matmul %38, %40, %cst_38 {dimension_numbers = #tpu.dot_dimension_numbers<[1], [0], [0], [1], [0, 0, 1, 1], [], []>} : vector<286x16xbf16>, vector<16x16xbf16>, vector<286x16xf32> -> vector<286x16xf32>
    %42 = arith.addf %37, %41 : vector<286x16xf32>
    %c36 = arith.constant 36 : index
    %c0_39 = arith.constant 0 : index
    %43 = vector.load %arg9[%c36, %c0_39] : memref<324x16xbf16, #tpu.memory_space<vmem>>, vector<286x16xbf16>
    %c6 = arith.constant 6 : index
    %c0_40 = arith.constant 0 : index
    %c0_41 = arith.constant 0 : index
    %44 = vector.load %arg5[%c6, %c0_40, %c0_41] : memref<9x16x16xbf16, #tpu.memory_space<vmem>>, vector<1x16x16xbf16>
    %45 = vector.shape_cast %44 : vector<1x16x16xbf16> to vector<16x16xbf16>
    %cst_42 = arith.constant dense<0.000000e+00> : vector<286x16xf32>
    %46 = tpu.matmul %43, %45, %cst_42 {dimension_numbers = #tpu.dot_dimension_numbers<[1], [0], [0], [1], [0, 0, 1, 1], [], []>} : vector<286x16xbf16>, vector<16x16xbf16>, vector<286x16xf32> -> vector<286x16xf32>
    %47 = arith.addf %42, %46 : vector<286x16xf32>
    %c37 = arith.constant 37 : index
    %c0_43 = arith.constant 0 : index
    %48 = vector.load %arg9[%c37, %c0_43] : memref<324x16xbf16, #tpu.memory_space<vmem>>, vector<286x16xbf16>
    %c7 = arith.constant 7 : index
    %c0_44 = arith.constant 0 : index
    %c0_45 = arith.constant 0 : index
    %49 = vector.load %arg5[%c7, %c0_44, %c0_45] : memref<9x16x16xbf16, #tpu.memory_space<vmem>>, vector<1x16x16xbf16>
    %50 = vector.shape_cast %49 : vector<1x16x16xbf16> to vector<16x16xbf16>
    %cst_46 = arith.constant dense<0.000000e+00> : vector<286x16xf32>
    %51 = tpu.matmul %48, %50, %cst_46 {dimension_numbers = #tpu.dot_dimension_numbers<[1], [0], [0], [1], [0, 0, 1, 1], [], []>} : vector<286x16xbf16>, vector<16x16xbf16>, vector<286x16xf32> -> vector<286x16xf32>
    %52 = arith.addf %47, %51 : vector<286x16xf32>
    %c38 = arith.constant 38 : index
    %c0_47 = arith.constant 0 : index
    %53 = vector.load %arg9[%c38, %c0_47] : memref<324x16xbf16, #tpu.memory_space<vmem>>, vector<286x16xbf16>
    %c8 = arith.constant 8 : index
    %c0_48 = arith.constant 0 : index
    %c0_49 = arith.constant 0 : index
    %54 = vector.load %arg5[%c8, %c0_48, %c0_49] : memref<9x16x16xbf16, #tpu.memory_space<vmem>>, vector<1x16x16xbf16>
    %55 = vector.shape_cast %54 : vector<1x16x16xbf16> to vector<16x16xbf16>
    %cst_50 = arith.constant dense<0.000000e+00> : vector<286x16xf32>
    %56 = tpu.matmul %53, %55, %cst_50 {dimension_numbers = #tpu.dot_dimension_numbers<[1], [0], [0], [1], [0, 0, 1, 1], [], []>} : vector<286x16xbf16>, vector<16x16xbf16>, vector<286x16xf32> -> vector<286x16xf32>
    %57 = arith.addf %52, %56 : vector<286x16xf32>
    %c0_51 = arith.constant 0 : index
    %c0_52 = arith.constant 0 : index
    %58 = vector.load %arg6[%c0_51, %c0_52] : memref<1x16xf32, #tpu.memory_space<vmem>>, vector<1x16xf32>
    %59 = vector.broadcast %58 : vector<1x16xf32> to vector<286x16xf32>
    %60 = arith.addf %57, %59 : vector<286x16xf32>
    %cst_53 = arith.constant 0.000000e+00 : f32
    %61 = vector.broadcast %cst_53 : f32 to vector<286x16xf32>
    %62 = arith.maximumf %60, %61 : vector<286x16xf32>
    %c0_54 = arith.constant 0 : index
    %c0_55 = arith.constant 0 : index
    %c0_56 = arith.constant 0 : index
    %63 = vector.load %arg7[%c0_54, %c0_55, %c0_56] : memref<1x286x16xbf16, #tpu.memory_space<vmem>>, vector<1x286x16xbf16>
    %64 = vector.shape_cast %63 : vector<1x286x16xbf16> to vector<286x16xbf16>
    %65 = arith.extf %64 : vector<286x16xbf16> to vector<286x16xf32>
    %66 = arith.addf %62, %65 : vector<286x16xf32>
    %cst_57 = arith.constant 0.000000e+00 : f32
    %67 = vector.broadcast %cst_57 : f32 to vector<286x16xf32>
    %68 = arith.maximumf %66, %67 : vector<286x16xf32>
    %69 = arith.truncf %68 : vector<286x16xf32> to vector<286x16xbf16>
    %c0_58 = arith.constant 0 : index
    %c0_59 = arith.constant 0 : index
    %c0_60 = arith.constant 0 : index
    %70 = vector.load %arg8[%c0_58, %c0_59, %c0_60] : memref<1x286x16xbf16, #tpu.memory_space<vmem>>, vector<1x286x16xbf16>
    %71 = vector.shape_cast %70 : vector<1x286x16xbf16> to vector<286x16xbf16>
    %72 = vector.shape_cast %69 : vector<286x16xbf16> to vector<1x286x16xbf16>
    tpu.vector_store %arg8[%c0_58, %c0_59, %c0_60], %72 {strides = array<i32>} : memref<1x286x16xbf16, #tpu.memory_space<vmem>>, vector<1x286x16xbf16>,
    return
  }
  func.func @transform_0(%arg0: i32) -> (i32, i32, i32) {
    %c0_i32 = arith.constant 0 : i32
    %c0_i32_0 = arith.constant 0 : i32
    %c0_i32_1 = arith.constant 0 : i32
    return %arg0, %c0_i32, %c0_i32_0 : i32, i32, i32
  }
  func.func @transform_1(%arg0: i32) -> (i32, i32) {
    %c0_i32 = arith.constant 0 : i32
    %c0_i32_0 = arith.constant 0 : i32
    %c0_i32_1 = arith.constant 0 : i32
    return %c0_i32, %c0_i32_0 : i32, i32
  }
  func.func @transform_2(%arg0: i32) -> (i32, i32) {
    %c0_i32 = arith.constant 0 : i32
    %c0_i32_0 = arith.constant 0 : i32
    %c0_i32_1 = arith.constant 0 : i32
    return %c0_i32, %c0_i32_0 : i32, i32
  }
  func.func @transform_3(%arg0: i32) -> (i32, i32) {
    %c0_i32 = arith.constant 0 : i32
    %c0_i32_0 = arith.constant 0 : i32
    %c0_i32_1 = arith.constant 0 : i32
    return %c0_i32, %c0_i32_0 : i32, i32
  }
  func.func @transform_4(%arg0: i32) -> (i32, i32, i32) {
    %c0_i32 = arith.constant 0 : i32
    %c0_i32_0 = arith.constant 0 : i32
    %c0_i32_1 = arith.constant 0 : i32
    %c0_i32_2 = arith.constant 0 : i32
    return %c0_i32, %c0_i32_0, %c0_i32_1 : i32, i32, i32
  }
  func.func @transform_5(%arg0: i32) -> (i32, i32) {
    %c0_i32 = arith.constant 0 : i32
    %c0_i32_0 = arith.constant 0 : i32
    %c0_i32_1 = arith.constant 0 : i32
    return %c0_i32, %c0_i32_0 : i32, i32
  }
  func.func @transform_6(%arg0: i32) -> (i32, i32, i32) {
    %c0_i32 = arith.constant 0 : i32
    %c0_i32_0 = arith.constant 0 : i32
    %c0_i32_1 = arith.constant 0 : i32
    return %arg0, %c0_i32, %c0_i32_0 : i32, i32, i32
  }
  func.func @transform_7(%arg0: i32) -> (i32, i32, i32) {
    %c0_i32 = arith.constant 0 : i32
    %c0_i32_0 = arith.constant 0 : i32
    %c0_i32_1 = arith.constant 0 : i32
    return %arg0, %c0_i32, %c0_i32_0 : i32, i32, i32
  }
}

module attributes {stable_mosaic.version = 11 : i64} {
  func.func @_res_unit_kernel(%arg0: i32, %arg1: memref<1x100x144xbf16, #tpu.memory_space<vmem>>, %arg2: memref<100x1xf32, #tpu.memory_space<vmem>>, %arg3: memref<144x24xbf16, #tpu.memory_space<vmem>>, %arg4: memref<1x24xf32, #tpu.memory_space<vmem>>, %arg5: memref<9x24x24xbf16, #tpu.memory_space<vmem>>, %arg6: memref<1x24xf32, #tpu.memory_space<vmem>>, %arg7: memref<1x78x16xbf16, #tpu.memory_space<vmem>>, %arg8: memref<16x24xbf16, #tpu.memory_space<vmem>>, %arg9: memref<1x24xf32, #tpu.memory_space<vmem>>, %arg10: memref<1x78x24xbf16, #tpu.memory_space<vmem>>, %arg11: memref<100x24xbf16, #tpu.memory_space<vmem>>) attributes {dimension_semantics = [#tpu.dimension_semantics<parallel>], iteration_bounds = array<i64: 2>, scalar_prefetch = 0 : i64, scratch_operands = 1 : i64, tpu.core_type = #tpu.core_type<tc>, window_params = [{transform_indices = @transform_0, window_bounds = array<i64: 1, 100, 144>}, {pipeline_mode = #tpu.pipeline_mode<synchronous>, transform_indices = @transform_1, window_bounds = array<i64: 100, 1>}, {pipeline_mode = #tpu.pipeline_mode<synchronous>, transform_indices = @transform_2, window_bounds = array<i64: 144, 24>}, {pipeline_mode = #tpu.pipeline_mode<synchronous>, transform_indices = @transform_3, window_bounds = array<i64: 1, 24>}, {pipeline_mode = #tpu.pipeline_mode<synchronous>, transform_indices = @transform_4, window_bounds = array<i64: 9, 24, 24>}, {pipeline_mode = #tpu.pipeline_mode<synchronous>, transform_indices = @transform_5, window_bounds = array<i64: 1, 24>}, {transform_indices = @transform_6, window_bounds = array<i64: 1, 78, 16>}, {pipeline_mode = #tpu.pipeline_mode<synchronous>, transform_indices = @transform_7, window_bounds = array<i64: 16, 24>}, {pipeline_mode = #tpu.pipeline_mode<synchronous>, transform_indices = @transform_8, window_bounds = array<i64: 1, 24>}, {transform_indices = @transform_9, window_bounds = array<i64: 1, 78, 24>}]} {
    %c0 = arith.constant 0 : index
    %c0_0 = arith.constant 0 : index
    %c0_1 = arith.constant 0 : index
    %0 = vector.load %arg1[%c0, %c0_0, %c0_1] : memref<1x100x144xbf16, #tpu.memory_space<vmem>>, vector<1x100x144xbf16>
    %1 = vector.shape_cast %0 : vector<1x100x144xbf16> to vector<100x144xbf16>
    %c0_2 = arith.constant 0 : index
    %c0_3 = arith.constant 0 : index
    %2 = vector.load %arg3[%c0_2, %c0_3] : memref<144x24xbf16, #tpu.memory_space<vmem>>, vector<144x24xbf16>
    %cst = arith.constant dense<0.000000e+00> : vector<100x24xf32>
    %3 = tpu.matmul %1, %2, %cst {dimension_numbers = #tpu.dot_dimension_numbers<[1], [0], [0], [1], [0, 0, 1, 1], [], []>} : vector<100x144xbf16>, vector<144x24xbf16>, vector<100x24xf32> -> vector<100x24xf32>
    %c0_4 = arith.constant 0 : index
    %c0_5 = arith.constant 0 : index
    %4 = vector.load %arg4[%c0_4, %c0_5] : memref<1x24xf32, #tpu.memory_space<vmem>>, vector<1x24xf32>
    %5 = vector.broadcast %4 : vector<1x24xf32> to vector<100x24xf32>
    %6 = arith.addf %3, %5 : vector<100x24xf32>
    %cst_6 = arith.constant 0.000000e+00 : f32
    %7 = vector.broadcast %cst_6 : f32 to vector<100x24xf32>
    %8 = arith.maximumf %6, %7 : vector<100x24xf32>
    %c0_7 = arith.constant 0 : index
    %c0_8 = arith.constant 0 : index
    %9 = vector.load %arg2[%c0_7, %c0_8] : memref<100x1xf32, #tpu.memory_space<vmem>>, vector<100x1xf32>
    %10 = vector.broadcast %9 : vector<100x1xf32> to vector<100x24xf32>
    %11 = arith.mulf %8, %10 : vector<100x24xf32>
    %12 = arith.truncf %11 : vector<100x24xf32> to vector<100x24xbf16>
    %c0_9 = arith.constant 0 : index
    %c0_10 = arith.constant 0 : index
    %13 = vector.load %arg11[%c0_9, %c0_10] : memref<100x24xbf16, #tpu.memory_space<vmem>>, vector<100x24xbf16>
    tpu.vector_store %arg11[%c0_9, %c0_10], %12 {strides = array<i32>} : memref<100x24xbf16, #tpu.memory_space<vmem>>, vector<100x24xbf16>,
    %c0_11 = arith.constant 0 : index
    %c0_12 = arith.constant 0 : index
    %14 = vector.load %arg11[%c0_11, %c0_12] : memref<100x24xbf16, #tpu.memory_space<vmem>>, vector<78x24xbf16>
    %c0_13 = arith.constant 0 : index
    %c0_14 = arith.constant 0 : index
    %c0_15 = arith.constant 0 : index
    %15 = vector.load %arg5[%c0_13, %c0_14, %c0_15] : memref<9x24x24xbf16, #tpu.memory_space<vmem>>, vector<1x24x24xbf16>
    %16 = vector.shape_cast %15 : vector<1x24x24xbf16> to vector<24x24xbf16>
    %cst_16 = arith.constant dense<0.000000e+00> : vector<78x24xf32>
    %17 = tpu.matmul %14, %16, %cst_16 {dimension_numbers = #tpu.dot_dimension_numbers<[1], [0], [0], [1], [0, 0, 1, 1], [], []>} : vector<78x24xbf16>, vector<24x24xbf16>, vector<78x24xf32> -> vector<78x24xf32>
    %c1 = arith.constant 1 : index
    %c0_17 = arith.constant 0 : index
    %18 = vector.load %arg11[%c1, %c0_17] : memref<100x24xbf16, #tpu.memory_space<vmem>>, vector<78x24xbf16>
    %c1_18 = arith.constant 1 : index
    %c0_19 = arith.constant 0 : index
    %c0_20 = arith.constant 0 : index
    %19 = vector.load %arg5[%c1_18, %c0_19, %c0_20] : memref<9x24x24xbf16, #tpu.memory_space<vmem>>, vector<1x24x24xbf16>
    %20 = vector.shape_cast %19 : vector<1x24x24xbf16> to vector<24x24xbf16>
    %cst_21 = arith.constant dense<0.000000e+00> : vector<78x24xf32>
    %21 = tpu.matmul %18, %20, %cst_21 {dimension_numbers = #tpu.dot_dimension_numbers<[1], [0], [0], [1], [0, 0, 1, 1], [], []>} : vector<78x24xbf16>, vector<24x24xbf16>, vector<78x24xf32> -> vector<78x24xf32>
    %22 = arith.addf %17, %21 : vector<78x24xf32>
    %c2 = arith.constant 2 : index
    %c0_22 = arith.constant 0 : index
    %23 = vector.load %arg11[%c2, %c0_22] : memref<100x24xbf16, #tpu.memory_space<vmem>>, vector<78x24xbf16>
    %c2_23 = arith.constant 2 : index
    %c0_24 = arith.constant 0 : index
    %c0_25 = arith.constant 0 : index
    %24 = vector.load %arg5[%c2_23, %c0_24, %c0_25] : memref<9x24x24xbf16, #tpu.memory_space<vmem>>, vector<1x24x24xbf16>
    %25 = vector.shape_cast %24 : vector<1x24x24xbf16> to vector<24x24xbf16>
    %cst_26 = arith.constant dense<0.000000e+00> : vector<78x24xf32>
    %26 = tpu.matmul %23, %25, %cst_26 {dimension_numbers = #tpu.dot_dimension_numbers<[1], [0], [0], [1], [0, 0, 1, 1], [], []>} : vector<78x24xbf16>, vector<24x24xbf16>, vector<78x24xf32> -> vector<78x24xf32>
    %27 = arith.addf %22, %26 : vector<78x24xf32>
    %c10 = arith.constant 10 : index
    %c0_27 = arith.constant 0 : index
    %28 = vector.load %arg11[%c10, %c0_27] : memref<100x24xbf16, #tpu.memory_space<vmem>>, vector<78x24xbf16>
    %c3 = arith.constant 3 : index
    %c0_28 = arith.constant 0 : index
    %c0_29 = arith.constant 0 : index
    %29 = vector.load %arg5[%c3, %c0_28, %c0_29] : memref<9x24x24xbf16, #tpu.memory_space<vmem>>, vector<1x24x24xbf16>
    %30 = vector.shape_cast %29 : vector<1x24x24xbf16> to vector<24x24xbf16>
    %cst_30 = arith.constant dense<0.000000e+00> : vector<78x24xf32>
    %31 = tpu.matmul %28, %30, %cst_30 {dimension_numbers = #tpu.dot_dimension_numbers<[1], [0], [0], [1], [0, 0, 1, 1], [], []>} : vector<78x24xbf16>, vector<24x24xbf16>, vector<78x24xf32> -> vector<78x24xf32>
    %32 = arith.addf %27, %31 : vector<78x24xf32>
    %c11 = arith.constant 11 : index
    %c0_31 = arith.constant 0 : index
    %33 = vector.load %arg11[%c11, %c0_31] : memref<100x24xbf16, #tpu.memory_space<vmem>>, vector<78x24xbf16>
    %c4 = arith.constant 4 : index
    %c0_32 = arith.constant 0 : index
    %c0_33 = arith.constant 0 : index
    %34 = vector.load %arg5[%c4, %c0_32, %c0_33] : memref<9x24x24xbf16, #tpu.memory_space<vmem>>, vector<1x24x24xbf16>
    %35 = vector.shape_cast %34 : vector<1x24x24xbf16> to vector<24x24xbf16>
    %cst_34 = arith.constant dense<0.000000e+00> : vector<78x24xf32>
    %36 = tpu.matmul %33, %35, %cst_34 {dimension_numbers = #tpu.dot_dimension_numbers<[1], [0], [0], [1], [0, 0, 1, 1], [], []>} : vector<78x24xbf16>, vector<24x24xbf16>, vector<78x24xf32> -> vector<78x24xf32>
    %37 = arith.addf %32, %36 : vector<78x24xf32>
    %c12 = arith.constant 12 : index
    %c0_35 = arith.constant 0 : index
    %38 = vector.load %arg11[%c12, %c0_35] : memref<100x24xbf16, #tpu.memory_space<vmem>>, vector<78x24xbf16>
    %c5 = arith.constant 5 : index
    %c0_36 = arith.constant 0 : index
    %c0_37 = arith.constant 0 : index
    %39 = vector.load %arg5[%c5, %c0_36, %c0_37] : memref<9x24x24xbf16, #tpu.memory_space<vmem>>, vector<1x24x24xbf16>
    %40 = vector.shape_cast %39 : vector<1x24x24xbf16> to vector<24x24xbf16>
    %cst_38 = arith.constant dense<0.000000e+00> : vector<78x24xf32>
    %41 = tpu.matmul %38, %40, %cst_38 {dimension_numbers = #tpu.dot_dimension_numbers<[1], [0], [0], [1], [0, 0, 1, 1], [], []>} : vector<78x24xbf16>, vector<24x24xbf16>, vector<78x24xf32> -> vector<78x24xf32>
    %42 = arith.addf %37, %41 : vector<78x24xf32>
    %c20 = arith.constant 20 : index
    %c0_39 = arith.constant 0 : index
    %43 = vector.load %arg11[%c20, %c0_39] : memref<100x24xbf16, #tpu.memory_space<vmem>>, vector<78x24xbf16>
    %c6 = arith.constant 6 : index
    %c0_40 = arith.constant 0 : index
    %c0_41 = arith.constant 0 : index
    %44 = vector.load %arg5[%c6, %c0_40, %c0_41] : memref<9x24x24xbf16, #tpu.memory_space<vmem>>, vector<1x24x24xbf16>
    %45 = vector.shape_cast %44 : vector<1x24x24xbf16> to vector<24x24xbf16>
    %cst_42 = arith.constant dense<0.000000e+00> : vector<78x24xf32>
    %46 = tpu.matmul %43, %45, %cst_42 {dimension_numbers = #tpu.dot_dimension_numbers<[1], [0], [0], [1], [0, 0, 1, 1], [], []>} : vector<78x24xbf16>, vector<24x24xbf16>, vector<78x24xf32> -> vector<78x24xf32>
    %47 = arith.addf %42, %46 : vector<78x24xf32>
    %c21 = arith.constant 21 : index
    %c0_43 = arith.constant 0 : index
    %48 = vector.load %arg11[%c21, %c0_43] : memref<100x24xbf16, #tpu.memory_space<vmem>>, vector<78x24xbf16>
    %c7 = arith.constant 7 : index
    %c0_44 = arith.constant 0 : index
    %c0_45 = arith.constant 0 : index
    %49 = vector.load %arg5[%c7, %c0_44, %c0_45] : memref<9x24x24xbf16, #tpu.memory_space<vmem>>, vector<1x24x24xbf16>
    %50 = vector.shape_cast %49 : vector<1x24x24xbf16> to vector<24x24xbf16>
    %cst_46 = arith.constant dense<0.000000e+00> : vector<78x24xf32>
    %51 = tpu.matmul %48, %50, %cst_46 {dimension_numbers = #tpu.dot_dimension_numbers<[1], [0], [0], [1], [0, 0, 1, 1], [], []>} : vector<78x24xbf16>, vector<24x24xbf16>, vector<78x24xf32> -> vector<78x24xf32>
    %52 = arith.addf %47, %51 : vector<78x24xf32>
    %c22 = arith.constant 22 : index
    %c0_47 = arith.constant 0 : index
    %53 = vector.load %arg11[%c22, %c0_47] : memref<100x24xbf16, #tpu.memory_space<vmem>>, vector<78x24xbf16>
    %c8 = arith.constant 8 : index
    %c0_48 = arith.constant 0 : index
    %c0_49 = arith.constant 0 : index
    %54 = vector.load %arg5[%c8, %c0_48, %c0_49] : memref<9x24x24xbf16, #tpu.memory_space<vmem>>, vector<1x24x24xbf16>
    %55 = vector.shape_cast %54 : vector<1x24x24xbf16> to vector<24x24xbf16>
    %cst_50 = arith.constant dense<0.000000e+00> : vector<78x24xf32>
    %56 = tpu.matmul %53, %55, %cst_50 {dimension_numbers = #tpu.dot_dimension_numbers<[1], [0], [0], [1], [0, 0, 1, 1], [], []>} : vector<78x24xbf16>, vector<24x24xbf16>, vector<78x24xf32> -> vector<78x24xf32>
    %57 = arith.addf %52, %56 : vector<78x24xf32>
    %c0_51 = arith.constant 0 : index
    %c0_52 = arith.constant 0 : index
    %58 = vector.load %arg6[%c0_51, %c0_52] : memref<1x24xf32, #tpu.memory_space<vmem>>, vector<1x24xf32>
    %59 = vector.broadcast %58 : vector<1x24xf32> to vector<78x24xf32>
    %60 = arith.addf %57, %59 : vector<78x24xf32>
    %cst_53 = arith.constant 0.000000e+00 : f32
    %61 = vector.broadcast %cst_53 : f32 to vector<78x24xf32>
    %62 = arith.maximumf %60, %61 : vector<78x24xf32>
    %c0_54 = arith.constant 0 : index
    %c0_55 = arith.constant 0 : index
    %c0_56 = arith.constant 0 : index
    %63 = vector.load %arg7[%c0_54, %c0_55, %c0_56] : memref<1x78x16xbf16, #tpu.memory_space<vmem>>, vector<1x78x16xbf16>
    %64 = vector.shape_cast %63 : vector<1x78x16xbf16> to vector<78x16xbf16>
    %c0_57 = arith.constant 0 : index
    %c0_58 = arith.constant 0 : index
    %65 = vector.load %arg8[%c0_57, %c0_58] : memref<16x24xbf16, #tpu.memory_space<vmem>>, vector<16x24xbf16>
    %cst_59 = arith.constant dense<0.000000e+00> : vector<78x24xf32>
    %66 = tpu.matmul %64, %65, %cst_59 {dimension_numbers = #tpu.dot_dimension_numbers<[1], [0], [0], [1], [0, 0, 1, 1], [], []>} : vector<78x16xbf16>, vector<16x24xbf16>, vector<78x24xf32> -> vector<78x24xf32>
    %c0_60 = arith.constant 0 : index
    %c0_61 = arith.constant 0 : index
    %67 = vector.load %arg9[%c0_60, %c0_61] : memref<1x24xf32, #tpu.memory_space<vmem>>, vector<1x24xf32>
    %68 = vector.broadcast %67 : vector<1x24xf32> to vector<78x24xf32>
    %69 = arith.addf %66, %68 : vector<78x24xf32>
    %70 = arith.addf %62, %69 : vector<78x24xf32>
    %cst_62 = arith.constant 0.000000e+00 : f32
    %71 = vector.broadcast %cst_62 : f32 to vector<78x24xf32>
    %72 = arith.maximumf %70, %71 : vector<78x24xf32>
    %73 = arith.truncf %72 : vector<78x24xf32> to vector<78x24xbf16>
    %c0_63 = arith.constant 0 : index
    %c0_64 = arith.constant 0 : index
    %c0_65 = arith.constant 0 : index
    %74 = vector.load %arg10[%c0_63, %c0_64, %c0_65] : memref<1x78x24xbf16, #tpu.memory_space<vmem>>, vector<1x78x24xbf16>
    %75 = vector.shape_cast %74 : vector<1x78x24xbf16> to vector<78x24xbf16>
    %76 = vector.shape_cast %73 : vector<78x24xbf16> to vector<1x78x24xbf16>
    tpu.vector_store %arg10[%c0_63, %c0_64, %c0_65], %76 {strides = array<i32>} : memref<1x78x24xbf16, #tpu.memory_space<vmem>>, vector<1x78x24xbf16>,
    return
  }
  func.func @transform_0(%arg0: i32) -> (i32, i32, i32) {
    %c0_i32 = arith.constant 0 : i32
    %c0_i32_0 = arith.constant 0 : i32
    %c0_i32_1 = arith.constant 0 : i32
    return %arg0, %c0_i32, %c0_i32_0 : i32, i32, i32
  }
  func.func @transform_1(%arg0: i32) -> (i32, i32) {
    %c0_i32 = arith.constant 0 : i32
    %c0_i32_0 = arith.constant 0 : i32
    %c0_i32_1 = arith.constant 0 : i32
    return %c0_i32, %c0_i32_0 : i32, i32
  }
  func.func @transform_2(%arg0: i32) -> (i32, i32) {
    %c0_i32 = arith.constant 0 : i32
    %c0_i32_0 = arith.constant 0 : i32
    %c0_i32_1 = arith.constant 0 : i32
    return %c0_i32, %c0_i32_0 : i32, i32
  }
  func.func @transform_3(%arg0: i32) -> (i32, i32) {
    %c0_i32 = arith.constant 0 : i32
    %c0_i32_0 = arith.constant 0 : i32
    %c0_i32_1 = arith.constant 0 : i32
    return %c0_i32, %c0_i32_0 : i32, i32
  }
  func.func @transform_4(%arg0: i32) -> (i32, i32, i32) {
    %c0_i32 = arith.constant 0 : i32
    %c0_i32_0 = arith.constant 0 : i32
    %c0_i32_1 = arith.constant 0 : i32
    %c0_i32_2 = arith.constant 0 : i32
    return %c0_i32, %c0_i32_0, %c0_i32_1 : i32, i32, i32
  }
  func.func @transform_5(%arg0: i32) -> (i32, i32) {
    %c0_i32 = arith.constant 0 : i32
    %c0_i32_0 = arith.constant 0 : i32
    %c0_i32_1 = arith.constant 0 : i32
    return %c0_i32, %c0_i32_0 : i32, i32
  }
  func.func @transform_6(%arg0: i32) -> (i32, i32, i32) {
    %c0_i32 = arith.constant 0 : i32
    %c0_i32_0 = arith.constant 0 : i32
    %c0_i32_1 = arith.constant 0 : i32
    return %arg0, %c0_i32, %c0_i32_0 : i32, i32, i32
  }
  func.func @transform_7(%arg0: i32) -> (i32, i32) {
    %c0_i32 = arith.constant 0 : i32
    %c0_i32_0 = arith.constant 0 : i32
    %c0_i32_1 = arith.constant 0 : i32
    return %c0_i32, %c0_i32_0 : i32, i32
  }
  func.func @transform_8(%arg0: i32) -> (i32, i32) {
    %c0_i32 = arith.constant 0 : i32
    %c0_i32_0 = arith.constant 0 : i32
    %c0_i32_1 = arith.constant 0 : i32
    return %c0_i32, %c0_i32_0 : i32, i32
  }
  func.func @transform_9(%arg0: i32) -> (i32, i32, i32) {
    %c0_i32 = arith.constant 0 : i32
    %c0_i32_0 = arith.constant 0 : i32
    %c0_i32_1 = arith.constant 0 : i32
    return %arg0, %c0_i32, %c0_i32_0 : i32, i32, i32
  }
}

module attributes {stable_mosaic.version = 11 : i64} {
  func.func @_res_unit_kernel(%arg0: i32, %arg1: memref<1x100x216xbf16, #tpu.memory_space<vmem>>, %arg2: memref<100x1xf32, #tpu.memory_space<vmem>>, %arg3: memref<216x24xbf16, #tpu.memory_space<vmem>>, %arg4: memref<1x24xf32, #tpu.memory_space<vmem>>, %arg5: memref<9x24x24xbf16, #tpu.memory_space<vmem>>, %arg6: memref<1x24xf32, #tpu.memory_space<vmem>>, %arg7: memref<1x78x24xbf16, #tpu.memory_space<vmem>>, %arg8: memref<1x78x24xbf16, #tpu.memory_space<vmem>>, %arg9: memref<100x24xbf16, #tpu.memory_space<vmem>>) attributes {dimension_semantics = [#tpu.dimension_semantics<parallel>], iteration_bounds = array<i64: 2>, scalar_prefetch = 0 : i64, scratch_operands = 1 : i64, tpu.core_type = #tpu.core_type<tc>, window_params = [{transform_indices = @transform_0, window_bounds = array<i64: 1, 100, 216>}, {pipeline_mode = #tpu.pipeline_mode<synchronous>, transform_indices = @transform_1, window_bounds = array<i64: 100, 1>}, {pipeline_mode = #tpu.pipeline_mode<synchronous>, transform_indices = @transform_2, window_bounds = array<i64: 216, 24>}, {pipeline_mode = #tpu.pipeline_mode<synchronous>, transform_indices = @transform_3, window_bounds = array<i64: 1, 24>}, {pipeline_mode = #tpu.pipeline_mode<synchronous>, transform_indices = @transform_4, window_bounds = array<i64: 9, 24, 24>}, {pipeline_mode = #tpu.pipeline_mode<synchronous>, transform_indices = @transform_5, window_bounds = array<i64: 1, 24>}, {transform_indices = @transform_6, window_bounds = array<i64: 1, 78, 24>}, {transform_indices = @transform_7, window_bounds = array<i64: 1, 78, 24>}]} {
    %c0 = arith.constant 0 : index
    %c0_0 = arith.constant 0 : index
    %c0_1 = arith.constant 0 : index
    %0 = vector.load %arg1[%c0, %c0_0, %c0_1] : memref<1x100x216xbf16, #tpu.memory_space<vmem>>, vector<1x100x216xbf16>
    %1 = vector.shape_cast %0 : vector<1x100x216xbf16> to vector<100x216xbf16>
    %c0_2 = arith.constant 0 : index
    %c0_3 = arith.constant 0 : index
    %2 = vector.load %arg3[%c0_2, %c0_3] : memref<216x24xbf16, #tpu.memory_space<vmem>>, vector<216x24xbf16>
    %cst = arith.constant dense<0.000000e+00> : vector<100x24xf32>
    %3 = tpu.matmul %1, %2, %cst {dimension_numbers = #tpu.dot_dimension_numbers<[1], [0], [0], [1], [0, 0, 1, 1], [], []>} : vector<100x216xbf16>, vector<216x24xbf16>, vector<100x24xf32> -> vector<100x24xf32>
    %c0_4 = arith.constant 0 : index
    %c0_5 = arith.constant 0 : index
    %4 = vector.load %arg4[%c0_4, %c0_5] : memref<1x24xf32, #tpu.memory_space<vmem>>, vector<1x24xf32>
    %5 = vector.broadcast %4 : vector<1x24xf32> to vector<100x24xf32>
    %6 = arith.addf %3, %5 : vector<100x24xf32>
    %cst_6 = arith.constant 0.000000e+00 : f32
    %7 = vector.broadcast %cst_6 : f32 to vector<100x24xf32>
    %8 = arith.maximumf %6, %7 : vector<100x24xf32>
    %c0_7 = arith.constant 0 : index
    %c0_8 = arith.constant 0 : index
    %9 = vector.load %arg2[%c0_7, %c0_8] : memref<100x1xf32, #tpu.memory_space<vmem>>, vector<100x1xf32>
    %10 = vector.broadcast %9 : vector<100x1xf32> to vector<100x24xf32>
    %11 = arith.mulf %8, %10 : vector<100x24xf32>
    %12 = arith.truncf %11 : vector<100x24xf32> to vector<100x24xbf16>
    %c0_9 = arith.constant 0 : index
    %c0_10 = arith.constant 0 : index
    %13 = vector.load %arg9[%c0_9, %c0_10] : memref<100x24xbf16, #tpu.memory_space<vmem>>, vector<100x24xbf16>
    tpu.vector_store %arg9[%c0_9, %c0_10], %12 {strides = array<i32>} : memref<100x24xbf16, #tpu.memory_space<vmem>>, vector<100x24xbf16>,
    %c0_11 = arith.constant 0 : index
    %c0_12 = arith.constant 0 : index
    %14 = vector.load %arg9[%c0_11, %c0_12] : memref<100x24xbf16, #tpu.memory_space<vmem>>, vector<78x24xbf16>
    %c0_13 = arith.constant 0 : index
    %c0_14 = arith.constant 0 : index
    %c0_15 = arith.constant 0 : index
    %15 = vector.load %arg5[%c0_13, %c0_14, %c0_15] : memref<9x24x24xbf16, #tpu.memory_space<vmem>>, vector<1x24x24xbf16>
    %16 = vector.shape_cast %15 : vector<1x24x24xbf16> to vector<24x24xbf16>
    %cst_16 = arith.constant dense<0.000000e+00> : vector<78x24xf32>
    %17 = tpu.matmul %14, %16, %cst_16 {dimension_numbers = #tpu.dot_dimension_numbers<[1], [0], [0], [1], [0, 0, 1, 1], [], []>} : vector<78x24xbf16>, vector<24x24xbf16>, vector<78x24xf32> -> vector<78x24xf32>
    %c1 = arith.constant 1 : index
    %c0_17 = arith.constant 0 : index
    %18 = vector.load %arg9[%c1, %c0_17] : memref<100x24xbf16, #tpu.memory_space<vmem>>, vector<78x24xbf16>
    %c1_18 = arith.constant 1 : index
    %c0_19 = arith.constant 0 : index
    %c0_20 = arith.constant 0 : index
    %19 = vector.load %arg5[%c1_18, %c0_19, %c0_20] : memref<9x24x24xbf16, #tpu.memory_space<vmem>>, vector<1x24x24xbf16>
    %20 = vector.shape_cast %19 : vector<1x24x24xbf16> to vector<24x24xbf16>
    %cst_21 = arith.constant dense<0.000000e+00> : vector<78x24xf32>
    %21 = tpu.matmul %18, %20, %cst_21 {dimension_numbers = #tpu.dot_dimension_numbers<[1], [0], [0], [1], [0, 0, 1, 1], [], []>} : vector<78x24xbf16>, vector<24x24xbf16>, vector<78x24xf32> -> vector<78x24xf32>
    %22 = arith.addf %17, %21 : vector<78x24xf32>
    %c2 = arith.constant 2 : index
    %c0_22 = arith.constant 0 : index
    %23 = vector.load %arg9[%c2, %c0_22] : memref<100x24xbf16, #tpu.memory_space<vmem>>, vector<78x24xbf16>
    %c2_23 = arith.constant 2 : index
    %c0_24 = arith.constant 0 : index
    %c0_25 = arith.constant 0 : index
    %24 = vector.load %arg5[%c2_23, %c0_24, %c0_25] : memref<9x24x24xbf16, #tpu.memory_space<vmem>>, vector<1x24x24xbf16>
    %25 = vector.shape_cast %24 : vector<1x24x24xbf16> to vector<24x24xbf16>
    %cst_26 = arith.constant dense<0.000000e+00> : vector<78x24xf32>
    %26 = tpu.matmul %23, %25, %cst_26 {dimension_numbers = #tpu.dot_dimension_numbers<[1], [0], [0], [1], [0, 0, 1, 1], [], []>} : vector<78x24xbf16>, vector<24x24xbf16>, vector<78x24xf32> -> vector<78x24xf32>
    %27 = arith.addf %22, %26 : vector<78x24xf32>
    %c10 = arith.constant 10 : index
    %c0_27 = arith.constant 0 : index
    %28 = vector.load %arg9[%c10, %c0_27] : memref<100x24xbf16, #tpu.memory_space<vmem>>, vector<78x24xbf16>
    %c3 = arith.constant 3 : index
    %c0_28 = arith.constant 0 : index
    %c0_29 = arith.constant 0 : index
    %29 = vector.load %arg5[%c3, %c0_28, %c0_29] : memref<9x24x24xbf16, #tpu.memory_space<vmem>>, vector<1x24x24xbf16>
    %30 = vector.shape_cast %29 : vector<1x24x24xbf16> to vector<24x24xbf16>
    %cst_30 = arith.constant dense<0.000000e+00> : vector<78x24xf32>
    %31 = tpu.matmul %28, %30, %cst_30 {dimension_numbers = #tpu.dot_dimension_numbers<[1], [0], [0], [1], [0, 0, 1, 1], [], []>} : vector<78x24xbf16>, vector<24x24xbf16>, vector<78x24xf32> -> vector<78x24xf32>
    %32 = arith.addf %27, %31 : vector<78x24xf32>
    %c11 = arith.constant 11 : index
    %c0_31 = arith.constant 0 : index
    %33 = vector.load %arg9[%c11, %c0_31] : memref<100x24xbf16, #tpu.memory_space<vmem>>, vector<78x24xbf16>
    %c4 = arith.constant 4 : index
    %c0_32 = arith.constant 0 : index
    %c0_33 = arith.constant 0 : index
    %34 = vector.load %arg5[%c4, %c0_32, %c0_33] : memref<9x24x24xbf16, #tpu.memory_space<vmem>>, vector<1x24x24xbf16>
    %35 = vector.shape_cast %34 : vector<1x24x24xbf16> to vector<24x24xbf16>
    %cst_34 = arith.constant dense<0.000000e+00> : vector<78x24xf32>
    %36 = tpu.matmul %33, %35, %cst_34 {dimension_numbers = #tpu.dot_dimension_numbers<[1], [0], [0], [1], [0, 0, 1, 1], [], []>} : vector<78x24xbf16>, vector<24x24xbf16>, vector<78x24xf32> -> vector<78x24xf32>
    %37 = arith.addf %32, %36 : vector<78x24xf32>
    %c12 = arith.constant 12 : index
    %c0_35 = arith.constant 0 : index
    %38 = vector.load %arg9[%c12, %c0_35] : memref<100x24xbf16, #tpu.memory_space<vmem>>, vector<78x24xbf16>
    %c5 = arith.constant 5 : index
    %c0_36 = arith.constant 0 : index
    %c0_37 = arith.constant 0 : index
    %39 = vector.load %arg5[%c5, %c0_36, %c0_37] : memref<9x24x24xbf16, #tpu.memory_space<vmem>>, vector<1x24x24xbf16>
    %40 = vector.shape_cast %39 : vector<1x24x24xbf16> to vector<24x24xbf16>
    %cst_38 = arith.constant dense<0.000000e+00> : vector<78x24xf32>
    %41 = tpu.matmul %38, %40, %cst_38 {dimension_numbers = #tpu.dot_dimension_numbers<[1], [0], [0], [1], [0, 0, 1, 1], [], []>} : vector<78x24xbf16>, vector<24x24xbf16>, vector<78x24xf32> -> vector<78x24xf32>
    %42 = arith.addf %37, %41 : vector<78x24xf32>
    %c20 = arith.constant 20 : index
    %c0_39 = arith.constant 0 : index
    %43 = vector.load %arg9[%c20, %c0_39] : memref<100x24xbf16, #tpu.memory_space<vmem>>, vector<78x24xbf16>
    %c6 = arith.constant 6 : index
    %c0_40 = arith.constant 0 : index
    %c0_41 = arith.constant 0 : index
    %44 = vector.load %arg5[%c6, %c0_40, %c0_41] : memref<9x24x24xbf16, #tpu.memory_space<vmem>>, vector<1x24x24xbf16>
    %45 = vector.shape_cast %44 : vector<1x24x24xbf16> to vector<24x24xbf16>
    %cst_42 = arith.constant dense<0.000000e+00> : vector<78x24xf32>
    %46 = tpu.matmul %43, %45, %cst_42 {dimension_numbers = #tpu.dot_dimension_numbers<[1], [0], [0], [1], [0, 0, 1, 1], [], []>} : vector<78x24xbf16>, vector<24x24xbf16>, vector<78x24xf32> -> vector<78x24xf32>
    %47 = arith.addf %42, %46 : vector<78x24xf32>
    %c21 = arith.constant 21 : index
    %c0_43 = arith.constant 0 : index
    %48 = vector.load %arg9[%c21, %c0_43] : memref<100x24xbf16, #tpu.memory_space<vmem>>, vector<78x24xbf16>
    %c7 = arith.constant 7 : index
    %c0_44 = arith.constant 0 : index
    %c0_45 = arith.constant 0 : index
    %49 = vector.load %arg5[%c7, %c0_44, %c0_45] : memref<9x24x24xbf16, #tpu.memory_space<vmem>>, vector<1x24x24xbf16>
    %50 = vector.shape_cast %49 : vector<1x24x24xbf16> to vector<24x24xbf16>
    %cst_46 = arith.constant dense<0.000000e+00> : vector<78x24xf32>
    %51 = tpu.matmul %48, %50, %cst_46 {dimension_numbers = #tpu.dot_dimension_numbers<[1], [0], [0], [1], [0, 0, 1, 1], [], []>} : vector<78x24xbf16>, vector<24x24xbf16>, vector<78x24xf32> -> vector<78x24xf32>
    %52 = arith.addf %47, %51 : vector<78x24xf32>
    %c22 = arith.constant 22 : index
    %c0_47 = arith.constant 0 : index
    %53 = vector.load %arg9[%c22, %c0_47] : memref<100x24xbf16, #tpu.memory_space<vmem>>, vector<78x24xbf16>
    %c8 = arith.constant 8 : index
    %c0_48 = arith.constant 0 : index
    %c0_49 = arith.constant 0 : index
    %54 = vector.load %arg5[%c8, %c0_48, %c0_49] : memref<9x24x24xbf16, #tpu.memory_space<vmem>>, vector<1x24x24xbf16>
    %55 = vector.shape_cast %54 : vector<1x24x24xbf16> to vector<24x24xbf16>
    %cst_50 = arith.constant dense<0.000000e+00> : vector<78x24xf32>
    %56 = tpu.matmul %53, %55, %cst_50 {dimension_numbers = #tpu.dot_dimension_numbers<[1], [0], [0], [1], [0, 0, 1, 1], [], []>} : vector<78x24xbf16>, vector<24x24xbf16>, vector<78x24xf32> -> vector<78x24xf32>
    %57 = arith.addf %52, %56 : vector<78x24xf32>
    %c0_51 = arith.constant 0 : index
    %c0_52 = arith.constant 0 : index
    %58 = vector.load %arg6[%c0_51, %c0_52] : memref<1x24xf32, #tpu.memory_space<vmem>>, vector<1x24xf32>
    %59 = vector.broadcast %58 : vector<1x24xf32> to vector<78x24xf32>
    %60 = arith.addf %57, %59 : vector<78x24xf32>
    %cst_53 = arith.constant 0.000000e+00 : f32
    %61 = vector.broadcast %cst_53 : f32 to vector<78x24xf32>
    %62 = arith.maximumf %60, %61 : vector<78x24xf32>
    %c0_54 = arith.constant 0 : index
    %c0_55 = arith.constant 0 : index
    %c0_56 = arith.constant 0 : index
    %63 = vector.load %arg7[%c0_54, %c0_55, %c0_56] : memref<1x78x24xbf16, #tpu.memory_space<vmem>>, vector<1x78x24xbf16>
    %64 = vector.shape_cast %63 : vector<1x78x24xbf16> to vector<78x24xbf16>
    %65 = arith.extf %64 : vector<78x24xbf16> to vector<78x24xf32>
    %66 = arith.addf %62, %65 : vector<78x24xf32>
    %cst_57 = arith.constant 0.000000e+00 : f32
    %67 = vector.broadcast %cst_57 : f32 to vector<78x24xf32>
    %68 = arith.maximumf %66, %67 : vector<78x24xf32>
    %69 = arith.truncf %68 : vector<78x24xf32> to vector<78x24xbf16>
    %c0_58 = arith.constant 0 : index
    %c0_59 = arith.constant 0 : index
    %c0_60 = arith.constant 0 : index
    %70 = vector.load %arg8[%c0_58, %c0_59, %c0_60] : memref<1x78x24xbf16, #tpu.memory_space<vmem>>, vector<1x78x24xbf16>
    %71 = vector.shape_cast %70 : vector<1x78x24xbf16> to vector<78x24xbf16>
    %72 = vector.shape_cast %69 : vector<78x24xbf16> to vector<1x78x24xbf16>
    tpu.vector_store %arg8[%c0_58, %c0_59, %c0_60], %72 {strides = array<i32>} : memref<1x78x24xbf16, #tpu.memory_space<vmem>>, vector<1x78x24xbf16>,
    return
  }
  func.func @transform_0(%arg0: i32) -> (i32, i32, i32) {
    %c0_i32 = arith.constant 0 : i32
    %c0_i32_0 = arith.constant 0 : i32
    %c0_i32_1 = arith.constant 0 : i32
    return %arg0, %c0_i32, %c0_i32_0 : i32, i32, i32
  }
  func.func @transform_1(%arg0: i32) -> (i32, i32) {
    %c0_i32 = arith.constant 0 : i32
    %c0_i32_0 = arith.constant 0 : i32
    %c0_i32_1 = arith.constant 0 : i32
    return %c0_i32, %c0_i32_0 : i32, i32
  }
  func.func @transform_2(%arg0: i32) -> (i32, i32) {
    %c0_i32 = arith.constant 0 : i32
    %c0_i32_0 = arith.constant 0 : i32
    %c0_i32_1 = arith.constant 0 : i32
    return %c0_i32, %c0_i32_0 : i32, i32
  }
  func.func @transform_3(%arg0: i32) -> (i32, i32) {
    %c0_i32 = arith.constant 0 : i32
    %c0_i32_0 = arith.constant 0 : i32
    %c0_i32_1 = arith.constant 0 : i32
    return %c0_i32, %c0_i32_0 : i32, i32
  }
  func.func @transform_4(%arg0: i32) -> (i32, i32, i32) {
    %c0_i32 = arith.constant 0 : i32
    %c0_i32_0 = arith.constant 0 : i32
    %c0_i32_1 = arith.constant 0 : i32
    %c0_i32_2 = arith.constant 0 : i32
    return %c0_i32, %c0_i32_0, %c0_i32_1 : i32, i32, i32
  }
  func.func @transform_5(%arg0: i32) -> (i32, i32) {
    %c0_i32 = arith.constant 0 : i32
    %c0_i32_0 = arith.constant 0 : i32
    %c0_i32_1 = arith.constant 0 : i32
    return %c0_i32, %c0_i32_0 : i32, i32
  }
  func.func @transform_6(%arg0: i32) -> (i32, i32, i32) {
    %c0_i32 = arith.constant 0 : i32
    %c0_i32_0 = arith.constant 0 : i32
    %c0_i32_1 = arith.constant 0 : i32
    return %arg0, %c0_i32, %c0_i32_0 : i32, i32, i32
  }
  func.func @transform_7(%arg0: i32) -> (i32, i32, i32) {
    %c0_i32 = arith.constant 0 : i32
    %c0_i32_0 = arith.constant 0 : i32
    %c0_i32_1 = arith.constant 0 : i32
    return %arg0, %c0_i32, %c0_i32_0 : i32, i32, i32
  }
}

module attributes {stable_mosaic.version = 11 : i64} {
  func.func @_res_unit_kernel(%arg0: i32, %arg1: memref<1x36x216xbf16, #tpu.memory_space<vmem>>, %arg2: memref<36x1xf32, #tpu.memory_space<vmem>>, %arg3: memref<216x32xbf16, #tpu.memory_space<vmem>>, %arg4: memref<1x32xf32, #tpu.memory_space<vmem>>, %arg5: memref<9x32x32xbf16, #tpu.memory_space<vmem>>, %arg6: memref<1x32xf32, #tpu.memory_space<vmem>>, %arg7: memref<1x22x24xbf16, #tpu.memory_space<vmem>>, %arg8: memref<24x32xbf16, #tpu.memory_space<vmem>>, %arg9: memref<1x32xf32, #tpu.memory_space<vmem>>, %arg10: memref<1x22x32xbf16, #tpu.memory_space<vmem>>, %arg11: memref<36x32xbf16, #tpu.memory_space<vmem>>) attributes {dimension_semantics = [#tpu.dimension_semantics<parallel>], iteration_bounds = array<i64: 2>, scalar_prefetch = 0 : i64, scratch_operands = 1 : i64, tpu.core_type = #tpu.core_type<tc>, window_params = [{transform_indices = @transform_0, window_bounds = array<i64: 1, 36, 216>}, {pipeline_mode = #tpu.pipeline_mode<synchronous>, transform_indices = @transform_1, window_bounds = array<i64: 36, 1>}, {pipeline_mode = #tpu.pipeline_mode<synchronous>, transform_indices = @transform_2, window_bounds = array<i64: 216, 32>}, {pipeline_mode = #tpu.pipeline_mode<synchronous>, transform_indices = @transform_3, window_bounds = array<i64: 1, 32>}, {pipeline_mode = #tpu.pipeline_mode<synchronous>, transform_indices = @transform_4, window_bounds = array<i64: 9, 32, 32>}, {pipeline_mode = #tpu.pipeline_mode<synchronous>, transform_indices = @transform_5, window_bounds = array<i64: 1, 32>}, {transform_indices = @transform_6, window_bounds = array<i64: 1, 22, 24>}, {pipeline_mode = #tpu.pipeline_mode<synchronous>, transform_indices = @transform_7, window_bounds = array<i64: 24, 32>}, {pipeline_mode = #tpu.pipeline_mode<synchronous>, transform_indices = @transform_8, window_bounds = array<i64: 1, 32>}, {transform_indices = @transform_9, window_bounds = array<i64: 1, 22, 32>}]} {
    %c0 = arith.constant 0 : index
    %c0_0 = arith.constant 0 : index
    %c0_1 = arith.constant 0 : index
    %0 = vector.load %arg1[%c0, %c0_0, %c0_1] : memref<1x36x216xbf16, #tpu.memory_space<vmem>>, vector<1x36x216xbf16>
    %1 = vector.shape_cast %0 : vector<1x36x216xbf16> to vector<36x216xbf16>
    %c0_2 = arith.constant 0 : index
    %c0_3 = arith.constant 0 : index
    %2 = vector.load %arg3[%c0_2, %c0_3] : memref<216x32xbf16, #tpu.memory_space<vmem>>, vector<216x32xbf16>
    %cst = arith.constant dense<0.000000e+00> : vector<36x32xf32>
    %3 = tpu.matmul %1, %2, %cst {dimension_numbers = #tpu.dot_dimension_numbers<[1], [0], [0], [1], [0, 0, 1, 1], [], []>} : vector<36x216xbf16>, vector<216x32xbf16>, vector<36x32xf32> -> vector<36x32xf32>
    %c0_4 = arith.constant 0 : index
    %c0_5 = arith.constant 0 : index
    %4 = vector.load %arg4[%c0_4, %c0_5] : memref<1x32xf32, #tpu.memory_space<vmem>>, vector<1x32xf32>
    %5 = vector.broadcast %4 : vector<1x32xf32> to vector<36x32xf32>
    %6 = arith.addf %3, %5 : vector<36x32xf32>
    %cst_6 = arith.constant 0.000000e+00 : f32
    %7 = vector.broadcast %cst_6 : f32 to vector<36x32xf32>
    %8 = arith.maximumf %6, %7 : vector<36x32xf32>
    %c0_7 = arith.constant 0 : index
    %c0_8 = arith.constant 0 : index
    %9 = vector.load %arg2[%c0_7, %c0_8] : memref<36x1xf32, #tpu.memory_space<vmem>>, vector<36x1xf32>
    %10 = vector.broadcast %9 : vector<36x1xf32> to vector<36x32xf32>
    %11 = arith.mulf %8, %10 : vector<36x32xf32>
    %12 = arith.truncf %11 : vector<36x32xf32> to vector<36x32xbf16>
    %c0_9 = arith.constant 0 : index
    %c0_10 = arith.constant 0 : index
    %13 = vector.load %arg11[%c0_9, %c0_10] : memref<36x32xbf16, #tpu.memory_space<vmem>>, vector<36x32xbf16>
    tpu.vector_store %arg11[%c0_9, %c0_10], %12 {strides = array<i32>} : memref<36x32xbf16, #tpu.memory_space<vmem>>, vector<36x32xbf16>,
    %c0_11 = arith.constant 0 : index
    %c0_12 = arith.constant 0 : index
    %14 = vector.load %arg11[%c0_11, %c0_12] : memref<36x32xbf16, #tpu.memory_space<vmem>>, vector<22x32xbf16>
    %c0_13 = arith.constant 0 : index
    %c0_14 = arith.constant 0 : index
    %c0_15 = arith.constant 0 : index
    %15 = vector.load %arg5[%c0_13, %c0_14, %c0_15] : memref<9x32x32xbf16, #tpu.memory_space<vmem>>, vector<1x32x32xbf16>
    %16 = vector.shape_cast %15 : vector<1x32x32xbf16> to vector<32x32xbf16>
    %cst_16 = arith.constant dense<0.000000e+00> : vector<22x32xf32>
    %17 = tpu.matmul %14, %16, %cst_16 {dimension_numbers = #tpu.dot_dimension_numbers<[1], [0], [0], [1], [0, 0, 1, 1], [], []>} : vector<22x32xbf16>, vector<32x32xbf16>, vector<22x32xf32> -> vector<22x32xf32>
    %c1 = arith.constant 1 : index
    %c0_17 = arith.constant 0 : index
    %18 = vector.load %arg11[%c1, %c0_17] : memref<36x32xbf16, #tpu.memory_space<vmem>>, vector<22x32xbf16>
    %c1_18 = arith.constant 1 : index
    %c0_19 = arith.constant 0 : index
    %c0_20 = arith.constant 0 : index
    %19 = vector.load %arg5[%c1_18, %c0_19, %c0_20] : memref<9x32x32xbf16, #tpu.memory_space<vmem>>, vector<1x32x32xbf16>
    %20 = vector.shape_cast %19 : vector<1x32x32xbf16> to vector<32x32xbf16>
    %cst_21 = arith.constant dense<0.000000e+00> : vector<22x32xf32>
    %21 = tpu.matmul %18, %20, %cst_21 {dimension_numbers = #tpu.dot_dimension_numbers<[1], [0], [0], [1], [0, 0, 1, 1], [], []>} : vector<22x32xbf16>, vector<32x32xbf16>, vector<22x32xf32> -> vector<22x32xf32>
    %22 = arith.addf %17, %21 : vector<22x32xf32>
    %c2 = arith.constant 2 : index
    %c0_22 = arith.constant 0 : index
    %23 = vector.load %arg11[%c2, %c0_22] : memref<36x32xbf16, #tpu.memory_space<vmem>>, vector<22x32xbf16>
    %c2_23 = arith.constant 2 : index
    %c0_24 = arith.constant 0 : index
    %c0_25 = arith.constant 0 : index
    %24 = vector.load %arg5[%c2_23, %c0_24, %c0_25] : memref<9x32x32xbf16, #tpu.memory_space<vmem>>, vector<1x32x32xbf16>
    %25 = vector.shape_cast %24 : vector<1x32x32xbf16> to vector<32x32xbf16>
    %cst_26 = arith.constant dense<0.000000e+00> : vector<22x32xf32>
    %26 = tpu.matmul %23, %25, %cst_26 {dimension_numbers = #tpu.dot_dimension_numbers<[1], [0], [0], [1], [0, 0, 1, 1], [], []>} : vector<22x32xbf16>, vector<32x32xbf16>, vector<22x32xf32> -> vector<22x32xf32>
    %27 = arith.addf %22, %26 : vector<22x32xf32>
    %c6 = arith.constant 6 : index
    %c0_27 = arith.constant 0 : index
    %28 = vector.load %arg11[%c6, %c0_27] : memref<36x32xbf16, #tpu.memory_space<vmem>>, vector<22x32xbf16>
    %c3 = arith.constant 3 : index
    %c0_28 = arith.constant 0 : index
    %c0_29 = arith.constant 0 : index
    %29 = vector.load %arg5[%c3, %c0_28, %c0_29] : memref<9x32x32xbf16, #tpu.memory_space<vmem>>, vector<1x32x32xbf16>
    %30 = vector.shape_cast %29 : vector<1x32x32xbf16> to vector<32x32xbf16>
    %cst_30 = arith.constant dense<0.000000e+00> : vector<22x32xf32>
    %31 = tpu.matmul %28, %30, %cst_30 {dimension_numbers = #tpu.dot_dimension_numbers<[1], [0], [0], [1], [0, 0, 1, 1], [], []>} : vector<22x32xbf16>, vector<32x32xbf16>, vector<22x32xf32> -> vector<22x32xf32>
    %32 = arith.addf %27, %31 : vector<22x32xf32>
    %c7 = arith.constant 7 : index
    %c0_31 = arith.constant 0 : index
    %33 = vector.load %arg11[%c7, %c0_31] : memref<36x32xbf16, #tpu.memory_space<vmem>>, vector<22x32xbf16>
    %c4 = arith.constant 4 : index
    %c0_32 = arith.constant 0 : index
    %c0_33 = arith.constant 0 : index
    %34 = vector.load %arg5[%c4, %c0_32, %c0_33] : memref<9x32x32xbf16, #tpu.memory_space<vmem>>, vector<1x32x32xbf16>
    %35 = vector.shape_cast %34 : vector<1x32x32xbf16> to vector<32x32xbf16>
    %cst_34 = arith.constant dense<0.000000e+00> : vector<22x32xf32>
    %36 = tpu.matmul %33, %35, %cst_34 {dimension_numbers = #tpu.dot_dimension_numbers<[1], [0], [0], [1], [0, 0, 1, 1], [], []>} : vector<22x32xbf16>, vector<32x32xbf16>, vector<22x32xf32> -> vector<22x32xf32>
    %37 = arith.addf %32, %36 : vector<22x32xf32>
    %c8 = arith.constant 8 : index
    %c0_35 = arith.constant 0 : index
    %38 = vector.load %arg11[%c8, %c0_35] : memref<36x32xbf16, #tpu.memory_space<vmem>>, vector<22x32xbf16>
    %c5 = arith.constant 5 : index
    %c0_36 = arith.constant 0 : index
    %c0_37 = arith.constant 0 : index
    %39 = vector.load %arg5[%c5, %c0_36, %c0_37] : memref<9x32x32xbf16, #tpu.memory_space<vmem>>, vector<1x32x32xbf16>
    %40 = vector.shape_cast %39 : vector<1x32x32xbf16> to vector<32x32xbf16>
    %cst_38 = arith.constant dense<0.000000e+00> : vector<22x32xf32>
    %41 = tpu.matmul %38, %40, %cst_38 {dimension_numbers = #tpu.dot_dimension_numbers<[1], [0], [0], [1], [0, 0, 1, 1], [], []>} : vector<22x32xbf16>, vector<32x32xbf16>, vector<22x32xf32> -> vector<22x32xf32>
    %42 = arith.addf %37, %41 : vector<22x32xf32>
    %c12 = arith.constant 12 : index
    %c0_39 = arith.constant 0 : index
    %43 = vector.load %arg11[%c12, %c0_39] : memref<36x32xbf16, #tpu.memory_space<vmem>>, vector<22x32xbf16>
    %c6_40 = arith.constant 6 : index
    %c0_41 = arith.constant 0 : index
    %c0_42 = arith.constant 0 : index
    %44 = vector.load %arg5[%c6_40, %c0_41, %c0_42] : memref<9x32x32xbf16, #tpu.memory_space<vmem>>, vector<1x32x32xbf16>
    %45 = vector.shape_cast %44 : vector<1x32x32xbf16> to vector<32x32xbf16>
    %cst_43 = arith.constant dense<0.000000e+00> : vector<22x32xf32>
    %46 = tpu.matmul %43, %45, %cst_43 {dimension_numbers = #tpu.dot_dimension_numbers<[1], [0], [0], [1], [0, 0, 1, 1], [], []>} : vector<22x32xbf16>, vector<32x32xbf16>, vector<22x32xf32> -> vector<22x32xf32>
    %47 = arith.addf %42, %46 : vector<22x32xf32>
    %c13 = arith.constant 13 : index
    %c0_44 = arith.constant 0 : index
    %48 = vector.load %arg11[%c13, %c0_44] : memref<36x32xbf16, #tpu.memory_space<vmem>>, vector<22x32xbf16>
    %c7_45 = arith.constant 7 : index
    %c0_46 = arith.constant 0 : index
    %c0_47 = arith.constant 0 : index
    %49 = vector.load %arg5[%c7_45, %c0_46, %c0_47] : memref<9x32x32xbf16, #tpu.memory_space<vmem>>, vector<1x32x32xbf16>
    %50 = vector.shape_cast %49 : vector<1x32x32xbf16> to vector<32x32xbf16>
    %cst_48 = arith.constant dense<0.000000e+00> : vector<22x32xf32>
    %51 = tpu.matmul %48, %50, %cst_48 {dimension_numbers = #tpu.dot_dimension_numbers<[1], [0], [0], [1], [0, 0, 1, 1], [], []>} : vector<22x32xbf16>, vector<32x32xbf16>, vector<22x32xf32> -> vector<22x32xf32>
    %52 = arith.addf %47, %51 : vector<22x32xf32>
    %c14 = arith.constant 14 : index
    %c0_49 = arith.constant 0 : index
    %53 = vector.load %arg11[%c14, %c0_49] : memref<36x32xbf16, #tpu.memory_space<vmem>>, vector<22x32xbf16>
    %c8_50 = arith.constant 8 : index
    %c0_51 = arith.constant 0 : index
    %c0_52 = arith.constant 0 : index
    %54 = vector.load %arg5[%c8_50, %c0_51, %c0_52] : memref<9x32x32xbf16, #tpu.memory_space<vmem>>, vector<1x32x32xbf16>
    %55 = vector.shape_cast %54 : vector<1x32x32xbf16> to vector<32x32xbf16>
    %cst_53 = arith.constant dense<0.000000e+00> : vector<22x32xf32>
    %56 = tpu.matmul %53, %55, %cst_53 {dimension_numbers = #tpu.dot_dimension_numbers<[1], [0], [0], [1], [0, 0, 1, 1], [], []>} : vector<22x32xbf16>, vector<32x32xbf16>, vector<22x32xf32> -> vector<22x32xf32>
    %57 = arith.addf %52, %56 : vector<22x32xf32>
    %c0_54 = arith.constant 0 : index
    %c0_55 = arith.constant 0 : index
    %58 = vector.load %arg6[%c0_54, %c0_55] : memref<1x32xf32, #tpu.memory_space<vmem>>, vector<1x32xf32>
    %59 = vector.broadcast %58 : vector<1x32xf32> to vector<22x32xf32>
    %60 = arith.addf %57, %59 : vector<22x32xf32>
    %cst_56 = arith.constant 0.000000e+00 : f32
    %61 = vector.broadcast %cst_56 : f32 to vector<22x32xf32>
    %62 = arith.maximumf %60, %61 : vector<22x32xf32>
    %c0_57 = arith.constant 0 : index
    %c0_58 = arith.constant 0 : index
    %c0_59 = arith.constant 0 : index
    %63 = vector.load %arg7[%c0_57, %c0_58, %c0_59] : memref<1x22x24xbf16, #tpu.memory_space<vmem>>, vector<1x22x24xbf16>
    %64 = vector.shape_cast %63 : vector<1x22x24xbf16> to vector<22x24xbf16>
    %c0_60 = arith.constant 0 : index
    %c0_61 = arith.constant 0 : index
    %65 = vector.load %arg8[%c0_60, %c0_61] : memref<24x32xbf16, #tpu.memory_space<vmem>>, vector<24x32xbf16>
    %cst_62 = arith.constant dense<0.000000e+00> : vector<22x32xf32>
    %66 = tpu.matmul %64, %65, %cst_62 {dimension_numbers = #tpu.dot_dimension_numbers<[1], [0], [0], [1], [0, 0, 1, 1], [], []>} : vector<22x24xbf16>, vector<24x32xbf16>, vector<22x32xf32> -> vector<22x32xf32>
    %c0_63 = arith.constant 0 : index
    %c0_64 = arith.constant 0 : index
    %67 = vector.load %arg9[%c0_63, %c0_64] : memref<1x32xf32, #tpu.memory_space<vmem>>, vector<1x32xf32>
    %68 = vector.broadcast %67 : vector<1x32xf32> to vector<22x32xf32>
    %69 = arith.addf %66, %68 : vector<22x32xf32>
    %70 = arith.addf %62, %69 : vector<22x32xf32>
    %cst_65 = arith.constant 0.000000e+00 : f32
    %71 = vector.broadcast %cst_65 : f32 to vector<22x32xf32>
    %72 = arith.maximumf %70, %71 : vector<22x32xf32>
    %73 = arith.truncf %72 : vector<22x32xf32> to vector<22x32xbf16>
    %c0_66 = arith.constant 0 : index
    %c0_67 = arith.constant 0 : index
    %c0_68 = arith.constant 0 : index
    %74 = vector.load %arg10[%c0_66, %c0_67, %c0_68] : memref<1x22x32xbf16, #tpu.memory_space<vmem>>, vector<1x22x32xbf16>
    %75 = vector.shape_cast %74 : vector<1x22x32xbf16> to vector<22x32xbf16>
    %76 = vector.shape_cast %73 : vector<22x32xbf16> to vector<1x22x32xbf16>
    tpu.vector_store %arg10[%c0_66, %c0_67, %c0_68], %76 {strides = array<i32>} : memref<1x22x32xbf16, #tpu.memory_space<vmem>>, vector<1x22x32xbf16>,
    return
  }
  func.func @transform_0(%arg0: i32) -> (i32, i32, i32) {
    %c0_i32 = arith.constant 0 : i32
    %c0_i32_0 = arith.constant 0 : i32
    %c0_i32_1 = arith.constant 0 : i32
    return %arg0, %c0_i32, %c0_i32_0 : i32, i32, i32
  }
  func.func @transform_1(%arg0: i32) -> (i32, i32) {
    %c0_i32 = arith.constant 0 : i32
    %c0_i32_0 = arith.constant 0 : i32
    %c0_i32_1 = arith.constant 0 : i32
    return %c0_i32, %c0_i32_0 : i32, i32
  }
  func.func @transform_2(%arg0: i32) -> (i32, i32) {
    %c0_i32 = arith.constant 0 : i32
    %c0_i32_0 = arith.constant 0 : i32
    %c0_i32_1 = arith.constant 0 : i32
    return %c0_i32, %c0_i32_0 : i32, i32
  }
  func.func @transform_3(%arg0: i32) -> (i32, i32) {
    %c0_i32 = arith.constant 0 : i32
    %c0_i32_0 = arith.constant 0 : i32
    %c0_i32_1 = arith.constant 0 : i32
    return %c0_i32, %c0_i32_0 : i32, i32
  }
  func.func @transform_4(%arg0: i32) -> (i32, i32, i32) {
    %c0_i32 = arith.constant 0 : i32
    %c0_i32_0 = arith.constant 0 : i32
    %c0_i32_1 = arith.constant 0 : i32
    %c0_i32_2 = arith.constant 0 : i32
    return %c0_i32, %c0_i32_0, %c0_i32_1 : i32, i32, i32
  }
  func.func @transform_5(%arg0: i32) -> (i32, i32) {
    %c0_i32 = arith.constant 0 : i32
    %c0_i32_0 = arith.constant 0 : i32
    %c0_i32_1 = arith.constant 0 : i32
    return %c0_i32, %c0_i32_0 : i32, i32
  }
  func.func @transform_6(%arg0: i32) -> (i32, i32, i32) {
    %c0_i32 = arith.constant 0 : i32
    %c0_i32_0 = arith.constant 0 : i32
    %c0_i32_1 = arith.constant 0 : i32
    return %arg0, %c0_i32, %c0_i32_0 : i32, i32, i32
  }
  func.func @transform_7(%arg0: i32) -> (i32, i32) {
    %c0_i32 = arith.constant 0 : i32
    %c0_i32_0 = arith.constant 0 : i32
    %c0_i32_1 = arith.constant 0 : i32
    return %c0_i32, %c0_i32_0 : i32, i32
  }
  func.func @transform_8(%arg0: i32) -> (i32, i32) {
    %c0_i32 = arith.constant 0 : i32
    %c0_i32_0 = arith.constant 0 : i32
    %c0_i32_1 = arith.constant 0 : i32
    return %c0_i32, %c0_i32_0 : i32, i32
  }
  func.func @transform_9(%arg0: i32) -> (i32, i32, i32) {
    %c0_i32 = arith.constant 0 : i32
    %c0_i32_0 = arith.constant 0 : i32
    %c0_i32_1 = arith.constant 0 : i32
    return %arg0, %c0_i32, %c0_i32_0 : i32, i32, i32
  }
}

module attributes {stable_mosaic.version = 11 : i64} {
  func.func @_res_unit_kernel(%arg0: i32, %arg1: memref<1x36x288xbf16, #tpu.memory_space<vmem>>, %arg2: memref<36x1xf32, #tpu.memory_space<vmem>>, %arg3: memref<288x32xbf16, #tpu.memory_space<vmem>>, %arg4: memref<1x32xf32, #tpu.memory_space<vmem>>, %arg5: memref<9x32x32xbf16, #tpu.memory_space<vmem>>, %arg6: memref<1x32xf32, #tpu.memory_space<vmem>>, %arg7: memref<1x22x32xbf16, #tpu.memory_space<vmem>>, %arg8: memref<1x22x32xbf16, #tpu.memory_space<vmem>>, %arg9: memref<36x32xbf16, #tpu.memory_space<vmem>>) attributes {dimension_semantics = [#tpu.dimension_semantics<parallel>], iteration_bounds = array<i64: 2>, scalar_prefetch = 0 : i64, scratch_operands = 1 : i64, tpu.core_type = #tpu.core_type<tc>, window_params = [{transform_indices = @transform_0, window_bounds = array<i64: 1, 36, 288>}, {pipeline_mode = #tpu.pipeline_mode<synchronous>, transform_indices = @transform_1, window_bounds = array<i64: 36, 1>}, {pipeline_mode = #tpu.pipeline_mode<synchronous>, transform_indices = @transform_2, window_bounds = array<i64: 288, 32>}, {pipeline_mode = #tpu.pipeline_mode<synchronous>, transform_indices = @transform_3, window_bounds = array<i64: 1, 32>}, {pipeline_mode = #tpu.pipeline_mode<synchronous>, transform_indices = @transform_4, window_bounds = array<i64: 9, 32, 32>}, {pipeline_mode = #tpu.pipeline_mode<synchronous>, transform_indices = @transform_5, window_bounds = array<i64: 1, 32>}, {transform_indices = @transform_6, window_bounds = array<i64: 1, 22, 32>}, {transform_indices = @transform_7, window_bounds = array<i64: 1, 22, 32>}]} {
    %c0 = arith.constant 0 : index
    %c0_0 = arith.constant 0 : index
    %c0_1 = arith.constant 0 : index
    %0 = vector.load %arg1[%c0, %c0_0, %c0_1] : memref<1x36x288xbf16, #tpu.memory_space<vmem>>, vector<1x36x288xbf16>
    %1 = vector.shape_cast %0 : vector<1x36x288xbf16> to vector<36x288xbf16>
    %c0_2 = arith.constant 0 : index
    %c0_3 = arith.constant 0 : index
    %2 = vector.load %arg3[%c0_2, %c0_3] : memref<288x32xbf16, #tpu.memory_space<vmem>>, vector<288x32xbf16>
    %cst = arith.constant dense<0.000000e+00> : vector<36x32xf32>
    %3 = tpu.matmul %1, %2, %cst {dimension_numbers = #tpu.dot_dimension_numbers<[1], [0], [0], [1], [0, 0, 1, 1], [], []>} : vector<36x288xbf16>, vector<288x32xbf16>, vector<36x32xf32> -> vector<36x32xf32>
    %c0_4 = arith.constant 0 : index
    %c0_5 = arith.constant 0 : index
    %4 = vector.load %arg4[%c0_4, %c0_5] : memref<1x32xf32, #tpu.memory_space<vmem>>, vector<1x32xf32>
    %5 = vector.broadcast %4 : vector<1x32xf32> to vector<36x32xf32>
    %6 = arith.addf %3, %5 : vector<36x32xf32>
    %cst_6 = arith.constant 0.000000e+00 : f32
    %7 = vector.broadcast %cst_6 : f32 to vector<36x32xf32>
    %8 = arith.maximumf %6, %7 : vector<36x32xf32>
    %c0_7 = arith.constant 0 : index
    %c0_8 = arith.constant 0 : index
    %9 = vector.load %arg2[%c0_7, %c0_8] : memref<36x1xf32, #tpu.memory_space<vmem>>, vector<36x1xf32>
    %10 = vector.broadcast %9 : vector<36x1xf32> to vector<36x32xf32>
    %11 = arith.mulf %8, %10 : vector<36x32xf32>
    %12 = arith.truncf %11 : vector<36x32xf32> to vector<36x32xbf16>
    %c0_9 = arith.constant 0 : index
    %c0_10 = arith.constant 0 : index
    %13 = vector.load %arg9[%c0_9, %c0_10] : memref<36x32xbf16, #tpu.memory_space<vmem>>, vector<36x32xbf16>
    tpu.vector_store %arg9[%c0_9, %c0_10], %12 {strides = array<i32>} : memref<36x32xbf16, #tpu.memory_space<vmem>>, vector<36x32xbf16>,
    %c0_11 = arith.constant 0 : index
    %c0_12 = arith.constant 0 : index
    %14 = vector.load %arg9[%c0_11, %c0_12] : memref<36x32xbf16, #tpu.memory_space<vmem>>, vector<22x32xbf16>
    %c0_13 = arith.constant 0 : index
    %c0_14 = arith.constant 0 : index
    %c0_15 = arith.constant 0 : index
    %15 = vector.load %arg5[%c0_13, %c0_14, %c0_15] : memref<9x32x32xbf16, #tpu.memory_space<vmem>>, vector<1x32x32xbf16>
    %16 = vector.shape_cast %15 : vector<1x32x32xbf16> to vector<32x32xbf16>
    %cst_16 = arith.constant dense<0.000000e+00> : vector<22x32xf32>
    %17 = tpu.matmul %14, %16, %cst_16 {dimension_numbers = #tpu.dot_dimension_numbers<[1], [0], [0], [1], [0, 0, 1, 1], [], []>} : vector<22x32xbf16>, vector<32x32xbf16>, vector<22x32xf32> -> vector<22x32xf32>
    %c1 = arith.constant 1 : index
    %c0_17 = arith.constant 0 : index
    %18 = vector.load %arg9[%c1, %c0_17] : memref<36x32xbf16, #tpu.memory_space<vmem>>, vector<22x32xbf16>
    %c1_18 = arith.constant 1 : index
    %c0_19 = arith.constant 0 : index
    %c0_20 = arith.constant 0 : index
    %19 = vector.load %arg5[%c1_18, %c0_19, %c0_20] : memref<9x32x32xbf16, #tpu.memory_space<vmem>>, vector<1x32x32xbf16>
    %20 = vector.shape_cast %19 : vector<1x32x32xbf16> to vector<32x32xbf16>
    %cst_21 = arith.constant dense<0.000000e+00> : vector<22x32xf32>
    %21 = tpu.matmul %18, %20, %cst_21 {dimension_numbers = #tpu.dot_dimension_numbers<[1], [0], [0], [1], [0, 0, 1, 1], [], []>} : vector<22x32xbf16>, vector<32x32xbf16>, vector<22x32xf32> -> vector<22x32xf32>
    %22 = arith.addf %17, %21 : vector<22x32xf32>
    %c2 = arith.constant 2 : index
    %c0_22 = arith.constant 0 : index
    %23 = vector.load %arg9[%c2, %c0_22] : memref<36x32xbf16, #tpu.memory_space<vmem>>, vector<22x32xbf16>
    %c2_23 = arith.constant 2 : index
    %c0_24 = arith.constant 0 : index
    %c0_25 = arith.constant 0 : index
    %24 = vector.load %arg5[%c2_23, %c0_24, %c0_25] : memref<9x32x32xbf16, #tpu.memory_space<vmem>>, vector<1x32x32xbf16>
    %25 = vector.shape_cast %24 : vector<1x32x32xbf16> to vector<32x32xbf16>
    %cst_26 = arith.constant dense<0.000000e+00> : vector<22x32xf32>
    %26 = tpu.matmul %23, %25, %cst_26 {dimension_numbers = #tpu.dot_dimension_numbers<[1], [0], [0], [1], [0, 0, 1, 1], [], []>} : vector<22x32xbf16>, vector<32x32xbf16>, vector<22x32xf32> -> vector<22x32xf32>
    %27 = arith.addf %22, %26 : vector<22x32xf32>
    %c6 = arith.constant 6 : index
    %c0_27 = arith.constant 0 : index
    %28 = vector.load %arg9[%c6, %c0_27] : memref<36x32xbf16, #tpu.memory_space<vmem>>, vector<22x32xbf16>
    %c3 = arith.constant 3 : index
    %c0_28 = arith.constant 0 : index
    %c0_29 = arith.constant 0 : index
    %29 = vector.load %arg5[%c3, %c0_28, %c0_29] : memref<9x32x32xbf16, #tpu.memory_space<vmem>>, vector<1x32x32xbf16>
    %30 = vector.shape_cast %29 : vector<1x32x32xbf16> to vector<32x32xbf16>
    %cst_30 = arith.constant dense<0.000000e+00> : vector<22x32xf32>
    %31 = tpu.matmul %28, %30, %cst_30 {dimension_numbers = #tpu.dot_dimension_numbers<[1], [0], [0], [1], [0, 0, 1, 1], [], []>} : vector<22x32xbf16>, vector<32x32xbf16>, vector<22x32xf32> -> vector<22x32xf32>
    %32 = arith.addf %27, %31 : vector<22x32xf32>
    %c7 = arith.constant 7 : index
    %c0_31 = arith.constant 0 : index
    %33 = vector.load %arg9[%c7, %c0_31] : memref<36x32xbf16, #tpu.memory_space<vmem>>, vector<22x32xbf16>
    %c4 = arith.constant 4 : index
    %c0_32 = arith.constant 0 : index
    %c0_33 = arith.constant 0 : index
    %34 = vector.load %arg5[%c4, %c0_32, %c0_33] : memref<9x32x32xbf16, #tpu.memory_space<vmem>>, vector<1x32x32xbf16>
    %35 = vector.shape_cast %34 : vector<1x32x32xbf16> to vector<32x32xbf16>
    %cst_34 = arith.constant dense<0.000000e+00> : vector<22x32xf32>
    %36 = tpu.matmul %33, %35, %cst_34 {dimension_numbers = #tpu.dot_dimension_numbers<[1], [0], [0], [1], [0, 0, 1, 1], [], []>} : vector<22x32xbf16>, vector<32x32xbf16>, vector<22x32xf32> -> vector<22x32xf32>
    %37 = arith.addf %32, %36 : vector<22x32xf32>
    %c8 = arith.constant 8 : index
    %c0_35 = arith.constant 0 : index
    %38 = vector.load %arg9[%c8, %c0_35] : memref<36x32xbf16, #tpu.memory_space<vmem>>, vector<22x32xbf16>
    %c5 = arith.constant 5 : index
    %c0_36 = arith.constant 0 : index
    %c0_37 = arith.constant 0 : index
    %39 = vector.load %arg5[%c5, %c0_36, %c0_37] : memref<9x32x32xbf16, #tpu.memory_space<vmem>>, vector<1x32x32xbf16>
    %40 = vector.shape_cast %39 : vector<1x32x32xbf16> to vector<32x32xbf16>
    %cst_38 = arith.constant dense<0.000000e+00> : vector<22x32xf32>
    %41 = tpu.matmul %38, %40, %cst_38 {dimension_numbers = #tpu.dot_dimension_numbers<[1], [0], [0], [1], [0, 0, 1, 1], [], []>} : vector<22x32xbf16>, vector<32x32xbf16>, vector<22x32xf32> -> vector<22x32xf32>
    %42 = arith.addf %37, %41 : vector<22x32xf32>
    %c12 = arith.constant 12 : index
    %c0_39 = arith.constant 0 : index
    %43 = vector.load %arg9[%c12, %c0_39] : memref<36x32xbf16, #tpu.memory_space<vmem>>, vector<22x32xbf16>
    %c6_40 = arith.constant 6 : index
    %c0_41 = arith.constant 0 : index
    %c0_42 = arith.constant 0 : index
    %44 = vector.load %arg5[%c6_40, %c0_41, %c0_42] : memref<9x32x32xbf16, #tpu.memory_space<vmem>>, vector<1x32x32xbf16>
    %45 = vector.shape_cast %44 : vector<1x32x32xbf16> to vector<32x32xbf16>
    %cst_43 = arith.constant dense<0.000000e+00> : vector<22x32xf32>
    %46 = tpu.matmul %43, %45, %cst_43 {dimension_numbers = #tpu.dot_dimension_numbers<[1], [0], [0], [1], [0, 0, 1, 1], [], []>} : vector<22x32xbf16>, vector<32x32xbf16>, vector<22x32xf32> -> vector<22x32xf32>
    %47 = arith.addf %42, %46 : vector<22x32xf32>
    %c13 = arith.constant 13 : index
    %c0_44 = arith.constant 0 : index
    %48 = vector.load %arg9[%c13, %c0_44] : memref<36x32xbf16, #tpu.memory_space<vmem>>, vector<22x32xbf16>
    %c7_45 = arith.constant 7 : index
    %c0_46 = arith.constant 0 : index
    %c0_47 = arith.constant 0 : index
    %49 = vector.load %arg5[%c7_45, %c0_46, %c0_47] : memref<9x32x32xbf16, #tpu.memory_space<vmem>>, vector<1x32x32xbf16>
    %50 = vector.shape_cast %49 : vector<1x32x32xbf16> to vector<32x32xbf16>
    %cst_48 = arith.constant dense<0.000000e+00> : vector<22x32xf32>
    %51 = tpu.matmul %48, %50, %cst_48 {dimension_numbers = #tpu.dot_dimension_numbers<[1], [0], [0], [1], [0, 0, 1, 1], [], []>} : vector<22x32xbf16>, vector<32x32xbf16>, vector<22x32xf32> -> vector<22x32xf32>
    %52 = arith.addf %47, %51 : vector<22x32xf32>
    %c14 = arith.constant 14 : index
    %c0_49 = arith.constant 0 : index
    %53 = vector.load %arg9[%c14, %c0_49] : memref<36x32xbf16, #tpu.memory_space<vmem>>, vector<22x32xbf16>
    %c8_50 = arith.constant 8 : index
    %c0_51 = arith.constant 0 : index
    %c0_52 = arith.constant 0 : index
    %54 = vector.load %arg5[%c8_50, %c0_51, %c0_52] : memref<9x32x32xbf16, #tpu.memory_space<vmem>>, vector<1x32x32xbf16>
    %55 = vector.shape_cast %54 : vector<1x32x32xbf16> to vector<32x32xbf16>
    %cst_53 = arith.constant dense<0.000000e+00> : vector<22x32xf32>
    %56 = tpu.matmul %53, %55, %cst_53 {dimension_numbers = #tpu.dot_dimension_numbers<[1], [0], [0], [1], [0, 0, 1, 1], [], []>} : vector<22x32xbf16>, vector<32x32xbf16>, vector<22x32xf32> -> vector<22x32xf32>
    %57 = arith.addf %52, %56 : vector<22x32xf32>
    %c0_54 = arith.constant 0 : index
    %c0_55 = arith.constant 0 : index
    %58 = vector.load %arg6[%c0_54, %c0_55] : memref<1x32xf32, #tpu.memory_space<vmem>>, vector<1x32xf32>
    %59 = vector.broadcast %58 : vector<1x32xf32> to vector<22x32xf32>
    %60 = arith.addf %57, %59 : vector<22x32xf32>
    %cst_56 = arith.constant 0.000000e+00 : f32
    %61 = vector.broadcast %cst_56 : f32 to vector<22x32xf32>
    %62 = arith.maximumf %60, %61 : vector<22x32xf32>
    %c0_57 = arith.constant 0 : index
    %c0_58 = arith.constant 0 : index
    %c0_59 = arith.constant 0 : index
    %63 = vector.load %arg7[%c0_57, %c0_58, %c0_59] : memref<1x22x32xbf16, #tpu.memory_space<vmem>>, vector<1x22x32xbf16>
    %64 = vector.shape_cast %63 : vector<1x22x32xbf16> to vector<22x32xbf16>
    %65 = arith.extf %64 : vector<22x32xbf16> to vector<22x32xf32>
    %66 = arith.addf %62, %65 : vector<22x32xf32>
    %cst_60 = arith.constant 0.000000e+00 : f32
    %67 = vector.broadcast %cst_60 : f32 to vector<22x32xf32>
    %68 = arith.maximumf %66, %67 : vector<22x32xf32>
    %69 = arith.truncf %68 : vector<22x32xf32> to vector<22x32xbf16>
    %c0_61 = arith.constant 0 : index
    %c0_62 = arith.constant 0 : index
    %c0_63 = arith.constant 0 : index
    %70 = vector.load %arg8[%c0_61, %c0_62, %c0_63] : memref<1x22x32xbf16, #tpu.memory_space<vmem>>, vector<1x22x32xbf16>
    %71 = vector.shape_cast %70 : vector<1x22x32xbf16> to vector<22x32xbf16>
    %72 = vector.shape_cast %69 : vector<22x32xbf16> to vector<1x22x32xbf16>
    tpu.vector_store %arg8[%c0_61, %c0_62, %c0_63], %72 {strides = array<i32>} : memref<1x22x32xbf16, #tpu.memory_space<vmem>>, vector<1x22x32xbf16>,
    return
  }
  func.func @transform_0(%arg0: i32) -> (i32, i32, i32) {
    %c0_i32 = arith.constant 0 : i32
    %c0_i32_0 = arith.constant 0 : i32
    %c0_i32_1 = arith.constant 0 : i32
    return %arg0, %c0_i32, %c0_i32_0 : i32, i32, i32
  }
  func.func @transform_1(%arg0: i32) -> (i32, i32) {
    %c0_i32 = arith.constant 0 : i32
    %c0_i32_0 = arith.constant 0 : i32
    %c0_i32_1 = arith.constant 0 : i32
    return %c0_i32, %c0_i32_0 : i32, i32
  }
  func.func @transform_2(%arg0: i32) -> (i32, i32) {
    %c0_i32 = arith.constant 0 : i32
    %c0_i32_0 = arith.constant 0 : i32
    %c0_i32_1 = arith.constant 0 : i32
    return %c0_i32, %c0_i32_0 : i32, i32
  }
  func.func @transform_3(%arg0: i32) -> (i32, i32) {
    %c0_i32 = arith.constant 0 : i32
    %c0_i32_0 = arith.constant 0 : i32
    %c0_i32_1 = arith.constant 0 : i32
    return %c0_i32, %c0_i32_0 : i32, i32
  }
  func.func @transform_4(%arg0: i32) -> (i32, i32, i32) {
    %c0_i32 = arith.constant 0 : i32
    %c0_i32_0 = arith.constant 0 : i32
    %c0_i32_1 = arith.constant 0 : i32
    %c0_i32_2 = arith.constant 0 : i32
    return %c0_i32, %c0_i32_0, %c0_i32_1 : i32, i32, i32
  }
  func.func @transform_5(%arg0: i32) -> (i32, i32) {
    %c0_i32 = arith.constant 0 : i32
    %c0_i32_0 = arith.constant 0 : i32
    %c0_i32_1 = arith.constant 0 : i32
    return %c0_i32, %c0_i32_0 : i32, i32
  }
  func.func @transform_6(%arg0: i32) -> (i32, i32, i32) {
    %c0_i32 = arith.constant 0 : i32
    %c0_i32_0 = arith.constant 0 : i32
    %c0_i32_1 = arith.constant 0 : i32
    return %arg0, %c0_i32, %c0_i32_0 : i32, i32, i32
  }
  func.func @transform_7(%arg0: i32) -> (i32, i32, i32) {
    %c0_i32 = arith.constant 0 : i32
    %c0_i32_0 = arith.constant 0 : i32
    %c0_i32_1 = arith.constant 0 : i32
    return %arg0, %c0_i32, %c0_i32_0 : i32, i32, i32
  }
}

module attributes {stable_mosaic.version = 11 : i64} {
  func.func @_mm_conv_kernel(%arg0: i32, %arg1: memref<1x16x32xbf16, #tpu.memory_space<vmem>>, %arg2: memref<32x64xbf16, #tpu.memory_space<vmem>>, %arg3: memref<1x64xf32, #tpu.memory_space<vmem>>, %arg4: memref<1x16x64xf32, #tpu.memory_space<vmem>>) attributes {dimension_semantics = [#tpu.dimension_semantics<parallel>], iteration_bounds = array<i64: 2>, scalar_prefetch = 0 : i64, scratch_operands = 0 : i64, tpu.core_type = #tpu.core_type<tc>, window_params = [{transform_indices = @transform_0, window_bounds = array<i64: 1, 16, 32>}, {pipeline_mode = #tpu.pipeline_mode<synchronous>, transform_indices = @transform_1, window_bounds = array<i64: 32, 64>}, {pipeline_mode = #tpu.pipeline_mode<synchronous>, transform_indices = @transform_2, window_bounds = array<i64: 1, 64>}, {transform_indices = @transform_3, window_bounds = array<i64: 1, 16, 64>}]} {
    %c0 = arith.constant 0 : index
    %c0_0 = arith.constant 0 : index
    %c0_1 = arith.constant 0 : index
    %0 = vector.load %arg1[%c0, %c0_0, %c0_1] : memref<1x16x32xbf16, #tpu.memory_space<vmem>>, vector<1x16x32xbf16>
    %1 = vector.shape_cast %0 : vector<1x16x32xbf16> to vector<16x32xbf16>
    %c0_2 = arith.constant 0 : index
    %c0_3 = arith.constant 0 : index
    %2 = vector.load %arg2[%c0_2, %c0_3] : memref<32x64xbf16, #tpu.memory_space<vmem>>, vector<32x64xbf16>
    %cst = arith.constant dense<0.000000e+00> : vector<16x64xf32>
    %3 = tpu.matmul %1, %2, %cst {dimension_numbers = #tpu.dot_dimension_numbers<[1], [0], [0], [1], [0, 0, 1, 1], [], []>} : vector<16x32xbf16>, vector<32x64xbf16>, vector<16x64xf32> -> vector<16x64xf32>
    %c0_4 = arith.constant 0 : index
    %c0_5 = arith.constant 0 : index
    %4 = vector.load %arg3[%c0_4, %c0_5] : memref<1x64xf32, #tpu.memory_space<vmem>>, vector<1x64xf32>
    %5 = vector.broadcast %4 : vector<1x64xf32> to vector<16x64xf32>
    %6 = arith.addf %3, %5 : vector<16x64xf32>
    %c0_6 = arith.constant 0 : index
    %c0_7 = arith.constant 0 : index
    %c0_8 = arith.constant 0 : index
    %7 = vector.load %arg4[%c0_6, %c0_7, %c0_8] : memref<1x16x64xf32, #tpu.memory_space<vmem>>, vector<1x16x64xf32>
    %8 = vector.shape_cast %7 : vector<1x16x64xf32> to vector<16x64xf32>
    %9 = vector.shape_cast %6 : vector<16x64xf32> to vector<1x16x64xf32>
    tpu.vector_store %arg4[%c0_6, %c0_7, %c0_8], %9 {strides = array<i32>} : memref<1x16x64xf32, #tpu.memory_space<vmem>>, vector<1x16x64xf32>,
    return
  }
  func.func @transform_0(%arg0: i32) -> (i32, i32, i32) {
    %c0_i32 = arith.constant 0 : i32
    %c0_i32_0 = arith.constant 0 : i32
    %c0_i32_1 = arith.constant 0 : i32
    return %arg0, %c0_i32, %c0_i32_0 : i32, i32, i32
  }
  func.func @transform_1(%arg0: i32) -> (i32, i32) {
    %c0_i32 = arith.constant 0 : i32
    %c0_i32_0 = arith.constant 0 : i32
    %c0_i32_1 = arith.constant 0 : i32
    return %c0_i32, %c0_i32_0 : i32, i32
  }
  func.func @transform_2(%arg0: i32) -> (i32, i32) {
    %c0_i32 = arith.constant 0 : i32
    %c0_i32_0 = arith.constant 0 : i32
    %c0_i32_1 = arith.constant 0 : i32
    return %c0_i32, %c0_i32_0 : i32, i32
  }
  func.func @transform_3(%arg0: i32) -> (i32, i32, i32) {
    %c0_i32 = arith.constant 0 : i32
    %c0_i32_0 = arith.constant 0 : i32
    %c0_i32_1 = arith.constant 0 : i32
    return %arg0, %c0_i32, %c0_i32_0 : i32, i32, i32
  }
}

</mosaic_0001>

<bundles_post_ra>
// kernel: _lambda_.8
= control target key start
LH: loop header
LB: loop body
LE: loop exit
PB: predicated region body
PF: predicated region fallthrough
CT: control target
= control target key end

     0   :  { %s1145_s12 = smov 0   ;;  %s1349_s0 = inlined_call_operand.vmem [shape: bf16[2,256,152], index: 0, kind: input, shape index: {}]   ;;  %s1350_s1 = inlined_call_operand.vmem [shape: bf16[152,16], index: 1, kind: input, shape index: {}]   ;;  %s1351_s2 = inlined_call_operand.vmem [shape: f32[1,16], index: 2, kind: input, shape index: {}]   ;;  %s1352_s3 = inlined_call_operand.vmem [shape: bf16[2,256,16], index: 3, kind: output, shape index: {}]  }
   0x1 LB: > { %s893_s13 = sadd.s32 4294967295, %s1122_s12   ;;  %p897_p0 = scmp.ge.s32.totalorder %s1122_s12, 1  ;;  %s1122_s12 = sphi %s1145_s12, %s13_s12  }
   0x2   : > { %p137_p1 = scmp.lt.s32.totalorder %s1122_s12, 3 }
   0x4   : > { %p138_p2 = pnand %p897_p0, %p137_p1 }
   0x5   : > { %p161_p3 = scmp.lt.s32.totalorder (!%p138_p2), %s893_s13, 1 }
   0x6   : > { %141 = sbr.rel (%p138_p2) target bundleno = 312 (0x138), region = 32 }
   0xb   : > { %v1058_v0 = vld [vmem:[%s1350_s1 + $0x38] sm:$0xff]   ;;  %v1124_v1 = vmov 0   ;;  %v1059_v2 = vld [vmem:[%s1350_s1 + $0x30] sm:$0xff]   ;;  %s1354_s13 = smov (!%p161_p3, %s893_s13), 1  ;;  %v1060_v3 = vld [vmem:[%s1350_s1 + $0x28] sm:$0xff]   ;;  %vm431_vm0 = vcmask 195584  }
   0xc   : > { %484 = vmatprep.subr.bf16.mxu0 %v1124_v1  ;;  %1029 = vmatprep.subr.bf16.mxu1 %v1124_v1  ;;  %s995_s20 = sshll.u32 %s1354_s13, 8  ;;  %v1061_v4 = vld [vmem:[%s1350_s1 + $0x20] sm:$0xff]   ;;  %v1062_v7 = vld [vmem:[%s1350_s1 + $0x18] sm:$0xff]   ;;  %v1063_v8 = vld [vmem:[%s1350_s1 + $0x10] sm:$0xff]   ;;  %vm480_vm1 = vcmask 1043456   ;;  %s996_s15 = sshll.u32 %s1354_s13, 7 }
   0xd   : > { %485 = vmatpush1.bf16.msra.mxu0 %v1058_v0  ;;  %1039 = vmatpush1.bf16.msra.mxu1 %v1058_v0  ;;  %s1168_s23 = scalar_lea.vmem %s1349_s0, %s995_s20  ;;  %v1064_v9 = vld [vmem:[%s1350_s1 + $0x8] sm:$0xff]   ;;  %v1065_v10 = vld [vmem:[%s1350_s1] sm:$0xff]   ;;  %s1250_s18 = scalar_lea.vmem %s1352_s3, %s996_s15  ;;  %vm805_vm2 = vcmask 125952  }
   0xe   : > { %486 = vmatprep.subr.bf16.mxu0 %v1124_v1  ;;  %1030 = vmatprep.subr.bf16.mxu1 %v1124_v1  ;;  %v1070_v5 = vld [vmem:[%s1168_s23 + $0x4] ss:$8 sps:$4 sm:$0xff]   ;;  %v1066_v11 = vld [vmem:[%s1350_s1 + $0x48] ss:$0 sps:$4 sm:$0xff]   ;;  %v1074_v16 = vld [vmem:[%s1168_s23 + $0x14] ss:$8 sps:$4 sm:$0xff]  }
   0xf   : > { %945 = vmatprep.mubr.msk.bf16.mxu0 %vm431_vm0, %v1070_v5  ;;  %v1073_v6 = vld [vmem:[%s1168_s23 + $0x84] ss:$8 sps:$4 sm:$0xff]   ;;  %v482_v12 = vsel %vm480_vm1, %v1066_v11, 0  ;;  %v1068_v14 = vld [vmem:[%s1168_s23] ss:$8 sps:$4 sm:$0xff]  }
  0x10   : > { %953 = vmatprep.mubr.msk.bf16.mxu1 %vm431_vm0, %v1073_v6  ;;  %v1067_v13 = vld [vmem:[%s1350_s1 + $0x40] sm:$0xff]   ;;  %v1076_v17 = vld [vmem:[%s1168_s23 + $0x94] ss:$8 sps:$4 sm:$0xff]   ;;  %v1078_v18 = vld [vmem:[%s1168_s23 + $0x10] ss:$8 sps:$4 sm:$0xff]  }
  0x11   : > { %487 = vmatpush1.bf16.msra.mxu0 %v1059_v2  ;;  %1040 = vmatpush1.bf16.msra.mxu1 %v1059_v2  ;;  %v1071_v15 = vld [vmem:[%s1168_s23 + $0x80] ss:$8 sps:$4 sm:$0xff]   ;;  %v1079_v19 = vld [vmem:[%s1168_s23 + $0x90] ss:$8 sps:$4 sm:$0xff]   ;;  %v1080_v20 = vld [vmem:[%s1168_s23 + $0x24] ss:$8 sps:$4 sm:$0xff]  }
  0x12   : > { %488 = vmatprep.subr.bf16.mxu0 %v1124_v1  ;;  %1031 = vmatprep.subr.bf16.mxu1 %v1124_v1  ;;  %v1082_v21 = vld [vmem:[%s1168_s23 + $0xa4] ss:$8 sps:$4 sm:$0xff]   ;;  %v1084_v22 = vld [vmem:[%s1168_s23 + $0x20] ss:$8 sps:$4 sm:$0xff]   ;;  %v1086_v24 = vld [vmem:[%s1168_s23 + $0x34] ss:$8 sps:$4 sm:$0xff]  }
  0x13   : > { %v1085_v23 = vld [vmem:[%s1168_s23 + $0xa0] ss:$8 sps:$4 sm:$0xff]   ;;  %v1088_v25 = vld [vmem:[%s1168_s23 + $0xb4] ss:$8 sps:$4 sm:$0xff]   ;;  %v1090_v26 = vld [vmem:[%s1168_s23 + $0x30] ss:$8 sps:$4 sm:$0xff]  }
  0x14   : > { %v1091_v27 = vld [vmem:[%s1168_s23 + $0xb0] ss:$8 sps:$4 sm:$0xff]   ;;  %v1092_v28 = vld [vmem:[%s1168_s23 + $0x44] ss:$8 sps:$4 sm:$0xff]   ;;  %v1096_v30 = vld [vmem:[%s1168_s23 + $0x40] ss:$8 sps:$4 sm:$0xff]  }
  0x15   : > { %489 = vmatpush1.bf16.msra.mxu0 %v1060_v3  ;;  %1041 = vmatpush1.bf16.msra.mxu1 %v1060_v3  ;;  %v1094_v29 = vld [vmem:[%s1168_s23 + $0xc4] ss:$8 sps:$4 sm:$0xff]   ;;  %v1097_v31 = vld [vmem:[%s1168_s23 + $0xc0] ss:$8 sps:$4 sm:$0xff]   ;;  %v1098_v32 = vld [vmem:[%s1168_s23 + $0x54] ss:$8 sps:$4 sm:$0xff]  }
  0x16   : > { %490 = vmatprep.subr.bf16.mxu0 %v1124_v1  ;;  %1032 = vmatprep.subr.bf16.mxu1 %v1124_v1  ;;  %v1100_v33 = vld [vmem:[%s1168_s23 + $0xd4] ss:$8 sps:$4 sm:$0xff]   ;;  %v1102_v34 = vld [vmem:[%s1168_s23 + $0x50] ss:$8 sps:$4 sm:$0xff]   ;;  %v1104_v36 = vld [vmem:[%s1168_s23 + $0x64] ss:$8 sps:$4 sm:$0xff]  }
  0x17   : > { %v1103_v35 = vld [vmem:[%s1168_s23 + $0xd0] ss:$8 sps:$4 sm:$0xff]   ;;  %v1106_v37 = vld [vmem:[%s1168_s23 + $0xe4] ss:$8 sps:$4 sm:$0xff]   ;;  %v1108_v38 = vld [vmem:[%s1168_s23 + $0x60] ss:$8 sps:$4 sm:$0xff]  }
  0x18   : > { %v1109_v39 = vld [vmem:[%s1168_s23 + $0xe0] ss:$8 sps:$4 sm:$0xff]   ;;  %v1110_v40 = vld [vmem:[%s1168_s23 + $0x74] ss:$8 sps:$4 sm:$0xff]   ;;  %v1114_v42 = vld [vmem:[%s1168_s23 + $0x70] ss:$8 sps:$4 sm:$0xff]  }
  0x19   : > { %491 = vmatpush1.bf16.msra.mxu0 %v1061_v4  ;;  %1042 = vmatpush1.bf16.msra.mxu1 %v1061_v4  ;;  %v1112_v41 = vld [vmem:[%s1168_s23 + $0xf4] ss:$8 sps:$4 sm:$0xff]   ;;  %v1115_v43 = vld [vmem:[%s1168_s23 + $0xf0] ss:$8 sps:$4 sm:$0xff]   ;;  %v1242_v44 = vld [vmem:[%s1351_s2] ss:$0 sm:$0xff] }
  0x1a   : > { %492 = vmatprep.subr.bf16.mxu0 %v1124_v1  ;;  %1033 = vmatprep.subr.bf16.mxu1 %v1124_v1 }
  0x1d   : > { %493 = vmatpush1.bf16.msra.mxu0 %v1062_v7  ;;  %1043 = vmatpush1.bf16.msra.mxu1 %v1062_v7 }
  0x1e   : > { %494 = vmatprep.subr.bf16.mxu0 %v1124_v1  ;;  %1034 = vmatprep.subr.bf16.mxu1 %v1124_v1 }
  0x21   : > { %495 = vmatpush1.bf16.msra.mxu0 %v1063_v8  ;;  %1044 = vmatpush1.bf16.msra.mxu1 %v1063_v8 }
  0x22   : > { %496 = vmatprep.subr.bf16.mxu0 %v1124_v1  ;;  %1035 = vmatprep.subr.bf16.mxu1 %v1124_v1 }
  0x25   : > { %497 = vmatpush1.bf16.msra.mxu0 %v1064_v9  ;;  %1045 = vmatpush1.bf16.msra.mxu1 %v1064_v9 }
  0x26   : > { %498 = vmatprep.subr.bf16.mxu0 %v1124_v1  ;;  %1036 = vmatprep.subr.bf16.mxu1 %v1124_v1 }
  0x29   : > { %499 = vmatpush1.bf16.msra.mxu0 %v1065_v10  ;;  %1046 = vmatpush1.bf16.msra.mxu1 %v1065_v10 }
  0x2a   : > { %512 = vmatprep.subr.bf16.mxu0 %v1124_v1  ;;  %1037 = vmatprep.subr.bf16.mxu1 %v1124_v1 }
  0x2d   : > { %513 = vmatpush2.bf16.msra.mxu0 %v482_v12  ;;  %1047 = vmatpush2.bf16.msra.mxu1 %v482_v12 }
  0x2e   : > { %514 = vmatprep.subr.bf16.mxu0 %v1124_v1  ;;  %1038 = vmatprep.subr.bf16.mxu1 %v1124_v1 }
  0x31   : > { %515 = vmatpush2.bf16.msra.mxu0 %v1067_v13  ;;  %1048 = vmatpush2.bf16.msra.mxu1 %v1067_v13 }
  0x34   : > { %517 = vmatmul.mubr.bf16.vlgmr.msra.gmra.mxu0 %v1068_v14  ;;  %581 = vmatmul.mubr.bf16.vlgmr.msra.gmra.mxu1 %v1071_v15 }
  0x35   : > { %946 = vmatprep.mubr.msk.bf16.mxu0 %vm431_vm0, %v1074_v16  ;;  %954 = vmatprep.mubr.msk.bf16.mxu1 %vm431_vm0, %v1076_v17 }
  0x3c   : > { %525 = vmatmul.mubr.bf16.gmra.mxu0 %v1078_v18  ;;  %589 = vmatmul.mubr.bf16.gmra.mxu1 %v1079_v19 }
  0x3d   : > { %947 = vmatprep.mubr.msk.bf16.mxu0 %vm431_vm0, %v1080_v20  ;;  %955 = vmatprep.mubr.msk.bf16.mxu1 %vm431_vm0, %v1082_v21 }
  0x44   : > { %533 = vmatmul.mubr.bf16.gmra.mxu0 %v1084_v22  ;;  %597 = vmatmul.mubr.bf16.gmra.mxu1 %v1085_v23 }
  0x45   : > { %948 = vmatprep.mubr.msk.bf16.mxu0 %vm431_vm0, %v1086_v24  ;;  %956 = vmatprep.mubr.msk.bf16.mxu1 %vm431_vm0, %v1088_v25 }
  0x4c   : > { %541 = vmatmul.mubr.bf16.gmra.mxu0 %v1090_v26  ;;  %605 = vmatmul.mubr.bf16.gmra.mxu1 %v1091_v27 }
  0x4d   : > { %949 = vmatprep.mubr.msk.bf16.mxu0 %vm431_vm0, %v1092_v28  ;;  %957 = vmatprep.mubr.msk.bf16.mxu1 %vm431_vm0, %v1094_v29 }
  0x54   : > { %549 = vmatmul.mubr.bf16.gmra.mxu0 %v1096_v30  ;;  %613 = vmatmul.mubr.bf16.gmra.mxu1 %v1097_v31 }
  0x55   : > { %950 = vmatprep.mubr.msk.bf16.mxu0 %vm431_vm0, %v1098_v32  ;;  %958 = vmatprep.mubr.msk.bf16.mxu1 %vm431_vm0, %v1100_v33 }
  0x5c   : > { %557 = vmatmul.mubr.bf16.gmra.mxu0 %v1102_v34  ;;  %621 = vmatmul.mubr.bf16.gmra.mxu1 %v1103_v35 }
  0x5d   : > { %951 = vmatprep.mubr.msk.bf16.mxu0 %vm431_vm0, %v1104_v36  ;;  %959 = vmatprep.mubr.msk.bf16.mxu1 %vm431_vm0, %v1106_v37 }
  0x64   : > { %565 = vmatmul.mubr.bf16.gmra.mxu0 %v1108_v38  ;;  %629 = vmatmul.mubr.bf16.gmra.mxu1 %v1109_v39 }
  0x65   : > { %952 = vmatprep.mubr.msk.bf16.mxu0 %vm431_vm0, %v1110_v40  ;;  %960 = vmatprep.mubr.msk.bf16.mxu1 %vm431_vm0, %v1112_v41 }
  0x6c   : > { %573 = vmatmul.mubr.bf16.gmra.mxu0 %v1114_v42  ;;  %637 = vmatmul.mubr.bf16.gmra.mxu1 %v1115_v43 }
  0xf4   : > { %v518_v45 = vpop.f32.mrf.mxu0  ;;  %v582_v46 = vpop.f32.mrf.mxu1 }
  0xf5   : > { %v519_v47 = vadd.f32 %v1242_v44, %v518_v45  ;;  %v583_v48 = vadd.f32 %v1242_v44, %v582_v46 }
  0xf6   : > { %v520_v49 = vpop.f32.mrf.mxu0  ;;  %v584_v50 = vpop.f32.mrf.mxu1 }
  0xf7   : > { %v645_v51 = vmax.f32 %v519_v47, 0.0  ;;  %v661_v52 = vmax.f32 %v583_v48, 0.0 }
  0xf8   : > { %v521_v53 = vpop.f32.mrf.mxu0  ;;  %v585_v54 = vpop.f32.mrf.mxu1 }
  0xf9   : > { %v997_v55 = vpack.c.bf16 %v645_v51, %v645_v51  ;;  %v1013_v56 = vpack.c.bf16 %v661_v52, %v661_v52  ;;  %v522_v57 = vadd.f32 %v1242_v44, %v521_v53  ;;  %v586_v58 = vadd.f32 %v1242_v44, %v585_v54 }
  0xfa   : > { %v523_v59 = vpop.f32.mrf.mxu0  ;;  %v587_v60 = vpop.f32.mrf.mxu1 }
  0xfb   : > { %806 = vst.msk [vmem:[%s1250_s18] sm:$0xf] %vm805_vm2, %v997_v55  ;;  %822 = vst.msk [vmem:[%s1250_s18 + $0x40] sm:$0xf] %vm805_vm2, %v1013_v56  ;;  %v646_v61 = vmax.f32 %v522_v57, 0.0  ;;  %v662_v62 = vmax.f32 %v586_v58, 0.0 }
  0xfc   : > { %v526_v63 = vpop.f32.mrf.mxu0  ;;  %v590_v0 = vpop.f32.mrf.mxu1 }
  0xfd   : > { %v998_v1 = vpack.c.bf16 %v646_v61, %v646_v61  ;;  %v1014_v2 = vpack.c.bf16 %v662_v62, %v662_v62  ;;  %v527_v3 = vadd.f32 %v1242_v44, %v526_v63  ;;  %v591_v4 = vadd.f32 %v1242_v44, %v590_v0 }
  0xfe   : > { %v528_v5 = vpop.f32.mrf.mxu0  ;;  %v592_v6 = vpop.f32.mrf.mxu1 }
  0xff   : > { %807 = vst.msk [vmem:[%s1250_s18 + $0x4] sm:$0xf] %vm805_vm2, %v998_v1  ;;  %823 = vst.msk [vmem:[%s1250_s18 + $0x44] sm:$0xf] %vm805_vm2, %v1014_v2  ;;  %v647_v7 = vmax.f32 %v527_v3, 0.0  ;;  %v663_v8 = vmax.f32 %v591_v4, 0.0 }
 0x100   : > { %v529_v9 = vpop.f32.mrf.mxu0  ;;  %v593_v10 = vpop.f32.mrf.mxu1 }
 0x101   : > { %v999_v11 = vpack.c.bf16 %v647_v7, %v647_v7  ;;  %v1015_v12 = vpack.c.bf16 %v663_v8, %v663_v8  ;;  %v530_v13 = vadd.f32 %v1242_v44, %v529_v9  ;;  %v594_v14 = vadd.f32 %v1242_v44, %v593_v10 }
 0x102   : > { %v531_v15 = vpop.f32.mrf.mxu0  ;;  %v595_v16 = vpop.f32.mrf.mxu1 }
 0x103   : > { %808 = vst.msk [vmem:[%s1250_s18 + $0x8] sm:$0xf] %vm805_vm2, %v999_v11  ;;  %824 = vst.msk [vmem:[%s1250_s18 + $0x48] sm:$0xf] %vm805_vm2, %v1015_v12  ;;  %v648_v17 = vmax.f32 %v530_v13, 0.0  ;;  %v664_v18 = vmax.f32 %v594_v14, 0.0 }
 0x104   : > { %v534_v19 = vpop.f32.mrf.mxu0  ;;  %v598_v20 = vpop.f32.mrf.mxu1 }
 0x105   : > { %v1000_v21 = vpack.c.bf16 %v648_v17, %v648_v17  ;;  %v1016_v22 = vpack.c.bf16 %v664_v18, %v664_v18  ;;  %v535_v23 = vadd.f32 %v1242_v44, %v534_v19  ;;  %v599_v24 = vadd.f32 %v1242_v44, %v598_v20 }
 0x106   : > { %v536_v25 = vpop.f32.mrf.mxu0  ;;  %v600_v26 = vpop.f32.mrf.mxu1 }
 0x107   : > { %809 = vst.msk [vmem:[%s1250_s18 + $0xc] sm:$0xf] %vm805_vm2, %v1000_v21  ;;  %825 = vst.msk [vmem:[%s1250_s18 + $0x4c] sm:$0xf] %vm805_vm2, %v1016_v22  ;;  %v649_v27 = vmax.f32 %v535_v23, 0.0  ;;  %v665_v28 = vmax.f32 %v599_v24, 0.0 }
 0x108   : > { %v537_v29 = vpop.f32.mrf.mxu0  ;;  %v601_v30 = vpop.f32.mrf.mxu1 }
 0x109   : > { %v1001_v31 = vpack.c.bf16 %v649_v27, %v649_v27  ;;  %v1017_v32 = vpack.c.bf16 %v665_v28, %v665_v28  ;;  %v538_v33 = vadd.f32 %v1242_v44, %v537_v29  ;;  %v602_v34 = vadd.f32 %v1242_v44, %v601_v30 }
 0x10a   : > { %v539_v35 = vpop.f32.mrf.mxu0  ;;  %v603_v36 = vpop.f32.mrf.mxu1 }
 0x10b   : > { %810 = vst.msk [vmem:[%s1250_s18 + $0x10] sm:$0xf] %vm805_vm2, %v1001_v31  ;;  %826 = vst.msk [vmem:[%s1250_s18 + $0x50] sm:$0xf] %vm805_vm2, %v1017_v32  ;;  %v650_v37 = vmax.f32 %v538_v33, 0.0  ;;  %v666_v38 = vmax.f32 %v602_v34, 0.0 }
 0x10c   : > { %v542_v39 = vpop.f32.mrf.mxu0  ;;  %v606_v40 = vpop.f32.mrf.mxu1 }
 0x10d   : > { %v1002_v41 = vpack.c.bf16 %v650_v37, %v650_v37  ;;  %v1018_v42 = vpack.c.bf16 %v666_v38, %v666_v38  ;;  %v543_v43 = vadd.f32 %v1242_v44, %v542_v39  ;;  %v607_v45 = vadd.f32 %v1242_v44, %v606_v40 }
 0x10e   : > { %v544_v46 = vpop.f32.mrf.mxu0  ;;  %v608_v47 = vpop.f32.mrf.mxu1 }
 0x10f   : > { %811 = vst.msk [vmem:[%s1250_s18 + $0x14] sm:$0xf] %vm805_vm2, %v1002_v41  ;;  %827 = vst.msk [vmem:[%s1250_s18 + $0x54] sm:$0xf] %vm805_vm2, %v1018_v42  ;;  %v651_v48 = vmax.f32 %v543_v43, 0.0  ;;  %v667_v49 = vmax.f32 %v607_v45, 0.0 }
 0x110   : > { %v545_v50 = vpop.f32.mrf.mxu0  ;;  %v609_v51 = vpop.f32.mrf.mxu1 }
 0x111   : > { %v1003_v52 = vpack.c.bf16 %v651_v48, %v651_v48  ;;  %v1019_v53 = vpack.c.bf16 %v667_v49, %v667_v49  ;;  %v546_v54 = vadd.f32 %v1242_v44, %v545_v50  ;;  %v610_v55 = vadd.f32 %v1242_v44, %v609_v51 }
 0x112   : > { %v547_v56 = vpop.f32.mrf.mxu0  ;;  %v611_v57 = vpop.f32.mrf.mxu1 }
 0x113   : > { %812 = vst.msk [vmem:[%s1250_s18 + $0x18] sm:$0xf] %vm805_vm2, %v1003_v52  ;;  %828 = vst.msk [vmem:[%s1250_s18 + $0x58] sm:$0xf] %vm805_vm2, %v1019_v53  ;;  %v652_v58 = vmax.f32 %v546_v54, 0.0  ;;  %v668_v59 = vmax.f32 %v610_v55, 0.0 }
 0x114   : > { %v550_v60 = vpop.f32.mrf.mxu0  ;;  %v614_v61 = vpop.f32.mrf.mxu1 }
 0x115   : > { %v1004_v62 = vpack.c.bf16 %v652_v58, %v652_v58  ;;  %v1020_v63 = vpack.c.bf16 %v668_v59, %v668_v59  ;;  %v551_v0 = vadd.f32 %v1242_v44, %v550_v60  ;;  %v615_v1 = vadd.f32 %v1242_v44, %v614_v61 }
 0x116   : > { %v552_v2 = vpop.f32.mrf.mxu0  ;;  %v616_v3 = vpop.f32.mrf.mxu1 }
 0x117   : > { %813 = vst.msk [vmem:[%s1250_s18 + $0x1c] sm:$0xf] %vm805_vm2, %v1004_v62  ;;  %829 = vst.msk [vmem:[%s1250_s18 + $0x5c] sm:$0xf] %vm805_vm2, %v1020_v63  ;;  %v653_v4 = vmax.f32 %v551_v0, 0.0  ;;  %v669_v5 = vmax.f32 %v615_v1, 0.0 }
 0x118   : > { %v553_v6 = vpop.f32.mrf.mxu0  ;;  %v617_v7 = vpop.f32.mrf.mxu1 }
 0x119   : > { %v1005_v8 = vpack.c.bf16 %v653_v4, %v653_v4  ;;  %v1021_v9 = vpack.c.bf16 %v669_v5, %v669_v5  ;;  %v554_v10 = vadd.f32 %v1242_v44, %v553_v6  ;;  %v618_v11 = vadd.f32 %v1242_v44, %v617_v7 }
 0x11a   : > { %v555_v12 = vpop.f32.mrf.mxu0  ;;  %v619_v13 = vpop.f32.mrf.mxu1 }
 0x11b   : > { %814 = vst.msk [vmem:[%s1250_s18 + $0x20] sm:$0xf] %vm805_vm2, %v1005_v8  ;;  %830 = vst.msk [vmem:[%s1250_s18 + $0x60] sm:$0xf] %vm805_vm2, %v1021_v9  ;;  %v654_v14 = vmax.f32 %v554_v10, 0.0  ;;  %v670_v15 = vmax.f32 %v618_v11, 0.0 }
 0x11c   : > { %v558_v16 = vpop.f32.mrf.mxu0  ;;  %v622_v17 = vpop.f32.mrf.mxu1 }
 0x11d   : > { %v1006_v18 = vpack.c.bf16 %v654_v14, %v654_v14  ;;  %v1022_v19 = vpack.c.bf16 %v670_v15, %v670_v15  ;;  %v559_v20 = vadd.f32 %v1242_v44, %v558_v16  ;;  %v623_v21 = vadd.f32 %v1242_v44, %v622_v17 }
 0x11e   : > { %v560_v22 = vpop.f32.mrf.mxu0  ;;  %v624_v23 = vpop.f32.mrf.mxu1 }
 0x11f   : > { %815 = vst.msk [vmem:[%s1250_s18 + $0x24] sm:$0xf] %vm805_vm2, %v1006_v18  ;;  %831 = vst.msk [vmem:[%s1250_s18 + $0x64] sm:$0xf] %vm805_vm2, %v1022_v19  ;;  %v655_v24 = vmax.f32 %v559_v20, 0.0  ;;  %v671_v25 = vmax.f32 %v623_v21, 0.0 }
 0x120   : > { %v561_v26 = vpop.f32.mrf.mxu0  ;;  %v625_v27 = vpop.f32.mrf.mxu1 }
 0x121   : > { %v1007_v28 = vpack.c.bf16 %v655_v24, %v655_v24  ;;  %v1023_v29 = vpack.c.bf16 %v671_v25, %v671_v25  ;;  %v562_v30 = vadd.f32 %v1242_v44, %v561_v26  ;;  %v626_v31 = vadd.f32 %v1242_v44, %v625_v27 }
 0x122   : > { %v563_v32 = vpop.f32.mrf.mxu0  ;;  %v627_v33 = vpop.f32.mrf.mxu1 }
 0x123   : > { %816 = vst.msk [vmem:[%s1250_s18 + $0x28] sm:$0xf] %vm805_vm2, %v1007_v28  ;;  %832 = vst.msk [vmem:[%s1250_s18 + $0x68] sm:$0xf] %vm805_vm2, %v1023_v29  ;;  %v656_v34 = vmax.f32 %v562_v30, 0.0  ;;  %v672_v35 = vmax.f32 %v626_v31, 0.0 }
 0x124   : > { %v566_v36 = vpop.f32.mrf.mxu0  ;;  %v630_v37 = vpop.f32.mrf.mxu1 }
 0x125   : > { %v1008_v38 = vpack.c.bf16 %v656_v34, %v656_v34  ;;  %v1024_v39 = vpack.c.bf16 %v672_v35, %v672_v35  ;;  %v567_v40 = vadd.f32 %v1242_v44, %v566_v36  ;;  %v631_v41 = vadd.f32 %v1242_v44, %v630_v37 }
 0x126   : > { %v568_v42 = vpop.f32.mrf.mxu0  ;;  %v632_v43 = vpop.f32.mrf.mxu1 }
 0x127   : > { %817 = vst.msk [vmem:[%s1250_s18 + $0x2c] sm:$0xf] %vm805_vm2, %v1008_v38  ;;  %833 = vst.msk [vmem:[%s1250_s18 + $0x6c] sm:$0xf] %vm805_vm2, %v1024_v39  ;;  %v657_v45 = vmax.f32 %v567_v40, 0.0  ;;  %v673_v46 = vmax.f32 %v631_v41, 0.0 }
 0x128   : > { %v569_v47 = vpop.f32.mrf.mxu0  ;;  %v633_v48 = vpop.f32.mrf.mxu1 }
 0x129   : > { %v1009_v49 = vpack.c.bf16 %v657_v45, %v657_v45  ;;  %v1025_v50 = vpack.c.bf16 %v673_v46, %v673_v46  ;;  %v570_v51 = vadd.f32 %v1242_v44, %v569_v47  ;;  %v634_v52 = vadd.f32 %v1242_v44, %v633_v48 }
 0x12a   : > { %v571_v53 = vpop.f32.mrf.mxu0  ;;  %v635_v54 = vpop.f32.mrf.mxu1 }
 0x12b   : > { %818 = vst.msk [vmem:[%s1250_s18 + $0x30] sm:$0xf] %vm805_vm2, %v1009_v49  ;;  %834 = vst.msk [vmem:[%s1250_s18 + $0x70] sm:$0xf] %vm805_vm2, %v1025_v50  ;;  %v658_v55 = vmax.f32 %v570_v51, 0.0  ;;  %v674_v56 = vmax.f32 %v634_v52, 0.0 }
 0x12c   : > { %v574_v57 = vpop.f32.mrf.mxu0  ;;  %v638_v58 = vpop.f32.mrf.mxu1 }
 0x12d   : > { %v1010_v59 = vpack.c.bf16 %v658_v55, %v658_v55  ;;  %v1026_v60 = vpack.c.bf16 %v674_v56, %v674_v56  ;;  %v575_v61 = vadd.f32 %v1242_v44, %v574_v57  ;;  %v639_v62 = vadd.f32 %v1242_v44, %v638_v58 }
 0x12e   : > { %v576_v63 = vpop.f32.mrf.mxu0  ;;  %v640_v0 = vpop.f32.mrf.mxu1 }
 0x12f   : > { %819 = vst.msk [vmem:[%s1250_s18 + $0x34] sm:$0xf] %vm805_vm2, %v1010_v59  ;;  %835 = vst.msk [vmem:[%s1250_s18 + $0x74] sm:$0xf] %vm805_vm2, %v1026_v60  ;;  %v659_v1 = vmax.f32 %v575_v61, 0.0  ;;  %v675_v2 = vmax.f32 %v639_v62, 0.0 }
 0x130   : > { %v577_v3 = vpop.f32.mrf.mxu0  ;;  %v641_v4 = vpop.f32.mrf.mxu1 }
 0x131   : > { %v1011_v5 = vpack.c.bf16 %v659_v1, %v659_v1  ;;  %v1027_v6 = vpack.c.bf16 %v675_v2, %v675_v2  ;;  %v578_v7 = vadd.f32 %v1242_v44, %v577_v3  ;;  %v642_v8 = vadd.f32 %v1242_v44, %v641_v4 }
 0x132   : > { %v579_v9 = vpop.f32.mrf.mxu0  ;;  %v643_v10 = vpop.f32.mrf.mxu1 }
 0x133   : > { %820 = vst.msk [vmem:[%s1250_s18 + $0x38] sm:$0xf] %vm805_vm2, %v1011_v5  ;;  %836 = vst.msk [vmem:[%s1250_s18 + $0x78] sm:$0xf] %vm805_vm2, %v1027_v6  ;;  %v660_v11 = vmax.f32 %v578_v7, 0.0  ;;  %v676_v12 = vmax.f32 %v642_v8, 0.0 }
 0x135   : > { %v1012_v13 = vpack.c.bf16 %v660_v11, %v660_v11  ;;  %v1028_v14 = vpack.c.bf16 %v676_v12, %v676_v12 }
 0x137   : > { %821 = vst.msk [vmem:[%s1250_s18 + $0x3c] sm:$0xf] %vm805_vm2, %v1012_v13  ;;  %837 = vst.msk [vmem:[%s1250_s18 + $0x7c] sm:$0xf] %vm805_vm2, %v1028_v14 }
 0x138 PF: > { %s13_s12 = sadd.s32 1, %s1122_s12  }
 0x139   : > { %p10_p4 = scmp.ge.s32.totalorder %s13_s12, 4  }
 0x13b   :  { %12 = sbr.rel (!%p10_p4) target bundleno = 1 (0x1), region = 62 }

// kernel: _lambda_.9
= control target key start
LH: loop header
LB: loop body
LE: loop exit
PB: predicated region body
PF: predicated region fallthrough
CT: control target
= control target key end

     0   :  { %s6812_s24 = smov 0   ;;  %s9016_s0 = inlined_call_operand.vmem [shape: bf16[2,324,144], index: 0, kind: input, shape index: {}]   ;;  %s9017_s1 = inlined_call_operand.vmem [shape: f32[324,1], index: 1, kind: input, shape index: {}]   ;;  %s9018_s2 = inlined_call_operand.vmem [shape: bf16[144,16], index: 2, kind: input, shape index: {}]   ;;  %s9019_s3 = inlined_call_operand.vmem [shape: f32[1,16], index: 3, kind: input, shape index: {}, may-alias: {3,5}]   ;;  %s9020_s4 = inlined_call_operand.vmem [shape: bf16[9,16,16], index: 4, kind: input, shape index: {}]   ;;  %s9021_s5 = inlined_call_operand.vmem [shape: f32[1,16], index: 5, kind: input, shape index: {}, may-alias: {3,5}]   ;;  %s9022_s6 = inlined_call_operand.vmem [shape: bf16[2,286,16], index: 6, kind: input, shape index: {}]   ;;  %s9023_s7 = inlined_call_operand.vmem [shape: bf16[2,286,16], index: 7, kind: output, shape index: {}]  }
   0x1 LB: > { %s5469_s25 = sadd.s32 4294967295, %s6769_s24   ;;  %p5473_p0 = scmp.ge.s32.totalorder %s6769_s24, 1  ;;  %s6769_s24 = sphi %s6812_s24, %s17_s24  }
   0x2   : > { %p247_p1 = scmp.lt.s32.totalorder %s6769_s24, 3 }
   0x4   : > { %p248_p2 = pnand %p5473_p0, %p247_p1 }
   0x6   : > { %251 = sbr.rel (%p248_p2) target bundleno = 979 (0x3d3), region = 48 }
   0xb   : > { %v6585_v0 = vld [vmem:[%s9018_s2 + $0x38] sm:$0xff]   ;;  %v6771_v1 = vmov 0   ;;  %p284_p3 = scmp.lt.s32.totalorder %s5469_s25, 1  ;;  %v6586_v2 = vld [vmem:[%s9018_s2 + $0x30] sm:$0xff]   ;;  %v6587_v3 = vld [vmem:[%s9018_s2 + $0x28] sm:$0xff]   ;;  %vm606_vm0 = vcmask 130048  }
   0xc   : > { %670 = vmatprep.subr.bf16.mxu0 %v6771_v1  ;;  %6583 = vset.pattern.permute.xlu0 %v6771_v1  ;;  %v6588_v4 = vld [vmem:[%s9018_s2 + $0x20] sm:$0xff]   ;;  %v917_v7 = vld [vmem:[%s9017_s1 + $0x30] sm:$0xff]  ;;  %v916_v8 = vld [vmem:[%s9017_s1 + $0x28] sm:$0xff]  ;;  %vm1363_vm1 = vcmask 125952   ;;  %vm1538_vm2 = vsmask.f32 7424 }
   0xd   : > { %671 = vmatpush1.bf16.msra.mxu0 %v6585_v0  ;;  %6584 = vset.pattern.permute.xlu1 %v6771_v1  ;;  %s9260_s25 = smov (!%p284_p3, %s5469_s25), 1  ;;  %v915_v6 = vld [vmem:[%s9017_s1 + $0x20] sm:$0xff]  ;;  %v6589_v9 = vld [vmem:[%s9018_s2 + $0x18] sm:$0xff]   ;;  %v6590_v11 = vld [vmem:[%s9018_s2 + $0x10] sm:$0xff]   ;;  %vm2149_vm3 = vcmask 1046528   ;;  %vm1404_vm5 = vcmask 123904  }
   0xe   : > { %672 = vmatprep.subr.bf16.mxu0 %v6771_v1  ;;  %s6572_s30 = smul.u32 328, %s9260_s25  ;;  %974 = vperm.xlu0 %6583, %v915_v6   ;;  %v918_v10 = vld [vmem:[%s9017_s1 + $0x38] sm:$0xff]  ;;  %v919_v12 = vld [vmem:[%s9017_s1 + $0x40] sm:$0xff]  ;;  %v920_v13 = vld [vmem:[%s9017_s1 + $0x48] sm:$0xff]  ;;  %vm3028_vm4 = vsmask.f32 6400 }
   0xf   : > { %984 = vperm.xlu1 %6584, %v917_v7   ;;  %v921_v14 = vld [vmem:[%s9017_s1 + $0x50] sm:$0xff]  ;;  %v6591_v15 = vld [vmem:[%s9018_s2 + $0x8] sm:$0xff]   ;;  %v922_v16 = vld [vmem:[%s9017_s1 + $0x58] sm:$0xff]  ;;  %vm3475_vm6 = vcmask 1045504   ;;  %vm4687_vm7 = vcmask 1044480   ;;  %s6573_s9 = smul.u32 144, %s9260_s25 }
  0x10   : > { %s6835_s12 = scalar_lea.vmem %s9016_s0, %s6572_s30  ;;  %v6592_v17 = vld [vmem:[%s9018_s2] sm:$0xff]   ;;  %v924_v19 = vld [vmem:[%s9017_s1 + $0x68] sm:$0xff]  ;;  %v925_v20 = vld [vmem:[%s9017_s1 + $0x70] sm:$0xff]  ;;  %vm4236_vm8 = vsmask.f32 5376  ;;  %vm5400_vm9 = vcmask 124928  }
  0x11   : > { %673 = vmatpush1.bf16.msra.mxu0 %v6586_v2  ;;  %v6596_v5 = vld [vmem:[%s6835_s12 + $0x4] ss:$8 sps:$4 sm:$0xff]   ;;  %v926_v22 = vld [vmem:[%s9017_s1 + $0x78] sm:$0xff]  ;;  %v6594_v23 = vld [vmem:[%s6835_s12] ss:$8 sps:$4 sm:$0xff]   ;;  %s8729_s11 = scalar_lea.vmem %s9022_s6, %s6573_s9  ;;  %s8769_s17 = scalar_lea.vmem %s9023_s7, %s6573_s9 }
  0x12   : > { %674 = vmatprep.subr.bf16.mxu0 %v6771_v1  ;;  %5529 = vmatprep.mubr.msk.bf16.mxu0 %vm606_vm0, %v6596_v5  ;;  %v923_v18 = vld [vmem:[%s9017_s1 + $0x60] sm:$0xff]  ;;  %v6597_v25 = vld [vmem:[%s6835_s12 + $0x14] ss:$8 sps:$4 sm:$0xff]   ;;  %v928_v26 = vld [vmem:[%s9017_s1 + $0x88] sm:$0xff] }
  0x13   : > { %979 = vperm.xlu0 %6583, %v916_v8   ;;  %989 = vperm.xlu1 %6584, %v918_v10   ;;  %v6593_v21 = vld [vmem:[%s9018_s2 + $0x40] sm:$0xff]   ;;  %v929_v27 = vld [vmem:[%s9017_s1 + $0x90] sm:$0xff]  ;;  %v930_v28 = vld [vmem:[%s9017_s1 + $0x98] sm:$0xff] }
  0x14   : > { %v927_v24 = vld [vmem:[%s9017_s1 + $0x80] sm:$0xff]  ;;  %v6599_v29 = vld [vmem:[%s6835_s12 + $0x10] ss:$8 sps:$4 sm:$0xff]   ;;  %v932_v32 = vld [vmem:[%s9017_s1 + $0xa8] sm:$0xff] }
  0x15   : > { %675 = vmatpush1.bf16.msra.mxu0 %v6587_v3  ;;  %v6600_v30 = vld [vmem:[%s6835_s12 + $0x24] ss:$8 sps:$4 sm:$0xff]   ;;  %v933_v33 = vld [vmem:[%s9017_s1 + $0xb0] sm:$0xff]  ;;  %v934_v34 = vld [vmem:[%s9017_s1 + $0xb8] sm:$0xff] }
  0x16   : > { %676 = vmatprep.subr.bf16.mxu0 %v6771_v1  ;;  %v931_v31 = vld [vmem:[%s9017_s1 + $0xa0] sm:$0xff]  ;;  %v6603_v37 = vld [vmem:[%s6835_s12 + $0x34] ss:$8 sps:$4 sm:$0xff]   ;;  %v936_v38 = vld [vmem:[%s9017_s1 + $0xc8] sm:$0xff] }
  0x17   : > { %994 = vperm.xlu0 %6583, %v919_v12   ;;  %999 = vperm.xlu1 %6584, %v920_v13   ;;  %v6602_v35 = vld [vmem:[%s6835_s12 + $0x20] ss:$8 sps:$4 sm:$0xff]   ;;  %v937_v39 = vld [vmem:[%s9017_s1 + $0xd0] sm:$0xff]  ;;  %v938_v40 = vld [vmem:[%s9017_s1 + $0xd8] sm:$0xff] }
  0x18   : > { %v935_v36 = vld [vmem:[%s9017_s1 + $0xc0] sm:$0xff]  ;;  %v6605_v41 = vld [vmem:[%s6835_s12 + $0x30] ss:$8 sps:$4 sm:$0xff]   ;;  %v940_v44 = vld [vmem:[%s9017_s1 + $0xe8] sm:$0xff] }
  0x19   : > { %677 = vmatpush1.bf16.msra.mxu0 %v6588_v4  ;;  %v939_v42 = vld [vmem:[%s9017_s1 + $0xe0] sm:$0xff]  ;;  %v941_v45 = vld [vmem:[%s9017_s1 + $0xf0] sm:$0xff]  ;;  %v942_v46 = vld [vmem:[%s9017_s1 + $0xf8] sm:$0xff] }
  0x1a   : > { %678 = vmatprep.subr.bf16.mxu0 %v6771_v1  ;;  %v6606_v43 = vld [vmem:[%s6835_s12 + $0x44] ss:$8 sps:$4 sm:$0xff]   ;;  %v6608_v47 = vld [vmem:[%s6835_s12 + $0x40] ss:$8 sps:$4 sm:$0xff]   ;;  %v6609_v49 = vld [vmem:[%s6835_s12 + $0x54] ss:$8 sps:$4 sm:$0xff]  }
  0x1b   : > { %1004 = vperm.xlu0 %6583, %v921_v14   ;;  %1009 = vperm.xlu1 %6584, %v922_v16   ;;  %v943_v48 = vld [vmem:[%s9017_s1 + $0x100] sm:$0xff]  ;;  %v944_v50 = vld [vmem:[%s9017_s1 + $0x108] sm:$0xff]  ;;  %v945_v51 = vld [vmem:[%s9017_s1 + $0x110] sm:$0xff] }
  0x1c   : > { %v946_v52 = vld [vmem:[%s9017_s1 + $0x118] sm:$0xff]  ;;  %v911_v54 = vld [vmem:[%s9017_s1] sm:$0xff]  ;;  %v912_v56 = vld [vmem:[%s9017_s1 + $0x8] sm:$0xff] }
  0x1d   : > { %679 = vmatpush1.bf16.msra.mxu0 %v6589_v9  ;;  %v6611_v53 = vld [vmem:[%s6835_s12 + $0x50] ss:$8 sps:$4 sm:$0xff]   ;;  %v6612_v55 = vld [vmem:[%s6835_s12 + $0x64] ss:$8 sps:$4 sm:$0xff]   ;;  %v6614_v59 = vld [vmem:[%s6835_s12 + $0x60] ss:$8 sps:$4 sm:$0xff]  }
  0x1e   : > { %680 = vmatprep.subr.bf16.mxu0 %v6771_v1  ;;  %v913_v57 = vld [vmem:[%s9017_s1 + $0x10] sm:$0xff]  ;;  %v914_v58 = vld [vmem:[%s9017_s1 + $0x18] sm:$0xff]  ;;  %v947_v60 = vld [vmem:[%s9017_s1 + $0x120] sm:$0xff] }
  0x1f   : > { %1014 = vperm.xlu0 %6583, %v923_v18   ;;  %1019 = vperm.xlu1 %6584, %v924_v19   ;;  %v6615_v61 = vld [vmem:[%s6835_s12 + $0x74] ss:$8 sps:$4 sm:$0xff]   ;;  %v948_v62 = vld [vmem:[%s9017_s1 + $0x128] sm:$0xff]  ;;  %v951_v2 = vld [vmem:[%s9017_s1 + $0x140] sm:$0xf] }
  0x20   : > { %v949_v63 = vld [vmem:[%s9017_s1 + $0x130] sm:$0xff]  ;;  %v950_v0 = vld [vmem:[%s9017_s1 + $0x138] sm:$0xff]  ;;  %v6618_v3 = vld [vmem:[%s6835_s12 + $0x84] ss:$8 sps:$4 sm:$0xff]  }
  0x21   : > { %681 = vmatpush1.bf16.msra.mxu0 %v6590_v11  ;;  %v6620_v4 = vld [vmem:[%s6835_s12 + $0x80] ss:$8 sps:$4 sm:$0xff]   ;;  %v6621_v5 = vld [vmem:[%s6835_s12 + $0x94] ss:$8 sps:$4 sm:$0xff]   ;;  %v6623_v6 = vld [vmem:[%s6835_s12 + $0x90] ss:$8 sps:$4 sm:$0xff]  }
  0x22   : > { %682 = vmatprep.subr.bf16.mxu0 %v6771_v1  ;;  %v6624_v7 = vld [vmem:[%s6835_s12 + $0xa4] ss:$8 sps:$4 sm:$0xff]   ;;  %v6626_v8 = vld [vmem:[%s6835_s12 + $0xa0] ss:$8 sps:$4 sm:$0xff]   ;;  %v6627_v9 = vld [vmem:[%s6835_s12 + $0xb4] ss:$8 sps:$4 sm:$0xff]  }
  0x23   : > { %1024 = vperm.xlu0 %6583, %v925_v20   ;;  %1029 = vperm.xlu1 %6584, %v926_v22   ;;  %v6629_v10 = vld [vmem:[%s6835_s12 + $0xb0] ss:$8 sps:$4 sm:$0xff]   ;;  %v6630_v11 = vld [vmem:[%s6835_s12 + $0xc4] ss:$8 sps:$4 sm:$0xff]   ;;  %v6632_v12 = vld [vmem:[%s6835_s12 + $0xc0] ss:$8 sps:$4 sm:$0xff]  }
  0x24   : > { %v6633_v13 = vld [vmem:[%s6835_s12 + $0xd4] ss:$8 sps:$4 sm:$0xff]   ;;  %v6636_v16 = vld [vmem:[%s6835_s12 + $0xe4] ss:$8 sps:$4 sm:$0xff]   ;;  %v6638_v20 = vld [vmem:[%s6835_s12 + $0xe0] ss:$8 sps:$4 sm:$0xff]  }
  0x25   : > { %683 = vmatpush1.bf16.msra.mxu0 %v6591_v15  ;;  %v6635_v15 = vld [vmem:[%s6835_s12 + $0xd0] ss:$8 sps:$4 sm:$0xff]   ;;  %v6639_v22 = vld [vmem:[%s6835_s12 + $0xf4] ss:$8 sps:$4 sm:$0xff]  }
  0x26   : > { %684 = vmatprep.subr.bf16.mxu0 %v6771_v1 }
  0x27   : > { %1034 = vperm.xlu0 %6583, %v927_v24   ;;  %1039 = vperm.xlu1 %6584, %v928_v26   ;;  %v7040_v24 = vld [vmem:[%s9020_s4 + $0x18] sm:$0xff]  }
  0x28   : > { %v6641_v26 = vld [vmem:[%s6835_s12 + $0xf0] ss:$8 sps:$4 sm:$0xff]  }
  0x29   : > { %685 = vmatpush1.bf16.msra.mxu0 %v6592_v17  ;;  %v6658_v17 = vld [vmem:[%s9020_s4 + $0x8] sm:$0xff]  }
  0x2a   : > { %700 = vmatprep.subr.bf16.mxu0 %v6771_v1  ;;  %v6617_v1 = vld [vmem:[%s6835_s12 + $0x70] ss:$8 sps:$4 sm:$0xff]   ;;  %6570 = vmatprep.subr.bf16.mxu1 %v6658_v17 }
  0x2b   : > { %1044 = vperm.xlu0 %6583, %v929_v27   ;;  %1049 = vperm.xlu1 %6584, %v930_v28   ;;  %v6642_v28 = vld [vmem:[%s6835_s12 + $0x104] ss:$8 sps:$4 sm:$0xff]  }
  0x2c   : > { %6571 = vmatpush3.bf16.msra.mxu1 %v6658_v17 }
  0x2d   : > { %701 = vmatpush2.bf16.msra.mxu0 %v6593_v21 }
  0x2e   : > { %6228 = vmatprep.subr.bf16.mxu0 %v6658_v17 }
  0x2f   : > { %1054 = vperm.xlu0 %6583, %v931_v31   ;;  %1059 = vperm.xlu1 %6584, %v932_v32   ;;  %v6644_v31 = vld [vmem:[%s6835_s12 + $0x100] ss:$8 sps:$4 sm:$0xff]   ;;  %v6645_v32 = vld [vmem:[%s6835_s12 + $0x114] ss:$8 sps:$4 sm:$0xff]  }
  0x30   : > { %703 = vmatmul.mubr.bf16.vlgmr.msra.gmra.mxu0 %v6594_v23 }
  0x31   : > { %5530 = vmatprep.mubr.msk.bf16.mxu0 %vm606_vm0, %v6597_v25  ;;  %6229 = vmatpush3.bf16.msra.mxu0 %v6658_v17 }
  0x32   : > { %6342 = vmatprep.subr.bf16.mxu0 %v7040_v24 }
  0x33   : > { %1064 = vperm.xlu0 %6583, %v933_v33   ;;  %1069 = vperm.xlu1 %6584, %v934_v34  }
  0x37   : > { %1074 = vperm.xlu0 %6583, %v935_v36   ;;  %1079 = vperm.xlu1 %6584, %v936_v38  }
  0x38   : > { %711 = vmatmul.mubr.bf16.gmra.mxu0 %v6599_v29 }
  0x39   : > { %5531 = vmatprep.mubr.msk.bf16.mxu0 %vm606_vm0, %v6600_v30 }
  0x3b   : > { %1084 = vperm.xlu0 %6583, %v937_v39   ;;  %1089 = vperm.xlu1 %6584, %v938_v40   ;;  %v6650_v40 = vld [vmem:[%s6835_s12 + $0x120] ss:$8 sps:$4 sm:$0xff]  }
  0x3f   : > { %1094 = vperm.xlu0 %6583, %v939_v42   ;;  %1099 = vperm.xlu1 %6584, %v940_v44   ;;  %v6651_v42 = vld [vmem:[%s6835_s12 + $0x134] ss:$8 sps:$4 sm:$0xff]   ;;  %v340_v44 = vld [vmem:[%s6835_s12 + $0x140] sm:$0x33] }
  0x40   : > { %719 = vmatmul.mubr.bf16.gmra.mxu0 %v6602_v35  ;;  %v6647_v35 = vld [vmem:[%s6835_s12 + $0x110] ss:$8 sps:$4 sm:$0xff]  }
  0x41   : > { %5532 = vmatprep.mubr.msk.bf16.mxu0 %vm606_vm0, %v6603_v37  ;;  %v6648_v37 = vld [vmem:[%s6835_s12 + $0x124] ss:$8 sps:$4 sm:$0xff]  }
  0x43   : > { %1104 = vperm.xlu0 %6583, %v941_v45   ;;  %1109 = vperm.xlu1 %6584, %v942_v46   ;;  %v6653_v46 = vld [vmem:[%s6835_s12 + $0x130] ss:$8 sps:$4 sm:$0xff]  }
  0x47   : > { %1114 = vperm.xlu0 %6583, %v943_v48   ;;  %1119 = vperm.xlu1 %6584, %v944_v50   ;;  %v5518_v50 = vcombine.low %v340_v44, %v340_v44 }
  0x48   : > { %727 = vmatmul.mubr.bf16.gmra.mxu0 %v6605_v41 }
  0x49   : > { %5533 = vmatprep.mubr.msk.bf16.mxu0 %vm606_vm0, %v6606_v43 }
  0x4b   : > { %1124 = vperm.xlu0 %6583, %v945_v51   ;;  %1129 = vperm.xlu1 %6584, %v946_v52  }
  0x4f   : > { %954 = vperm.xlu0 %6583, %v911_v54   ;;  %959 = vperm.xlu1 %6584, %v912_v56  }
  0x50   : > { %735 = vmatmul.mubr.bf16.gmra.mxu0 %v6608_v47  ;;  %v5519_v47 = vcombine.high %v340_v44, %v340_v44 }
  0x51   : > { %5534 = vmatprep.mubr.msk.bf16.mxu0 %vm606_vm0, %v6609_v49 }
  0x53   : > { %964 = vperm.xlu0 %6583, %v913_v57   ;;  %969 = vperm.xlu1 %6584, %v914_v58  }
  0x57   : > { %1134 = vperm.xlu0 %6583, %v947_v60   ;;  %1139 = vperm.xlu1 %6584, %v948_v62   ;;  %v7108_v60 = vld [vmem:[%s9020_s4] sm:$0xff]  }
  0x58   : > { %743 = vmatmul.mubr.bf16.gmra.mxu0 %v6611_v53  ;;  %6266 = vmatprep.subr.bf16.mxu1 %v7108_v60 }
  0x59   : > { %5535 = vmatprep.mubr.msk.bf16.mxu0 %vm606_vm0, %v6612_v55 }
  0x5b   : > { %1144 = vperm.xlu0 %6583, %v949_v63   ;;  %1149 = vperm.xlu1 %6584, %v950_v0   ;;  %v7120_v0 = vld [vmem:[%s9019_s3] ss:$0 sm:$0xff] }
  0x5f   : > { %1154 = vperm.xlu0 %6583, %v951_v2  }
  0x60   : > { %751 = vmatmul.mubr.bf16.gmra.mxu0 %v6614_v59 }
  0x61   : > { %5536 = vmatprep.mubr.msk.bf16.mxu0 %vm606_vm0, %v6615_v61 }
  0x68   : > { %759 = vmatmul.mubr.bf16.gmra.mxu0 %v6617_v1 }
  0x69   : > { %5537 = vmatprep.mubr.msk.bf16.mxu0 %vm606_vm0, %v6618_v3 }
  0x70   : > { %767 = vmatmul.mubr.bf16.gmra.mxu0 %v6620_v4 }
  0x71   : > { %5538 = vmatprep.mubr.msk.bf16.mxu0 %vm606_vm0, %v6621_v5 }
  0x78   : > { %775 = vmatmul.mubr.bf16.gmra.mxu0 %v6623_v6 }
  0x79   : > { %5539 = vmatprep.mubr.msk.bf16.mxu0 %vm606_vm0, %v6624_v7 }
  0x80   : > { %783 = vmatmul.mubr.bf16.gmra.mxu0 %v6626_v8 }
  0x81   : > { %5540 = vmatprep.mubr.msk.bf16.mxu0 %vm606_vm0, %v6627_v9 }
  0x88   : > { %791 = vmatmul.mubr.bf16.gmra.mxu0 %v6629_v10 }
  0x89   : > { %5541 = vmatprep.mubr.msk.bf16.mxu0 %vm606_vm0, %v6630_v11  ;;  %v7019_v14 = vpop.permute.xlu0 %974 }
  0x8a   : > { %v7026_v18 = vpop.permute.xlu1 %984 }
  0x8e   : > { %v7028_v19 = vpop.permute.xlu0 %979  ;;  %v7032_v21 = vpop.permute.xlu1 %989 }
  0x90   : > { %799 = vmatmul.mubr.bf16.gmra.mxu0 %v6632_v12 }
  0x91   : > { %5542 = vmatprep.mubr.msk.bf16.mxu0 %vm606_vm0, %v6633_v13 }
  0x92   : > { %v7035_v23 = vpop.permute.xlu0 %994  ;;  %v7044_v25 = vpop.permute.xlu1 %999 }
  0x96   : > { %v7047_v27 = vpop.permute.xlu0 %1004  ;;  %v7050_v29 = vpop.permute.xlu1 %1009 }
  0x98   : > { %807 = vmatmul.mubr.bf16.gmra.mxu0 %v6635_v15 }
  0x99   : > { %5543 = vmatprep.mubr.msk.bf16.mxu0 %vm606_vm0, %v6636_v16 }
  0x9a   : > { %v7053_v30 = vpop.permute.xlu0 %1014  ;;  %v7057_v33 = vpop.permute.xlu1 %1019 }
  0x9e   : > { %v7059_v34 = vpop.permute.xlu0 %1024  ;;  %v7063_v36 = vpop.permute.xlu1 %1029 }
  0xa0   : > { %815 = vmatmul.mubr.bf16.gmra.mxu0 %v6638_v20 }
  0xa1   : > { %5544 = vmatprep.mubr.msk.bf16.mxu0 %vm606_vm0, %v6639_v22 }
  0xa2   : > { %v7066_v38 = vpop.permute.xlu0 %1034  ;;  %v7069_v39 = vpop.permute.xlu1 %1039 }
  0xa6   : > { %v7072_v41 = vpop.permute.xlu0 %1044  ;;  %v7075_v43 = vpop.permute.xlu1 %1049 }
  0xa8   : > { %823 = vmatmul.mubr.bf16.gmra.mxu0 %v6641_v26 }
  0xa9   : > { %5545 = vmatprep.mubr.msk.bf16.mxu0 %vm606_vm0, %v6642_v28 }
  0xaa   : > { %v7079_v45 = vpop.permute.xlu0 %1054  ;;  %v7082_v48 = vpop.permute.xlu1 %1059 }
  0xae   : > { %v7084_v49 = vpop.permute.xlu0 %1064  ;;  %v7087_v51 = vpop.permute.xlu1 %1069 }
  0xb0   : > { %831 = vmatmul.mubr.bf16.gmra.mxu0 %v6644_v31 }
  0xb1   : > { %5546 = vmatprep.mubr.msk.bf16.mxu0 %vm606_vm0, %v6645_v32 }
  0xb2   : > { %v7089_v52 = vpop.permute.xlu0 %1074  ;;  %v7091_v53 = vpop.permute.xlu1 %1079 }
  0xb6   : > { %v7093_v54 = vpop.permute.xlu0 %1084  ;;  %v7095_v55 = vpop.permute.xlu1 %1089 }
  0xb8   : > { %839 = vmatmul.mubr.bf16.gmra.mxu0 %v6647_v35 }
  0xb9   : > { %5547 = vmatprep.mubr.msk.bf16.mxu0 %vm606_vm0, %v6648_v37 }
  0xba   : > { %v7097_v56 = vpop.permute.xlu0 %1094  ;;  %v7099_v57 = vpop.permute.xlu1 %1099 }
  0xbe   : > { %v7101_v58 = vpop.permute.xlu0 %1104  ;;  %v7103_v59 = vpop.permute.xlu1 %1109 }
  0xc0   : > { %847 = vmatmul.mubr.bf16.gmra.mxu0 %v6650_v40 }
  0xc1   : > { %5548 = vmatprep.mubr.msk.bf16.mxu0 %vm606_vm0, %v6651_v42 }
  0xc2   : > { %v7110_v61 = vpop.permute.xlu0 %1114  ;;  %v7113_v62 = vpop.permute.xlu1 %1119 }
  0xc6   : > { %v7115_v63 = vpop.permute.xlu0 %1124  ;;  %v7122_v2 = vpop.permute.xlu1 %1129 }
  0xc8   : > { %855 = vmatmul.mubr.bf16.gmra.mxu0 %v6653_v46 }
  0xc9   : > { %5549 = vmatprep.mubr.msk.bf16.mxu0 %vm606_vm0, %v5519_v47 }
  0xca   : > { %v955_v5 = vpop.permute.xlu0 %954  ;;  %v960_v11 = vpop.permute.xlu1 %959 }
  0xce   : > { %v965_v22 = vpop.permute.xlu0 %964  ;;  %v970_v40 = vpop.permute.xlu1 %969 }
  0xd0   : > { %863 = vmatmul.mubr.bf16.gmra.mxu0 %v5518_v50 }
  0xf0   : > { %v704_v1 = vpop.f32.mrf.mxu0 }
  0xf1   : > { %v705_v3 = vadd.f32 %v7120_v0, %v704_v1 }
  0xf2   : > { %v706_v4 = vpop.f32.mrf.mxu0 }
  0xf3   : > { %v870_v6 = vmax.f32 %v705_v3, 0.0 }
  0xf4   : > { %v707_v7 = vpop.f32.mrf.mxu0 }
  0xf5   : > { %v1157_v8 = vmul.f32 %v955_v5, %v870_v6  ;;  %v708_v9 = vadd.f32 %v7120_v0, %v707_v7 }
  0xf6   : > { %v709_v10 = vpop.f32.mrf.mxu0 }
  0xf7   : > { %v5896_v12 = vpack.c.bf16 %v1157_v8, %v1157_v8  ;;  %v871_v13 = vmax.f32 %v708_v9, 0.0 }
  0xf8   : > { %v712_v15 = vpop.f32.mrf.mxu0 }
  0xf9   : > { %1364 = vst.msk [vmem:[#allocation2] sm:$0xf] %vm1363_vm1, %v5896_v12  ;;  %v1158_v16 = vmul.f32 %v960_v11, %v871_v13  ;;  %v713_v17 = vadd.f32 %v7120_v0, %v712_v15 }
  0xfa   : > { %v714_v20 = vpop.f32.mrf.mxu0 }
  0xfb   : > { %v5897_v26 = vpack.c.bf16 %v1158_v16, %v1158_v16  ;;  %v872_v28 = vmax.f32 %v713_v17, 0.0 }
  0xfc   : > { %v715_v31 = vpop.f32.mrf.mxu0 }
  0xfd   : > { %1365 = vst.msk [vmem:[#allocation2 + $0x4] sm:$0xf] %vm1363_vm1, %v5897_v26  ;;  %v1159_v32 = vmul.f32 %v965_v22, %v872_v28  ;;  %v716_v35 = vadd.f32 %v7120_v0, %v715_v31 }
  0xfe   : > { %v717_v37 = vpop.f32.mrf.mxu0 }
  0xff   : > { %v5898_v42 = vpack.c.bf16 %v1159_v32, %v1159_v32  ;;  %v873_v44 = vmax.f32 %v716_v35, 0.0 }
 0x100   : > { %v720_v46 = vpop.f32.mrf.mxu0  ;;  %v1406_v6 = vld [vmem:[#allocation2] sm:$0xf] }
 0x101   : > { %1366 = vst.msk [vmem:[#allocation2 + $0x8] sm:$0xf] %vm1363_vm1, %v5898_v42  ;;  %v1160_v47 = vmul.f32 %v970_v40, %v873_v44  ;;  %v721_v50 = vadd.f32 %v7120_v0, %v720_v46 }
 0x102   : > { %v722_v1 = vpop.f32.mrf.mxu0 }
 0x103   : > { %v5899_v3 = vpack.c.bf16 %v1160_v47, %v1160_v47  ;;  %v874_v4 = vmax.f32 %v721_v50, 0.0 }
 0x104   : > { %v723_v5 = vpop.f32.mrf.mxu0  ;;  %v1407_v7 = vld [vmem:[#allocation2 + $0x4] sm:$0xf] }
 0x105   : > { %1367 = vst.msk [vmem:[#allocation2 + $0xc] sm:$0xf] %vm1363_vm1, %v5899_v3  ;;  %v1161_v8 = vmul.f32 %v7019_v14, %v874_v4  ;;  %v724_v9 = vadd.f32 %v7120_v0, %v723_v5  ;;  %v7135_v10 = vcombine.low %v1406_v6, %v1407_v7 }
 0x106   : > { %v725_v11 = vpop.f32.mrf.mxu0 }
 0x107   : > { %v5900_v12 = vpack.c.bf16 %v1161_v8, %v1161_v8  ;;  %v875_v13 = vmax.f32 %v724_v9, 0.0  ;;  %v1542_v16 = vshll.u32 %v7135_v10, 16  ;;  %v1540_v42 = vshrl.u32 %v7135_v10, 16 }
 0x108   : > { %v728_v15 = vpop.f32.mrf.mxu0 }
 0x109   : > { %1368 = vst.msk [vmem:[#allocation2 + $0x10] sm:$0xf] %vm1363_vm1, %v5900_v12  ;;  %v1162_v17 = vmul.f32 %v7028_v19, %v875_v13  ;;  %v729_v20 = vadd.f32 %v7120_v0, %v728_v15  ;;  %v1544_v32 = vrot.slane %v1542_v16, 1 }
 0x10a   : > { %v730_v22 = vpop.f32.mrf.mxu0 }
 0x10b   : > { %v5901_v26 = vpack.c.bf16 %v1162_v17, %v1162_v17  ;;  %v876_v28 = vmax.f32 %v729_v20, 0.0  ;;  %v1545_v50 = vor.u32 %v1544_v32, %v1540_v42 }
 0x10c   : > { %v731_v14 = vpop.f32.mrf.mxu0  ;;  %v6657_v31 = vld [vmem:[#allocation2 + $0x8] sm:$0xff]  }
 0x10d   : > { %1369 = vst.msk [vmem:[#allocation2 + $0x14] sm:$0xf] %vm1363_vm1, %v5901_v26  ;;  %v1163_v35 = vmul.f32 %v7026_v18, %v876_v28  ;;  %v732_v37 = vadd.f32 %v7120_v0, %v731_v14  ;;  %v1547_v44 = vshll.u32 %v6657_v31, 16  ;;  %v6660_v13 = vld [vmem:[#allocation2 + $0x8] sm:$0xfe]  }
 0x10e   : > { %v733_v40 = vpop.f32.mrf.mxu0  ;;  %v2896_v20 = vld [vmem:[#allocation2 + $0xc] sm:$0xf]  ;;  %v2895_v14 = vld [vmem:[#allocation2 + $0x8] sm:$0xe]  ;;  %v2587_v42 = vrot.slane %v6660_v13, 1 }
 0x10f   : > { %v5902_v46 = vpack.c.bf16 %v1163_v35, %v1163_v35  ;;  %v877_v19 = vmax.f32 %v732_v37, 0.0  ;;  %v1549_v1 = vrot.slane %v1547_v44, 1  ;;  %v5713_v44 = vcombine.low %v2895_v14, %v2896_v20 }
 0x110   : > { %v736_v47 = vpop.f32.mrf.mxu0 }
 0x111   : > { %1370 = vst.msk [vmem:[#allocation2 + $0x18] sm:$0xf] %vm1363_vm1, %v5902_v46  ;;  %v1164_v3 = vmul.f32 %v7032_v21, %v877_v19  ;;  %v737_v4 = vadd.f32 %v7120_v0, %v736_v47  ;;  %v1550_v18 = vsel %vm1538_vm2, %v1545_v50, %v1549_v1  ;;  %v1551_v21 = vshrl.u32 %v6657_v31, 16 }
 0x112   : > { %v738_v5 = vpop.f32.mrf.mxu0  ;;  %6230 = vmatprep.mubr.msk.bf16.mxu0 %vm606_vm0, %v1550_v18 }
 0x113   : > { %v5903_v6 = vpack.c.bf16 %v1164_v3, %v1164_v3  ;;  %v878_v7 = vmax.f32 %v737_v4, 0.0  ;;  %v1553_v32 = vor.u32 %v1551_v21, %v1549_v1 }
 0x114   : > { %v739_v8 = vpop.f32.mrf.mxu0  ;;  %v6659_v9 = vld [vmem:[#allocation2 + $0x10] sm:$0xff]  }
 0x115   : > { %1371 = vst.msk [vmem:[#allocation2 + $0x1c] sm:$0xf] %vm1363_vm1, %v5903_v6  ;;  %v1165_v11 = vmul.f32 %v7035_v23, %v878_v7  ;;  %v740_v12 = vadd.f32 %v7120_v0, %v739_v8  ;;  %v6661_v15 = vld [vmem:[#allocation2 + $0x10] sm:$0xff]   ;;  %v1555_v17 = vshll.u32 %v6659_v9, 16  ;;  %v3030_v6 = vshrl.u32 %v5713_v44, 16 }
 0x116   : > { %v741_v16 = vpop.f32.mrf.mxu0  ;;  %v2588_v28 = vrot.slane %v6661_v15, 1  ;;  %v6697_v19 = vld [vmem:[#allocation2 + $0x10] sm:$0xff]   ;;  %v1559_v8 = vshrl.u32 %v6659_v9, 16 }
 0x117   : > { %v5904_v22 = vpack.c.bf16 %v1165_v11, %v1165_v11  ;;  %v879_v26 = vmax.f32 %v740_v12, 0.0  ;;  %v1557_v37 = vrot.slane %v1555_v17, 1  ;;  %v6699_v12 = vld [vmem:[%s9020_s4 + $0x28] sm:$0xff]   ;;  %v3038_v13 = vshrl.u32 %v6697_v19, 16 }
 0x118   : > { %v744_v35 = vpop.f32.mrf.mxu0  ;;  %v2589_v1 = vsel %vm2149_vm3, %v2587_v42, %v2588_v28  ;;  %v3041_v16 = vshll.u32 %v6697_v19, 16 }
 0x119   : > { %1372 = vst.msk [vmem:[#allocation2 + $0x20] sm:$0xf] %vm1363_vm1, %v5904_v22  ;;  %v1166_v40 = vmul.f32 %v7044_v25, %v879_v26  ;;  %v745_v23 = vadd.f32 %v7120_v0, %v744_v35  ;;  %v1558_v31 = vsel %vm1538_vm2, %v1553_v32, %v1557_v37  ;;  %v1561_v20 = vor.u32 %v1559_v8, %v1557_v37 }
 0x11a   : > { %v746_v46 = vpop.f32.mrf.mxu0  ;;  %6231 = vmatmul.mubr.msk.bf16.vlgmr.msra.gmra.mxu0 %vm606_vm0, %v1558_v31  ;;  %v3032_v37 = vrot.slane %v3030_v6, 1 }
 0x11b   : > { %v5905_v47 = vpack.c.bf16 %v1166_v40, %v1166_v40  ;;  %v880_v50 = vmax.f32 %v745_v23, 0.0  ;;  %6344 = vmatprep.mubr.msk.bf16.mxu0 %vm606_vm0, %v2589_v1  ;;  %6343 = vmatpush3.bf16.msra.mxu0 %v7040_v24  ;;  %v3040_v40 = vrot.slane %v3038_v13, 1 }
 0x11c   : > { %v747_v3 = vpop.f32.mrf.mxu0  ;;  %v6663_v25 = vld [vmem:[#allocation2 + $0x18] sm:$0xff]   ;;  %6418 = vmatprep.subr.bf16.mxu0 %v6699_v12 }
 0x11d   : > { %1373 = vst.msk [vmem:[#allocation2 + $0x24] sm:$0xf] %vm1363_vm1, %v5905_v47  ;;  %v1167_v4 = vmul.f32 %v7047_v27, %v880_v50  ;;  %v748_v5 = vadd.f32 %v7120_v0, %v747_v3  ;;  %v6664_v18 = vld [vmem:[#allocation2 + $0x18] sm:$0xff]   ;;  %v1563_v11 = vshll.u32 %v6663_v25, 16  ;;  %v3033_v27 = vshll.u32 %v5713_v44, 16 }
 0x11e   : > { %v749_v7 = vpop.f32.mrf.mxu0  ;;  %v2590_v24 = vrot.slane %v6664_v18, 1  ;;  %v3043_v44 = vrot.slane %v3041_v16, 2  ;;  %v6700_v3 = vld [vmem:[#allocation2 + $0x18] sm:$0xff]   ;;  %v1567_v6 = vshrl.u32 %v6663_v25, 16  ;;  %v6695_v25 = vld [vmem:[%s9020_s4 + $0x10] sm:$0xff]  }
 0x11f   : > { %v5906_v15 = vpack.c.bf16 %v1167_v4, %v1167_v4  ;;  %v881_v21 = vmax.f32 %v748_v5, 0.0  ;;  %v1565_v22 = vrot.slane %v1563_v11, 1 }
 0x120   : > { %v752_v17 = vpop.f32.mrf.mxu0  ;;  %v2591_v35 = vsel %vm2149_vm3, %v2588_v28, %v2590_v24  ;;  %v3044_v4 = vor.u32 %v3043_v44, %v3040_v40 }
 0x121   : > { %1374 = vst.msk [vmem:[#allocation2 + $0x28] sm:$0xf] %vm1363_vm1, %v5906_v15  ;;  %v1168_v26 = vmul.f32 %v7050_v29, %v881_v21  ;;  %v753_v9 = vadd.f32 %v7120_v0, %v752_v17  ;;  %v1566_v32 = vsel %vm1538_vm2, %v1561_v20, %v1565_v22  ;;  %v3035_v29 = vrot.slane %v3033_v27, 2 }
 0x122   : > { %v754_v14 = vpop.f32.mrf.mxu0  ;;  %6234 = vmatprep.mubr.msk.bf16.mxu1 %vm606_vm0, %v1566_v32  ;;  %6345 = vmatmul.mubr.msk.bf16.vlgmr.msra.gmra.mxu0 %vm606_vm0, %v2591_v35  ;;  %v1569_v13 = vor.u32 %v1567_v6, %v1565_v22  ;;  %v3050_v20 = vshll.u32 %v6700_v3, 16 }
 0x123   : > { %v5907_v23 = vpack.c.bf16 %v1168_v26, %v1168_v26  ;;  %v882_v42 = vmax.f32 %v753_v9, 0.0  ;;  %6419 = vmatpush3.bf16.msra.mxu0 %v6699_v12  ;;  %v3036_v12 = vor.u32 %v3035_v29, %v3032_v37 }
 0x124   : > { %v755_v46 = vpop.f32.mrf.mxu0  ;;  %v6665_v31 = vld [vmem:[#allocation2 + $0x20] sm:$0xff]   ;;  %v3052_v44 = vrot.slane %v3050_v20, 2 }
 0x125   : > { %1375 = vst.msk [vmem:[#allocation2 + $0x2c] sm:$0xf] %vm1363_vm1, %v5907_v23  ;;  %v1169_v19 = vmul.f32 %v7053_v30, %v882_v42  ;;  %v756_v47 = vadd.f32 %v7120_v0, %v755_v46  ;;  %v6666_v28 = vld [vmem:[#allocation2 + $0x20] sm:$0xff]   ;;  %v2592_v1 = vrot.slane %v6665_v31, 1  ;;  %v7186_v17 = vsel %vm3028_vm4, %v3036_v12, %v3044_v4 }
 0x126   : > { %v757_v50 = vpop.f32.mrf.mxu0  ;;  %v1571_v7 = vshll.u32 %v6666_v28, 16  ;;  %v6701_v42 = vld [vmem:[#allocation2 + $0x20] sm:$0xff]   ;;  %v1575_v29 = vshrl.u32 %v6666_v28, 16 }
 0x127   : > { %v5908_v5 = vpack.c.bf16 %v1169_v19, %v1169_v19  ;;  %v883_v18 = vmax.f32 %v756_v47, 0.0  ;;  %v2593_v11 = vsel %vm2149_vm3, %v2590_v24, %v2592_v1  ;;  %v3047_v24 = vshrl.u32 %v6700_v3, 16 }
 0x128   : > { %v760_v8 = vpop.f32.mrf.mxu0  ;;  %6348 = vmatprep.mubr.msk.bf16.mxu0 %vm606_vm0, %v2593_v11  ;;  %v1573_v21 = vrot.slane %v1571_v7, 1  ;;  %v3056_v7 = vshrl.u32 %v6701_v42, 16 }
 0x129   : > { %1376 = vst.msk [vmem:[#allocation2 + $0x30] sm:$0xf] %vm1363_vm1, %v5908_v5  ;;  %v1170_v30 = vmul.f32 %v7057_v33, %v883_v18  ;;  %v761_v15 = vadd.f32 %v7120_v0, %v760_v8  ;;  %v3049_v37 = vrot.slane %v3047_v24, 1  ;;  %v3059_v8 = vshll.u32 %v6701_v42, 16 }
 0x12a   : > { %v762_v16 = vpop.f32.mrf.mxu0  ;;  %v1574_v33 = vsel %vm1538_vm2, %v1569_v13, %v1573_v21  ;;  %v3058_v20 = vrot.slane %v3056_v7, 1 }
 0x12b   : > { %v5909_v27 = vpack.c.bf16 %v1170_v30, %v1170_v30  ;;  %v884_v26 = vmax.f32 %v761_v15, 0.0  ;;  %6235 = vmatmul.mubr.msk.bf16.vlgmr.msra.gmra.mxu1 %vm606_vm0, %v1574_v33  ;;  %v3053_v6 = vor.u32 %v3052_v44, %v3049_v37 }
 0x12c   : > { %v763_v22 = vpop.f32.mrf.mxu0  ;;  %v6667_v9 = vld [vmem:[#allocation2 + $0x28] sm:$0xff]   ;;  %6267 = vmatpush3.bf16.msra.mxu1 %v7108_v60  ;;  %v1577_v60 = vor.u32 %v1575_v29, %v1573_v21 }
 0x12d   : > { %1377 = vst.msk [vmem:[#allocation2 + $0x34] sm:$0xf] %vm1363_vm1, %v5909_v27  ;;  %v1171_v14 = vmul.f32 %v7059_v34, %v884_v26  ;;  %v764_v32 = vadd.f32 %v7120_v0, %v763_v22  ;;  %v6668_v35 = vld [vmem:[#allocation2 + $0x28] sm:$0xff]   ;;  %v2594_v23 = vrot.slane %v6667_v9, 1  ;;  %6304 = vmatprep.subr.bf16.mxu1 %v6695_v25  ;;  %v3061_v27 = vrot.slane %v3059_v8, 2 }
 0x12e   : > { %v765_v40 = vpop.f32.mrf.mxu0  ;;  %v1579_v19 = vshll.u32 %v6668_v35, 16  ;;  %v6702_v24 = vld [vmem:[#allocation2 + $0x28] sm:$0xff]   ;;  %v1583_v22 = vshrl.u32 %v6668_v35, 16 }
 0x12f   : > { %v5910_v46 = vpack.c.bf16 %v1171_v14, %v1171_v14  ;;  %v885_v31 = vmax.f32 %v764_v32, 0.0  ;;  %v2595_v50 = vsel %vm2149_vm3, %v2592_v1, %v2594_v23  ;;  %v3062_v44 = vor.u32 %v3061_v27, %v3058_v20 }
 0x130   : > { %v768_v47 = vpop.f32.mrf.mxu0  ;;  %6349 = vmatmul.mubr.msk.bf16.gmra.mxu0 %vm606_vm0, %v2595_v50  ;;  %v1581_v5 = vrot.slane %v1579_v19, 1 }
 0x131   : > { %1378 = vst.msk [vmem:[#allocation2 + $0x38] sm:$0xf] %vm1363_vm1, %v5910_v46  ;;  %v1172_v34 = vmul.f32 %v7063_v36, %v885_v31  ;;  %v769_v3 = vadd.f32 %v7120_v0, %v768_v47  ;;  %v7202_v36 = vsel %vm3028_vm4, %v3044_v4, %v3053_v6  ;;  %v3065_v46 = vshrl.u32 %v6702_v24, 16 }
 0x132   : > { %v770_v18 = vpop.f32.mrf.mxu0  ;;  %v1582_v12 = vsel %vm1538_vm2, %v1577_v60, %v1581_v5  ;;  %v1585_v40 = vor.u32 %v1583_v22, %v1581_v5  ;;  %v3068_v31 = vshll.u32 %v6702_v24, 16 }
 0x133   : > { %v5911_v11 = vpack.c.bf16 %v1172_v34, %v1172_v34  ;;  %v886_v28 = vmax.f32 %v769_v3, 0.0  ;;  %6238 = vmatprep.mubr.msk.bf16.mxu1 %vm606_vm0, %v1582_v12  ;;  %v3067_v7 = vrot.slane %v3065_v46, 1 }
 0x134   : > { %v771_v30 = vpop.f32.mrf.mxu0  ;;  %v6669_v1 = vld [vmem:[#allocation2 + $0x30] sm:$0xff]   ;;  %v3070_v8 = vrot.slane %v3068_v31, 2 }
 0x135   : > { %1379 = vst.msk [vmem:[#allocation2 + $0x3c] sm:$0xf] %vm1363_vm1, %v5911_v11  ;;  %v1173_v13 = vmul.f32 %v7066_v38, %v886_v28  ;;  %v772_v15 = vadd.f32 %v7120_v0, %v771_v30  ;;  %v6670_v21 = vld [vmem:[#allocation2 + $0x30] sm:$0xff]   ;;  %v2596_v25 = vrot.slane %v6669_v1, 1 }
 0x136   : > { %v773_v16 = vpop.f32.mrf.mxu0  ;;  %v1587_v9 = vshll.u32 %v6670_v21, 16  ;;  %v7220_v18 = vld [vmem:[#allocation2 + $0x30] sm:$0xff]   ;;  %v1591_v12 = vshrl.u32 %v6670_v21, 16  ;;  %v3071_v20 = vor.u32 %v3070_v8, %v3067_v7 }
 0x137   : > { %v5912_v26 = vpack.c.bf16 %v1173_v13, %v1173_v13  ;;  %v887_v33 = vmax.f32 %v772_v15, 0.0  ;;  %v2597_v4 = vsel %vm2149_vm3, %v2594_v23, %v2596_v25  ;;  %v3074_v27 = vshrl.u32 %v7220_v18, 16 }
 0x138   : > { %v776_v14 = vpop.f32.mrf.mxu0  ;;  %6352 = vmatprep.mubr.msk.bf16.mxu0 %vm606_vm0, %v2597_v4  ;;  %v1589_v42 = vrot.slane %v1587_v9, 1  ;;  %v3077_v21 = vshll.u32 %v7220_v18, 16  ;;  %v7232_v9 = vsel %vm3028_vm4, %v3062_v44, %v3071_v20 }
 0x139   : > { %1380 = vst.msk [vmem:[#allocation2 + $0x40] sm:$0xf] %vm1363_vm1, %v5912_v26  ;;  %v1174_v32 = vmul.f32 %v7069_v39, %v887_v33  ;;  %v777_v38 = vadd.f32 %v7120_v0, %v776_v14  ;;  %v7215_v39 = vsel %vm3028_vm4, %v3053_v6, %v3062_v44 }
 0x13a   : > { %v778_v37 = vpop.f32.mrf.mxu0  ;;  %v1590_v19 = vsel %vm1538_vm2, %v1585_v40, %v1589_v42  ;;  %v1593_v15 = vor.u32 %v1591_v12, %v1589_v42  ;;  %v3079_v46 = vrot.slane %v3077_v21, 2 }
 0x13b   : > { %v5913_v29 = vpack.c.bf16 %v1174_v32, %v1174_v32  ;;  %v888_v35 = vmax.f32 %v777_v38, 0.0  ;;  %6239 = vmatmul.mubr.msk.bf16.gmra.mxu1 %vm606_vm0, %v1590_v19  ;;  %v3076_v37 = vrot.slane %v3074_v27, 1 }
 0x13c   : > { %v779_v47 = vpop.f32.mrf.mxu0  ;;  %v6671_v23 = vld [vmem:[#allocation2 + $0x38] sm:$0xff]  }
 0x13d   : > { %1381 = vst.msk [vmem:[#allocation2 + $0x44] sm:$0xf] %vm1363_vm1, %v5913_v29  ;;  %v1175_v50 = vmul.f32 %v7072_v41, %v888_v35  ;;  %v780_v34 = vadd.f32 %v7120_v0, %v779_v47  ;;  %v6672_v3 = vld [vmem:[#allocation2 + $0x38] sm:$0xff]   ;;  %v2598_v5 = vrot.slane %v6671_v23, 1  ;;  %v3080_v7 = vor.u32 %v3079_v46, %v3076_v37 }
 0x13e   : > { %v781_v60 = vpop.f32.mrf.mxu0  ;;  %v1595_v30 = vshll.u32 %v6672_v3, 16  ;;  %v7237_v42 = vld [vmem:[#allocation2 + $0x38] sm:$0xff]   ;;  %v1599_v35 = vshrl.u32 %v6672_v3, 16 }
 0x13f   : > { %v5914_v11 = vpack.c.bf16 %v1175_v50, %v1175_v50  ;;  %v889_v28 = vmax.f32 %v780_v34, 0.0  ;;  %v2599_v6 = vsel %vm2149_vm3, %v2596_v25, %v2598_v5  ;;  %v3083_v8 = vshrl.u32 %v7237_v42, 16 }
 0x140   : > { %v784_v1 = vpop.f32.mrf.mxu0  ;;  %6353 = vmatmul.mubr.msk.bf16.gmra.mxu0 %vm606_vm0, %v2599_v6  ;;  %v1597_v16 = vrot.slane %v1595_v30, 1  ;;  %v3086_v3 = vshll.u32 %v7237_v42, 16  ;;  %v7249_v30 = vsel %vm3028_vm4, %v3071_v20, %v3080_v7 }
 0x141   : > { %1382 = vst.msk [vmem:[#allocation2 + $0x48] sm:$0xf] %vm1363_vm1, %v5914_v11  ;;  %v1176_v41 = vmul.f32 %v7075_v43, %v889_v28  ;;  %v785_v13 = vadd.f32 %v7120_v0, %v784_v1 }
 0x142   : > { %v786_v24 = vpop.f32.mrf.mxu0  ;;  %v1598_v25 = vsel %vm1538_vm2, %v1593_v15, %v1597_v16  ;;  %v1601_v50 = vor.u32 %v1599_v35, %v1597_v16  ;;  %v3088_v27 = vrot.slane %v3086_v3, 2 }
 0x143   : > { %v5915_v26 = vpack.c.bf16 %v1176_v41, %v1176_v41  ;;  %v890_v33 = vmax.f32 %v785_v13, 0.0  ;;  %6242 = vmatprep.mubr.msk.bf16.mxu1 %vm606_vm0, %v1598_v25  ;;  %v3085_v24 = vrot.slane %v3083_v8, 1 }
 0x144   : > { %v787_v22 = vpop.f32.mrf.mxu0  ;;  %v6673_v43 = vld [vmem:[#allocation2 + $0x40] sm:$0xff]  }
 0x145   : > { %1383 = vst.msk [vmem:[#allocation2 + $0x4c] sm:$0xf] %vm1363_vm1, %v5915_v26  ;;  %v1177_v14 = vmul.f32 %v7079_v45, %v890_v33  ;;  %v788_v4 = vadd.f32 %v7120_v0, %v787_v22  ;;  %v6674_v32 = vld [vmem:[#allocation2 + $0x40] sm:$0xff]   ;;  %v2600_v40 = vrot.slane %v6673_v43, 1  ;;  %v3089_v37 = vor.u32 %v3088_v27, %v3085_v24 }
 0x146   : > { %v789_v38 = vpop.f32.mrf.mxu0  ;;  %v1603_v19 = vshll.u32 %v6674_v32, 16  ;;  %v7256_v16 = vld [vmem:[#allocation2 + $0x40] sm:$0xff]   ;;  %v1607_v33 = vshrl.u32 %v6674_v32, 16 }
 0x147   : > { %v5916_v31 = vpack.c.bf16 %v1177_v14, %v1177_v14  ;;  %v891_v29 = vmax.f32 %v788_v4, 0.0  ;;  %v2601_v44 = vsel %vm2149_vm3, %v2598_v5, %v2600_v40  ;;  %v3092_v46 = vshrl.u32 %v7256_v16, 16 }
 0x148   : > { %v792_v47 = vpop.f32.mrf.mxu0  ;;  %6356 = vmatprep.mubr.msk.bf16.mxu0 %vm606_vm0, %v2601_v44  ;;  %v1605_v34 = vrot.slane %v1603_v19, 1  ;;  %v3095_v32 = vshll.u32 %v7256_v16, 16  ;;  %v7269_v19 = vsel %vm3028_vm4, %v3080_v7, %v3089_v37 }
 0x149   : > { %1384 = vst.msk [vmem:[#allocation2 + $0x50] sm:$0xf] %vm1363_vm1, %v5916_v31  ;;  %v1178_v45 = vmul.f32 %v7082_v48, %v891_v29  ;;  %v793_v23 = vadd.f32 %v7120_v0, %v792_v47 }
 0x14a   : > { %v794_v60 = vpop.f32.mrf.mxu0  ;;  %v1606_v5 = vsel %vm1538_vm2, %v1601_v50, %v1605_v34  ;;  %v1609_v14 = vor.u32 %v1607_v33, %v1605_v34  ;;  %v3097_v8 = vrot.slane %v3095_v32, 2 }
 0x14b   : > { %v5917_v11 = vpack.c.bf16 %v1178_v45, %v1178_v45  ;;  %v892_v28 = vmax.f32 %v793_v23, 0.0  ;;  %6243 = vmatmul.mubr.msk.bf16.gmra.mxu1 %vm606_vm0, %v1606_v5  ;;  %v3094_v60 = vrot.slane %v3092_v46, 1 }
 0x14c   : > { %v795_v12 = vpop.f32.mrf.mxu0  ;;  %v6675_v48 = vld [vmem:[#allocation2 + $0x48] sm:$0xff]  }
 0x14d   : > { %1385 = vst.msk [vmem:[#allocation2 + $0x54] sm:$0xf] %vm1363_vm1, %v5917_v11  ;;  %v1179_v1 = vmul.f32 %v7084_v49, %v892_v28  ;;  %v796_v6 = vadd.f32 %v7120_v0, %v795_v12  ;;  %v7254_v41 = vld [vmem:[#allocation2 + $0x48] sm:$0xff]   ;;  %v2602_v15 = vrot.slane %v6675_v48, 1  ;;  %v3098_v24 = vor.u32 %v3097_v8, %v3094_v60 }
 0x14e   : > { %v797_v13 = vpop.f32.mrf.mxu0  ;;  %v1611_v20 = vshll.u32 %v7254_v41, 16  ;;  %v7276_v34 = vld [vmem:[#allocation2 + $0x48] sm:$0xff]   ;;  %v1615_v28 = vshrl.u32 %v7254_v41, 16 }
 0x14f   : > { %v5918_v21 = vpack.c.bf16 %v1179_v1, %v1179_v1  ;;  %v893_v26 = vmax.f32 %v796_v6, 0.0  ;;  %v2603_v22 = vsel %vm2149_vm3, %v2600_v40, %v2602_v15  ;;  %v3101_v27 = vshrl.u32 %v7276_v34, 16 }
 0x150   : > { %v800_v25 = vpop.f32.mrf.mxu0  ;;  %6357 = vmatmul.mubr.msk.bf16.gmra.mxu0 %vm606_vm0, %v2603_v22  ;;  %v1613_v4 = vrot.slane %v1611_v20, 1 }
 0x151   : > { %1386 = vst.msk [vmem:[#allocation2 + $0x58] sm:$0xf] %vm1363_vm1, %v5918_v21  ;;  %v1180_v49 = vmul.f32 %v7087_v51, %v893_v26  ;;  %v801_v43 = vadd.f32 %v7120_v0, %v800_v25  ;;  %v3104_v21 = vshll.u32 %v7276_v34, 16  ;;  %v7290_v25 = vsel %vm3028_vm4, %v3089_v37, %v3098_v24 }
 0x152   : > { %v802_v38 = vpop.f32.mrf.mxu0  ;;  %v1614_v40 = vsel %vm1538_vm2, %v1609_v14, %v1613_v4  ;;  %v1617_v1 = vor.u32 %v1615_v28, %v1613_v4  ;;  %v3103_v46 = vrot.slane %v3101_v27, 1  ;;  %v7321_v27 = vld [vmem:[%s9020_s4 + $0x38] sm:$0xff]  }
 0x153   : > { %v5919_v31 = vpack.c.bf16 %v1180_v49, %v1180_v49  ;;  %v894_v29 = vmax.f32 %v801_v43, 0.0  ;;  %6246 = vmatprep.mubr.msk.bf16.mxu1 %vm606_vm0, %v1614_v40  ;;  %v3106_v32 = vrot.slane %v3104_v21, 2  ;;  %6494 = vmatprep.subr.bf16.mxu0 %v7321_v27 }
 0x154   : > { %v803_v35 = vpop.f32.mrf.mxu0  ;;  %v6677_v51 = vld [vmem:[#allocation2 + $0x50] sm:$0xff]  }
 0x155   : > { %1387 = vst.msk [vmem:[#allocation2 + $0x5c] sm:$0xf] %vm1363_vm1, %v5919_v31  ;;  %v1181_v47 = vmul.f32 %v7089_v52, %v894_v29  ;;  %v804_v44 = vadd.f32 %v7120_v0, %v803_v35  ;;  %v7274_v45 = vld [vmem:[#allocation2 + $0x50] sm:$0xff]   ;;  %v2604_v50 = vrot.slane %v6677_v51, 1  ;;  %v3107_v8 = vor.u32 %v3106_v32, %v3103_v46 }
 0x156   : > { %v805_v23 = vpop.f32.mrf.mxu0  ;;  %v1619_v7 = vshll.u32 %v7274_v45, 16  ;;  %v7297_v38 = vld [vmem:[#allocation2 + $0x50] sm:$0xff]   ;;  %v1623_v40 = vshrl.u32 %v7274_v45, 16 }
 0x157   : > { %v5920_v3 = vpack.c.bf16 %v1181_v47, %v1181_v47  ;;  %v895_v11 = vmax.f32 %v804_v44, 0.0  ;;  %v2605_v12 = vsel %vm2149_vm3, %v2602_v15, %v2604_v50 }
 0x158   : > { %v808_v5 = vpop.f32.mrf.mxu0  ;;  %6360 = vmatprep.mubr.msk.bf16.mxu0 %vm606_vm0, %v2605_v12  ;;  %v1621_v6 = vrot.slane %v1619_v7, 1  ;;  %v7311_v12 = vsel %vm3028_vm4, %v3098_v24, %v3107_v8 }
 0x159   : > { %1388 = vst.msk [vmem:[#allocation2 + $0x60] sm:$0xf] %vm1363_vm1, %v5920_v3  ;;  %v1182_v52 = vmul.f32 %v7091_v53, %v895_v11  ;;  %v809_v48 = vadd.f32 %v7120_v0, %v808_v5  ;;  %v3110_v3 = vshrl.u32 %v7297_v38, 16  ;;  %v3113_v11 = vshll.u32 %v7297_v38, 16 }
 0x15a   : > { %v810_v13 = vpop.f32.mrf.mxu0  ;;  %v1622_v15 = vsel %vm1538_vm2, %v1617_v1, %v1621_v6  ;;  %v1625_v44 = vor.u32 %v1623_v40, %v1621_v6 }
 0x15b   : > { %v5921_v26 = vpack.c.bf16 %v1182_v52, %v1182_v52  ;;  %v896_v33 = vmax.f32 %v809_v48, 0.0  ;;  %6247 = vmatmul.mubr.msk.bf16.gmra.mxu1 %vm606_vm0, %v1622_v15  ;;  %v3112_v21 = vrot.slane %v3110_v3, 1 }
 0x15c   : > { %v811_v20 = vpop.f32.mrf.mxu0  ;;  %v6680_v53 = vld [vmem:[#allocation2 + $0x58] sm:$0xff]  }
 0x15d   : > { %1389 = vst.msk [vmem:[#allocation2 + $0x64] sm:$0xf] %vm1363_vm1, %v5921_v26  ;;  %v1183_v22 = vmul.f32 %v7093_v54, %v896_v33  ;;  %v812_v49 = vadd.f32 %v7120_v0, %v811_v20  ;;  %v7295_v43 = vld [vmem:[#allocation2 + $0x58] sm:$0xff]   ;;  %v2606_v4 = vrot.slane %v6680_v53, 1  ;;  %v3115_v26 = vrot.slane %v3113_v11, 2 }
 0x15e   : > { %v813_v14 = vpop.f32.mrf.mxu0  ;;  %v1627_v37 = vshll.u32 %v7295_v43, 16  ;;  %v1631_v15 = vshrl.u32 %v7295_v43, 16  ;;  %v7326_v53 = vld [vmem:[#allocation2 + $0x58] sm:$0xff]  }
 0x15f   : > { %v5922_v31 = vpack.c.bf16 %v1183_v22, %v1183_v22  ;;  %v897_v29 = vmax.f32 %v812_v49, 0.0  ;;  %v2607_v51 = vsel %vm2149_vm3, %v2604_v50, %v2606_v4  ;;  %v7334_v49 = vld [vmem:[%s9019_s3] ss:$0 sm:$0xff] }
 0x160   : > { %v816_v35 = vpop.f32.mrf.mxu0  ;;  %6361 = vmatmul.mubr.msk.bf16.gmra.mxu0 %vm606_vm0, %v2607_v51  ;;  %v1629_v23 = vrot.slane %v1627_v37, 1 }
 0x161   : > { %1390 = vst.msk [vmem:[#allocation2 + $0x68] sm:$0xf] %vm1363_vm1, %v5922_v31  ;;  %v1184_v54 = vmul.f32 %v7095_v55, %v897_v29  ;;  %v817_v47 = vadd.f32 %v7120_v0, %v816_v35  ;;  %v3116_v31 = vor.u32 %v3115_v26, %v3112_v21 }
 0x162   : > { %v818_v60 = vpop.f32.mrf.mxu0  ;;  %v1630_v50 = vsel %vm1538_vm2, %v1625_v44, %v1629_v23  ;;  %v1633_v46 = vor.u32 %v1631_v15, %v1629_v23 }
 0x163   : > { %v5923_v28 = vpack.c.bf16 %v1184_v54, %v1184_v54  ;;  %v898_v7 = vmax.f32 %v817_v47, 0.0  ;;  %6250 = vmatprep.mubr.msk.bf16.mxu1 %vm606_vm0, %v1630_v50  ;;  %v7341_v51 = vsel %vm3028_vm4, %v3107_v8, %v3116_v31  ;;  %v3119_v54 = vshrl.u32 %v7326_v53, 16 }
 0x164   : > { %v819_v5 = vpop.f32.mrf.mxu0  ;;  %v6682_v55 = vld [vmem:[#allocation2 + $0x60] sm:$0xff]  }
 0x165   : > { %1391 = vst.msk [vmem:[#allocation2 + $0x6c] sm:$0xf] %vm1363_vm1, %v5923_v28  ;;  %v1185_v52 = vmul.f32 %v7097_v56, %v898_v7  ;;  %v820_v48 = vadd.f32 %v7120_v0, %v819_v5  ;;  %v7316_v1 = vld [vmem:[#allocation2 + $0x60] sm:$0xff]   ;;  %v2608_v13 = vrot.slane %v6682_v55, 1  ;;  %v3122_v28 = vshll.u32 %v7326_v53, 16 }
 0x166   : > { %v821_v6 = vpop.f32.mrf.mxu0  ;;  %v1635_v20 = vshll.u32 %v7316_v1, 16  ;;  %v7349_v11 = vld [vmem:[#allocation2 + $0x60] sm:$0xff]   ;;  %v1639_v8 = vshrl.u32 %v7316_v1, 16 }
 0x167   : > { %v5924_v33 = vpack.c.bf16 %v1185_v52, %v1185_v52  ;;  %v899_v24 = vmax.f32 %v820_v48, 0.0  ;;  %v2609_v0 = vsel %vm2149_vm3, %v2606_v4, %v2608_v13  ;;  %v3128_v15 = vshrl.u32 %v7349_v11, 16 }
 0x168   : > { %v824_v56 = vpop.f32.mrf.mxu0  ;;  %6364 = vmatprep.mubr.msk.bf16.mxu0 %vm606_vm0, %v2609_v0  ;;  %v1637_v32 = vrot.slane %v1635_v20, 1  ;;  %v3131_v20 = vshll.u32 %v7349_v11, 16 }
 0x169   : > { %1392 = vst.msk [vmem:[#allocation2 + $0x70] sm:$0xf] %vm1363_vm1, %v5924_v33  ;;  %v1186_v22 = vmul.f32 %v7099_v57, %v899_v24  ;;  %v825_v14 = vadd.f32 %v7334_v49, %v824_v56  ;;  %v3124_v24 = vrot.slane %v3122_v28, 2 }
 0x16a   : > { %v826_v4 = vpop.f32.mrf.mxu0  ;;  %v1638_v37 = vsel %vm1538_vm2, %v1633_v46, %v1637_v32  ;;  %v1641_v21 = vor.u32 %v1639_v8, %v1637_v32 }
 0x16b   : > { %v5925_v29 = vpack.c.bf16 %v1186_v22, %v1186_v22  ;;  %v900_v40 = vmax.f32 %v825_v14, 0.0  ;;  %6251 = vmatmul.mubr.msk.bf16.gmra.mxu1 %vm606_vm0, %v1638_v37 }
 0x16c   : > { %v827_v35 = vpop.f32.mrf.mxu0  ;;  %v6684_v57 = vld [vmem:[#allocation2 + $0x68] sm:$0xff]  }
 0x16d   : > { %1393 = vst.msk [vmem:[#allocation2 + $0x74] sm:$0xf] %vm1363_vm1, %v5925_v29  ;;  %v1187_v47 = vmul.f32 %v7101_v58, %v900_v40  ;;  %v828_v44 = vadd.f32 %v7334_v49, %v827_v35  ;;  %v7347_v23 = vld [vmem:[#allocation2 + $0x68] sm:$0xff]   ;;  %v2610_v3 = vrot.slane %v6684_v57, 1  ;;  %v3121_v58 = vrot.slane %v3119_v54, 1 }
 0x16e   : > { %v829_v60 = vpop.f32.mrf.mxu0  ;;  %v1643_v5 = vshll.u32 %v7347_v23, 16  ;;  %v3130_v35 = vrot.slane %v3128_v15, 1  ;;  %v3133_v57 = vrot.slane %v3131_v20, 2 }
 0x16f   : > { %v5926_v7 = vpack.c.bf16 %v1187_v47, %v1187_v47  ;;  %v901_v50 = vmax.f32 %v828_v44, 0.0  ;;  %v2611_v52 = vsel %vm2149_vm3, %v2608_v13, %v2610_v3  ;;  %v3125_v14 = vor.u32 %v3124_v24, %v3121_v58 }
 0x170   : > { %v832_v55 = vpop.f32.mrf.mxu0  ;;  %6365 = vmatmul.mubr.msk.bf16.gmra.mxu0 %vm606_vm0, %v2611_v52  ;;  %v1645_v26 = vrot.slane %v1643_v5, 1  ;;  %v1647_v44 = vshrl.u32 %v7347_v23, 16  ;;  %v3134_v52 = vor.u32 %v3133_v57, %v3130_v35 }
 0x171   : > { %1394 = vst.msk [vmem:[#allocation2 + $0x78] sm:$0xf] %vm1363_vm1, %v5926_v7  ;;  %v1188_v48 = vmul.f32 %v7103_v59, %v901_v50  ;;  %v833_v6 = vadd.f32 %v7334_v49, %v832_v55  ;;  %v7369_v37 = vsel %vm3028_vm4, %v3116_v31, %v3125_v14  ;;  %v7374_v7 = vld [vmem:[#allocation2 + $0x68] sm:$0xff]  }
 0x172   : > { %v834_v33 = vpop.f32.mrf.mxu0  ;;  %v1646_v13 = vsel %vm1538_vm2, %v1641_v21, %v1645_v26  ;;  %v1649_v8 = vor.u32 %v1647_v44, %v1645_v26 }
 0x173   : > { %v5927_v56 = vpack.c.bf16 %v1188_v48, %v1188_v48  ;;  %v902_v0 = vmax.f32 %v833_v6, 0.0  ;;  %6254 = vmatprep.mubr.msk.bf16.mxu1 %vm606_vm0, %v1646_v13  ;;  %v7383_v33 = vsel %vm3028_vm4, %v3125_v14, %v3134_v52  ;;  %v3140_v13 = vshll.u32 %v7374_v7, 16 }
 0x174   : > { %v835_v22 = vpop.f32.mrf.mxu0  ;;  %v6686_v59 = vld [vmem:[#allocation2 + $0x70] sm:$0xff]  }
 0x175   : > { %1395 = vst.msk [vmem:[#allocation2 + $0x7c] sm:$0xf] %vm1363_vm1, %v5927_v56  ;;  %v1189_v46 = vmul.f32 %v7110_v61, %v902_v0  ;;  %v836_v32 = vadd.f32 %v7334_v49, %v835_v22  ;;  %v7366_v4 = vld [vmem:[#allocation2 + $0x70] sm:$0xff]   ;;  %v2612_v40 = vrot.slane %v6686_v59, 1 }
 0x176   : > { %v837_v29 = vpop.f32.mrf.mxu0  ;;  %v1651_v60 = vshll.u32 %v7366_v4, 16  ;;  %v7391_v0 = vld [vmem:[#allocation2 + $0x70] sm:$0xff]   ;;  %v1655_v14 = vshrl.u32 %v7366_v4, 16 }
 0x177   : > { %v5928_v54 = vpack.c.bf16 %v1189_v46, %v1189_v46  ;;  %v903_v47 = vmax.f32 %v836_v32, 0.0  ;;  %v2613_v61 = vsel %vm2149_vm3, %v2610_v3, %v2612_v40 }
 0x178   : > { %v840_v28 = vpop.f32.mrf.mxu0  ;;  %6368 = vmatprep.mubr.msk.bf16.mxu0 %vm606_vm0, %v2613_v61  ;;  %v1653_v5 = vrot.slane %v1651_v60, 1  ;;  %v3142_v60 = vrot.slane %v3140_v13, 2  ;;  %v3149_v61 = vshll.u32 %v7391_v0, 16 }
 0x179   : > { %1396 = vst.msk [vmem:[#allocation2 + $0x80] sm:$0xf] %vm1363_vm1, %v5928_v54  ;;  %v1190_v50 = vmul.f32 %v7113_v62, %v903_v47  ;;  %v841_v31 = vadd.f32 %v7334_v49, %v840_v28  ;;  %v3137_v62 = vshrl.u32 %v7374_v7, 16  ;;  %v3146_v28 = vshrl.u32 %v7391_v0, 16 }
 0x17a   : > { %v842_v55 = vpop.f32.mrf.mxu0  ;;  %v1654_v6 = vsel %vm1538_vm2, %v1649_v8, %v1653_v5  ;;  %v1657_v54 = vor.u32 %v1655_v14, %v1653_v5  ;;  %v1135_v8 = vpop.permute.xlu0 %1134 }
 0x17b   : > { %v5929_v58 = vpack.c.bf16 %v1190_v50, %v1190_v50  ;;  %v904_v48 = vmax.f32 %v841_v31, 0.0  ;;  %6255 = vmatmul.mubr.msk.bf16.gmra.mxu1 %vm606_vm0, %v1654_v6  ;;  %v1140_v14 = vpop.permute.xlu1 %1139 }
 0x17c   : > { %v843_v21 = vpop.f32.mrf.mxu0  ;;  %v6688_v3 = vld [vmem:[#allocation2 + $0x78] sm:$0xff]  }
 0x17d   : > { %1397 = vst.msk [vmem:[#allocation2 + $0x84] sm:$0xf] %vm1363_vm1, %v5929_v58  ;;  %v1191_v26 = vmul.f32 %v7115_v63, %v904_v48  ;;  %v844_v24 = vadd.f32 %v7334_v49, %v843_v21  ;;  %v7389_v15 = vld [vmem:[#allocation2 + $0x78] sm:$0xff]   ;;  %v2614_v56 = vrot.slane %v6688_v3, 1  ;;  %v3139_v63 = vrot.slane %v3137_v62, 1 }
 0x17e   : > { %v845_v20 = vpop.f32.mrf.mxu0  ;;  %v1659_v46 = vshll.u32 %v7389_v15, 16 }
 0x17f   : > { %v5930_v22 = vpack.c.bf16 %v1191_v26, %v1191_v26  ;;  %v905_v59 = vmax.f32 %v844_v24, 0.0  ;;  %v2615_v29 = vsel %vm2149_vm3, %v2612_v40, %v2614_v56  ;;  %v3143_v58 = vor.u32 %v3142_v60, %v3139_v63 }
 0x180   : > { %v848_v32 = vpop.f32.mrf.mxu0  ;;  %6369 = vmatmul.mubr.msk.bf16.gmra.mxu0 %vm606_vm0, %v2615_v29  ;;  %v1661_v47 = vrot.slane %v1659_v46, 1  ;;  %v3148_v26 = vrot.slane %v3146_v28, 1  ;;  %v3151_v24 = vrot.slane %v3149_v61, 2  ;;  %v7415_v29 = vld [vmem:[#allocation2 + $0x78] sm:$0xff]  }
 0x181   : > { %1398 = vst.msk [vmem:[#allocation2 + $0x88] sm:$0xf] %vm1363_vm1, %v5930_v22  ;;  %v1192_v35 = vmul.f32 %v7122_v2, %v905_v59  ;;  %v849_v57 = vadd.f32 %v7334_v49, %v848_v32  ;;  %v7410_v62 = vsel %vm3028_vm4, %v3134_v52, %v3143_v58  ;;  %v1663_v22 = vshrl.u32 %v7389_v15, 16 }
 0x182   : > { %v850_v44 = vpop.f32.mrf.mxu0  ;;  %v1662_v40 = vsel %vm1538_vm2, %v1657_v54, %v1661_v47 }
 0x183   : > { %v5931_v50 = vpack.c.bf16 %v1192_v35, %v1192_v35  ;;  %v906_v31 = vmax.f32 %v849_v57, 0.0  ;;  %6258 = vmatprep.mubr.msk.bf16.mxu1 %vm606_vm0, %v1662_v40  ;;  %v1665_v35 = vor.u32 %v1663_v22, %v1661_v47  ;;  %v7420_v44 = vor.u32 %v3151_v24, %v3148_v26 }
 0x184   : > { %v851_v55 = vpop.f32.mrf.mxu0  ;;  %v6690_v2 = vld [vmem:[#allocation2 + $0x80] sm:$0xff]   ;;  %v3155_v47 = vshrl.u32 %v7415_v29, 16 }
 0x185   : > { %1399 = vst.msk [vmem:[#allocation2 + $0x8c] sm:$0xf] %vm1363_vm1, %v5931_v50  ;;  %v1193_v5 = vmul.f32 %v1135_v8, %v906_v31  ;;  %v852_v48 = vadd.f32 %v7334_v49, %v851_v55  ;;  %v7407_v6 = vld [vmem:[#allocation2 + $0x80] sm:$0xff]   ;;  %v2616_v3 = vrot.slane %v6690_v2, 1  ;;  %v7428_v55 = vsel %vm3028_vm4, %v3143_v58, %v7420_v44 }
 0x186   : > { %v853_v21 = vpop.f32.mrf.mxu0  ;;  %v1667_v59 = vshll.u32 %v7407_v6, 16  ;;  %v1671_v24 = vshrl.u32 %v7407_v6, 16 }
 0x187   : > { %v5932_v20 = vpack.c.bf16 %v1193_v5, %v1193_v5  ;;  %v907_v13 = vmax.f32 %v852_v48, 0.0  ;;  %v2617_v32 = vsel %vm2149_vm3, %v2614_v56, %v2616_v3  ;;  %v1145_v56 = vpop.permute.xlu0 %1144 }
 0x188   : > { %v856_v46 = vpop.f32.mrf.mxu0  ;;  %6372 = vmatprep.mubr.msk.bf16.mxu0 %vm606_vm0, %v2617_v32  ;;  %v1669_v57 = vrot.slane %v1667_v59, 1  ;;  %v7423_v50 = vld [vmem:[#allocation2 + $0x88] sm:$0xf] }
 0x189   : > { %1400 = vst.msk [vmem:[#allocation2 + $0x90] sm:$0xf] %vm1363_vm1, %v5932_v20  ;;  %v1194_v63 = vmul.f32 %v1140_v14, %v907_v13  ;;  %v857_v52 = vadd.f32 %v7334_v49, %v856_v46  ;;  %v3158_v20 = vshll.u32 %v7415_v29, 16  ;;  %v3468_v59 = vld [vmem:[#allocation2 + $0x8] sm:$0xc]  ;;  %v1150_v14 = vpop.permute.xlu1 %1149 }
 0x18a   : > { %v858_v54 = vpop.f32.mrf.mxu0  ;;  %v1670_v61 = vsel %vm1538_vm2, %v1665_v35, %v1669_v57 }
 0x18b   : > { %v5933_v60 = vpack.c.bf16 %v1194_v63, %v1194_v63  ;;  %v908_v28 = vmax.f32 %v857_v52, 0.0  ;;  %6259 = vmatmul.mubr.msk.bf16.gmra.mxu1 %vm606_vm0, %v1670_v61  ;;  %v1673_v63 = vor.u32 %v1671_v24, %v1669_v57  ;;  %v3157_v52 = vrot.slane %v3155_v47, 1  ;;  %v7444_v61 = vld [vmem:[#allocation2 + $0x80] sm:$0xff]  }
 0x18c   : > { %v859_v31 = vpop.f32.mrf.mxu0  ;;  %v6692_v40 = vld [vmem:[#allocation2 + $0x88] sm:$0xff]  }
 0x18d   : > { %v1444_v8 = vld [vmem:[#allocation2 + $0x8c] sm:$0xf]  ;;  %1401 = vst.msk [vmem:[#allocation2 + $0x94] sm:$0xf] %vm1363_vm1, %v5933_v60  ;;  %v1195_v2 = vmul.f32 %v1145_v56, %v908_v28  ;;  %v860_v5 = vadd.f32 %v7334_v49, %v859_v31  ;;  %v2618_v26 = vrot.slane %v6692_v40, 1 }
 0x18e   : > { %v7434_v48 = vcombine.low %v7423_v50, %v1444_v8  ;;  %v861_v21 = vpop.f32.mrf.mxu0  ;;  %v6744_v56 = vld [vmem:[#allocation2 + $0xc] sm:$0xf] }
 0x18f   : > { %v5934_v13 = vpack.c.bf16 %v1195_v2, %v1195_v2  ;;  %v909_v22 = vmax.f32 %v860_v5, 0.0  ;;  %v2619_v32 = vsel %vm2149_vm3, %v2616_v3, %v2618_v26  ;;  %v5753_v31 = vcombine.low %v3468_v59, %v6744_v56  ;;  %v7446_v8 = vld [vmem:[#allocation2 + $0x88] sm:$0xff]   ;;  %v1155_v21 = vpop.permute.xlu0 %1154 }
 0x190   : > { %v1675_v58 = vshll.u32 %v7434_v48, 16  ;;  %v864_v46 = vpop.f32.mrf.mxu0  ;;  %6373 = vmatmul.mubr.msk.bf16.gmra.mxu0 %vm606_vm0, %v2619_v32  ;;  %v1679_v28 = vshrl.u32 %v7434_v48, 16  ;;  %v3160_v3 = vrot.slane %v3158_v20, 2  ;;  %v3167_v20 = vshll.u32 %v7444_v61, 16 }
 0x191   : > { %1402 = vst.msk [vmem:[#allocation2 + $0x98] sm:$0xf] %vm1363_vm1, %v5934_v13  ;;  %v1196_v35 = vmul.f32 %v1150_v14, %v909_v22  ;;  %v865_v54 = vadd.f32 %v7334_v49, %v864_v46  ;;  %v6745_v14 = vld [vmem:[#allocation2 + $0x10] sm:$0xff]  }
 0x192   : > { %v1677_v60 = vrot.slane %v1675_v58, 1  ;;  %v866_v40 = vpop.f32.mrf.mxu0  ;;  %v3161_v13 = vor.u32 %v3160_v3, %v3157_v52  ;;  %v3164_v58 = vshrl.u32 %v7444_v61, 16  ;;  %v3477_v46 = vrot.slane %v6745_v14, 2 }
 0x193   : > { %v5935_v57 = vpack.c.bf16 %v1196_v35, %v1196_v35  ;;  %v910_v47 = vmax.f32 %v865_v54, 0.0  ;;  %v3173_v35 = vshrl.u32 %v7446_v8, 16  ;;  %v3169_v40 = vrot.slane %v3167_v20, 2 }
 0x194   : > { %v1678_v2 = vsel %vm1538_vm2, %v1673_v63, %v1677_v60  ;;  %v1681_v5 = vor.u32 %v1679_v28, %v1677_v60  ;;  %v6694_v49 = vld [vmem:[#allocation2 + $0x90] sm:$0xff]   ;;  %v867_v24 = vpop.f32.mrf.mxu0  ;;  %v7460_v52 = vsel %vm3028_vm4, %v7420_v44, %v3161_v13  ;;  %v3476_v60 = vrot.slane %v5753_v31, 2 }
 0x195   : > { %6262 = vmatprep.mubr.msk.bf16.mxu1 %vm606_vm0, %v1678_v2  ;;  %1403 = vst.msk [vmem:[#allocation2 + $0x9c] sm:$0xf] %vm1363_vm1, %v5935_v57  ;;  %v1197_v22 = vmul.f32 %v1155_v21, %v910_v47  ;;  %v2620_v59 = vrot.slane %v6694_v49, 1  ;;  %v7456_v63 = vld [vmem:[#allocation2 + $0x90] sm:$0xff]   ;;  %v3175_v3 = vrot.slane %v3173_v35, 1  ;;  %v3176_v57 = vshll.u32 %v7446_v8, 16 }
 0x196   : > { %6263 = vmatmul.mubr.msk.bf16.gmra.mxu1 %vm606_vm0, %v1681_v5  ;;  %v868_v32 = vpop.f32.mrf.mxu0  ;;  %v3478_v44 = vsel %vm3475_vm6, %v3476_v60, %v3477_v46  ;;  %v3182_v47 = vshrl.u32 %v7456_v63, 16  ;;  %v3185_v2 = vshll.u32 %v7456_v63, 16  ;;  %v7480_v24 = vld [vmem:[#allocation2 + $0x8] sm:$0xff]   ;;  %v7490_v35 = vld [vmem:[#allocation2 + $0x10] sm:$0xff]  }
 0x197   : > { %6268 = vmatprep.mubr.msk.bf16.mxu1 %vm606_vm0, %v7135_v10  ;;  %v5936_v54 = vpack.c.bf16 %v1197_v22, %v1197_v22  ;;  %v2621_v28 = vsel %vm2149_vm3, %v2618_v26, %v2620_v59  ;;  %v3166_v10 = vrot.slane %v3164_v58, 1  ;;  %v7476_v26 = vld [vmem:[%s9020_s4 + $0x20] sm:$0xff]   ;;  %v3178_v21 = vrot.slane %v3176_v57, 2  ;;  %v6747_v22 = vld [vmem:[#allocation2 + $0x18] sm:$0xff]   ;;  %v6748_v32 = vld [vmem:[%s9020_s4 + $0x10] sm:$0xff]  }
 0x198   : > { %v7464_v56 = vld [vmem:[#allocation2 + $0x98] ss:$0 sps:$4 sm:$0x11]   ;;  %6376 = vmatprep.mubr.msk.bf16.mxu0 %vm606_vm0, %v2621_v28  ;;  %v3184_v49 = vrot.slane %v3182_v47, 1  ;;  %v3479_v58 = vrot.slane %v6747_v22, 2  ;;  %v6752_v22 = vld [vmem:[#allocation2 + $0x28] sm:$0xff]  }
 0x199   : > { %1405 = vst.msk [vmem:[#allocation2 + $0xa0] sm:$0x3] %vm1404_vm5, %v5936_v54  ;;  %6377 = vmatmul.mubr.msk.bf16.gmra.mxu0 %vm606_vm0, %v2620_v59  ;;  %v3170_v31 = vor.u32 %v3169_v40, %v3166_v10  ;;  %v3191_v5 = vshll.u32 %v7464_v56, 16  ;;  %v3187_v59 = vrot.slane %v3185_v2, 2  ;;  %v6750_v54 = vld [vmem:[#allocation2 + $0x20] sm:$0xff]   ;;  %v3179_v28 = vor.u32 %v3178_v21, %v3175_v3  ;;  %v7507_v2 = vld [vmem:[#allocation2 + $0x68] sm:$0xff]  }
 0x19a   : > { %6420 = vmatprep.mubr.msk.bf16.mxu0 %vm606_vm0, %v3478_v44  ;;  %v3481_v60 = vrot.slane %v6750_v54, 2  ;;  %v3480_v40 = vsel %vm3475_vm6, %v3477_v46, %v3479_v58  ;;  %v7509_v3 = vld [vmem:[#allocation2 + $0x70] sm:$0xff]   ;;  %v7515_v46 = vld [vmem:[#allocation2 + $0x80] sm:$0xff]  }
 0x19b   : > { %v7485_v20 = vsel %vm3028_vm4, %v3161_v13, %v3170_v31  ;;  %v3193_v14 = vrot.slane %v3191_v5, 2  ;;  %v3188_v10 = vor.u32 %v3187_v59, %v3184_v49  ;;  %v7496_v13 = vsel %vm3028_vm4, %v3170_v31, %v3179_v28  ;;  %v7513_v31 = vld [vmem:[#allocation2 + $0x78] sm:$0xff]   ;;  %v7517_v5 = vld [vmem:[#allocation2 + $0x88] sm:$0xff]   ;;  %v7519_v21 = vld [vmem:[#allocation2 + $0x90] sm:$0xff]  }
 0x19c   : > { %9030 = vst [vmem:[#allocation3_spill] sm:$0xff] %v7485_v20  ;;  %9031 = vst [vmem:[#allocation4_spill] sm:$0xff] %v7496_v13  ;;  %v3482_v47 = vsel %vm3475_vm6, %v3479_v58, %v3481_v60  ;;  %v7521_v49 = vld [vmem:[#allocation2 + $0x18] sm:$0xff]   ;;  %v3483_v58 = vrot.slane %v6752_v22, 2  ;;  %v7525_v59 = vld [vmem:[#allocation2 + $0x20] sm:$0xff]   ;;  %v3942_v54 = vrot.slane %v7509_v3, 2 }
 0x19d   : > { %v7500_v44 = vsel %vm3028_vm4, %v3179_v28, %v3188_v10  ;;  %v7503_v57 = vsel %vm3028_vm4, %v3188_v10, %v3193_v14  ;;  %v7530_v14 = vld [vmem:[#allocation2 + $0x98] sm:$0xff]   ;;  %v3944_v28 = vrot.slane %v7513_v31, 2  ;;  %v3946_v10 = vrot.slane %v7515_v46, 2 }
 0x19e   : > { %6269 = vmatmul.mubr.msk.bf16.vlgmr.msra.gmra.mxu1 %vm606_vm0, %v7480_v24  ;;  %9032 = vst [vmem:[#allocation5_spill] sm:$0xff] %v7500_v44  ;;  %9033 = vst [vmem:[#allocation6_spill] sm:$0xff] %v7503_v57  ;;  %v3950_v22 = vrot.slane %v7519_v21, 2 }
 0x19f   : > { %6305 = vmatpush3.bf16.msra.mxu1 %v6748_v32  ;;  %6272 = vmatprep.mubr.msk.bf16.mxu1 %vm606_vm0, %v7490_v35  ;;  %v9024_v32 = vrot.slane %v7507_v2, 2  ;;  %v7545_v57 = vsel %vm3475_vm6, %v3942_v54, %v3944_v28  ;;  %v7548_v44 = vsel %vm3475_vm6, %v3944_v28, %v3946_v10  ;;  %v3487_v28 = vrot.slane %v7237_v42, 2 }
 0x1a0   : > { %6380 = vmatprep.subr.bf16.mxu1 %v7476_v26  ;;  %9035 = vst [vmem:[#allocation8_spill] sm:$0xff] %v7548_v44  ;;  %v4715_v42 = vrot.slane %v7515_v46, 3 }
 0x1a1   : > { %6421 = vmatmul.mubr.msk.bf16.vlgmr.msra.gmra.mxu0 %vm606_vm0, %v3480_v40  ;;  %v3948_v40 = vrot.slane %v7517_v5, 2 }
 0x1a2   : > { %6424 = vmatprep.mubr.msk.bf16.mxu0 %vm606_vm0, %v3482_v47  ;;  %6495 = vmatpush3.bf16.msra.mxu0 %v7321_v27  ;;  %v3485_v27 = vrot.slane %v7220_v18, 2  ;;  %v7540_v47 = vsel %vm3475_vm6, %v9024_v32, %v3942_v54  ;;  %v3484_v18 = vsel %vm3475_vm6, %v3481_v60, %v3483_v58  ;;  %v7565_v54 = vld [vmem:[#allocation2 + $0x28] sm:$0xff]  }
 0x1a3   : > { %9034 = vst [vmem:[#allocation7_spill] sm:$0xff] %v7540_v47  ;;  %v7551_v13 = vsel %vm3475_vm6, %v3946_v10, %v3948_v40  ;;  %v7556_v32 = vsel %vm3475_vm6, %v3948_v40, %v3950_v22  ;;  %v9025_v47 = vrot.slane %v7530_v14, 2  ;;  %v7571_v10 = vld [vmem:[#allocation2 + $0x30] sm:$0xff]   ;;  %v4711_v40 = vrot.slane %v7509_v3, 3 }
 0x1a4   : > { %9036 = vst [vmem:[#allocation9_spill] sm:$0xff] %v7551_v13  ;;  %v3486_v20 = vsel %vm3475_vm6, %v3483_v58, %v3485_v27  ;;  %9037 = vst [vmem:[#allocation10_spill] sm:$0xff] %v7556_v32  ;;  %v3489_v58 = vrot.slane %v7256_v16, 2  ;;  %v7582_v16 = vld [vmem:[#allocation2 + $0xa0] ss:$0 sps:$4 sm:$0x33]  }
 0x1a5   : > { %v7563_v60 = vsel %vm3475_vm6, %v3950_v22, %v9025_v47  ;;  %v4713_v22 = vrot.slane %v7513_v31, 3  ;;  %v4717_v13 = vrot.slane %v7517_v5, 3 }
 0x1a6   : > { %6273 = vmatmul.mubr.msk.bf16.gmra.mxu1 %vm606_vm0, %v7521_v49  ;;  %9038 = vst [vmem:[#allocation11_spill] sm:$0xff] %v7563_v60  ;;  %v3490_v47 = vsel %vm3475_vm6, %v3487_v28, %v3489_v58 }
 0x1a7   : > { %6276 = vmatprep.mubr.msk.bf16.mxu1 %vm606_vm0, %v7525_v59  ;;  %v7590_v32 = vsel %vm4687_vm7, %v4711_v40, %v4713_v22  ;;  %v7600_v44 = vsel %vm4687_vm7, %v4715_v42, %v4717_v13 }
 0x1a8   : > { %9040 = vst [vmem:[#allocation13_spill] sm:$0xff] %v7590_v32  ;;  %9042 = vst [vmem:[#allocation15_spill] sm:$0xff] %v7600_v44 }
 0x1a9   : > { %6425 = vmatmul.mubr.msk.bf16.gmra.mxu0 %vm606_vm0, %v3484_v18  ;;  %v3488_v18 = vsel %vm3475_vm6, %v3485_v27, %v3487_v28  ;;  %v4719_v27 = vrot.slane %v7519_v21, 3  ;;  %v7596_v28 = vsel %vm4687_vm7, %v4713_v22, %v4715_v42  ;;  %v7613_v22 = vld [vmem:[#allocation2 + $0x40] sm:$0xff]   ;;  %v3493_v42 = vrot.slane %v7297_v38, 2 }
 0x1aa   : > { %6428 = vmatprep.mubr.msk.bf16.mxu0 %vm606_vm0, %v3486_v20  ;;  %v9026_v20 = vrot.slane %v7507_v2, 3  ;;  %9041 = vst [vmem:[#allocation14_spill] sm:$0xff] %v7596_v28  ;;  %v3497_v38 = vrot.slane %v7349_v11, 2 }
 0x1ac   : > { %v7587_v60 = vsel %vm4687_vm7, %v9026_v20, %v4711_v40  ;;  %v7603_v20 = vsel %vm4687_vm7, %v4717_v13, %v4719_v27  ;;  %v3491_v40 = vrot.slane %v7276_v34, 2  ;;  %v4723_v13 = vrot.slane %v7582_v16, 3 }
 0x1ad   : > { %9039 = vst [vmem:[#allocation12_spill] sm:$0xff] %v7587_v60  ;;  %9043 = vst [vmem:[#allocation16_spill] sm:$0xff] %v7603_v20  ;;  %v7605_v60 = vld [vmem:[#allocation2 + $0x38] sm:$0xff]  }
 0x1ae   : > { %6277 = vmatmul.mubr.msk.bf16.gmra.mxu1 %vm606_vm0, %v7565_v54  ;;  %v3492_v44 = vsel %vm3475_vm6, %v3489_v58, %v3491_v40  ;;  %v3494_v34 = vsel %vm3475_vm6, %v3491_v40, %v3493_v42  ;;  %v7657_v40 = vld [vmem:[#allocation2 + $0x18] sm:$0xff]  }
 0x1af   : > { %6280 = vmatprep.mubr.msk.bf16.mxu1 %vm606_vm0, %v7571_v10 }
 0x1b1   : > { %6429 = vmatmul.mubr.msk.bf16.gmra.mxu0 %vm606_vm0, %v3488_v18  ;;  %v4721_v18 = vrot.slane %v7530_v14, 3 }
 0x1b2   : > { %6432 = vmatprep.mubr.msk.bf16.mxu0 %vm606_vm0, %v3490_v47 }
 0x1b3   : > { %v7611_v47 = vsel %vm4687_vm7, %v4719_v27, %v4721_v18  ;;  %v7620_v20 = vsel %vm4687_vm7, %v4721_v18, %v4723_v13  ;;  %v3495_v27 = vrot.slane %v7326_v53, 2  ;;  %v3509_v13 = vrot.slane %v7456_v63, 2 }
 0x1b4   : > { %9044 = vst [vmem:[#allocation17_spill] sm:$0xff] %v7611_v47  ;;  %9045 = vst [vmem:[#allocation18_spill] sm:$0xff] %v7620_v20 }
 0x1b5   : > { %v3496_v18 = vsel %vm3475_vm6, %v3493_v42, %v3495_v27  ;;  %v3786_v42 = vld [vmem:[#allocation2 + $0x10] sm:$0xc] }
 0x1b6   : > { %6281 = vmatmul.mubr.msk.bf16.gmra.mxu1 %vm606_vm0, %v7605_v60 }
 0x1b7   : > { %6284 = vmatprep.mubr.msk.bf16.mxu1 %vm606_vm0, %v7613_v22 }
 0x1b9   : > { %6433 = vmatmul.mubr.msk.bf16.gmra.mxu0 %vm606_vm0, %v3492_v44  ;;  %v3498_v44 = vsel %vm3475_vm6, %v3495_v27, %v3497_v38  ;;  %v4246_v27 = vshrl.u32 %v7657_v40, 16 }
 0x1ba   : > { %6436 = vmatprep.mubr.msk.bf16.mxu0 %vm606_vm0, %v3494_v34  ;;  %v2142_v34 = vld [vmem:[#allocation2] sm:$0xe] }
 0x1be   : > { %6285 = vmatmul.mubr.msk.bf16.gmra.mxu1 %vm606_vm0, %v7254_v41  ;;  %v3499_v41 = vrot.slane %v7374_v7, 2 }
 0x1bf   : > { %6288 = vmatprep.mubr.msk.bf16.mxu1 %vm606_vm0, %v7274_v45  ;;  %v3501_v45 = vrot.slane %v7391_v0, 2  ;;  %v7653_v0 = vld [vmem:[#allocation2 + $0x14] sm:$0xf] }
 0x1c0   : > { %v3500_v53 = vsel %vm3475_vm6, %v3497_v38, %v3499_v41  ;;  %v4249_v38 = vshll.u32 %v7657_v40, 16 }
 0x1c1   : > { %6437 = vmatmul.mubr.msk.bf16.gmra.mxu0 %vm606_vm0, %v3496_v18  ;;  %v3502_v11 = vsel %vm3475_vm6, %v3499_v41, %v3501_v45  ;;  %v6758_v18 = vld [vmem:[#allocation2 + $0x4] sm:$0xf]  ;;  %v1441_v41 = vld [vmem:[#allocation2 + $0x8c] sm:$0x7] }
 0x1c2   : > { %6440 = vmatprep.mubr.msk.bf16.mxu0 %vm606_vm0, %v3498_v44  ;;  %v5652_v44 = vcombine.low %v2142_v34, %v6758_v18  ;;  %v5630_v34 = vcombine.low %v7423_v50, %v1441_v41  ;;  %v2153_v41 = vrot.slane %v7490_v35, 1  ;;  %v7704_v35 = vld [vmem:[%s9020_s4 + $0x30] sm:$0xff]  }
 0x1c4   : > { %v2150_v18 = vrot.slane %v5652_v44, 1 }
 0x1c6   : > { %6289 = vmatmul.mubr.msk.bf16.gmra.mxu1 %vm606_vm0, %v7295_v43  ;;  %v3503_v43 = vrot.slane %v7415_v29, 2  ;;  %v7661_v29 = vcombine.low %v3786_v42, %v7653_v0  ;;  %v7679_v42 = vld [vmem:[#allocation2 + $0x28] sm:$0xff]  }
 0x1c7   : > { %6292 = vmatprep.mubr.msk.bf16.mxu1 %vm606_vm0, %v7316_v1  ;;  %v3505_v1 = vrot.slane %v7444_v61, 2  ;;  %v3507_v61 = vrot.slane %v7446_v8, 2  ;;  %v2151_v8 = vrot.slane %v7480_v24, 1  ;;  %v4267_v50 = vshll.u32 %v7679_v42, 16 }
 0x1c8   : > { %v3504_v7 = vsel %vm3475_vm6, %v3501_v45, %v3503_v43  ;;  %v4238_v45 = vshrl.u32 %v7661_v29, 16 }
 0x1c9   : > { %6441 = vmatmul.mubr.msk.bf16.gmra.mxu0 %vm606_vm0, %v3500_v53  ;;  %v3506_v58 = vsel %vm3475_vm6, %v3503_v43, %v3505_v1  ;;  %v4241_v53 = vshll.u32 %v7661_v29, 16  ;;  %v7675_v43 = vld [vmem:[#allocation2 + $0x20] sm:$0xff]   ;;  %v3510_v63 = vsel %vm3475_vm6, %v3507_v61, %v3509_v13  ;;  %v2152_v24 = vsel %vm2149_vm3, %v2150_v18, %v2151_v8 }
 0x1ca   : > { %6444 = vmatprep.mubr.msk.bf16.mxu0 %vm606_vm0, %v3502_v11  ;;  %v3508_v11 = vsel %vm3475_vm6, %v3505_v1, %v3507_v61  ;;  %v4240_v20 = vrot.slane %v4238_v45, 2  ;;  %v3511_v1 = vrot.slane %v7464_v56, 2  ;;  %v4258_v61 = vshll.u32 %v7675_v43, 16 }
 0x1cb   : > { %v4243_v47 = vrot.slane %v4241_v53, 3  ;;  %v2155_v53 = vrot.slane %v7521_v49, 1  ;;  %v4269_v18 = vrot.slane %v4267_v50, 3  ;;  %v2154_v49 = vsel %vm2149_vm3, %v2151_v8, %v2153_v41 }
 0x1cc   : > { %v3512_v45 = vsel %vm3475_vm6, %v3509_v13, %v3511_v1  ;;  %v2157_v8 = vrot.slane %v7525_v59, 1 }
 0x1cd   : > { %v4244_v44 = vor.u32 %v4243_v47, %v4240_v20  ;;  %v2156_v20 = vsel %vm2149_vm3, %v2153_v41, %v2155_v53 }
 0x1ce   : > { %6293 = vmatmul.mubr.msk.bf16.gmra.mxu1 %vm606_vm0, %v7347_v23  ;;  %v2158_v59 = vsel %vm2149_vm3, %v2155_v53, %v2157_v8 }
 0x1cf   : > { %6296 = vmatprep.mubr.msk.bf16.mxu1 %vm606_vm0, %v7366_v4 }
 0x1d1   : > { %6445 = vmatmul.mubr.msk.bf16.gmra.mxu0 %vm606_vm0, %v3504_v7  ;;  %v4248_v7 = vrot.slane %v4246_v27, 2 }
 0x1d2   : > { %6448 = vmatprep.mubr.msk.bf16.mxu0 %vm606_vm0, %v3506_v58  ;;  %v4251_v58 = vrot.slane %v4249_v38, 3  ;;  %v4264_v38 = vshrl.u32 %v7679_v42, 16 }
 0x1d4   : > { %v4252_v27 = vor.u32 %v4251_v58, %v4248_v7  ;;  %v4266_v58 = vrot.slane %v4264_v38, 2 }
 0x1d6   : > { %6297 = vmatmul.mubr.msk.bf16.gmra.mxu1 %vm606_vm0, %v7389_v15  ;;  %v4253_v7 = vsel %vm4236_vm8, %v4244_v44, %v4252_v27  ;;  %v2159_v44 = vrot.slane %v7565_v54, 1 }
 0x1d7   : > { %6300 = vmatprep.mubr.msk.bf16.mxu1 %vm606_vm0, %v7407_v6 }
 0x1d8   : > { %v2160_v54 = vsel %vm2149_vm3, %v2157_v8, %v2159_v44 }
 0x1d9   : > { %6449 = vmatmul.mubr.msk.bf16.gmra.mxu0 %vm606_vm0, %v3508_v11  ;;  %v4255_v11 = vshrl.u32 %v7675_v43, 16 }
 0x1da   : > { %6452 = vmatprep.mubr.msk.bf16.mxu0 %vm606_vm0, %v3510_v63  ;;  %v4260_v63 = vrot.slane %v4258_v61, 3 }
 0x1db   : > { %v4257_v56 = vrot.slane %v4255_v11, 2  ;;  %v4270_v11 = vor.u32 %v4269_v18, %v4266_v58  ;;  %v7723_v58 = vld [vmem:[#allocation2 + $0x48] sm:$0xff]  }
 0x1dd   : > { %v4261_v47 = vor.u32 %v4260_v63, %v4257_v56  ;;  %v7719_v56 = vld [vmem:[#allocation2 + $0x40] sm:$0xff]  }
 0x1de   : > { %6301 = vmatmul.mubr.msk.bf16.gmra.mxu1 %vm606_vm0, %v5630_v34  ;;  %v7694_v34 = vld [vmem:[#allocation2 + $0x30] sm:$0xff]   ;;  %v4291_v18 = vshrl.u32 %v7719_v56, 16 }
 0x1df   : > { %6306 = vmatprep.mubr.msk.bf16.mxu1 %vm606_vm0, %v2152_v24  ;;  %v7698_v24 = vld [vmem:[#allocation2 + $0x38] sm:$0xff]   ;;  %v4273_v13 = vshrl.u32 %v7694_v34, 16  ;;  %v4276_v1 = vshll.u32 %v7694_v34, 16  ;;  %v4262_v50 = vsel %vm4236_vm8, %v4252_v27, %v4261_v47 }
 0x1e0   : > { %v4282_v61 = vshrl.u32 %v7698_v24, 16  ;;  %v4285_v38 = vshll.u32 %v7698_v24, 16 }
 0x1e1   : > { %6453 = vmatmul.mubr.msk.bf16.gmra.mxu0 %vm606_vm0, %v3512_v45  ;;  %v4275_v41 = vrot.slane %v4273_v13, 2  ;;  %v4278_v45 = vrot.slane %v4276_v1, 3  ;;  %v4303_v13 = vshll.u32 %v7723_v58, 16  ;;  %v2161_v1 = vrot.slane %v7571_v10, 1 }
 0x1e2   : > { %6496 = vmatprep.mubr.msk.bf16.mxu0 %vm606_vm0, %v4253_v7  ;;  %v4284_v63 = vrot.slane %v4282_v61, 2  ;;  %v4287_v7 = vrot.slane %v4285_v38, 3  ;;  %v2163_v61 = vrot.slane %v7605_v60, 1  ;;  %v4293_v38 = vrot.slane %v4291_v18, 2 }
 0x1e3   : > { %v4279_v27 = vor.u32 %v4278_v45, %v4275_v41  ;;  %v2162_v10 = vsel %vm2149_vm3, %v2159_v44, %v2161_v1  ;;  %v2165_v44 = vrot.slane %v7613_v22, 1 }
 0x1e4   : > { %v2164_v60 = vsel %vm2149_vm3, %v2161_v1, %v2163_v61 }
 0x1e5   : > { %v4280_v53 = vsel %vm4236_vm8, %v4270_v11, %v4279_v27  ;;  %v2166_v22 = vsel %vm2149_vm3, %v2163_v61, %v2165_v44 }
 0x1e6   : > { %6307 = vmatmul.mubr.msk.bf16.vlgmr.msra.gmra.mxu1 %vm606_vm0, %v2154_v49  ;;  %v4294_v49 = vshll.u32 %v7719_v56, 16 }
 0x1e7   : > { %6381 = vmatpush3.bf16.msra.mxu1 %v7476_v26  ;;  %6310 = vmatprep.mubr.msk.bf16.mxu1 %vm606_vm0, %v2156_v20  ;;  %v4271_v26 = vsel %vm4236_vm8, %v4261_v47, %v4270_v11  ;;  %v4288_v20 = vor.u32 %v4287_v7, %v4284_v63  ;;  %v4300_v47 = vshrl.u32 %v7723_v58, 16  ;;  %v7741_v63 = vld [vmem:[#allocation2 + $0x58] sm:$0xff]  }
 0x1e8   : > { %6456 = vmatprep.subr.bf16.mxu1 %v7704_v35  ;;  %v4296_v8 = vrot.slane %v4294_v49, 3  ;;  %9047 = vst [vmem:[#allocation20_spill] sm:$0xff] %v7741_v63  ;;  %v4321_v18 = vshll.u32 %v7741_v63, 16 }
 0x1e9   : > { %6497 = vmatmul.mubr.msk.bf16.vlgmr.msra.gmra.mxu0 %vm606_vm0, %v4262_v50  ;;  %v7737_v50 = vld [vmem:[#allocation2 + $0x50] sm:$0xff]   ;;  %v4289_v41 = vsel %vm4236_vm8, %v4279_v27, %v4288_v20  ;;  %v4302_v45 = vrot.slane %v4300_v47, 2  ;;  %v4318_v27 = vshrl.u32 %v7741_v63, 16 }
 0x1ea   : > { %6500 = vmatprep.mubr.msk.bf16.mxu0 %vm606_vm0, %v4271_v26  ;;  %9046 = vst [vmem:[#allocation19_spill] sm:$0xff] %v7737_v50  ;;  %v4305_v26 = vrot.slane %v4303_v13, 3  ;;  %v4297_v11 = vor.u32 %v4296_v8, %v4293_v38  ;;  %v4309_v7 = vshrl.u32 %v7737_v50, 16  ;;  %v6759_v13 = vld [vmem:[#allocation2 + $0x48] sm:$0xff]   ;;  %v7756_v8 = vld [vmem:[#allocation2 + $0x60] sm:$0xff]  }
 0x1eb   : > { %v7752_v49 = vpop.f32.mrf.mxu1  ;;  %v2167_v1 = vrot.slane %v6759_v13, 1  ;;  %9048 = vst [vmem:[#allocation21_spill] sm:$0xff] %v7756_v8  ;;  %v6760_v13 = vld [vmem:[#allocation2 + $0x50] sm:$0xff]  }
 0x1ec   : > { %v4298_v47 = vsel %vm4236_vm8, %v4288_v20, %v4297_v11  ;;  %v2169_v61 = vrot.slane %v6760_v13, 1 }
 0x1ed   : > { %v2168_v20 = vsel %vm2149_vm3, %v2165_v44, %v2167_v1 }
 0x1ee   : > { %6311 = vmatmul.mubr.msk.bf16.gmra.mxu1 %vm606_vm0, %v2158_v59  ;;  %v4312_v59 = vshll.u32 %v7737_v50, 16  ;;  %v2170_v32 = vsel %vm2149_vm3, %v2167_v1, %v2169_v61 }
 0x1ef   : > { %6314 = vmatprep.mubr.msk.bf16.mxu1 %vm606_vm0, %v2160_v54  ;;  %v4306_v54 = vor.u32 %v4305_v26, %v4302_v45  ;;  %v4320_v45 = vrot.slane %v4318_v27, 2  ;;  %v4323_v26 = vrot.slane %v4321_v18, 3  ;;  %v4336_v27 = vshrl.u32 %v7507_v2, 16 }
 0x1f0   : > { %v4314_v38 = vrot.slane %v4312_v59, 3  ;;  %v4330_v59 = vshll.u32 %v7756_v8, 16  ;;  %v4339_v18 = vshll.u32 %v7507_v2, 16 }
 0x1f1   : > { %6501 = vmatmul.mubr.msk.bf16.gmra.mxu0 %vm606_vm0, %v4280_v53  ;;  %v4311_v53 = vrot.slane %v4309_v7, 2  ;;  %v4327_v7 = vshrl.u32 %v7756_v8, 16 }
 0x1f2   : > { %6504 = vmatprep.mubr.msk.bf16.mxu0 %vm606_vm0, %v4289_v41  ;;  %v4307_v41 = vsel %vm4236_vm8, %v4297_v11, %v4306_v54  ;;  %v4324_v11 = vor.u32 %v4323_v26, %v4320_v45  ;;  %v4341_v45 = vrot.slane %v4339_v18, 3  ;;  %v6762_v18 = vld [vmem:[#allocation2 + $0x60] sm:$0xff]  }
 0x1f3   : > { %v2173_v1 = vrot.slane %v6762_v18, 1 }
 0x1f6   : > { %6315 = vmatmul.mubr.msk.bf16.gmra.mxu1 %vm606_vm0, %v2162_v10  ;;  %v7761_v10 = vpop.f32.mrf.mxu1 }
 0x1f7   : > { %6318 = vmatprep.mubr.msk.bf16.mxu1 %vm606_vm0, %v2164_v60  ;;  %v4315_v60 = vor.u32 %v4314_v38, %v4311_v53  ;;  %v4329_v53 = vrot.slane %v4327_v7, 2  ;;  %v4332_v38 = vrot.slane %v4330_v59, 3  ;;  %v4345_v7 = vshrl.u32 %v7509_v3, 16 }
 0x1f8   : > { %v4348_v59 = vshll.u32 %v7509_v3, 16 }
 0x1f9   : > { %6505 = vmatmul.mubr.msk.bf16.gmra.mxu0 %vm606_vm0, %v4298_v47  ;;  %v7771_v47 = vpop.f32.mrf.mxu1  ;;  %v4325_v28 = vsel %vm4236_vm8, %v4315_v60, %v4324_v11  ;;  %v4333_v13 = vor.u32 %v4332_v38, %v4329_v53 }
 0x1fa   : > { %6508 = vmatprep.mubr.msk.bf16.mxu0 %vm606_vm0, %v4307_v41  ;;  %v4316_v41 = vsel %vm4236_vm8, %v4306_v54, %v4315_v60  ;;  %v4350_v53 = vrot.slane %v4348_v59, 3 }
 0x1fb   : > { %v7777_v26 = vpop.f32.mrf.mxu1 }
 0x1fe   : > { %6319 = vmatmul.mubr.msk.bf16.gmra.mxu1 %vm606_vm0, %v2166_v22  ;;  %v6761_v22 = vld [vmem:[#allocation2 + $0x58] sm:$0xff]  }
 0x1ff   : > { %6322 = vmatprep.mubr.msk.bf16.mxu1 %vm606_vm0, %v2168_v20  ;;  %v2171_v44 = vrot.slane %v6761_v22, 1  ;;  %v4338_v20 = vrot.slane %v4336_v27, 2  ;;  %v4357_v27 = vshll.u32 %v7513_v31, 16  ;;  %v4347_v22 = vrot.slane %v4345_v7, 2 }
 0x200   : > { %v4366_v7 = vshll.u32 %v7515_v46, 16 }
 0x201   : > { %6509 = vmatmul.mubr.msk.bf16.gmra.mxu0 %vm606_vm0, %v4316_v41  ;;  %v2172_v54 = vsel %vm2149_vm3, %v2169_v61, %v2171_v44  ;;  %v7784_v41 = vpop.f32.mrf.mxu1  ;;  %v4342_v60 = vor.u32 %v4341_v45, %v4338_v20  ;;  %v2175_v61 = vrot.slane %v7347_v23, 1  ;;  %v4359_v20 = vrot.slane %v4357_v27, 3 }
 0x202   : > { %6512 = vmatprep.mubr.msk.bf16.mxu0 %vm606_vm0, %v4325_v28  ;;  %v4354_v28 = vshrl.u32 %v7513_v31, 16  ;;  %v2174_v31 = vsel %vm2149_vm3, %v2171_v44, %v2173_v1  ;;  %v4351_v45 = vor.u32 %v4350_v53, %v4347_v22  ;;  %v4363_v23 = vshrl.u32 %v7515_v46, 16 }
 0x203   : > { %v7791_v38 = vpop.f32.mrf.mxu1  ;;  %v4343_v3 = vsel %vm4236_vm8, %v4333_v13, %v4342_v60  ;;  %v4375_v27 = vshll.u32 %v7517_v5, 16  ;;  %v2177_v44 = vrot.slane %v7366_v4, 1  ;;  %v4368_v22 = vrot.slane %v4366_v7, 3 }
 0x204   : > { %v4352_v18 = vsel %vm4236_vm8, %v4342_v60, %v4351_v45  ;;  %v4393_v7 = vshll.u32 %v7530_v14, 16 }
 0x205   : > { %v7801_v59 = vpop.f32.mrf.mxu1  ;;  %v2178_v4 = vsel %vm2149_vm3, %v2175_v61, %v2177_v44 }
 0x206   : > { %6323 = vmatmul.mubr.msk.bf16.gmra.mxu1 %vm606_vm0, %v2170_v32  ;;  %v4334_v32 = vsel %vm4236_vm8, %v4324_v11, %v4333_v13  ;;  %v2176_v11 = vsel %vm2149_vm3, %v2173_v1, %v2175_v61  ;;  %v2179_v1 = vrot.slane %v7389_v15, 1  ;;  %v2181_v61 = vrot.slane %v7407_v6, 1 }
 0x207   : > { %6326 = vmatprep.mubr.msk.bf16.mxu1 %vm606_vm0, %v2172_v54  ;;  %v4356_v54 = vrot.slane %v4354_v28, 2  ;;  %v4372_v28 = vshrl.u32 %v7517_v5, 16  ;;  %v7809_v53 = vpop.f32.mrf.mxu1 }
 0x208   : > { %v2180_v15 = vsel %vm2149_vm3, %v2177_v44, %v2179_v1  ;;  %v2182_v6 = vsel %vm2149_vm3, %v2179_v1, %v2181_v61 }
 0x209   : > { %6513 = vmatmul.mubr.msk.bf16.gmra.mxu0 %vm606_vm0, %v4334_v32  ;;  %v4360_v13 = vor.u32 %v4359_v20, %v4356_v54  ;;  %v4365_v32 = vrot.slane %v4363_v23, 2  ;;  %v4377_v54 = vrot.slane %v4375_v27, 3  ;;  %v7814_v20 = vpop.f32.mrf.mxu0  ;;  %v4390_v23 = vshrl.u32 %v7530_v14, 16 }
 0x20a   : > { %6516 = vmatprep.mubr.msk.bf16.mxu0 %vm606_vm0, %v4343_v3  ;;  %v4374_v3 = vrot.slane %v4372_v28, 2 }
 0x20b   : > { %v4361_v46 = vsel %vm4236_vm8, %v4351_v45, %v4360_v13  ;;  %v7816_v5 = vpop.f32.mrf.mxu1  ;;  %v4369_v60 = vor.u32 %v4368_v22, %v4365_v32  ;;  %v7826_v28 = vpop.f32.mrf.mxu0 }
 0x20c   : > { %v4378_v45 = vor.u32 %v4377_v54, %v4374_v3  ;;  %v4395_v3 = vrot.slane %v4393_v7, 3 }
 0x20d   : > { %v7828_v27 = vpop.f32.mrf.mxu1  ;;  %v4370_v44 = vsel %vm4236_vm8, %v4360_v13, %v4369_v60  ;;  %v7836_v54 = vpop.f32.mrf.mxu0 }
 0x20e   : > { %6327 = vmatmul.mubr.msk.bf16.gmra.mxu1 %vm606_vm0, %v2174_v31  ;;  %v4381_v31 = vshrl.u32 %v7519_v21, 16 }
 0x20f   : > { %6330 = vmatprep.mubr.msk.bf16.mxu1 %vm606_vm0, %v2176_v11  ;;  %v4384_v11 = vshll.u32 %v7519_v21, 16  ;;  %v4379_v21 = vsel %vm4236_vm8, %v4369_v60, %v4378_v45 }
 0x210   : > { %v4383_v32 = vrot.slane %v4381_v31, 2  ;;  %v4402_v31 = vshll.u32 %v7582_v16, 16 }
 0x211   : > { %6517 = vmatmul.mubr.msk.bf16.gmra.mxu0 %vm606_vm0, %v4352_v18  ;;  %v2183_v18 = vrot.slane %v7434_v48, 1  ;;  %v4386_v22 = vrot.slane %v4384_v11, 3  ;;  %v7846_v11 = vpop.f32.mrf.mxu0 }
 0x212   : > { %6520 = vmatprep.mubr.msk.bf16.mxu0 %vm606_vm0, %v4361_v46  ;;  %v4392_v46 = vrot.slane %v4390_v23, 2  ;;  %v4404_v1 = vrot.slane %v4402_v31, 3 }
 0x213   : > { %v2184_v48 = vsel %vm2149_vm3, %v2181_v61, %v2183_v18  ;;  %v4387_v13 = vor.u32 %v4386_v22, %v4383_v32 }
 0x214   : > { %v4396_v60 = vor.u32 %v4395_v3, %v4392_v46 }
 0x215   : > { %v4388_v7 = vsel %vm4236_vm8, %v4378_v45, %v4387_v13 }
 0x216   : > { %6331 = vmatmul.mubr.msk.bf16.gmra.mxu1 %vm606_vm0, %v2178_v4  ;;  %v7838_v4 = vpop.f32.mrf.mxu1  ;;  %v4397_v61 = vsel %vm4236_vm8, %v4387_v13, %v4396_v60 }
 0x217   : > { %6334 = vmatprep.mubr.msk.bf16.mxu1 %vm606_vm0, %v2180_v15  ;;  %v4399_v15 = vshrl.u32 %v7582_v16, 16  ;;  %v7856_v16 = vpop.f32.mrf.mxu0 }
 0x218   : > { %v7848_v23 = vpop.f32.mrf.mxu1  ;;  %9049 = vst [vmem:[#allocation22_spill] sm:$0xff] %v7856_v16 }
 0x219   : > { %6521 = vmatmul.mubr.msk.bf16.gmra.mxu0 %vm606_vm0, %v4370_v44  ;;  %v4401_v44 = vrot.slane %v4399_v15, 2  ;;  %v7863_v45 = vpop.f32.mrf.mxu0 }
 0x21a   : > { %6524 = vmatprep.mubr.msk.bf16.mxu0 %vm606_vm0, %v4379_v21  ;;  %9050 = vst [vmem:[#allocation23_spill] sm:$0xff] %v7863_v45  ;;  %v9087_v45 = vld [vmem:[#allocation5_spill] sm:$0xff] }
 0x21b   : > { %v7851_v21 = vpop.f32.mrf.mxu1  ;;  %v4405_v32 = vor.u32 %v4404_v1, %v4401_v44 }
 0x21d   : > { %v7859_v22 = vpop.f32.mrf.mxu1  ;;  %v4406_v46 = vsel %vm4236_vm8, %v4396_v60, %v4405_v32 }
 0x21e   : > { %6335 = vmatmul.mubr.msk.bf16.gmra.mxu1 %vm606_vm0, %v2182_v6  ;;  %v7872_v6 = vld [vmem:[%s9020_s4 + $0x40] sm:$0xff]  }
 0x21f   : > { %6338 = vmatprep.mubr.msk.bf16.mxu1 %vm606_vm0, %v2184_v48  ;;  %v7866_v3 = vpop.f32.mrf.mxu1 }
 0x221   : > { %6525 = vmatmul.mubr.msk.bf16.gmra.mxu0 %vm606_vm0, %v4388_v7  ;;  %v7878_v48 = vpop.f32.mrf.mxu1 }
 0x222   : > { %6528 = vmatprep.mubr.msk.bf16.mxu0 %vm606_vm0, %v4397_v61  ;;  %9052 = vst [vmem:[#allocation25_spill] sm:$0xff] %v7878_v48 }
 0x226   : > { %6339 = vmatmul.mubr.msk.bf16.gmra.mxu1 %vm606_vm0, %v2183_v18  ;;  %v7874_v18 = vpop.f32.mrf.mxu0 }
 0x227   : > { %6382 = vmatprep.mubr.msk.bf16.mxu1 %vm606_vm0, %v7186_v17  ;;  %9051 = vst [vmem:[#allocation24_spill] sm:$0xff] %v7874_v18 }
 0x228   : > { %v7884_v17 = vpop.f32.mrf.mxu0 }
 0x229   : > { %6529 = vmatmul.mubr.msk.bf16.gmra.mxu0 %vm606_vm0, %v4406_v46  ;;  %9053 = vst [vmem:[#allocation26_spill] sm:$0xff] %v7884_v17 }
 0x22a   : > { %v7888_v15 = vpop.f32.mrf.mxu0 }
 0x22b   : > { %v7886_v13 = vpop.f32.mrf.mxu1  ;;  %9055 = vst [vmem:[#allocation28_spill] sm:$0xff] %v7888_v15 }
 0x22c   : > { %9054 = vst [vmem:[#allocation27_spill] sm:$0xff] %v7886_v13  ;;  %v3934_v13 = vrot.slane %v7737_v50, 2 }
 0x22d   : > { %v7890_v31 = vpop.f32.mrf.mxu1 }
 0x22e   : > { %6383 = vmatmul.mubr.msk.bf16.vlgmr.msra.gmra.mxu1 %vm606_vm0, %v7202_v36  ;;  %9056 = vst [vmem:[#allocation29_spill] sm:$0xff] %v7890_v31  ;;  %v7894_v36 = vpop.f32.mrf.mxu0 }
 0x22f   : > { %6457 = vmatpush3.bf16.msra.mxu1 %v7704_v35  ;;  %6386 = vmatprep.mubr.msk.bf16.mxu1 %vm606_vm0, %v7215_v39  ;;  %9057 = vst [vmem:[#allocation30_spill] sm:$0xff] %v7894_v36  ;;  %v7898_v35 = vpop.f32.mrf.mxu1 }
 0x230   : > { %6532 = vmatprep.subr.bf16.mxu1 %v7872_v6  ;;  %9058 = vst [vmem:[#allocation31_spill] sm:$0xff] %v7898_v35  ;;  %v7900_v39 = vpop.f32.mrf.mxu0 }
 0x231   : > { %9059 = vst [vmem:[#allocation32_spill] sm:$0xff] %v7900_v39  ;;  %v7902_v60 = vpop.f32.mrf.mxu1 }
 0x232   : > { %9060 = vst [vmem:[#allocation33_spill] sm:$0xff] %v7902_v60  ;;  %v7906_v7 = vpop.f32.mrf.mxu0 }
 0x233   : > { %9061 = vst [vmem:[#allocation34_spill] sm:$0xff] %v7906_v7 }
 0x236   : > { %6387 = vmatmul.mubr.msk.bf16.gmra.mxu1 %vm606_vm0, %v7232_v9  ;;  %v7912_v9 = vpop.f32.mrf.mxu0 }
 0x237   : > { %6390 = vmatprep.mubr.msk.bf16.mxu1 %vm606_vm0, %v7249_v30  ;;  %9063 = vst [vmem:[#allocation36_spill] sm:$0xff] %v7912_v9 }
 0x238   : > { %v7916_v30 = vpop.f32.mrf.mxu0 }
 0x239   : > { %9065 = vst [vmem:[#allocation38_spill] sm:$0xff] %v7916_v30 }
 0x23b   : > { %v7908_v44 = vpop.f32.mrf.mxu1 }
 0x23c   : > { %9062 = vst [vmem:[#allocation35_spill] sm:$0xff] %v7908_v44  ;;  %v3930_v44 = vrot.slane %v7719_v56, 2 }
 0x23d   : > { %v7914_v1 = vpop.f32.mrf.mxu1 }
 0x23e   : > { %6391 = vmatmul.mubr.msk.bf16.gmra.mxu1 %vm606_vm0, %v7269_v19  ;;  %9064 = vst [vmem:[#allocation37_spill] sm:$0xff] %v7914_v1  ;;  %v7924_v19 = vpop.f32.mrf.mxu0 }
 0x23f   : > { %6394 = vmatprep.mubr.msk.bf16.mxu1 %vm606_vm0, %v7290_v25  ;;  %v7920_v61 = vpop.f32.mrf.mxu1  ;;  %9067 = vst [vmem:[#allocation40_spill] sm:$0xff] %v7924_v19 }
 0x240   : > { %9066 = vst [vmem:[#allocation39_spill] sm:$0xff] %v7920_v61  ;;  %v7928_v46 = vpop.f32.mrf.mxu0 }
 0x241   : > { %v7926_v32 = vpop.f32.mrf.mxu1  ;;  %9069 = vst [vmem:[#allocation42_spill] sm:$0xff] %v7928_v46 }
 0x242   : > { %9068 = vst [vmem:[#allocation41_spill] sm:$0xff] %v7926_v32  ;;  %v7934_v30 = vpop.f32.mrf.mxu0 }
 0x243   : > { %9071 = vst [vmem:[#allocation44_spill] sm:$0xff] %v7934_v30 }
 0x246   : > { %6395 = vmatmul.mubr.msk.bf16.gmra.mxu1 %vm606_vm0, %v7311_v12 }
 0x247   : > { %6398 = vmatprep.mubr.msk.bf16.mxu1 %vm606_vm0, %v7341_v51  ;;  %v7942_v51 = vpop.f32.mrf.mxu0 }
 0x248   : > { %9074 = vst [vmem:[#allocation47_spill] sm:$0xff] %v7942_v51 }
 0x249   : > { %v7950_v46 = vpop.f32.mrf.mxu0 }
 0x24a   : > { %9077 = vst [vmem:[#allocation50_spill] sm:$0xff] %v7950_v46 }
 0x24b   : > { %v7930_v25 = vpop.f32.mrf.mxu1 }
 0x24c   : > { %9070 = vst [vmem:[#allocation43_spill] sm:$0xff] %v7930_v25 }
 0x24d   : > { %v7936_v9 = vpop.f32.mrf.mxu1 }
 0x24e   : > { %6399 = vmatmul.mubr.msk.bf16.gmra.mxu1 %vm606_vm0, %v7369_v37  ;;  %9072 = vst [vmem:[#allocation45_spill] sm:$0xff] %v7936_v9 }
 0x24f   : > { %6402 = vmatprep.mubr.msk.bf16.mxu1 %vm606_vm0, %v7383_v33  ;;  %v7940_v12 = vpop.f32.mrf.mxu1  ;;  %v7958_v33 = vpop.f32.mrf.mxu0 }
 0x250   : > { %9073 = vst [vmem:[#allocation46_spill] sm:$0xff] %v7940_v12  ;;  %9080 = vst [vmem:[#allocation53_spill] sm:$0xff] %v7958_v33  ;;  %v3924_v12 = vrot.slane %v7679_v42, 2 }
 0x251   : > { %v7944_v19 = vpop.f32.mrf.mxu1  ;;  %v7962_v51 = vpop.f32.mrf.mxu0 }
 0x252   : > { %9075 = vst [vmem:[#allocation48_spill] sm:$0xff] %v7944_v19  ;;  %9082 = vst [vmem:[#allocation55_spill] sm:$0xff] %v7962_v51  ;;  %v9086_v51 = vld [vmem:[#allocation4_spill] sm:$0xff]  ;;  %v3922_v19 = vrot.slane %v7675_v43, 2 }
 0x256   : > { %v7946_v7 = vpop.f32.mrf.mxu1  ;;  %6403 = vmatmul.mubr.msk.bf16.gmra.mxu1 %vm606_vm0, %v7410_v62  ;;  %v9083_v62 = vld [vmem:[#allocation3_spill] sm:$0xff] }
 0x257   : > { %9076 = vst [vmem:[#allocation49_spill] sm:$0xff] %v7946_v7  ;;  %6406 = vmatprep.mubr.msk.bf16.mxu1 %vm606_vm0, %v7428_v55  ;;  %v7972_v55 = vpop.f32.mrf.mxu0 }
 0x258   : > { %v7954_v37 = vpop.f32.mrf.mxu1  ;;  %9084 = vst [vmem:[#allocation3_spill] sm:$0xff] %v7972_v55  ;;  %v3920_v55 = vrot.slane %v7657_v40, 2 }
 0x259   : > { %9078 = vst [vmem:[#allocation51_spill] sm:$0xff] %v7954_v37  ;;  %v7978_v33 = vpop.f32.mrf.mxu0 }
 0x25a   : > { %v7956_v30 = vpop.f32.mrf.mxu1  ;;  %9085 = vst [vmem:[#allocation56_spill] sm:$0xff] %v7978_v33  ;;  %v3919_v33 = vrot.slane %v7661_v29, 2 }
 0x25b   : > { %9079 = vst [vmem:[#allocation52_spill] sm:$0xff] %v7956_v30 }
 0x25c   : > { %v7960_v39 = vpop.f32.mrf.mxu1 }
 0x25d   : > { %9081 = vst [vmem:[#allocation54_spill] sm:$0xff] %v7960_v39 }
 0x25e   : > { %v7964_v36 = vpop.f32.mrf.mxu1  ;;  %6407 = vmatmul.mubr.msk.bf16.gmra.mxu1 %vm606_vm0, %v7460_v52 }
 0x25f   : > { %6410 = vmatprep.mubr.msk.bf16.mxu1 %vm606_vm0, %v9083_v62  ;;  %v7988_v62 = vpop.f32.mrf.mxu0 }
 0x260   : > { %v7970_v46 = vpop.f32.mrf.mxu1  ;;  %9088 = vst [vmem:[#allocation4_spill] sm:$0xff] %v7988_v62 }
 0x261   : > { %v7993_v39 = vpop.f32.mrf.mxu0 }
 0x262   : > { %v7974_v15 = vpop.f32.mrf.mxu1  ;;  %9089 = vst [vmem:[#allocation5_spill] sm:$0xff] %v7993_v39 }
 0x263   : > { %v8003_v7 = vpop.f32.mrf.mxu0 }
 0x264   : > { %v7976_v17 = vpop.f32.mrf.mxu1 }
 0x265   : > { %v8012_v29 = vpop.f32.mrf.mxu0 }
 0x266   : > { %v7980_v18 = vpop.f32.mrf.mxu1  ;;  %6411 = vmatmul.mubr.msk.bf16.gmra.mxu1 %vm606_vm0, %v9086_v51  ;;  %v9090_v51 = vld [vmem:[#allocation6_spill] sm:$0xff]  ;;  %9092 = vst [vmem:[#allocation57_spill] sm:$0xff] %v8012_v29  ;;  %v3926_v29 = vrot.slane %v7694_v34, 2 }
 0x267   : > { %6414 = vmatprep.mubr.msk.bf16.mxu1 %vm606_vm0, %v9087_v45  ;;  %v3921_v45 = vsel %vm3475_vm6, %v3919_v33, %v3920_v55  ;;  %9091 = vst [vmem:[#allocation6_spill] sm:$0xff] %v8003_v7  ;;  %v3925_v33 = vsel %vm3475_vm6, %v3922_v19, %v3924_v12 }
 0x268   : > { %v7986_v52 = vpop.f32.mrf.mxu1 }
 0x26a   : > { %v7990_v16 = vpop.f32.mrf.mxu1 }
 0x26c   : > { %v7995_v30 = vpop.f32.mrf.mxu1 }
 0x26e   : > { %v7998_v37 = vpop.f32.mrf.mxu1  ;;  %6415 = vmatmul.mubr.msk.bf16.gmra.mxu1 %vm606_vm0, %v9090_v51  ;;  %v3923_v51 = vsel %vm3475_vm6, %v3920_v55, %v3922_v19  ;;  %v3928_v55 = vrot.slane %v7698_v24, 2  ;;  %v3927_v19 = vsel %vm3475_vm6, %v3924_v12, %v3926_v29 }
 0x26f   : > { %6458 = vmatprep.mubr.msk.bf16.mxu1 %vm606_vm0, %v3921_v45  ;;  %v8021_v45 = vpop.f32.mrf.mxu0 }
 0x270   : > { %v8006_v62 = vpop.f32.mrf.mxu1  ;;  %9093 = vst [vmem:[#allocation58_spill] sm:$0xff] %v8021_v45 }
 0x271   : > { %v8027_v32 = vpop.f32.mrf.mxu0 }
 0x272   : > { %v8009_v39 = vpop.f32.mrf.mxu1  ;;  %9094 = vst [vmem:[#allocation59_spill] sm:$0xff] %v8027_v32 }
 0x274   : > { %v8014_v9 = vpop.f32.mrf.mxu1 }
 0x276   : > { %v8017_v25 = vpop.f32.mrf.mxu1  ;;  %6459 = vmatmul.mubr.msk.bf16.vlgmr.msra.gmra.mxu1 %vm606_vm0, %v3923_v51  ;;  %v8035_v51 = vpop.f32.mrf.mxu0 }
 0x277   : > { %6533 = vmatpush3.bf16.msra.mxu1 %v7872_v6  ;;  %6462 = vmatprep.mubr.msk.bf16.mxu1 %vm606_vm0, %v3925_v33  ;;  %9095 = vst [vmem:[#allocation60_spill] sm:$0xff] %v8035_v51  ;;  %v3929_v6 = vsel %vm3475_vm6, %v3926_v29, %v3928_v55  ;;  %v3932_v51 = vrot.slane %v7723_v58, 2 }
 0x278   : > { %v8025_v7 = vpop.f32.mrf.mxu1  ;;  %v8045_v32 = vpop.f32.mrf.mxu0 }
 0x279   : > { %9096 = vst [vmem:[#allocation61_spill] sm:$0xff] %v8045_v32  ;;  %v3933_v29 = vsel %vm3475_vm6, %v3930_v44, %v3932_v51 }
 0x27a   : > { %v8030_v61 = vpop.f32.mrf.mxu1  ;;  %v8053_v12 = vpop.f32.mrf.mxu0 }
 0x27b   : > { %9098 = vst [vmem:[#allocation63_spill] sm:$0xff] %v8053_v12  ;;  %v3936_v12 = vrot.slane %v7741_v63, 2  ;;  %v3938_v63 = vrot.slane %v7756_v8, 2 }
 0x27c   : > { %v8033_v1 = vpop.f32.mrf.mxu1 }
 0x27e   : > { %v8038_v45 = vpop.f32.mrf.mxu1  ;;  %6463 = vmatmul.mubr.msk.bf16.gmra.mxu1 %vm606_vm0, %v3927_v19  ;;  %v3931_v19 = vsel %vm3475_vm6, %v3928_v55, %v3930_v44  ;;  %v3937_v44 = vsel %vm3475_vm6, %v3934_v13, %v3936_v12 }
 0x27f   : > { %6466 = vmatprep.mubr.msk.bf16.mxu1 %vm606_vm0, %v3929_v6  ;;  %v8060_v6 = vpop.f32.mrf.mxu0 }
 0x280   : > { %v8043_v33 = vpop.f32.mrf.mxu1  ;;  %9100 = vst [vmem:[#allocation65_spill] sm:$0xff] %v8060_v6 }
 0x282   : > { %v8048_v60 = vpop.f32.mrf.mxu1 }
 0x284   : > { %v8051_v35 = vpop.f32.mrf.mxu1 }
 0x285   : > { %9097 = vst [vmem:[#allocation62_spill] sm:$0xff] %v8051_v35  ;;  %v8069_v35 = vpop.f32.mrf.mxu0 }
 0x286   : > { %v8056_v31 = vpop.f32.mrf.mxu1  ;;  %6467 = vmatmul.mubr.msk.bf16.gmra.mxu1 %vm606_vm0, %v3931_v19  ;;  %9101 = vst [vmem:[#allocation66_spill] sm:$0xff] %v8069_v35  ;;  %v3935_v19 = vsel %vm3475_vm6, %v3932_v51, %v3934_v13  ;;  %v3939_v51 = vsel %vm3475_vm6, %v3936_v12, %v3938_v63  ;;  %v9108_v13 = vrot.slane %v7507_v2, 2 }
 0x287   : > { %9099 = vst [vmem:[#allocation64_spill] sm:$0xff] %v8056_v31  ;;  %6470 = vmatprep.mubr.msk.bf16.mxu1 %vm606_vm0, %v3933_v29  ;;  %v8078_v29 = vpop.f32.mrf.mxu0 }
 0x288   : > { %v8063_v32 = vpop.f32.mrf.mxu1  ;;  %9104 = vst [vmem:[#allocation69_spill] sm:$0xff] %v8078_v29 }
 0x289   : > { %v8086_v35 = vpop.f32.mrf.mxu0 }
 0x28a   : > { %v8066_v48 = vpop.f32.mrf.mxu1  ;;  %9105 = vst [vmem:[#allocation70_spill] sm:$0xff] %v8086_v35 }
 0x28c   : > { %v8071_v55 = vpop.f32.mrf.mxu1 }
 0x28d   : > { %9102 = vst [vmem:[#allocation67_spill] sm:$0xff] %v8071_v55 }
 0x28e   : > { %v8074_v31 = vpop.f32.mrf.mxu1  ;;  %6471 = vmatmul.mubr.msk.bf16.gmra.mxu1 %vm606_vm0, %v3935_v19  ;;  %v3941_v19 = vsel %vm3475_vm6, %v3938_v63, %v9108_v13 }
 0x28f   : > { %9103 = vst [vmem:[#allocation68_spill] sm:$0xff] %v8074_v31  ;;  %6474 = vmatprep.mubr.msk.bf16.mxu1 %vm606_vm0, %v3937_v44  ;;  %v8097_v44 = vpop.f32.mrf.mxu0 }
 0x290   : > { %v8081_v6 = vpop.f32.mrf.mxu1  ;;  %9109 = vst [vmem:[#allocation73_spill] sm:$0xff] %v8097_v44 }
 0x291   : > { %v8104_v35 = vpop.f32.mrf.mxu0 }
 0x292   : > { %v8084_v50 = vpop.f32.mrf.mxu1  ;;  %9110 = vst [vmem:[#allocation74_spill] sm:$0xff] %v8104_v35  ;;  %v2008_v35 = vadd.f32 %v7964_v36, %v7814_v20  ;;  %v2003_v36 = vadd.f32 %v7976_v17, %v7846_v11  ;;  %v9124_v17 = vld [vmem:[#allocation11_spill] sm:$0xff] }
 0x294   : > { %v8088_v55 = vpop.f32.mrf.mxu1 }
 0x295   : > { %9106 = vst [vmem:[#allocation71_spill] sm:$0xff] %v8088_v55 }
 0x296   : > { %v8091_v31 = vpop.f32.mrf.mxu1  ;;  %6475 = vmatmul.mubr.msk.bf16.gmra.mxu1 %vm606_vm0, %v3939_v51  ;;  %v8112_v51 = vpop.f32.mrf.mxu0 }
 0x297   : > { %9107 = vst [vmem:[#allocation72_spill] sm:$0xff] %v8091_v31  ;;  %6478 = vmatprep.mubr.msk.bf16.mxu1 %vm606_vm0, %v3941_v19  ;;  %v9113_v31 = vld [vmem:[#allocation7_spill] sm:$0xff] }
 0x298   : > { %v8100_v29 = vpop.f32.mrf.mxu1  ;;  %9114 = vst [vmem:[#allocation7_spill] sm:$0xff] %v8112_v51  ;;  %v8120_v19 = vpop.f32.mrf.mxu0 }
 0x299   : > { %9117 = vst [vmem:[#allocation79_spill] sm:$0xff] %v8120_v19 }
 0x29a   : > { %v8102_v8 = vpop.f32.mrf.mxu1  ;;  %v8130_v51 = vpop.f32.mrf.mxu0 }
 0x29c   : > { %v8106_v55 = vpop.f32.mrf.mxu1 }
 0x29d   : > { %9111 = vst [vmem:[#allocation75_spill] sm:$0xff] %v8106_v55  ;;  %v9119_v55 = vld [vmem:[#allocation8_spill] sm:$0xff] }
 0x29e   : > { %v8108_v12 = vpop.f32.mrf.mxu1  ;;  %6479 = vmatmul.mubr.msk.bf16.gmra.mxu1 %vm606_vm0, %v9113_v31  ;;  %v2000_v31 = vadd.f32 %v7970_v46, %v7826_v28  ;;  %9120 = vst [vmem:[#allocation8_spill] sm:$0xff] %v8130_v51 }
 0x29f   : > { %9112 = vst [vmem:[#allocation76_spill] sm:$0xff] %v8108_v12  ;;  %6482 = vmatprep.mubr.msk.bf16.mxu1 %vm606_vm0, %v7545_v57 }
 0x2a0   : > { %v8116_v63 = vpop.f32.mrf.mxu1 }
 0x2a1   : > { %9115 = vst [vmem:[#allocation77_spill] sm:$0xff] %v8116_v63  ;;  %v9122_v63 = vld [vmem:[#allocation9_spill] sm:$0xff] }
 0x2a2   : > { %v8118_v13 = vpop.f32.mrf.mxu1 }
 0x2a3   : > { %9116 = vst [vmem:[#allocation78_spill] sm:$0xff] %v8118_v13 }
 0x2a4   : > { %v8122_v44 = vpop.f32.mrf.mxu1 }
 0x2a5   : > { %9118 = vst [vmem:[#allocation80_spill] sm:$0xff] %v8122_v44  ;;  %v2011_v44 = vadd.f32 %v7974_v15, %v7836_v54  ;;  %v2016_v54 = vadd.f32 %v7986_v52, %v7761_v10  ;;  %v4689_v10 = vrot.slane %v7657_v40, 3 }
 0x2a6   : > { %v6308_v12 = vpop.f32.mrf.mxu1  ;;  %6483 = vmatmul.mubr.msk.bf16.gmra.mxu1 %vm606_vm0, %v9119_v55  ;;  %v8142_v55 = vpop.f32.mrf.mxu0 }
 0x2a7   : > { %v8132_v57 = vadd.f32 %v6308_v12, %v2008_v35  ;;  %6486 = vmatprep.mubr.msk.bf16.mxu1 %vm606_vm0, %v9122_v63  ;;  %v2024_v35 = vadd.f32 %v7980_v18, %v7752_v49  ;;  %v6741_v63 = vld [vmem:[#allocation2 + $0xa0] ss:$0 sps:$4 sm:$0x11]   ;;  %v2027_v18 = vadd.f32 %v7990_v16, %v7771_v47  ;;  %v9125_v47 = vrot.slane %v7530_v14, 2 }
 0x2a8   : > { %v2279_v19 = vpop.f32.mrf.mxu1  ;;  %v8154_v15 = vpop.f32.mrf.mxu0  ;;  %v2043_v14 = vadd.f32 %v8009_v39, %v7801_v59 }
 0x2a9   : > { %9121 = vst [vmem:[#allocation81_spill] sm:$0xff] %v8132_v57  ;;  %v8138_v13 = vadd.f32 %v2279_v19, %v2000_v31  ;;  %v9123_v57 = vld [vmem:[#allocation10_spill] sm:$0xff] }
 0x2aa   : > { %v6309_v20 = vpop.f32.mrf.mxu1  ;;  %v8166_v52 = vpop.f32.mrf.mxu0 }
 0x2ab   : > { %v8144_v28 = vadd.f32 %v6309_v20, %v2011_v44  ;;  %v4680_v44 = vld [vmem:[#allocation2 + $0x10] sm:$0x8] }
 0x2ac   : > { %v2282_v46 = vpop.f32.mrf.mxu1  ;;  %v5837_v49 = vcombine.low %v4680_v44, %v7653_v0  ;;  %v2040_v0 = vadd.f32 %v7998_v37, %v7784_v41  ;;  %v4691_v44 = vrot.slane %v7675_v43, 3 }
 0x2ad   : > { %v8148_v12 = vadd.f32 %v2282_v46, %v2003_v36 }
 0x2ae   : > { %v6312_v51 = vpop.f32.mrf.mxu1  ;;  %6487 = vmatmul.mubr.msk.bf16.gmra.mxu1 %vm606_vm0, %v9123_v57  ;;  %v3954_v57 = vrot.slane %v6741_v63, 2  ;;  %v4692_v59 = vsel %vm4687_vm7, %v4689_v10, %v4691_v44 }
 0x2af   : > { %v8156_v11 = vadd.f32 %v6312_v51, %v2024_v35  ;;  %6490 = vmatprep.mubr.msk.bf16.mxu1 %vm606_vm0, %v9124_v17  ;;  %v2019_v51 = vadd.f32 %v7995_v30, %v7777_v26  ;;  %v4688_v35 = vrot.slane %v5837_v49, 3  ;;  %v2032_v26 = vadd.f32 %v8006_v62, %v7791_v38 }
 0x2b0   : > { %v2295_v19 = vpop.f32.mrf.mxu1  ;;  %v3955_v16 = vsel %vm3475_vm6, %v9125_v47, %v3954_v57  ;;  %v4693_v49 = vrot.slane %v7679_v42, 3  ;;  %v2035_v38 = vadd.f32 %v8014_v9, %v7809_v53  ;;  %v2048_v53 = vadd.f32 %v8025_v7, %v7828_v27 }
 0x2b1   : > { %v8163_v31 = vadd.f32 %v2295_v19, %v2016_v54  ;;  %v4690_v40 = vsel %vm4687_vm7, %v4688_v35, %v4689_v10  ;;  %v8181_v54 = vpop.f32.mrf.mxu0  ;;  %v4695_v10 = vrot.slane %v7694_v34, 3  ;;  %v2051_v27 = vadd.f32 %v8033_v1, %v7848_v23 }
 0x2b2   : > { %v6313_v20 = vpop.f32.mrf.mxu1  ;;  %v4694_v43 = vsel %vm4687_vm7, %v4691_v44, %v4693_v49  ;;  %v2064_v23 = vadd.f32 %v8043_v33, %v7859_v22  ;;  %v4701_v44 = vrot.slane %v7723_v58, 3 }
 0x2b3   : > { %v8170_v36 = vadd.f32 %v6313_v20, %v2027_v18  ;;  %v8194_v18 = vpop.f32.mrf.mxu0  ;;  %v2056_v20 = vadd.f32 %v8017_v25, %v7816_v5  ;;  %v2059_v5 = vadd.f32 %v8030_v61, %v7838_v4  ;;  %v4696_v4 = vsel %vm4687_vm7, %v4693_v49, %v4695_v10  ;;  %v9126_v49 = vld [vmem:[#allocation25_spill] sm:$0xff] }
 0x2b4   : > { %v2298_v46 = vpop.f32.mrf.mxu1 }
 0x2b5   : > { %v8174_v17 = vadd.f32 %v2298_v46, %v2019_v51  ;;  %v8207_v42 = vpop.f32.mrf.mxu0 }
 0x2b6   : > { %v6316_v63 = vpop.f32.mrf.mxu1  ;;  %6491 = vmatmul.mubr.msk.bf16.gmra.mxu1 %vm606_vm0, %v3955_v16 }
 0x2b7   : > { %v8185_v30 = vadd.f32 %v6316_v63, %v2040_v0  ;;  %6534 = vmatprep.mubr.msk.bf16.mxu1 %vm606_vm0, %v4690_v40  ;;  %v4697_v0 = vrot.slane %v7698_v24, 3  ;;  %v8220_v47 = vpop.f32.mrf.mxu0  ;;  %v2072_v63 = vadd.f32 %v8038_v45, %v7851_v21  ;;  %v2075_v21 = vadd.f32 %v8048_v60, %v7866_v3 }
 0x2b8   : > { %v2311_v41 = vpop.f32.mrf.mxu1 }
 0x2b9   : > { %v8190_v37 = vadd.f32 %v2311_v41, %v2032_v26  ;;  %v4698_v34 = vsel %vm4687_vm7, %v4695_v10, %v4697_v0  ;;  %v8233_v24 = vpop.f32.mrf.mxu0  ;;  %v4699_v41 = vrot.slane %v7719_v56, 3 }
 0x2ba   : > { %v6317_v19 = vpop.f32.mrf.mxu1 }
 0x2bb   : > { %v8198_v62 = vadd.f32 %v6317_v19, %v2043_v14  ;;  %v8246_v19 = vpop.f32.mrf.mxu0  ;;  %v4700_v3 = vsel %vm4687_vm7, %v4697_v0, %v4699_v41  ;;  %v4702_v56 = vsel %vm4687_vm7, %v4699_v41, %v4701_v44  ;;  %v9132_v0 = vld [vmem:[#allocation19_spill] sm:$0xff] }
 0x2bc   : > { %v2314_v57 = vpop.f32.mrf.mxu1 }
 0x2bd   : > { %v8202_v51 = vadd.f32 %v2314_v57, %v2035_v38  ;;  %v9127_v38 = vld [vmem:[#allocation62_spill] sm:$0xff]  ;;  %v8259_v58 = vpop.f32.mrf.mxu0 }
 0x2be   : > { %v6320_v39 = vpop.f32.mrf.mxu1  ;;  %6535 = vmatmul.mubr.msk.bf16.vlgmr.msra.gmra.mxu1 %vm606_vm0, %v4692_v59  ;;  %v2067_v22 = vadd.f32 %v9127_v38, %v9126_v49  ;;  %v9129_v59 = vld [vmem:[#allocation64_spill] sm:$0xff]  ;;  %v9136_v49 = vld [vmem:[#allocation35_spill] sm:$0xff] }
 0x2bf   : > { %v8211_v9 = vadd.f32 %v6320_v39, %v2056_v20  ;;  %6538 = vmatprep.mubr.msk.bf16.mxu1 %vm606_vm0, %v4694_v43  ;;  %v9128_v20 = vld [vmem:[#allocation27_spill] sm:$0xff]  ;;  %v9137_v38 = vld [vmem:[#allocation68_spill] sm:$0xff] }
 0x2c0   : > { %v2327_v46 = vpop.f32.mrf.mxu1  ;;  %v2088_v39 = vadd.f32 %v9129_v59, %v9128_v20 }
 0x2c1   : > { %v8216_v25 = vadd.f32 %v2327_v46, %v2048_v53  ;;  %v9130_v53 = vld [vmem:[#allocation29_spill] sm:$0xff] }
 0x2c2   : > { %v6321_v35 = vpop.f32.mrf.mxu1  ;;  %v2080_v46 = vadd.f32 %v8063_v32, %v9130_v53 }
 0x2c3   : > { %v8224_v7 = vadd.f32 %v6321_v35, %v2059_v5  ;;  %v9131_v35 = vld [vmem:[#allocation31_spill] sm:$0xff] }
 0x2c4   : > { %v2330_v16 = vpop.f32.mrf.mxu1 }
 0x2c5   : > { %v8228_v40 = vadd.f32 %v2330_v16, %v2051_v27  ;;  %v2091_v27 = vadd.f32 %v8066_v48, %v9131_v35 }
 0x2c6   : > { %v6324_v61 = vpop.f32.mrf.mxu1  ;;  %6539 = vmatmul.mubr.msk.bf16.gmra.mxu1 %vm606_vm0, %v4696_v4 }
 0x2c7   : > { %v8237_v1 = vadd.f32 %v6324_v61, %v2072_v63  ;;  %6542 = vmatprep.mubr.msk.bf16.mxu1 %vm606_vm0, %v4698_v34  ;;  %v4703_v63 = vrot.slane %v9132_v0, 3  ;;  %v9133_v61 = vld [vmem:[#allocation20_spill] sm:$0xff] }
 0x2c8   : > { %v2343_v26 = vpop.f32.mrf.mxu1  ;;  %v4705_v34 = vrot.slane %v9133_v61, 3  ;;  %v9142_v61 = vld [vmem:[#allocation71_spill] sm:$0xff] }
 0x2c9   : > { %v8242_v45 = vadd.f32 %v2343_v26, %v2064_v23  ;;  %v8272_v23 = vpop.f32.mrf.mxu0  ;;  %v9134_v26 = vld [vmem:[#allocation33_spill] sm:$0xff]  ;;  %v4704_v48 = vsel %vm4687_vm7, %v4701_v44, %v4703_v63 }
 0x2ca   : > { %v6325_v14 = vpop.f32.mrf.mxu1  ;;  %v4706_v59 = vsel %vm4687_vm7, %v4703_v63, %v4705_v34  ;;  %v9140_v44 = vld [vmem:[#allocation21_spill] sm:$0xff] }
 0x2cb   : > { %v8250_v33 = vadd.f32 %v6325_v14, %v2075_v21  ;;  %v9135_v21 = vld [vmem:[#allocation67_spill] sm:$0xff]  ;;  %v9141_v63 = vld [vmem:[#allocation41_spill] sm:$0xff] }
 0x2cc   : > { %v2346_v57 = vpop.f32.mrf.mxu1  ;;  %v2083_v32 = vadd.f32 %v9135_v21, %v9134_v26  ;;  %v2099_v26 = vadd.f32 %v9142_v61, %v9141_v63 }
 0x2cd   : > { %v8254_v43 = vadd.f32 %v2346_v57, %v2067_v22  ;;  %v2104_v22 = vadd.f32 %v9137_v38, %v9136_v49 }
 0x2ce   : > { %v6328_v60 = vpop.f32.mrf.mxu1  ;;  %6543 = vmatmul.mubr.msk.bf16.gmra.mxu1 %vm606_vm0, %v4700_v3  ;;  %v9138_v3 = vld [vmem:[#allocation37_spill] sm:$0xff] }
 0x2cf   : > { %v8263_v5 = vadd.f32 %v6328_v60, %v2088_v39  ;;  %6546 = vmatprep.mubr.msk.bf16.mxu1 %vm606_vm0, %v4702_v56  ;;  %v8285_v39 = vpop.f32.mrf.mxu0  ;;  %v2096_v60 = vadd.f32 %v8081_v6, %v9138_v3  ;;  %v9147_v3 = vld [vmem:[#allocation45_spill] sm:$0xff] }
 0x2d0   : > { %v2359_v10 = vpop.f32.mrf.mxu1 }
 0x2d1   : > { %v8268_v16 = vadd.f32 %v2359_v10, %v2080_v46  ;;  %v9139_v46 = vld [vmem:[#allocation39_spill] sm:$0xff] }
 0x2d2   : > { %v6329_v4 = vpop.f32.mrf.mxu1  ;;  %v2107_v10 = vadd.f32 %v8084_v50, %v9139_v46 }
 0x2d3   : > { %v8276_v41 = vadd.f32 %v6329_v4, %v2091_v27  ;;  %v4707_v27 = vrot.slane %v9140_v44, 3  ;;  %v8297_v4 = vpop.f32.mrf.mxu0 }
 0x2d4   : > { %v2362_v14 = vpop.f32.mrf.mxu1 }
 0x2d5   : > { %v8280_v57 = vadd.f32 %v2362_v14, %v2083_v32  ;;  %v9143_v32 = vld [vmem:[#allocation43_spill] sm:$0xff]  ;;  %v9144_v14 = vld [vmem:[#allocation72_spill] sm:$0xff]  ;;  %v4708_v50 = vsel %vm4687_vm7, %v4705_v34, %v4707_v27 }
 0x2d6   : > { %v6332_v20 = vpop.f32.mrf.mxu1  ;;  %6547 = vmatmul.mubr.msk.bf16.gmra.mxu1 %vm606_vm0, %v4704_v48  ;;  %v2120_v49 = vadd.f32 %v9144_v14, %v9143_v32  ;;  %v9145_v48 = vrot.slane %v7507_v2, 3  ;;  %v9150_v2 = vld [vmem:[#allocation48_spill] sm:$0xff] }
 0x2d7   : > { %v8289_v56 = vadd.f32 %v6332_v20, %v2104_v22  ;;  %6550 = vmatprep.mubr.msk.bf16.mxu1 %vm606_vm0, %v4706_v59  ;;  %v8312_v59 = vpop.f32.mrf.mxu0  ;;  %v9153_v32 = vld [vmem:[#allocation76_spill] sm:$0xff] }
 0x2d8   : > { %v2375_v53 = vpop.f32.mrf.mxu1  ;;  %v4710_v20 = vsel %vm4687_vm7, %v4707_v27, %v9145_v48  ;;  %9146 = vst [vmem:[#allocation9_spill] sm:$0xff] %v8312_v59  ;;  %v9151_v27 = vld [vmem:[#allocation75_spill] sm:$0xff]  ;;  %v9165_v59 = vld [vmem:[#allocation14_spill] sm:$0xff] }
 0x2d9   : > { %v8294_v35 = vadd.f32 %v2375_v53, %v2096_v60  ;;  %v2112_v60 = vadd.f32 %v8100_v29, %v9147_v3  ;;  %v8323_v63 = vpop.f32.mrf.mxu0  ;;  %v2115_v61 = vadd.f32 %v9151_v27, %v9150_v2  ;;  %v9152_v29 = vld [vmem:[#allocation49_spill] sm:$0xff]  ;;  %v9156_v48 = vld [vmem:[#allocation51_spill] sm:$0xff] }
 0x2da   : > { %v6333_v0 = vpop.f32.mrf.mxu1  ;;  %9149 = vst [vmem:[#allocation10_spill] sm:$0xff] %v8323_v63  ;;  %v2136_v14 = vadd.f32 %v9153_v32, %v9152_v29  ;;  %v9161_v29 = vld [vmem:[#allocation54_spill] sm:$0xff]  ;;  %v9162_v32 = vld [vmem:[#allocation80_spill] sm:$0xff] }
 0x2db   : > { %v8301_v21 = vadd.f32 %v6333_v0, %v2107_v10  ;;  %v9148_v10 = vld [vmem:[#allocation46_spill] sm:$0xff] }
 0x2dc   : > { %v2378_v6 = vpop.f32.mrf.mxu1  ;;  %v2123_v34 = vadd.f32 %v8102_v8, %v9148_v10  ;;  %v8335_v8 = vpop.f32.mrf.mxu0 }
 0x2dd   : > { %v8305_v38 = vadd.f32 %v2378_v6, %v2099_v26  ;;  %9155 = vst [vmem:[#allocation11_spill] sm:$0xff] %v8335_v8 }
 0x2de   : > { %v6336_v22 = vpop.f32.mrf.mxu1  ;;  %6551 = vmatmul.mubr.msk.bf16.gmra.mxu1 %vm606_vm0, %v4708_v50 }
 0x2df   : > { %v8316_v53 = vadd.f32 %v6336_v22, %v2120_v49  ;;  %6554 = vmatprep.mubr.msk.bf16.mxu1 %vm606_vm0, %v4710_v20  ;;  %v9154_v22 = vld [vmem:[#allocation12_spill] sm:$0xff]  ;;  %v9157_v20 = vld [vmem:[#allocation77_spill] sm:$0xff] }
 0x2e0   : > { %v2391_v46 = vpop.f32.mrf.mxu1  ;;  %v2128_v3 = vadd.f32 %v9157_v20, %v9156_v48  ;;  %v9164_v20 = vld [vmem:[#allocation22_spill] sm:$0xff] }
 0x2e1   : > { %v8321_v44 = vadd.f32 %v2391_v46, %v2112_v60  ;;  %v9158_v46 = vld [vmem:[#allocation13_spill] sm:$0xff] }
 0x2e2   : > { %v6337_v0 = vpop.f32.mrf.mxu1 }
 0x2e3   : > { %v8327_v26 = vadd.f32 %v6337_v0, %v2123_v34  ;;  %v9159_v34 = vld [vmem:[#allocation52_spill] sm:$0xff]  ;;  %v9160_v0 = vld [vmem:[#allocation78_spill] sm:$0xff] }
 0x2e4   : > { %v2394_v6 = vpop.f32.mrf.mxu1  ;;  %v2139_v2 = vadd.f32 %v9160_v0, %v9159_v34  ;;  %v9167_v34 = vld [vmem:[#allocation15_spill] sm:$0xff] }
 0x2e5   : > { %v8331_v49 = vadd.f32 %v2394_v6, %v2115_v61  ;;  %v8347_v6 = vpop.f32.mrf.mxu0  ;;  %v9168_v0 = vld [vmem:[#allocation23_spill] sm:$0xff] }
 0x2e6   : > { %v6340_v50 = vpop.f32.mrf.mxu1  ;;  %6555 = vmatmul.mubr.msk.bf16.gmra.mxu1 %vm606_vm0, %v9154_v22  ;;  %v2131_v22 = vadd.f32 %v9162_v32, %v9161_v29  ;;  %v9169_v32 = vld [vmem:[#allocation24_spill] sm:$0xff] }
 0x2e7   : > { %v8339_v60 = vadd.f32 %v6340_v50, %v2136_v14  ;;  %6558 = vmatprep.mubr.msk.bf16.mxu1 %vm606_vm0, %v9158_v46  ;;  %v9163_v50 = vld [vmem:[#allocation81_spill] sm:$0xff] }
 0x2e8   : > { %v2407_v10 = vpop.f32.mrf.mxu1  ;;  %v2861_v46 = vadd.f32 %v9164_v20, %v9163_v50 }
 0x2e9   : > { %v8345_v27 = vadd.f32 %v2407_v10, %v2128_v3  ;;  %v8359_v3 = vpop.f32.mrf.mxu0 }
 0x2ea   : > { %v6341_v61 = vpop.f32.mrf.mxu1  ;;  %9166 = vst [vmem:[#allocation25_spill] sm:$0xff] %v8359_v3 }
 0x2eb   : > { %v8351_v8 = vadd.f32 %v6341_v61, %v2139_v2  ;;  %v2859_v2 = vadd.f32 %v9168_v0, %v8138_v13  ;;  %v8371_v50 = vpop.f32.mrf.mxu0 }
 0x2ec   : > { %v2410_v48 = vpop.f32.mrf.mxu1  ;;  %9170 = vst [vmem:[#allocation62_spill] sm:$0xff] %v8371_v50 }
 0x2ed   : > { %v8353_v14 = vadd.f32 %v2410_v48, %v2131_v22  ;;  %v2862_v22 = vadd.f32 %v9169_v32, %v8144_v28  ;;  %v9175_v32 = vld [vmem:[#allocation17_spill] sm:$0xff] }
 0x2ee   : > { %v6384_v63 = vpop.f32.mrf.mxu1  ;;  %6559 = vmatmul.mubr.msk.bf16.gmra.mxu1 %vm606_vm0, %v9165_v59 }
 0x2ef   : > { %v8361_v10 = vadd.f32 %v6384_v63, %v2861_v46  ;;  %6562 = vmatprep.mubr.msk.bf16.mxu1 %vm606_vm0, %v9167_v34  ;;  %v9171_v63 = vld [vmem:[#allocation26_spill] sm:$0xff]  ;;  %v9172_v34 = vld [vmem:[#allocation28_spill] sm:$0xff] }
 0x2f0   : > { %v3289_v61 = vpop.f32.mrf.mxu1  ;;  %v2860_v20 = vadd.f32 %v9171_v63, %v8148_v12  ;;  %v2865_v13 = vadd.f32 %v9172_v34, %v8156_v11 }
 0x2f1   : > { %v8367_v29 = vadd.f32 %v3289_v61, %v2859_v2  ;;  %v9173_v2 = vld [vmem:[#allocation16_spill] sm:$0xff]  ;;  %v8383_v61 = vpop.f32.mrf.mxu0 }
 0x2f2   : > { %v6385_v48 = vpop.f32.mrf.mxu1  ;;  %9174 = vst [vmem:[#allocation27_spill] sm:$0xff] %v8383_v61 }
 0x2f3   : > { %v8373_v59 = vadd.f32 %v6385_v48, %v2862_v22  ;;  %v9176_v22 = vld [vmem:[#allocation30_spill] sm:$0xff]  ;;  %v8395_v34 = vpop.f32.mrf.mxu0 }
 0x2f4   : > { %v3292_v46 = vpop.f32.mrf.mxu1  ;;  %v2863_v12 = vadd.f32 %v9176_v22, %v8163_v31  ;;  %9178 = vst [vmem:[#allocation64_spill] sm:$0xff] %v8395_v34 }
 0x2f5   : > { %v8377_v3 = vadd.f32 %v3292_v46, %v2860_v20  ;;  %v9177_v20 = vld [vmem:[#allocation32_spill] sm:$0xff] }
 0x2f6   : > { %v6388_v0 = vpop.f32.mrf.mxu1  ;;  %6563 = vmatmul.mubr.msk.bf16.gmra.mxu1 %vm606_vm0, %v9173_v2  ;;  %v2866_v11 = vadd.f32 %v9177_v20, %v8170_v36  ;;  %v9183_v20 = vld [vmem:[#allocation38_spill] sm:$0xff] }
 0x2f7   : > { %v8385_v28 = vadd.f32 %v6388_v0, %v2865_v13  ;;  %6566 = vmatprep.mubr.msk.bf16.mxu1 %vm606_vm0, %v9175_v32  ;;  %v9179_v13 = vld [vmem:[#allocation34_spill] sm:$0xff]  ;;  %v9180_v32 = vld [vmem:[#allocation36_spill] sm:$0xff] }
 0x2f8   : > { %v3305_v48 = vpop.f32.mrf.mxu1  ;;  %v2864_v0 = vadd.f32 %v9179_v13, %v8174_v17  ;;  %v2869_v31 = vadd.f32 %v9180_v32, %v8185_v30  ;;  %v9184_v17 = vld [vmem:[#allocation40_spill] sm:$0xff]  ;;  %v9186_v32 = vld [vmem:[#allocation42_spill] sm:$0xff] }
 0x2f9   : > { %v8391_v63 = vadd.f32 %v3305_v48, %v2863_v12  ;;  %v9181_v12 = vld [vmem:[#allocation18_spill] sm:$0xff]  ;;  %v8407_v48 = vpop.f32.mrf.mxu0 }
 0x2fa   : > { %v6389_v46 = vpop.f32.mrf.mxu1  ;;  %9182 = vst [vmem:[#allocation29_spill] sm:$0xff] %v8407_v48 }
 0x2fb   : > { %v8397_v2 = vadd.f32 %v6389_v46, %v2866_v11  ;;  %v2867_v11 = vadd.f32 %v9183_v20, %v8190_v37 }
 0x2fc   : > { %v3308_v61 = vpop.f32.mrf.mxu1 }
 0x2fd   : > { %v8401_v50 = vadd.f32 %v3308_v61, %v2864_v0  ;;  %v2870_v61 = vadd.f32 %v9184_v17, %v8198_v62  ;;  %v8417_v0 = vpop.f32.mrf.mxu0  ;;  %v9189_v62 = vld [vmem:[#allocation47_spill] sm:$0xff] }
 0x2fe   : > { %v6392_v22 = vpop.f32.mrf.mxu1  ;;  %6567 = vmatmul.mubr.msk.bf16.gmra.mxu1 %vm606_vm0, %v9181_v12  ;;  %9185 = vst [vmem:[#allocation31_spill] sm:$0xff] %v8417_v0  ;;  %v2868_v12 = vadd.f32 %v9186_v32, %v8202_v51  ;;  %v2871_v17 = vadd.f32 %v9189_v62, %v8216_v25 }
 0x2ff   : > { %v8409_v36 = vadd.f32 %v6392_v22, %v2869_v31  ;;  %v9187_v22 = vld [vmem:[#allocation44_spill] sm:$0xff] }
 0x300   : > { %v3321_v46 = vpop.f32.mrf.mxu1  ;;  %v2873_v37 = vadd.f32 %v9187_v22, %v8211_v9  ;;  %v9192_v9 = vld [vmem:[#allocation53_spill] sm:$0xff] }
 0x301   : > { %v8413_v34 = vadd.f32 %v3321_v46, %v2867_v11  ;;  %v8427_v11 = vpop.f32.mrf.mxu0  ;;  %v2872_v22 = vadd.f32 %v9192_v9, %v8228_v40 }
 0x302   : > { %v6393_v13 = vpop.f32.mrf.mxu1  ;;  %9188 = vst [vmem:[#allocation19_spill] sm:$0xff] %v8427_v11 }
 0x303   : > { %v8419_v30 = vadd.f32 %v6393_v13, %v2870_v61  ;;  %v9190_v13 = vld [vmem:[#allocation50_spill] sm:$0xff] }
 0x304   : > { %v3324_v48 = vpop.f32.mrf.mxu1  ;;  %v2874_v51 = vadd.f32 %v9190_v13, %v8224_v7  ;;  %v9195_v7 = vld [vmem:[#allocation3_spill] sm:$0xff] }
 0x305   : > { %v8423_v31 = vadd.f32 %v3324_v48, %v2868_v12  ;;  %v8437_v48 = vpop.f32.mrf.mxu0  ;;  %v2875_v13 = vadd.f32 %v9195_v7, %v8242_v45 }
 0x306   : > { %v6396_v20 = vpop.f32.mrf.mxu1  ;;  %9191 = vst [vmem:[#allocation20_spill] sm:$0xff] %v8437_v48 }
 0x307   : > { %v8429_v46 = vadd.f32 %v6396_v20, %v2873_v37  ;;  %v9193_v20 = vld [vmem:[#allocation55_spill] sm:$0xff] }
 0x308   : > { %v3337_v0 = vpop.f32.mrf.mxu1  ;;  %v2877_v25 = vadd.f32 %v9193_v20, %v8237_v1  ;;  %v9198_v1 = vld [vmem:[#allocation4_spill] sm:$0xff] }
 0x309   : > { %v8433_v61 = vadd.f32 %v3337_v0, %v2871_v17  ;;  %v8447_v0 = vpop.f32.mrf.mxu0  ;;  %v2876_v20 = vadd.f32 %v9198_v1, %v8254_v43 }
 0x30a   : > { %v6397_v32 = vpop.f32.mrf.mxu1  ;;  %9194 = vst [vmem:[#allocation33_spill] sm:$0xff] %v8447_v0 }
 0x30b   : > { %v8439_v12 = vadd.f32 %v6397_v32, %v2874_v51  ;;  %v9196_v32 = vld [vmem:[#allocation56_spill] sm:$0xff] }
 0x30c   : > { %v3340_v11 = vpop.f32.mrf.mxu1  ;;  %v2878_v40 = vadd.f32 %v9196_v32, %v8250_v33  ;;  %v9201_v33 = vld [vmem:[#allocation6_spill] sm:$0xff] }
 0x30d   : > { %v8443_v37 = vadd.f32 %v3340_v11, %v2872_v22  ;;  %v8457_v11 = vpop.f32.mrf.mxu0  ;;  %v2879_v32 = vadd.f32 %v9201_v33, %v8268_v16 }
 0x30e   : > { %v6400_v62 = vpop.f32.mrf.mxu1  ;;  %9197 = vst [vmem:[#allocation67_spill] sm:$0xff] %v8457_v11 }
 0x30f   : > { %v8449_v17 = vadd.f32 %v6400_v62, %v2877_v25  ;;  %v9199_v62 = vld [vmem:[#allocation5_spill] sm:$0xff] }
 0x310   : > { %v3353_v48 = vpop.f32.mrf.mxu1  ;;  %v2881_v45 = vadd.f32 %v9199_v62, %v8263_v5  ;;  %v9204_v5 = vld [vmem:[#allocation58_spill] sm:$0xff] }
 0x311   : > { %v8453_v51 = vadd.f32 %v3353_v48, %v2875_v13  ;;  %v8467_v48 = vpop.f32.mrf.mxu0  ;;  %v2880_v62 = vadd.f32 %v9204_v5, %v8280_v57 }
 0x312   : > { %v6401_v9 = vpop.f32.mrf.mxu1  ;;  %9200 = vst [vmem:[#allocation35_spill] sm:$0xff] %v8467_v48 }
 0x313   : > { %v8459_v22 = vadd.f32 %v6401_v9, %v2878_v40  ;;  %v9202_v9 = vld [vmem:[#allocation57_spill] sm:$0xff] }
 0x314   : > { %v3356_v0 = vpop.f32.mrf.mxu1  ;;  %v2882_v43 = vadd.f32 %v9202_v9, %v8276_v41  ;;  %v9207_v41 = vld [vmem:[#allocation60_spill] sm:$0xff] }
 0x315   : > { %v8463_v25 = vadd.f32 %v3356_v0, %v2876_v20  ;;  %v8477_v0 = vpop.f32.mrf.mxu0  ;;  %v2883_v9 = vadd.f32 %v9207_v41, %v8294_v35 }
 0x316   : > { %v6404_v7 = vpop.f32.mrf.mxu1  ;;  %9203 = vst [vmem:[#allocation68_spill] sm:$0xff] %v8477_v0 }
 0x317   : > { %v8469_v13 = vadd.f32 %v6404_v7, %v2881_v45  ;;  %v9205_v7 = vld [vmem:[#allocation59_spill] sm:$0xff] }
 0x318   : > { %v3369_v11 = vpop.f32.mrf.mxu1  ;;  %v2885_v16 = vadd.f32 %v9205_v7, %v8289_v56  ;;  %v9210_v56 = vld [vmem:[#allocation63_spill] sm:$0xff] }
 0x319   : > { %v8473_v40 = vadd.f32 %v3369_v11, %v2879_v32  ;;  %v8487_v11 = vpop.f32.mrf.mxu0  ;;  %v2884_v7 = vadd.f32 %v9210_v56, %v8305_v38 }
 0x31a   : > { %v6405_v1 = vpop.f32.mrf.mxu1  ;;  %9206 = vst [vmem:[#allocation37_spill] sm:$0xff] %v8487_v11 }
 0x31b   : > { %v8479_v20 = vadd.f32 %v6405_v1, %v2882_v43  ;;  %v9208_v1 = vld [vmem:[#allocation61_spill] sm:$0xff] }
 0x31c   : > { %v3372_v48 = vpop.f32.mrf.mxu1  ;;  %v2886_v57 = vadd.f32 %v9208_v1, %v8301_v21  ;;  %v9213_v21 = vld [vmem:[#allocation66_spill] sm:$0xff] }
 0x31d   : > { %v8483_v45 = vadd.f32 %v3372_v48, %v2880_v62  ;;  %v8497_v48 = vpop.f32.mrf.mxu0  ;;  %v2887_v1 = vadd.f32 %v9213_v21, %v8321_v44 }
 0x31e   : > { %v6408_v33 = vpop.f32.mrf.mxu1  ;;  %9209 = vst [vmem:[#allocation39_spill] sm:$0xff] %v8497_v48 }
 0x31f   : > { %v8489_v32 = vadd.f32 %v6408_v33, %v2885_v16  ;;  %v9211_v33 = vld [vmem:[#allocation65_spill] sm:$0xff] }
 0x320   : > { %v3385_v0 = vpop.f32.mrf.mxu1  ;;  %v2889_v35 = vadd.f32 %v9211_v33, %v8316_v53  ;;  %v9216_v53 = vld [vmem:[#allocation70_spill] sm:$0xff] }
 0x321   : > { %v8493_v43 = vadd.f32 %v3385_v0, %v2883_v9  ;;  %v8507_v0 = vpop.f32.mrf.mxu0  ;;  %v2888_v33 = vadd.f32 %v9216_v53, %v8331_v49 }
 0x322   : > { %v6409_v5 = vpop.f32.mrf.mxu1  ;;  %9212 = vst [vmem:[#allocation21_spill] sm:$0xff] %v8507_v0 }
 0x323   : > { %v8499_v62 = vadd.f32 %v6409_v5, %v2886_v57  ;;  %v9214_v5 = vld [vmem:[#allocation69_spill] sm:$0xff] }
 0x324   : > { %v3388_v11 = vpop.f32.mrf.mxu1  ;;  %v2890_v38 = vadd.f32 %v9214_v5, %v8327_v26  ;;  %v9219_v26 = vld [vmem:[#allocation74_spill] sm:$0xff] }
 0x325   : > { %v8503_v16 = vadd.f32 %v3388_v11, %v2884_v7  ;;  %v8517_v11 = vpop.f32.mrf.mxu0  ;;  %v2891_v5 = vadd.f32 %v9219_v26, %v8345_v27 }
 0x326   : > { %v6412_v41 = vpop.f32.mrf.mxu1  ;;  %9215 = vst [vmem:[#allocation41_spill] sm:$0xff] %v8517_v11 }
 0x327   : > { %v8509_v9 = vadd.f32 %v6412_v41, %v2889_v35  ;;  %v9217_v41 = vld [vmem:[#allocation73_spill] sm:$0xff] }
 0x328   : > { %v3401_v48 = vpop.f32.mrf.mxu1  ;;  %v2893_v44 = vadd.f32 %v9217_v41, %v8339_v60  ;;  %v9221_v60 = vld [vmem:[#allocation79_spill] sm:$0xff] }
 0x329   : > { %v8513_v57 = vadd.f32 %v3401_v48, %v2887_v1  ;;  %v8527_v48 = vpop.f32.mrf.mxu0  ;;  %v2892_v41 = vadd.f32 %v9221_v60, %v8353_v14  ;;  %v3753_v14 = vadd.f32 %v8154_v15, %v8373_v59  ;;  %v3754_v15 = vadd.f32 %v8194_v18, %v8391_v63 }
 0x32a   : > { %v6413_v56 = vpop.f32.mrf.mxu1  ;;  %9218 = vst [vmem:[#allocation71_spill] sm:$0xff] %v8527_v48  ;;  %v3760_v18 = vadd.f32 %v8233_v24, %v8409_v36  ;;  %v3759_v24 = vadd.f32 %v8272_v23, %v8423_v31 }
 0x32b   : > { %v8519_v7 = vadd.f32 %v6413_v56, %v2890_v38  ;;  %v9220_v56 = vld [vmem:[#allocation7_spill] sm:$0xff] }
 0x32c   : > { %v3404_v0 = vpop.f32.mrf.mxu1  ;;  %v2894_v49 = vadd.f32 %v9220_v56, %v8351_v8  ;;  %v3750_v8 = vadd.f32 %v8142_v55, %v8367_v29  ;;  %v3756_v55 = vadd.f32 %v8181_v54, %v8385_v28  ;;  %v3755_v54 = vadd.f32 %v8220_v47, %v8401_v50 }
 0x32d   : > { %v8523_v35 = vadd.f32 %v3404_v0, %v2888_v33  ;;  %v8537_v0 = vpop.f32.mrf.mxu0  ;;  %v3761_v47 = vadd.f32 %v8259_v58, %v8419_v30  ;;  %v3762_v58 = vadd.f32 %v8297_v4, %v8433_v61 }
 0x32e   : > { %v6416_v21 = vpop.f32.mrf.mxu1 }
 0x32f   : > { %v8529_v1 = vadd.f32 %v6416_v21, %v2893_v44  ;;  %v9222_v21 = vld [vmem:[#allocation8_spill] sm:$0xff] }
 0x330   : > { %v3417_v11 = vpop.f32.mrf.mxu1  ;;  %v3752_v27 = vadd.f32 %v9222_v21, %v8361_v10  ;;  %v3751_v10 = vadd.f32 %v8166_v52, %v8377_v3  ;;  %v3757_v52 = vadd.f32 %v8207_v42, %v8397_v2  ;;  %v3758_v42 = vadd.f32 %v8246_v19, %v8413_v34 }
 0x331   : > { %v8533_v38 = vadd.f32 %v3417_v11, %v2891_v5  ;;  %v8547_v11 = vpop.f32.mrf.mxu0  ;;  %v3764_v19 = vadd.f32 %v8285_v39, %v8429_v46  ;;  %v9224_v39 = vld [vmem:[#allocation10_spill] sm:$0xff] }
 0x332   : > { %v6417_v53 = vpop.f32.mrf.mxu1  ;;  %v3763_v46 = vadd.f32 %v9224_v39, %v8443_v37 }
 0x333   : > { %v8539_v33 = vadd.f32 %v6417_v53, %v2894_v49 }
 0x334   : > { %v3420_v48 = vpop.f32.mrf.mxu1 }
 0x335   : > { %v8543_v44 = vadd.f32 %v3420_v48, %v2892_v41  ;;  %v8557_v48 = vpop.f32.mrf.mxu0 }
 0x336   : > { %v6460_v26 = vpop.f32.mrf.mxu1 }
 0x337   : > { %v8549_v5 = vadd.f32 %v6460_v26, %v3752_v27  ;;  %v8567_v27 = vpop.f32.mrf.mxu0 }
 0x338   : > { %v4050_v56 = vpop.f32.mrf.mxu1 }
 0x339   : > { %v8553_v49 = vadd.f32 %v4050_v56, %v3750_v8  ;;  %v8577_v56 = vpop.f32.mrf.mxu0 }
 0x33a   : > { %v6461_v53 = vpop.f32.mrf.mxu1 }
 0x33b   : > { %v8559_v60 = vadd.f32 %v6461_v53, %v3753_v14 }
 0x33c   : > { %v4053_v41 = vpop.f32.mrf.mxu1 }
 0x33d   : > { %v8563_v21 = vadd.f32 %v4053_v41, %v3751_v10  ;;  %v8587_v10 = vpop.f32.mrf.mxu0 }
 0x33e   : > { %v6464_v29 = vpop.f32.mrf.mxu1 }
 0x33f   : > { %v8569_v26 = vadd.f32 %v6464_v29, %v3756_v55  ;;  %v8597_v29 = vpop.f32.mrf.mxu0 }
 0x340   : > { %v4066_v59 = vpop.f32.mrf.mxu1 }
 0x341   : > { %v8573_v8 = vadd.f32 %v4066_v59, %v3754_v15 }
 0x342   : > { %v6465_v3 = vpop.f32.mrf.mxu1 }
 0x343   : > { %v8579_v14 = vadd.f32 %v6465_v3, %v3757_v52  ;;  %v8607_v52 = vpop.f32.mrf.mxu0 }
 0x344   : > { %v4069_v28 = vpop.f32.mrf.mxu1 }
 0x345   : > { %v8583_v53 = vadd.f32 %v4069_v28, %v3755_v54  ;;  %v9223_v28 = vld [vmem:[#allocation9_spill] sm:$0xff] }
 0x346   : > { %v6468_v63 = vpop.f32.mrf.mxu1  ;;  %v3765_v23 = vadd.f32 %v9223_v28, %v8439_v12  ;;  %v3766_v12 = vadd.f32 %v8347_v6, %v8453_v51 }
 0x347   : > { %v8589_v41 = vadd.f32 %v6468_v63, %v3760_v18  ;;  %v8617_v18 = vpop.f32.mrf.mxu0 }
 0x348   : > { %v4082_v2 = vpop.f32.mrf.mxu1 }
 0x349   : > { %v8593_v55 = vadd.f32 %v4082_v2, %v3758_v42 }
 0x34a   : > { %v6469_v50 = vpop.f32.mrf.mxu1 }
 0x34b   : > { %v8599_v15 = vadd.f32 %v6469_v50, %v3761_v47  ;;  %v9225_v47 = vld [vmem:[#allocation11_spill] sm:$0xff]  ;;  %v8627_v50 = vpop.f32.mrf.mxu0 }
 0x34c   : > { %v4085_v36 = vpop.f32.mrf.mxu1  ;;  %v3768_v4 = vadd.f32 %v9225_v47, %v8449_v17  ;;  %v9227_v17 = vld [vmem:[#allocation62_spill] sm:$0xff] }
 0x34d   : > { %v8603_v59 = vadd.f32 %v4085_v36, %v3759_v24 }
 0x34e   : > { %v6472_v34 = vpop.f32.mrf.mxu1 }
 0x34f   : > { %v8609_v3 = vadd.f32 %v6472_v34, %v3764_v19  ;;  %v9226_v34 = vld [vmem:[#allocation25_spill] sm:$0xff] }
 0x350   : > { %v4098_v30 = vpop.f32.mrf.mxu1  ;;  %v3769_v37 = vadd.f32 %v9226_v34, %v8459_v22  ;;  %v9229_v22 = vld [vmem:[#allocation64_spill] sm:$0xff] }
 0x351   : > { %v8613_v54 = vadd.f32 %v4098_v30, %v3762_v58  ;;  %v8637_v30 = vpop.f32.mrf.mxu0 }
 0x352   : > { %v6473_v31 = vpop.f32.mrf.mxu1 }
 0x353   : > { %v8619_v63 = vadd.f32 %v6473_v31, %v3765_v23  ;;  %v3767_v23 = vadd.f32 %v9227_v17, %v8463_v25 }
 0x354   : > { %v4101_v42 = vpop.f32.mrf.mxu1 }
 0x355   : > { %v8623_v2 = vadd.f32 %v4101_v42, %v3763_v46  ;;  %v9228_v46 = vld [vmem:[#allocation27_spill] sm:$0xff]  ;;  %v8647_v42 = vpop.f32.mrf.mxu0 }
 0x356   : > { %v6476_v61 = vpop.f32.mrf.mxu1  ;;  %v3772_v6 = vadd.f32 %v9228_v46, %v8469_v13  ;;  %v9231_v13 = vld [vmem:[#allocation31_spill] sm:$0xff] }
 0x357   : > { %v8629_v24 = vadd.f32 %v6476_v61, %v3768_v4  ;;  %v3770_v4 = vadd.f32 %v9229_v22, %v8473_v40  ;;  %v3771_v17 = vadd.f32 %v9231_v13, %v8483_v45  ;;  %v9232_v46 = vld [vmem:[#allocation19_spill] sm:$0xff] }
 0x358   : > { %v4114_v36 = vpop.f32.mrf.mxu1  ;;  %v3776_v40 = vadd.f32 %v9232_v46, %v8489_v32  ;;  %v9235_v32 = vld [vmem:[#allocation67_spill] sm:$0xff] }
 0x359   : > { %v8633_v19 = vadd.f32 %v4114_v36, %v3766_v12  ;;  %v9230_v36 = vld [vmem:[#allocation29_spill] sm:$0xff] }
 0x35a   : > { %v6477_v58 = vpop.f32.mrf.mxu1  ;;  %v3773_v25 = vadd.f32 %v9230_v36, %v8479_v20  ;;  %v9233_v20 = vld [vmem:[#allocation20_spill] sm:$0xff] }
 0x35b   : > { %v8639_v28 = vadd.f32 %v6477_v58, %v3769_v37  ;;  %v8657_v37 = vpop.f32.mrf.mxu0 }
 0x35c   : > { %v4117_v31 = vpop.f32.mrf.mxu1 }
 0x35d   : > { %v8643_v39 = vadd.f32 %v4117_v31, %v3767_v23 }
 0x35e   : > { %v6480_v51 = vpop.f32.mrf.mxu1 }
 0x35f   : > { %v8649_v47 = vadd.f32 %v6480_v51, %v3772_v6  ;;  %v8667_v51 = vpop.f32.mrf.mxu0 }
 0x360   : > { %v4130_v61 = vpop.f32.mrf.mxu1 }
 0x361   : > { %v8653_v12 = vadd.f32 %v4130_v61, %v3770_v4  ;;  %v3774_v4 = vadd.f32 %v9233_v20, %v8493_v43  ;;  %v8677_v13 = vpop.f32.mrf.mxu0 }
 0x362   : > { %v6481_v34 = vpop.f32.mrf.mxu1 }
 0x363   : > { %v8659_v58 = vadd.f32 %v6481_v34, %v3773_v25  ;;  %v9234_v25 = vld [vmem:[#allocation33_spill] sm:$0xff] }
 0x364   : > { %v4133_v23 = vpop.f32.mrf.mxu1  ;;  %v3777_v45 = vadd.f32 %v9234_v25, %v8499_v62  ;;  %v9238_v62 = vld [vmem:[#allocation68_spill] sm:$0xff] }
 0x365   : > { %v8663_v31 = vadd.f32 %v4133_v23, %v3771_v17  ;;  %v3775_v23 = vadd.f32 %v9235_v32, %v8503_v16  ;;  %v3778_v25 = vadd.f32 %v9238_v62, %v8513_v57  ;;  %v9240_v16 = vld [vmem:[#allocation37_spill] sm:$0xff] }
 0x366   : > { %v6484_v6 = vpop.f32.mrf.mxu1  ;;  %v3781_v32 = vadd.f32 %v9240_v16, %v8519_v7  ;;  %v9244_v57 = vld [vmem:[#allocation21_spill] sm:$0xff] }
 0x367   : > { %v8669_v22 = vadd.f32 %v6484_v6, %v3776_v40  ;;  %v9237_v6 = vld [vmem:[#allocation35_spill] sm:$0xff]  ;;  %v3784_v62 = vadd.f32 %v9244_v57, %v8529_v1  ;;  %v9246_v7 = vld [vmem:[#allocation41_spill] sm:$0xff]  ;;  %v3783_v1 = vadd.f32 %v8537_v0, %v8543_v44 }
 0x368   : > { %v4146_v61 = vpop.f32.mrf.mxu1  ;;  %v3780_v43 = vadd.f32 %v9237_v6, %v8509_v9  ;;  %v9242_v9 = vld [vmem:[#allocation39_spill] sm:$0xff]  ;;  %v3782_v16 = vadd.f32 %v9246_v7, %v8533_v38 }
 0x369   : > { %v8673_v36 = vadd.f32 %v4146_v61, %v3774_v4  ;;  %v8687_v4 = vpop.f32.mrf.mxu0  ;;  %v3779_v6 = vadd.f32 %v9242_v9, %v8523_v35  ;;  %v9248_v35 = vld [vmem:[#allocation71_spill] sm:$0xff] }
 0x36a   : > { %v6485_v34 = vpop.f32.mrf.mxu1  ;;  %v3785_v9 = vadd.f32 %v9248_v35, %v8539_v33  ;;  %v4646_v33 = vadd.f32 %v8547_v11, %v8549_v5  ;;  %v6041_v0 = vld [vmem:[%s8729_s11 + $0x8] sm:$0xff]   ;;  %v4647_v5 = vadd.f32 %v8567_v27, %v8559_v60  ;;  %v6043_v27 = vld [vmem:[%s8729_s11 + $0x18] sm:$0xff]  }
 0x36b   : > { %v8679_v17 = vadd.f32 %v6485_v34, %v3777_v45 }
 0x36c   : > { %v4149_v46 = vpop.f32.mrf.mxu1 }
 0x36d   : > { %v8683_v40 = vadd.f32 %v4149_v46, %v3775_v23  ;;  %v8697_v46 = vpop.f32.mrf.mxu0 }
 0x36e   : > { %v6488_v20 = vpop.f32.mrf.mxu1 }
 0x36f   : > { %9236 = vst [vmem:[#allocation43_spill] sm:$0xff] %v8683_v40  ;;  %v8689_v61 = vadd.f32 %v6488_v20, %v3780_v43 }
 0x370   : > { %v4162_v45 = vpop.f32.mrf.mxu1 }
 0x371   : > { %v8693_v34 = vadd.f32 %v4162_v45, %v3778_v25  ;;  %v8707_v45 = vpop.f32.mrf.mxu0 }
 0x372   : > { %v6489_v23 = vpop.f32.mrf.mxu1 }
 0x373   : > { %9239 = vst [vmem:[#allocation72_spill] sm:$0xff] %v8693_v34  ;;  %v8699_v40 = vadd.f32 %v6489_v23, %v3781_v32 }
 0x374   : > { %v4165_v43 = vpop.f32.mrf.mxu1 }
 0x375   : > { %9241 = vst [vmem:[#allocation45_spill] sm:$0xff] %v8699_v40  ;;  %v8703_v20 = vadd.f32 %v4165_v43, %v3779_v6  ;;  %v8718_v43 = vpop.f32.mrf.mxu0 }
 0x376   : > { %v6492_v25 = vpop.f32.mrf.mxu1 }
 0x377   : > { %9243 = vst [vmem:[#allocation46_spill] sm:$0xff] %v8703_v20  ;;  %v8709_v34 = vadd.f32 %v6492_v25, %v3784_v62  ;;  %v8738_v25 = vld [vmem:[%s9021_s5] ss:$0 sm:$0xff]  ;;  %v8741_v44 = vpop.f32.mrf.mxu0 }
 0x378   : > { %v4178_v32 = vpop.f32.mrf.mxu1 }
 0x379   : > { %9245 = vst [vmem:[#allocation48_spill] sm:$0xff] %v8709_v34  ;;  %v8714_v23 = vadd.f32 %v4178_v32, %v3782_v16  ;;  %v4644_v16 = vadd.f32 %v8557_v48, %v8553_v49  ;;  %v5974_v32 = vld [vmem:[%s8729_s11] sm:$0xff]   ;;  %v4645_v49 = vadd.f32 %v8577_v56, %v8563_v21  ;;  %v5980_v48 = vunpack.c.h.bf16 %v6041_v0 }
 0x37a   : > { %v6493_v6 = vpop.f32.mrf.mxu1  ;;  %v5976_v34 = vunpack.c.h.bf16 %v5974_v32 }
 0x37b   : > { %9247 = vst [vmem:[#allocation75_spill] sm:$0xff] %v8714_v23  ;;  %v8720_v20 = vadd.f32 %v6493_v6, %v3785_v9  ;;  %v5979_v6 = vunpack.c.l.bf16 %v6041_v0  ;;  %v8762_v0 = vld [vmem:[%s8729_s11 + $0x10] sm:$0xff]  }
 0x37c   : > { %v4181_v38 = vpop.f32.mrf.mxu1 }
 0x37d   : > { %9249 = vst [vmem:[#allocation49_spill] sm:$0xff] %v8720_v20  ;;  %v8731_v57 = vadd.f32 %v4181_v38, %v3783_v1  ;;  %v5975_v1 = vunpack.c.l.bf16 %v5974_v32  ;;  %v5987_v32 = vunpack.c.l.bf16 %v6043_v27 }
 0x37e   : > { %v6536_v62 = vpop.f32.mrf.mxu1 }
 0x37f   : > { %9250 = vst [vmem:[#allocation76_spill] sm:$0xff] %v8731_v57  ;;  %v4964_v7 = vadd.f32 %v6536_v62, %v4646_v33  ;;  %v8749_v57 = vpop.f32.mrf.mxu0 }
 0x380   : > { %v4819_v35 = vpop.f32.mrf.mxu1 }
 0x381   : > { %v5007_v9 = vadd.f32 %v8738_v25, %v4964_v7  ;;  %v4962_v11 = vadd.f32 %v4819_v35, %v4644_v16 }
 0x382   : > { %v6537_v38 = vpop.f32.mrf.mxu1 }
 0x383   : > { %v5043_v20 = vmax.f32 %v5007_v9, 0.0  ;;  %v5005_v33 = vadd.f32 %v8738_v25, %v4962_v11  ;;  %v4965_v62 = vadd.f32 %v6537_v38, %v4647_v5  ;;  %v4650_v9 = vadd.f32 %v8587_v10, %v8569_v26  ;;  %v8758_v11 = vpop.f32.mrf.mxu0 }
 0x384   : > { %v4822_v7 = vpop.f32.mrf.mxu1  ;;  %v4648_v26 = vadd.f32 %v8597_v29, %v8573_v8 }
 0x385   : > { %v5151_v23 = vadd.f32 %v5979_v6, %v5043_v20  ;;  %v5041_v16 = vmax.f32 %v5005_v33, 0.0  ;;  %v5008_v35 = vadd.f32 %v8738_v25, %v4965_v62  ;;  %v4963_v60 = vadd.f32 %v4822_v7, %v4645_v49 }
 0x386   : > { %v6540_v40 = vpop.f32.mrf.mxu1 }
 0x387   : > { %v5187_v5 = vmax.f32 %v5151_v23, 0.0  ;;  %v5149_v38 = vadd.f32 %v5975_v1, %v5041_v16  ;;  %v5044_v21 = vmax.f32 %v5008_v35, 0.0  ;;  %v5006_v56 = vadd.f32 %v8738_v25, %v4963_v60  ;;  %v8779_v60 = vpop.f32.mrf.mxu0 }
 0x388   : > { %v4968_v20 = vadd.f32 %v6540_v40, %v4650_v9  ;;  %v4835_v10 = vpop.f32.mrf.mxu1  ;;  %v4651_v23 = vadd.f32 %v8607_v52, %v8579_v14  ;;  %v5983_v16 = vunpack.c.l.bf16 %v8762_v0  ;;  %v4649_v40 = vadd.f32 %v8617_v18, %v8583_v53 }
 0x389   : > { %v5939_v6 = vpack.c.bf16 %v5187_v5, %v5187_v5  ;;  %v5185_v1 = vmax.f32 %v5149_v38, 0.0  ;;  %v5152_v33 = vadd.f32 %v5980_v48, %v5044_v21  ;;  %v5042_v62 = vmax.f32 %v5006_v56, 0.0 }
 0x38a   : > { %v5011_v49 = vadd.f32 %v8738_v25, %v4968_v20  ;;  %v4966_v7 = vadd.f32 %v4835_v10, %v4648_v26  ;;  %v6541_v35 = vpop.f32.mrf.mxu1  ;;  %v5988_v5 = vunpack.c.h.bf16 %v6043_v27  ;;  %v4654_v21 = vadd.f32 %v8627_v50, %v8589_v41  ;;  %v8790_v26 = vld [vmem:[%s8729_s11 + $0x28] sm:$0xff]   ;;  %v8798_v50 = vpop.f32.mrf.mxu0 }
 0x38b   : > { %5367 = vst.msk [vmem:[%s8769_s17 + $0x8] sm:$0xf] %vm1363_vm1, %v5939_v6  ;;  %v5937_v8 = vpack.c.bf16 %v5185_v1, %v5185_v1  ;;  %v5188_v14 = vmax.f32 %v5152_v33, 0.0  ;;  %v5150_v29 = vadd.f32 %v5976_v34, %v5042_v62  ;;  %v4969_v52 = vadd.f32 %v6541_v35, %v4651_v23  ;;  %v8793_v34 = vld [vmem:[%s8729_s11 + $0x20] sm:$0xff]  }
 0x38c   : > { %v5047_v48 = vmax.f32 %v5011_v49, 0.0  ;;  %v5009_v9 = vadd.f32 %v8738_v25, %v4966_v7  ;;  %v4838_v38 = vpop.f32.mrf.mxu1  ;;  %v5984_v27 = vunpack.c.h.bf16 %v8762_v0  ;;  %v4652_v41 = vadd.f32 %v8637_v30, %v8593_v55 }
 0x38d   : > { %5365 = vst.msk [vmem:[%s8769_s17] sm:$0xf] %vm1363_vm1, %v5937_v8  ;;  %v5940_v53 = vpack.c.bf16 %v5188_v14, %v5188_v14  ;;  %v5186_v18 = vmax.f32 %v5150_v29, 0.0  ;;  %v5012_v56 = vadd.f32 %v8738_v25, %v4969_v52  ;;  %v4967_v20 = vadd.f32 %v4838_v38, %v4649_v40  ;;  %v8811_v38 = vpop.f32.mrf.mxu0 }
 0x38e   : > { %v5155_v10 = vadd.f32 %v5987_v32, %v5047_v48  ;;  %v5045_v23 = vmax.f32 %v5009_v9, 0.0  ;;  %v6544_v6 = vpop.f32.mrf.mxu1  ;;  %v5995_v32 = vunpack.c.l.bf16 %v8790_v26  ;;  %v5991_v0 = vunpack.c.l.bf16 %v8793_v34 }
 0x38f   : > { %5368 = vst.msk [vmem:[%s8769_s17 + $0xc] sm:$0xf] %vm1363_vm1, %v5940_v53  ;;  %v5938_v1 = vpack.c.bf16 %v5186_v18, %v5186_v18  ;;  %v5048_v33 = vmax.f32 %v5012_v56, 0.0  ;;  %v5010_v62 = vadd.f32 %v8738_v25, %v4967_v20  ;;  %v4972_v49 = vadd.f32 %v6544_v6, %v4654_v21 }
 0x390   : > { %v5191_v7 = vmax.f32 %v5155_v10, 0.0  ;;  %v5153_v35 = vadd.f32 %v5983_v16, %v5045_v23  ;;  %v4851_v40 = vpop.f32.mrf.mxu1  ;;  %v4655_v48 = vadd.f32 %v8647_v42, %v8599_v15  ;;  %v5996_v16 = vunpack.c.h.bf16 %v8790_v26 }
 0x391   : > { %5366 = vst.msk [vmem:[%s8769_s17 + $0x4] sm:$0xf] %vm1363_vm1, %v5938_v1  ;;  %v5156_v55 = vadd.f32 %v5988_v5, %v5048_v33  ;;  %v5046_v30 = vmax.f32 %v5010_v62, 0.0  ;;  %v5015_v8 = vadd.f32 %v8738_v25, %v4972_v49  ;;  %v4970_v14 = vadd.f32 %v4851_v40, %v4652_v41  ;;  %v8821_v41 = vld [vmem:[%s8729_s11 + $0x38] sm:$0xff]  }
 0x392   : > { %v5943_v29 = vpack.c.bf16 %v5191_v7, %v5191_v7  ;;  %v5189_v52 = vmax.f32 %v5153_v35, 0.0  ;;  %v6545_v9 = vpop.f32.mrf.mxu1  ;;  %v4653_v15 = vadd.f32 %v8657_v37, %v8603_v59  ;;  %v4658_v26 = vadd.f32 %v8667_v51, %v8609_v3  ;;  %v8829_v3 = vpop.f32.mrf.mxu0 }
 0x393   : > { %v5192_v21 = vmax.f32 %v5156_v55, 0.0  ;;  %v5154_v53 = vadd.f32 %v5984_v27, %v5046_v30  ;;  %v5051_v18 = vmax.f32 %v5015_v8, 0.0  ;;  %v5013_v5 = vadd.f32 %v8738_v25, %v4970_v14 }
 0x394   : > { %5371 = vst.msk [vmem:[%s8769_s17 + $0x18] sm:$0xf] %vm1363_vm1, %v5943_v29  ;;  %v5941_v56 = vpack.c.bf16 %v5189_v52, %v5189_v52  ;;  %v4973_v20 = vadd.f32 %v6545_v9, %v4655_v48  ;;  %v4854_v42 = vpop.f32.mrf.mxu1  ;;  %v5992_v62 = vunpack.c.h.bf16 %v8793_v34  ;;  %v4656_v37 = vadd.f32 %v8677_v13, %v8613_v54 }
 0x395   : > { %v5944_v10 = vpack.c.bf16 %v5192_v21, %v5192_v21  ;;  %v5190_v23 = vmax.f32 %v5154_v53, 0.0  ;;  %v5159_v6 = vadd.f32 %v5995_v32, %v5051_v18  ;;  %v5049_v27 = vmax.f32 %v5013_v5, 0.0  ;;  %v8834_v32 = vld [vmem:[%s8729_s11 + $0x30] sm:$0xff]   ;;  %v8846_v53 = vpop.f32.mrf.mxu0 }
 0x396   : > { %5369 = vst.msk [vmem:[%s8769_s17 + $0x10] sm:$0xf] %vm1363_vm1, %v5941_v56  ;;  %v5016_v1 = vadd.f32 %v8738_v25, %v4973_v20  ;;  %v4971_v33 = vadd.f32 %v4854_v42, %v4653_v15  ;;  %v6548_v59 = vpop.f32.mrf.mxu1  ;;  %v6003_v34 = vunpack.c.l.bf16 %v8821_v41  ;;  %v4659_v54 = vadd.f32 %v8687_v4, %v8619_v63  ;;  %v8852_v56 = vld [vmem:[%s8729_s11 + $0x48] sm:$0xff]  }
 0x397   : > { %5372 = vst.msk [vmem:[%s8769_s17 + $0x1c] sm:$0xf] %vm1363_vm1, %v5944_v10  ;;  %v5942_v51 = vpack.c.bf16 %v5190_v23, %v5190_v23  ;;  %v5195_v49 = vmax.f32 %v5159_v6, 0.0  ;;  %v5157_v7 = vadd.f32 %v5991_v0, %v5049_v27  ;;  %v4976_v35 = vadd.f32 %v6548_v59, %v4658_v26 }
 0x398   : > { %v5052_v40 = vmax.f32 %v5016_v1, 0.0  ;;  %v5014_v55 = vadd.f32 %v8738_v25, %v4971_v33  ;;  %v4867_v30 = vpop.f32.mrf.mxu1  ;;  %v5999_v48 = vunpack.c.l.bf16 %v8834_v32  ;;  %v4657_v21 = vadd.f32 %v8697_v46, %v8623_v2 }
 0x399   : > { %5370 = vst.msk [vmem:[%s8769_s17 + $0x14] sm:$0xf] %vm1363_vm1, %v5942_v51  ;;  %v5947_v13 = vpack.c.bf16 %v5195_v49, %v5195_v49  ;;  %v5193_v8 = vmax.f32 %v5157_v7, 0.0  ;;  %v5019_v0 = vadd.f32 %v8738_v25, %v4976_v35  ;;  %v4974_v14 = vadd.f32 %v4867_v30, %v4656_v37  ;;  %v8866_v7 = vld [vmem:[%s8729_s11 + $0x40] sm:$0xff]  }
 0x39a   : > { %v5160_v29 = vadd.f32 %v5996_v16, %v5052_v40  ;;  %v5050_v52 = vmax.f32 %v5014_v55, 0.0  ;;  %v6549_v9 = vpop.f32.mrf.mxu1  ;;  %v6004_v15 = vunpack.c.h.bf16 %v8821_v41  ;;  %v6000_v26 = vunpack.c.h.bf16 %v8834_v32 }
 0x39b   : > { %5375 = vst.msk [vmem:[%s8769_s17 + $0x28] sm:$0xf] %vm1363_vm1, %v5947_v13  ;;  %v5945_v63 = vpack.c.bf16 %v5193_v8, %v5193_v8  ;;  %v5055_v4 = vmax.f32 %v5019_v0, 0.0  ;;  %v5017_v18 = vadd.f32 %v8738_v25, %v4974_v14  ;;  %v4977_v5 = vadd.f32 %v6549_v9, %v4659_v54 }
 0x39c   : > { %v5196_v16 = vmax.f32 %v5160_v29, 0.0  ;;  %v5158_v20 = vadd.f32 %v5992_v62, %v5050_v52  ;;  %v4870_v42 = vpop.f32.mrf.mxu1  ;;  %v4662_v1 = vadd.f32 %v8707_v45, %v8629_v24  ;;  %v6011_v41 = vunpack.c.l.bf16 %v8852_v56  ;;  %v8862_v62 = vpop.f32.mrf.mxu0 }
 0x39d   : > { %5373 = vst.msk [vmem:[%s8769_s17 + $0x20] sm:$0xf] %vm1363_vm1, %v5945_v63  ;;  %v5163_v2 = vadd.f32 %v6003_v34, %v5055_v4  ;;  %v5053_v46 = vmax.f32 %v5017_v18, 0.0  ;;  %v5020_v10 = vadd.f32 %v8738_v25, %v4977_v5  ;;  %v4975_v23 = vadd.f32 %v4870_v42, %v4657_v21 }
 0x39e   : > { %v5948_v6 = vpack.c.bf16 %v5196_v16, %v5196_v16  ;;  %v5194_v27 = vmax.f32 %v5158_v20, 0.0  ;;  %v6552_v33 = vpop.f32.mrf.mxu1  ;;  %v4660_v24 = vadd.f32 %v8718_v43, %v8633_v19  ;;  %v4663_v40 = vadd.f32 %v8741_v44, %v8639_v28  ;;  %v8880_v43 = vpop.f32.mrf.mxu0  ;;  %v8892_v16 = vld [vmem:[%s8729_s11 + $0x58] sm:$0xff]   ;;  %v8895_v20 = vld [vmem:[%s8729_s11 + $0x50] sm:$0xff]  }
 0x39f   : > { %v5199_v59 = vmax.f32 %v5163_v2, 0.0  ;;  %v5161_v37 = vadd.f32 %v5999_v48, %v5053_v46  ;;  %v5056_v51 = vmax.f32 %v5020_v10, 0.0  ;;  %v5018_v49 = vadd.f32 %v8738_v25, %v4975_v23 }
 0x3a0   : > { %5376 = vst.msk [vmem:[%s8769_s17 + $0x2c] sm:$0xf] %vm1363_vm1, %v5948_v6  ;;  %v5946_v35 = vpack.c.bf16 %v5194_v27, %v5194_v27  ;;  %v4980_v32 = vadd.f32 %v6552_v33, %v4662_v1  ;;  %v4883_v45 = vpop.f32.mrf.mxu1  ;;  %v6007_v0 = vunpack.c.l.bf16 %v8866_v7  ;;  %v4661_v19 = vadd.f32 %v8749_v57, %v8643_v39 }
 0x3a1   : > { %v5951_v55 = vpack.c.bf16 %v5199_v59, %v5199_v59  ;;  %v5197_v34 = vmax.f32 %v5161_v37, 0.0  ;;  %v5164_v30 = vadd.f32 %v6004_v15, %v5056_v51  ;;  %v5054_v54 = vmax.f32 %v5018_v49, 0.0 }
 0x3a2   : > { %5374 = vst.msk [vmem:[%s8769_s17 + $0x24] sm:$0xf] %vm1363_vm1, %v5946_v35  ;;  %v5023_v13 = vadd.f32 %v8738_v25, %v4980_v32  ;;  %v4978_v8 = vadd.f32 %v4883_v45, %v4660_v24  ;;  %v6553_v14 = vpop.f32.mrf.mxu1  ;;  %v6012_v21 = vunpack.c.h.bf16 %v8852_v56  ;;  %v4666_v39 = vadd.f32 %v8758_v11, %v8649_v47  ;;  %v8900_v11 = vpop.f32.mrf.mxu0 }
 0x3a3   : > { %5379 = vst.msk [vmem:[%s8769_s17 + $0x38] sm:$0xf] %vm1363_vm1, %v5951_v55  ;;  %v5949_v28 = vpack.c.bf16 %v5197_v34, %v5197_v34  ;;  %v5200_v44 = vmax.f32 %v5164_v30, 0.0  ;;  %v5162_v29 = vadd.f32 %v6000_v26, %v5054_v54  ;;  %v4981_v52 = vadd.f32 %v6553_v14, %v4663_v40 }
 0x3a4   : > { %v5059_v48 = vmax.f32 %v5023_v13, 0.0  ;;  %v5021_v9 = vadd.f32 %v8738_v25, %v4978_v8  ;;  %v4886_v63 = vpop.f32.mrf.mxu1  ;;  %v6008_v56 = vunpack.c.h.bf16 %v8866_v7  ;;  %v4664_v47 = vadd.f32 %v8779_v60, %v8653_v12  ;;  %v8913_v24 = vpop.f32.mrf.mxu0 }
 0x3a5   : > { %5377 = vst.msk [vmem:[%s8769_s17 + $0x30] sm:$0xf] %vm1363_vm1, %v5949_v28  ;;  %v5952_v57 = vpack.c.bf16 %v5200_v44, %v5200_v44  ;;  %v5198_v4 = vmax.f32 %v5162_v29, 0.0  ;;  %v5024_v18 = vadd.f32 %v8738_v25, %v4981_v52  ;;  %v4979_v5 = vadd.f32 %v4886_v63, %v4661_v19  ;;  %v8923_v28 = vld [vmem:[%s8729_s11 + $0x68] sm:$0xff]   ;;  %v8934_v63 = vld [vmem:[%s8729_s11 + $0x60] sm:$0xff]  }
 0x3a6   : > { %v5167_v15 = vadd.f32 %v6011_v41, %v5059_v48  ;;  %v5057_v42 = vmax.f32 %v5021_v9, 0.0  ;;  %v6556_v26 = vpop.f32.mrf.mxu1  ;;  %v6019_v1 = vunpack.c.l.bf16 %v8892_v16  ;;  %v6015_v41 = vunpack.c.l.bf16 %v8895_v20 }
 0x3a7   : > { %5380 = vst.msk [vmem:[%s8769_s17 + $0x3c] sm:$0xf] %vm1363_vm1, %v5952_v57  ;;  %v5950_v2 = vpack.c.bf16 %v5198_v4, %v5198_v4  ;;  %v5060_v46 = vmax.f32 %v5024_v18, 0.0  ;;  %v5022_v10 = vadd.f32 %v8738_v25, %v4979_v5  ;;  %v4984_v23 = vadd.f32 %v6556_v26, %v4666_v39 }
 0x3a8   : > { %v5203_v6 = vmax.f32 %v5167_v15, 0.0  ;;  %v5165_v27 = vadd.f32 %v6007_v0, %v5057_v42  ;;  %v4899_v33 = vpop.f32.mrf.mxu1  ;;  %v4667_v7 = vadd.f32 %v8798_v50, %v8659_v58  ;;  %v6020_v32 = vunpack.c.h.bf16 %v8892_v16 }
 0x3a9   : > { %5378 = vst.msk [vmem:[%s8769_s17 + $0x34] sm:$0xf] %vm1363_vm1, %v5950_v2  ;;  %v5168_v12 = vadd.f32 %v6012_v21, %v5060_v46  ;;  %v5058_v60 = vmax.f32 %v5022_v10, 0.0  ;;  %v5027_v59 = vadd.f32 %v8738_v25, %v4984_v23  ;;  %v4982_v37 = vadd.f32 %v4899_v33, %v4664_v47  ;;  %v9251_v47 = vld [vmem:[#allocation43_spill] sm:$0xff] }
 0x3aa   : > { %v5955_v51 = vpack.c.bf16 %v5203_v6, %v5203_v6  ;;  %v5201_v49 = vmax.f32 %v5165_v27, 0.0  ;;  %v6557_v35 = vpop.f32.mrf.mxu1  ;;  %v4665_v58 = vadd.f32 %v8811_v38, %v8663_v31  ;;  %v4670_v13 = vadd.f32 %v8829_v3, %v8669_v22  ;;  %v6527_v22 = vpop.f32.mrf.mxu0  ;;  %v8950_v6 = vld [vmem:[%s8729_s11 + $0x78] sm:$0xff]  }
 0x3ab   : > { %v5204_v45 = vmax.f32 %v5168_v12, 0.0  ;;  %v5166_v40 = vadd.f32 %v6008_v56, %v5058_v60  ;;  %v5063_v55 = vmax.f32 %v5027_v59, 0.0  ;;  %v5025_v34 = vadd.f32 %v8738_v25, %v4982_v37 }
 0x3ac   : > { %5383 = vst.msk [vmem:[%s8769_s17 + $0x48] sm:$0xf] %vm1363_vm1, %v5955_v51  ;;  %v5953_v30 = vpack.c.bf16 %v5201_v49, %v5201_v49  ;;  %v4985_v54 = vadd.f32 %v6557_v35, %v4667_v7  ;;  %v4902_v50 = vpop.f32.mrf.mxu1  ;;  %v6016_v52 = vunpack.c.h.bf16 %v8895_v20  ;;  %v4668_v38 = vadd.f32 %v8846_v53, %v8673_v36  ;;  %v4616_v46 = vpop.f32.mrf.mxu0 }
 0x3ad   : > { %v5956_v8 = vpack.c.bf16 %v5204_v45, %v5204_v45  ;;  %v5202_v0 = vmax.f32 %v5166_v40, 0.0  ;;  %v5171_v14 = vadd.f32 %v6019_v1, %v5063_v55  ;;  %v5061_v19 = vmax.f32 %v5025_v34, 0.0 }
 0x3ae   : > { %5381 = vst.msk [vmem:[%s8769_s17 + $0x40] sm:$0xf] %vm1363_vm1, %v5953_v30  ;;  %v5028_v44 = vadd.f32 %v8738_v25, %v4985_v54  ;;  %v4983_v29 = vadd.f32 %v4902_v50, %v4665_v58  ;;  %v6560_v31 = vpop.f32.mrf.mxu1  ;;  %v6027_v4 = vunpack.c.l.bf16 %v8923_v28  ;;  %v4671_v5 = vadd.f32 %v8862_v62, %v8679_v17  ;;  %v6530_v45 = vpop.f32.mrf.mxu0  ;;  %v8962_v54 = vld [vmem:[%s8729_s11 + $0x70] sm:$0xff]  }
 0x3af   : > { %5384 = vst.msk [vmem:[%s8769_s17 + $0x4c] sm:$0xf] %vm1363_vm1, %v5956_v8  ;;  %v5954_v3 = vpack.c.bf16 %v5202_v0, %v5202_v0  ;;  %v5207_v48 = vmax.f32 %v5171_v14, 0.0  ;;  %v5169_v9 = vadd.f32 %v6015_v41, %v5061_v19  ;;  %v4988_v21 = vadd.f32 %v6560_v31, %v4670_v13  ;;  %v9252_v13 = vld [vmem:[#allocation72_spill] sm:$0xff]  ;;  %v9253_v8 = vld [vmem:[#allocation45_spill] sm:$0xff] }
 0x3b0   : > { %v5064_v39 = vmax.f32 %v5028_v44, 0.0  ;;  %v5026_v57 = vadd.f32 %v8738_v25, %v4983_v29  ;;  %v4915_v18 = vpop.f32.mrf.mxu1  ;;  %v6023_v56 = vunpack.c.l.bf16 %v8934_v63  ;;  %v4669_v2 = vadd.f32 %v8880_v43, %v9251_v47 }
 0x3b1   : > { %5382 = vst.msk [vmem:[%s8769_s17 + $0x44] sm:$0xf] %vm1363_vm1, %v5954_v3  ;;  %v5959_v36 = vpack.c.bf16 %v5207_v48, %v5207_v48  ;;  %v5205_v53 = vmax.f32 %v5169_v9, 0.0  ;;  %v5031_v16 = vadd.f32 %v8738_v25, %v4988_v21  ;;  %v4986_v20 = vadd.f32 %v4915_v18, %v4668_v38  ;;  %v9254_v3 = vld [vmem:[#allocation46_spill] sm:$0xff]  ;;  %v4629_v9 = vpop.f32.mrf.mxu0 }
 0x3b2   : > { %v5172_v15 = vadd.f32 %v6020_v32, %v5064_v39  ;;  %v5062_v42 = vmax.f32 %v5026_v57, 0.0  ;;  %v6561_v26 = vpop.f32.mrf.mxu1  ;;  %v6028_v33 = vunpack.c.h.bf16 %v8923_v28  ;;  %v6024_v12 = vunpack.c.h.bf16 %v8934_v63 }
 0x3b3   : > { %5387 = vst.msk [vmem:[%s8769_s17 + $0x58] sm:$0xf] %vm1363_vm1, %v5959_v36  ;;  %v5957_v17 = vpack.c.bf16 %v5205_v53, %v5205_v53  ;;  %v5067_v62 = vmax.f32 %v5031_v16, 0.0  ;;  %v5029_v10 = vadd.f32 %v8738_v25, %v4986_v20  ;;  %v4989_v23 = vadd.f32 %v6561_v26, %v4671_v5  ;;  %v9255_v5 = vld [vmem:[#allocation48_spill] sm:$0xff] }
 0x3b4   : > { %v5208_v27 = vmax.f32 %v5172_v15, 0.0  ;;  %v5170_v1 = vadd.f32 %v6016_v52, %v5062_v42  ;;  %v4918_v41 = vpop.f32.mrf.mxu1  ;;  %v4674_v7 = vadd.f32 %v8900_v11, %v8689_v61  ;;  %v6035_v32 = vunpack.c.l.bf16 %v8950_v6  ;;  %v5111_v42 = vld [vmem:[%s8729_s11 + $0x88] sm:$0xf] }
 0x3b5   : > { %5385 = vst.msk [vmem:[%s8769_s17 + $0x50] sm:$0xf] %vm1363_vm1, %v5957_v17  ;;  %v5175_v43 = vadd.f32 %v6027_v4, %v5067_v62  ;;  %v5065_v60 = vmax.f32 %v5029_v10, 0.0  ;;  %v5032_v59 = vadd.f32 %v8738_v25, %v4989_v23  ;;  %v4987_v37 = vadd.f32 %v4918_v41, %v4669_v2  ;;  %v6531_v62 = vpop.f32.mrf.mxu0 }
 0x3b6   : > { %v5960_v51 = vpack.c.bf16 %v5208_v27, %v5208_v27  ;;  %v5206_v49 = vmax.f32 %v5170_v1, 0.0  ;;  %v6564_v35 = vpop.f32.mrf.mxu1  ;;  %v4672_v61 = vadd.f32 %v8913_v24, %v9252_v13  ;;  %v4675_v0 = vadd.f32 %v6527_v22, %v9253_v8  ;;  %v6056_v1 = vld [vmem:[%s8729_s11 + $0x80] sm:$0xff]  }
 0x3b7   : > { %v5211_v40 = vmax.f32 %v5175_v43, 0.0  ;;  %v5173_v55 = vadd.f32 %v6023_v56, %v5065_v60  ;;  %v5068_v34 = vmax.f32 %v5032_v59, 0.0  ;;  %v5030_v30 = vadd.f32 %v8738_v25, %v4987_v37 }
 0x3b8   : > { %5388 = vst.msk [vmem:[%s8769_s17 + $0x5c] sm:$0xf] %vm1363_vm1, %v5960_v51  ;;  %v5958_v58 = vpack.c.bf16 %v5206_v49, %v5206_v49  ;;  %v4992_v50 = vadd.f32 %v6564_v35, %v4674_v7  ;;  %v4931_v11 = vpop.f32.mrf.mxu1  ;;  %v6031_v31 = vunpack.c.l.bf16 %v8962_v54  ;;  %v4673_v48 = vadd.f32 %v4616_v46, %v9254_v3  ;;  %v9256_v46 = vld [vmem:[#allocation75_spill] sm:$0xff] }
 0x3b9   : > { %v5963_v14 = vpack.c.bf16 %v5211_v40, %v5211_v40  ;;  %v5209_v19 = vmax.f32 %v5173_v55, 0.0  ;;  %v5176_v28 = vadd.f32 %v6028_v33, %v5068_v34  ;;  %v5066_v44 = vmax.f32 %v5030_v30, 0.0  ;;  %v4632_v55 = vpop.f32.mrf.mxu0 }
 0x3ba   : > { %5386 = vst.msk [vmem:[%s8769_s17 + $0x54] sm:$0xf] %vm1363_vm1, %v5958_v58  ;;  %v5035_v29 = vadd.f32 %v8738_v25, %v4992_v50  ;;  %v4990_v52 = vadd.f32 %v4931_v11, %v4672_v61  ;;  %v6565_v38 = vpop.f32.mrf.mxu1  ;;  %v6036_v4 = vunpack.c.h.bf16 %v8950_v6  ;;  %v4678_v36 = vadd.f32 %v6530_v45, %v9255_v5  ;;  %v5112_v50 = vld [vmem:[%s8729_s11 + $0x8c] sm:$0x7] }
 0x3bb   : > { %5391 = vst.msk [vmem:[%s8769_s17 + $0x68] sm:$0xf] %vm1363_vm1, %v5963_v14  ;;  %v5961_v24 = vpack.c.bf16 %v5209_v19, %v5209_v19  ;;  %v5212_v22 = vmax.f32 %v5176_v28, 0.0  ;;  %v5174_v21 = vadd.f32 %v6024_v12, %v5066_v44  ;;  %v4993_v63 = vadd.f32 %v6565_v38, %v4675_v0  ;;  %v9258_v11 = vld [vmem:[#allocation76_spill] sm:$0xff] }
 0x3bc   : > { %v5071_v39 = vmax.f32 %v5035_v29, 0.0  ;;  %v5033_v57 = vadd.f32 %v8738_v25, %v4990_v52  ;;  %v4934_v18 = vpop.f32.mrf.mxu1  ;;  %v6032_v47 = vunpack.c.h.bf16 %v8962_v54  ;;  %v4676_v17 = vadd.f32 %v4629_v9, %v9256_v46 }
 0x3bd   : > { %5389 = vst.msk [vmem:[%s8769_s17 + $0x60] sm:$0xf] %vm1363_vm1, %v5961_v24  ;;  %v5964_v53 = vpack.c.bf16 %v5212_v22, %v5212_v22  ;;  %v5210_v16 = vmax.f32 %v5174_v21, 0.0  ;;  %v5036_v20 = vadd.f32 %v8738_v25, %v4993_v63  ;;  %v4991_v15 = vadd.f32 %v4934_v18, %v4673_v48 }
 0x3be   : > { %v5179_v56 = vadd.f32 %v6035_v32, %v5071_v39  ;;  %v5069_v26 = vmax.f32 %v5033_v57, 0.0  ;;  %v6568_v2 = vpop.f32.mrf.mxu1  ;;  %v5147_v12 = vunpack.c.l.bf16 %v5111_v42  ;;  %v6039_v35 = vunpack.c.l.bf16 %v6056_v1  ;;  %v9257_v32 = vld [vmem:[#allocation49_spill] sm:$0xff] }
 0x3bf   : > { %5392 = vst.msk [vmem:[%s8769_s17 + $0x6c] sm:$0xf] %vm1363_vm1, %v5964_v53  ;;  %v5962_v10 = vpack.c.bf16 %v5210_v16, %v5210_v16  ;;  %v5072_v23 = vmax.f32 %v5036_v20, 0.0  ;;  %v5034_v6 = vadd.f32 %v8738_v25, %v4991_v15  ;;  %v4996_v27 = vadd.f32 %v6568_v2, %v4678_v36 }
 0x3c0   : > { %v5215_v33 = vmax.f32 %v5179_v56, 0.0  ;;  %v5177_v41 = vadd.f32 %v6031_v31, %v5069_v26  ;;  %v4947_v43 = vpop.f32.mrf.mxu1  ;;  %v4679_v45 = vadd.f32 %v6531_v62, %v9257_v32  ;;  %v4677_v8 = vadd.f32 %v4632_v55, %v9258_v11 }
 0x3c1   : > { %5390 = vst.msk [vmem:[%s8769_s17 + $0x64] sm:$0xf] %vm1363_vm1, %v5962_v10  ;;  %v5180_v60 = vadd.f32 %v6036_v4, %v5072_v23  ;;  %v5070_v59 = vmax.f32 %v5034_v6, 0.0  ;;  %v5039_v37 = vadd.f32 %v8738_v25, %v4996_v27  ;;  %v4994_v51 = vadd.f32 %v4947_v43, %v4676_v17 }
 0x3c2   : > { %v5967_v49 = vpack.c.bf16 %v5215_v33, %v5215_v33  ;;  %v5213_v7 = vmax.f32 %v5177_v41, 0.0  ;;  %v6569_v40 = vpop.f32.mrf.mxu1  ;;  %v5148_v52 = vunpack.c.l.bf16 %v5112_v50  ;;  %v6040_v22 = vunpack.c.h.bf16 %v6056_v1 }
 0x3c3   : > { %v5216_v34 = vmax.f32 %v5180_v60, 0.0  ;;  %v5178_v30 = vadd.f32 %v6032_v47, %v5070_v59  ;;  %v5075_v54 = vmax.f32 %v5039_v37, 0.0  ;;  %v5037_v58 = vadd.f32 %v8738_v25, %v4994_v51 }
 0x3c4   : > { %5395 = vst.msk [vmem:[%s8769_s17 + $0x78] sm:$0xf] %vm1363_vm1, %v5967_v49  ;;  %v5965_v13 = vpack.c.bf16 %v5213_v7, %v5213_v7  ;;  %v4997_v61 = vadd.f32 %v6569_v40, %v4679_v45  ;;  %v4950_v0 = vpop.f32.mrf.mxu1 }
 0x3c5   : > { %v5968_v14 = vpack.c.bf16 %v5216_v34, %v5216_v34  ;;  %v5214_v19 = vmax.f32 %v5178_v30, 0.0  ;;  %v5183_v28 = vadd.f32 %v5147_v12, %v5075_v54  ;;  %v5073_v44 = vmax.f32 %v5037_v58, 0.0 }
 0x3c6   : > { %5393 = vst.msk [vmem:[%s8769_s17 + $0x70] sm:$0xf] %vm1363_vm1, %v5965_v13  ;;  %v5040_v29 = vadd.f32 %v8738_v25, %v4997_v61  ;;  %v4995_v31 = vadd.f32 %v4950_v0, %v4677_v8 }
 0x3c7   : > { %5396 = vst.msk [vmem:[%s8769_s17 + $0x7c] sm:$0xf] %vm1363_vm1, %v5968_v14  ;;  %v5966_v38 = vpack.c.bf16 %v5214_v19, %v5214_v19  ;;  %v5219_v3 = vmax.f32 %v5183_v28, 0.0  ;;  %v5181_v48 = vadd.f32 %v6039_v35, %v5073_v44 }
 0x3c8   : > { %v5076_v9 = vmax.f32 %v5040_v29, 0.0  ;;  %v5038_v24 = vadd.f32 %v8738_v25, %v4995_v31 }
 0x3c9   : > { %5394 = vst.msk [vmem:[%s8769_s17 + $0x74] sm:$0xf] %vm1363_vm1, %v5966_v38  ;;  %v5971_v21 = vpack.c.bf16 %v5219_v3, %v5219_v3  ;;  %v5217_v63 = vmax.f32 %v5181_v48, 0.0 }
 0x3ca   : > { %v5184_v39 = vadd.f32 %v5148_v52, %v5076_v9  ;;  %v5074_v57 = vmax.f32 %v5038_v24, 0.0 }
 0x3cb   : > { %5399 = vst.msk [vmem:[%s8769_s17 + $0x88] sm:$0xf] %vm1363_vm1, %v5971_v21  ;;  %v5969_v4 = vpack.c.bf16 %v5217_v63, %v5217_v63 }
 0x3cc   : > { %v5220_v18 = vmax.f32 %v5184_v39, 0.0  ;;  %v5182_v5 = vadd.f32 %v6040_v22, %v5074_v57 }
 0x3cd   : > { %5397 = vst.msk [vmem:[%s8769_s17 + $0x80] sm:$0xf] %vm1363_vm1, %v5969_v4 }
 0x3ce   : > { %v5972_v36 = vpack.c.bf16 %v5220_v18, %v5220_v18  ;;  %v5218_v53 = vmax.f32 %v5182_v5, 0.0 }
 0x3d0   : > { %5401 = vst.msk [vmem:[%s8769_s17 + $0x8c] sm:$0x7] %vm5400_vm9, %v5972_v36  ;;  %v5970_v25 = vpack.c.bf16 %v5218_v53, %v5218_v53 }
 0x3d2   : > { %5398 = vst.msk [vmem:[%s8769_s17 + $0x84] sm:$0xf] %vm1363_vm1, %v5970_v25 }
 0x3d3 PF: > { %s17_s24 = sadd.s32 1, %s6769_s24  }
 0x3d4   : > { %p14_p4 = scmp.ge.s32.totalorder %s17_s24, 4  }
 0x3d6   :  { %16 = sbr.rel (!%p14_p4) target bundleno = 1 (0x1), region = 89 }

// kernel: _lambda_.11
= control target key start
LH: loop header
LB: loop body
LE: loop exit
PB: predicated region body
PF: predicated region fallthrough
CT: control target
= control target key end

     0   :  { %s3136_s30 = smov 0   ;;  %s3932_s0 = inlined_call_operand.vmem [shape: bf16[2,100,144], index: 0, kind: input, shape index: {}]   ;;  %s3933_s1 = inlined_call_operand.vmem [shape: f32[100,1], index: 1, kind: input, shape index: {}]   ;;  %s3934_s2 = inlined_call_operand.vmem [shape: bf16[144,24], index: 2, kind: input, shape index: {}]   ;;  %s3935_s3 = inlined_call_operand.vmem [shape: f32[1,24], index: 3, kind: input, shape index: {}, may-alias: {3,5,8}]   ;;  %s3936_s4 = inlined_call_operand.vmem [shape: bf16[9,24,24], index: 4, kind: input, shape index: {}]   ;;  %s3937_s5 = inlined_call_operand.vmem [shape: f32[1,24], index: 5, kind: input, shape index: {}, may-alias: {3,5,8}]   ;;  %s3938_s6 = inlined_call_operand.vmem [shape: bf16[2,78,16], index: 6, kind: input, shape index: {}]   ;;  %s3939_s7 = inlined_call_operand.vmem [shape: bf16[16,24], index: 7, kind: input, shape index: {}]   ;;  %s3940_s8 = inlined_call_operand.vmem [shape: f32[1,24], index: 8, kind: input, shape index: {}, may-alias: {3,5,8}]   ;;  %s3941_s9 = inlined_call_operand.vmem [shape: bf16[2,78,24], index: 9, kind: output, shape index: {}]  }
   0x1 LB: > { %s2460_s10 = sadd.s32 4294967295, %s3081_s30   ;;  %p2464_p0 = scmp.ge.s32.totalorder %s3081_s30, 1  ;;  %s3081_s30 = sphi %s3136_s30, %s19_s30  }
   0x2   : > { %p297_p1 = scmp.lt.s32.totalorder %s3081_s30, 3 }
   0x4   : > { %p298_p2 = pnand %p2464_p0, %p297_p1 }
   0x5   : > { %p338_p3 = scmp.lt.s32.totalorder (!%p298_p2), %s2460_s10, 1 }
   0x6   : > { %301 = sbr.rel (%p298_p2) target bundleno = 718 (0x2ce), region = 56 }
   0xb   : > { %v2996_v0 = vld [vmem:[%s3934_s2 + $0x38] sm:$0xff]   ;;  %v3083_v1 = vmov 0   ;;  %v2997_v2 = vld [vmem:[%s3934_s2 + $0x30] sm:$0xff]   ;;  %s3943_s10 = smov (!%p338_p3, %s2460_s10), 1  ;;  %v2998_v3 = vld [vmem:[%s3934_s2 + $0x28] sm:$0xff]   ;;  %vm506_vm0 = vcmask 130048  }
   0xc   : > { %528 = vmatprep.subr.bf16.mxu0 %v3083_v1  ;;  %2994 = vset.pattern.permute.xlu0 %v3083_v1  ;;  %s2981_s15 = smul.u32 104, %s3943_s10  ;;  %v2999_v4 = vld [vmem:[%s3934_s2 + $0x20] sm:$0xff]   ;;  %v3000_v6 = vld [vmem:[%s3934_s2 + $0x18] sm:$0xff]   ;;  %v3001_v8 = vld [vmem:[%s3934_s2 + $0x10] sm:$0xff]   ;;  %vm896_vm1 = vcmask 1043456   ;;  %v3084_v39 = vmov 0.0  }
   0xd   : > { %529 = vmatpush1.bf16.msra.mxu0 %v2996_v0  ;;  %2995 = vset.pattern.permute.xlu1 %v3083_v1  ;;  %v629_v7 = vld [vmem:[%s3933_s1] sm:$0xff]  ;;  %v631_v9 = vld [vmem:[%s3933_s1 + $0x10] sm:$0xff]  ;;  %v630_v10 = vld [vmem:[%s3933_s1 + $0x8] sm:$0xff]  ;;  %vm3085_vm2 = vmmov 0   ;;  %vm773_vm3 = vcmask 191488   ;;  %vm1080_vm4 = vcmask 1046528  }
   0xe   : > { %530 = vmatprep.subr.bf16.mxu0 %v3083_v1  ;;  %s3159_s20 = scalar_lea.vmem %s3932_s0, %s2981_s15  ;;  %644 = vperm.xlu0 %2994, %v629_v7   ;;  %v632_v11 = vld [vmem:[%s3933_s1 + $0x18] sm:$0xff]  ;;  %v3002_v12 = vld [vmem:[%s3934_s2 + $0x8] sm:$0xff]   ;;  %v633_v13 = vld [vmem:[%s3933_s1 + $0x20] sm:$0xff]  ;;  %vm831_vm5 = vsmask.f32 7424  ;;  %vm880_vm6 = vcmask 195584  }
   0xf   : > { %v3007_v5 = vld [vmem:[%s3159_s20 + $0x4] ss:$8 sps:$4 sm:$0xff]   ;;  %654 = vperm.xlu1 %2995, %v631_v9   ;;  %v635_v16 = vld [vmem:[%s3933_s1 + $0x30] sm:$0xff]  ;;  %v636_v17 = vld [vmem:[%s3933_s1 + $0x38] sm:$0xff]  ;;  %2743 = vmatprep.subr.bf16.mxu1 %v3084_v39  ;;  %vm1401_vm7 = vsmask.f32 6400 }
  0x10   : > { %2492 = vmatprep.mubr.msk.bf16.mxu0 %vm506_vm0, %v3007_v5  ;;  %v634_v14 = vld [vmem:[%s3933_s1 + $0x28] sm:$0xff]  ;;  %v3003_v15 = vld [vmem:[%s3934_s2] sm:$0xff]   ;;  %v3008_v22 = vld [vmem:[%s3159_s20 + $0x14] ss:$8 sps:$4 sm:$0xff]   ;;  %2747 = vmatprep.mubr.msk.bf16.mxu1 %vm3085_vm2, %v3084_v39  ;;  %vm786_vm8 = vcmask 189440   ;;  %vm1569_vm9 = vcmask 1045504  }
  0x11   : > { %531 = vmatpush1.bf16.msra.mxu0 %v2997_v2  ;;  %v3004_v18 = vld [vmem:[%s3934_s2 + $0x40] sm:$0xff]   ;;  %v638_v20 = vld [vmem:[%s3933_s1 + $0x48] sm:$0xff]  ;;  %v639_v23 = vld [vmem:[%s3933_s1 + $0x50] sm:$0xff]  ;;  %vm2035_vm10 = vcmask 1044480   ;;  %s2982_s29 = smul.u32 40, %s3943_s10  ;;  %vm2391_vm12 = vcmask 190464  }
  0x12   : > { %532 = vmatprep.subr.bf16.mxu0 %v3083_v1  ;;  %649 = vperm.xlu0 %2994, %v630_v10   ;;  %v637_v19 = vld [vmem:[%s3933_s1 + $0x40] sm:$0xff]  ;;  %v640_v24 = vld [vmem:[%s3933_s1 + $0x58] sm:$0xff]  ;;  %v3025_v38 = vld [vmem:[%s3936_s4 + $0x14] ss:$0 sps:$4 sm:$0xff]   ;;  %vm1863_vm11 = vsmask.f32 5376 }
  0x13   : > { %659 = vperm.xlu1 %2995, %v632_v11   ;;  %v3005_v21 = vld [vmem:[%s3159_s20] ss:$8 sps:$4 sm:$0xff]   ;;  %v3010_v26 = vld [vmem:[%s3159_s20 + $0x10] ss:$8 sps:$4 sm:$0xff]   ;;  %v3011_v27 = vld [vmem:[%s3159_s20 + $0x24] ss:$8 sps:$4 sm:$0xff]   ;;  %s3548_s13 = scalar_lea.vmem %s3938_s6, %s2982_s29  ;;  %s3863_s16 = scalar_lea.vmem %s3941_s9, %s2982_s29 }
  0x14   : > { %v641_v25 = vld [vmem:[%s3933_s1 + $0x60] sm:$0xf]  ;;  %v3014_v29 = vld [vmem:[%s3159_s20 + $0x34] ss:$8 sps:$4 sm:$0xff]   ;;  %v3016_v30 = vld [vmem:[%s3159_s20 + $0x30] ss:$8 sps:$4 sm:$0xff]  }
  0x15   : > { %533 = vmatpush1.bf16.msra.mxu0 %v2998_v3  ;;  %v3013_v28 = vld [vmem:[%s3159_s20 + $0x20] ss:$8 sps:$4 sm:$0xff]   ;;  %v3017_v31 = vld [vmem:[%s3159_s20 + $0x44] ss:$8 sps:$4 sm:$0xff]   ;;  %v3020_v33 = vld [vmem:[%s3159_s20 + $0x54] ss:$8 sps:$4 sm:$0xff]  }
  0x16   : > { %534 = vmatprep.subr.bf16.mxu0 %v3083_v1  ;;  %664 = vperm.xlu0 %2994, %v633_v13   ;;  %v3019_v32 = vld [vmem:[%s3159_s20 + $0x40] ss:$8 sps:$4 sm:$0xff]   ;;  %v3022_v35 = vld [vmem:[%s3159_s20 + $0x50] ss:$8 sps:$4 sm:$0xff]   ;;  %v898_v40 = vsel %vm896_vm1, %v3025_v38, 0 }
  0x17   : > { %669 = vperm.xlu1 %2995, %v634_v14   ;;  %v366_v34 = vld [vmem:[%s3159_s20 + $0x60] sm:$0x33]  ;;  %v3026_v41 = vld [vmem:[%s3936_s4 + $0x2c] ss:$0 sps:$4 sm:$0xff]   ;;  %2744 = vmatpush3.bf16.msra.mxu1 %v898_v40 }
  0x18   : > { %v2482_v36 = vcombine.high %v366_v34, %v366_v34  ;;  %v2481_v37 = vcombine.low %v366_v34, %v366_v34  ;;  %2745 = vmatprep.subr.bf16.mxu1 %v3084_v39  ;;  %v1273_v42 = vsel %vm896_vm1, %v3026_v41, 0  ;;  %v3027_v43 = vld [vmem:[%s3936_s4 + $0xc] sm:$0xff]   ;;  %v3028_v44 = vld [vmem:[%s3936_s4 + $0x24] sm:$0xff]   ;;  %v3265_v45 = vld [vmem:[%s3935_s3] ss:$0 sm:$0xff] }
  0x19   : > { %535 = vmatpush1.bf16.msra.mxu0 %v2999_v4  ;;  %v3031_v34 = vld [vmem:[%s3936_s4 + $0x8] ss:$0 sps:$4 sm:$0xff]  }
  0x1a   : > { %536 = vmatprep.subr.bf16.mxu0 %v3083_v1  ;;  %674 = vperm.xlu0 %2994, %v635_v16  }
  0x1b   : > { %679 = vperm.xlu1 %2995, %v636_v17   ;;  %2746 = vmatpush3.bf16.msra.mxu1 %v3027_v43 }
  0x1c   : > { %2767 = vmatprep.subr.bf16.mxu1 %v3084_v39 }
  0x1d   : > { %537 = vmatpush1.bf16.msra.mxu0 %v3000_v6 }
  0x1e   : > { %538 = vmatprep.subr.bf16.mxu0 %v3083_v1  ;;  %684 = vperm.xlu0 %2994, %v637_v19  }
  0x1f   : > { %689 = vperm.xlu1 %2995, %v638_v20  }
  0x21   : > { %539 = vmatpush1.bf16.msra.mxu0 %v3001_v8 }
  0x22   : > { %540 = vmatprep.subr.bf16.mxu0 %v3083_v1  ;;  %694 = vperm.xlu0 %2994, %v639_v23  }
  0x23   : > { %699 = vperm.xlu1 %2995, %v640_v24  }
  0x25   : > { %541 = vmatpush1.bf16.msra.mxu0 %v3002_v12 }
  0x26   : > { %542 = vmatprep.subr.bf16.mxu0 %v3083_v1  ;;  %704 = vperm.xlu0 %2994, %v641_v25  }
  0x29   : > { %543 = vmatpush1.bf16.msra.mxu0 %v3003_v15 }
  0x2a   : > { %558 = vmatprep.subr.bf16.mxu0 %v3083_v1 }
  0x2d   : > { %559 = vmatpush2.bf16.msra.mxu0 %v3004_v18 }
  0x2e   : > { %2815 = vmatprep.subr.bf16.mxu0 %v3084_v39 }
  0x30   : > { %561 = vmatmul.mubr.bf16.vlgmr.msra.gmra.mxu0 %v3005_v21 }
  0x31   : > { %2493 = vmatprep.mubr.msk.bf16.mxu0 %vm506_vm0, %v3008_v22  ;;  %2816 = vmatpush3.bf16.msra.mxu0 %v1273_v42 }
  0x32   : > { %2817 = vmatprep.subr.bf16.mxu0 %v3084_v39 }
  0x35   : > { %2818 = vmatpush3.bf16.msra.mxu0 %v3028_v44 }
  0x36   : > { %2863 = vmatprep.subr.bf16.mxu0 %v3084_v39 }
  0x38   : > { %569 = vmatmul.mubr.bf16.gmra.mxu0 %v3010_v26 }
  0x39   : > { %2494 = vmatprep.mubr.msk.bf16.mxu0 %vm506_vm0, %v3011_v27 }
  0x40   : > { %577 = vmatmul.mubr.bf16.gmra.mxu0 %v3013_v28 }
  0x41   : > { %2495 = vmatprep.mubr.msk.bf16.mxu0 %vm506_vm0, %v3014_v29 }
  0x48   : > { %585 = vmatmul.mubr.bf16.gmra.mxu0 %v3016_v30 }
  0x49   : > { %2496 = vmatprep.mubr.msk.bf16.mxu0 %vm506_vm0, %v3017_v31 }
  0x50   : > { %593 = vmatmul.mubr.bf16.gmra.mxu0 %v3019_v32 }
  0x51   : > { %2497 = vmatprep.mubr.msk.bf16.mxu0 %vm506_vm0, %v3020_v33 }
  0x58   : > { %601 = vmatmul.mubr.bf16.gmra.mxu0 %v3022_v35 }
  0x59   : > { %2498 = vmatprep.mubr.msk.bf16.mxu0 %vm506_vm0, %v2482_v36 }
  0x60   : > { %609 = vmatmul.mubr.bf16.gmra.mxu0 %v2481_v37 }
  0x61   : > { %2819 = vmatprep.mubr.msk.bf16.mxu0 %vm3085_vm2, %v3084_v39 }
  0x89   : > { %v645_v48 = vpop.permute.xlu0 %644 }
  0x8a   : > { %v655_v61 = vpop.permute.xlu1 %654 }
  0x8d   : > { %v650_v57 = vpop.permute.xlu0 %649 }
  0x8e   : > { %v660_v7 = vpop.permute.xlu1 %659 }
  0x91   : > { %v665_v14 = vpop.permute.xlu0 %664 }
  0x92   : > { %v670_v24 = vpop.permute.xlu1 %669 }
  0x95   : > { %v675_v35 = vpop.permute.xlu0 %674 }
  0xf0   : > { %v562_v46 = vpop.f32.mrf.mxu0 }
  0xf1   : > { %v563_v47 = vadd.f32 %v3265_v45, %v562_v46 }
  0xf2   : > { %v564_v49 = vpop.f32.mrf.mxu0 }
  0xf3   : > { %v616_v50 = vmax.f32 %v563_v47, 0.0 }
  0xf4   : > { %v565_v51 = vpop.f32.mrf.mxu0 }
  0xf5   : > { %v707_v52 = vmul.f32 %v645_v48, %v616_v50  ;;  %v566_v53 = vadd.f32 %v3265_v45, %v565_v51  ;;  %v997_v51 = vsel %vm896_vm1, %v3031_v34, 0 }
  0xf6   : > { %v567_v54 = vpop.f32.mrf.mxu0 }
  0xf7   : > { %v2651_v55 = vpack.c.bf16 %v707_v52, %v707_v52  ;;  %v617_v56 = vmax.f32 %v566_v53, 0.0  ;;  %v3041_v52 = vld [vmem:[%s3936_s4 + $0x44] ss:$0 sps:$4 sm:$0xff]   ;;  %v680_v54 = vpop.permute.xlu1 %679 }
  0xf8   : > { %v570_v58 = vpop.f32.mrf.mxu0 }
  0xf9   : > { %774 = vst.msk [vmem:[#allocation2] sm:$0xf] %vm773_vm3, %v2651_v55  ;;  %v708_v59 = vmul.f32 %v650_v57, %v617_v56  ;;  %v571_v60 = vadd.f32 %v3265_v45, %v570_v58 }
  0xfa   : > { %v572_v62 = vpop.f32.mrf.mxu0 }
  0xfb   : > { %v2652_v63 = vpack.c.bf16 %v708_v59, %v708_v59  ;;  %v618_v0 = vmax.f32 %v571_v60, 0.0 }
  0xfc   : > { %v573_v1 = vpop.f32.mrf.mxu0 }
  0xfd   : > { %775 = vst.msk [vmem:[#allocation2 + $0x4] sm:$0xf] %vm773_vm3, %v2652_v63  ;;  %v709_v2 = vmul.f32 %v655_v61, %v618_v0  ;;  %v574_v3 = vadd.f32 %v3265_v45, %v573_v1 }
  0xfe   : > { %v575_v4 = vpop.f32.mrf.mxu0 }
  0xff   : > { %v2653_v5 = vpack.c.bf16 %v709_v2, %v709_v2  ;;  %v619_v6 = vmax.f32 %v574_v3, 0.0 }
 0x100   : > { %v578_v8 = vpop.f32.mrf.mxu0  ;;  %v788_v16 = vld [vmem:[#allocation2] sm:$0xf] }
 0x101   : > { %776 = vst.msk [vmem:[#allocation2 + $0x8] sm:$0xf] %vm773_vm3, %v2653_v5  ;;  %v710_v9 = vmul.f32 %v660_v7, %v619_v6  ;;  %v579_v10 = vadd.f32 %v3265_v45, %v578_v8  ;;  %v1072_v29 = vld [vmem:[#allocation2] sm:$0xe]  ;;  %v1606_v7 = vsel %vm896_vm1, %v3041_v52, 0 }
 0x102   : > { %v580_v11 = vpop.f32.mrf.mxu0  ;;  %v3038_v6 = vld [vmem:[%s3936_s4] sm:$0xff]  }
 0x103   : > { %v2654_v12 = vpack.c.bf16 %v710_v9, %v710_v9  ;;  %v620_v13 = vmax.f32 %v579_v10, 0.0  ;;  %v685_v9 = vpop.permute.xlu0 %684 }
 0x104   : > { %v581_v15 = vpop.f32.mrf.mxu0  ;;  %v789_v17 = vld [vmem:[#allocation2 + $0x4] sm:$0xf] }
 0x105   : > { %777 = vst.msk [vmem:[#allocation2 + $0xc] sm:$0xf] %vm773_vm3, %v2654_v12  ;;  %v711_v18 = vmul.f32 %v665_v14, %v620_v13  ;;  %v582_v19 = vadd.f32 %v3265_v45, %v581_v15  ;;  %v3277_v20 = vcombine.low %v788_v16, %v789_v17  ;;  %v2538_v31 = vcombine.low %v1072_v29, %v789_v17  ;;  %v1358_v62 = vld [vmem:[#allocation2 + $0x4] sm:$0xe] }
 0x106   : > { %v583_v21 = vpop.f32.mrf.mxu0 }
 0x107   : > { %v2655_v22 = vpack.c.bf16 %v711_v18, %v711_v18  ;;  %v621_v23 = vmax.f32 %v582_v19, 0.0  ;;  %v835_v26 = vshll.u32 %v3277_v20, 16  ;;  %v833_v43 = vshrl.u32 %v3277_v20, 16  ;;  %v3042_v18 = vld [vmem:[%s3936_s4 + $0x3c] sm:$0xff]  }
 0x108   : > { %v586_v25 = vpop.f32.mrf.mxu0  ;;  %v3032_v46 = vld [vmem:[#allocation2 + $0x4] sm:$0xfe]   ;;  %v1081_v47 = vrot.slane %v2538_v31, 1 }
 0x109   : > { %778 = vst.msk [vmem:[#allocation2 + $0x10] sm:$0xf] %vm773_vm3, %v2655_v22  ;;  %v712_v27 = vmul.f32 %v670_v24, %v621_v23  ;;  %v587_v28 = vadd.f32 %v3265_v45, %v586_v25  ;;  %v837_v38 = vrot.slane %v835_v26, 1  ;;  %v3296_v53 = vld [vmem:[#allocation2 + $0x8] sm:$0xf]  ;;  %v1239_v1 = vrot.slane %v3032_v46, 1  ;;  %v690_v26 = vpop.permute.xlu1 %689 }
 0x10a   : > { %v588_v30 = vpop.f32.mrf.mxu0  ;;  %v2564_v3 = vcombine.low %v1358_v62, %v3296_v53 }
 0x10b   : > { %v2656_v32 = vpack.c.bf16 %v712_v27, %v712_v27  ;;  %v622_v33 = vmax.f32 %v587_v28, 0.0  ;;  %v838_v56 = vor.u32 %v837_v38, %v833_v43 }
 0x10c   : > { %v589_v36 = vpop.f32.mrf.mxu0  ;;  %v3285_v37 = vld [vmem:[#allocation2 + $0x8] sm:$0xff]   ;;  %v1403_v21 = vshrl.u32 %v2564_v3, 16  ;;  %v1406_v24 = vshll.u32 %v2564_v3, 16 }
 0x10d   : > { %779 = vst.msk [vmem:[#allocation2 + $0x14] sm:$0xf] %vm773_vm3, %v2656_v32  ;;  %v713_v40 = vmul.f32 %v675_v35, %v622_v33  ;;  %v590_v41 = vadd.f32 %v3265_v45, %v589_v36  ;;  %v840_v44 = vshll.u32 %v3285_v37, 16  ;;  %v1082_v48 = vrot.slane %v3285_v37, 1  ;;  %v700_v62 = vpop.permute.xlu1 %699 }
 0x10e   : > { %v591_v42 = vpop.f32.mrf.mxu0  ;;  %v844_v16 = vshrl.u32 %v3285_v37, 16  ;;  %v1405_v38 = vrot.slane %v1403_v21, 1 }
 0x10f   : > { %v2657_v49 = vpack.c.bf16 %v713_v40, %v713_v40  ;;  %v623_v50 = vmax.f32 %v590_v41, 0.0  ;;  %v842_v57 = vrot.slane %v840_v44, 1  ;;  %v3301_v59 = vsel %vm1080_vm4, %v1081_v47, %v1082_v48  ;;  %v695_v44 = vpop.permute.xlu0 %694 }
 0x110   : > { %v594_v55 = vpop.f32.mrf.mxu0  ;;  %v3298_v58 = vld [vmem:[#allocation2 + $0xc] sm:$0xff]   ;;  %v1408_v42 = vrot.slane %v1406_v24, 2 }
 0x111   : > { %780 = vst.msk [vmem:[#allocation2 + $0x18] sm:$0xf] %vm773_vm3, %v2657_v49  ;;  %v714_v60 = vmul.f32 %v680_v54, %v623_v50  ;;  %v595_v61 = vadd.f32 %v3265_v45, %v594_v55  ;;  %v843_v0 = vsel %vm831_vm5, %v838_v56, %v842_v57  ;;  %v1240_v2 = vrot.slane %v3298_v58, 1  ;;  %v3313_v8 = vld [vmem:[#allocation2 + $0xc] sm:$0xff]  }
 0x112   : > { %v596_v63 = vpop.f32.mrf.mxu0  ;;  %2748 = vmatmul.mubr.msk.bf16.vlgmr.msra.gmra.mxu1 %vm880_vm6, %v843_v0  ;;  %v1411_v25 = vshrl.u32 %v3313_v8, 16  ;;  %v846_v28 = vor.u32 %v844_v16, %v842_v57  ;;  %v1414_v49 = vshll.u32 %v3313_v8, 16 }
 0x113   : > { %v2658_v4 = vpack.c.bf16 %v714_v60, %v714_v60  ;;  %v624_v5 = vmax.f32 %v595_v61, 0.0  ;;  %2768 = vmatpush3.bf16.msra.mxu1 %v997_v51  ;;  %v1241_v11 = vsel %vm1080_vm4, %v1239_v1, %v1240_v2  ;;  %2751 = vmatprep.mubr.msk.bf16.mxu1 %vm3085_vm2, %v3084_v39  ;;  %v1409_v61 = vor.u32 %v1408_v42, %v1405_v38  ;;  %v1691_v42 = vld [vmem:[#allocation2 + $0x8] sm:$0xc] }
 0x114   : > { %v597_v10 = vpop.f32.mrf.mxu0  ;;  %v3318_v12 = vld [vmem:[#allocation2 + $0x10] sm:$0xff]   ;;  %2820 = vmatmul.mubr.msk.bf16.vlgmr.msra.gmra.mxu0 %vm880_vm6, %v1241_v11  ;;  %2769 = vmatprep.subr.bf16.mxu1 %v3084_v39  ;;  %v1413_v43 = vrot.slane %v1411_v25, 1  ;;  %v1416_v57 = vrot.slane %v1414_v49, 2 }
 0x115   : > { %781 = vst.msk [vmem:[#allocation2 + $0x1c] sm:$0xf] %vm773_vm3, %v2658_v4  ;;  %v715_v13 = vmul.f32 %v685_v9, %v624_v5  ;;  %v598_v14 = vadd.f32 %v3265_v45, %v597_v10  ;;  %v848_v17 = vshll.u32 %v3318_v12, 16  ;;  %2823 = vmatprep.mubr.msk.bf16.mxu0 %vm3085_vm2, %v3084_v39  ;;  %2864 = vmatpush3.bf16.msra.mxu0 %v1606_v7  ;;  %v1084_v19 = vrot.slane %v3318_v12, 1 }
 0x116   : > { %v599_v15 = vpop.f32.mrf.mxu0  ;;  %2865 = vmatprep.subr.bf16.mxu0 %v3084_v39  ;;  %v852_v54 = vshrl.u32 %v3318_v12, 16  ;;  %v1417_v4 = vor.u32 %v1416_v57, %v1413_v43  ;;  %v1692_v43 = vld [vmem:[#allocation2 + $0xc] sm:$0xf] }
 0x117   : > { %v2659_v22 = vpack.c.bf16 %v715_v13, %v715_v13  ;;  %v625_v23 = vmax.f32 %v598_v14, 0.0  ;;  %v850_v29 = vrot.slane %v848_v17, 1  ;;  %2770 = vmatpush3.bf16.msra.mxu1 %v3038_v6  ;;  %v3335_v31 = vsel %vm1080_vm4, %v1082_v48, %v1084_v19  ;;  %v705_v17 = vpop.permute.xlu0 %704 }
 0x118   : > { %v602_v27 = vpop.f32.mrf.mxu0  ;;  %v3035_v30 = vld [vmem:[#allocation2 + $0x14] sm:$0xff]   ;;  %2791 = vmatprep.subr.bf16.mxu1 %v3084_v39  ;;  %v3366_v11 = vsel %vm1401_vm7, %v1409_v61, %v1417_v4 }
 0x119   : > { %782 = vst.msk [vmem:[#allocation2 + $0x20] sm:$0xf] %vm773_vm3, %v2659_v22  ;;  %v716_v32 = vmul.f32 %v690_v26, %v625_v23  ;;  %v603_v33 = vadd.f32 %v3265_v45, %v602_v27  ;;  %v851_v35 = vsel %vm831_vm5, %v846_v28, %v850_v29  ;;  %v1242_v36 = vrot.slane %v3035_v30, 1  ;;  %2866 = vmatpush3.bf16.msra.mxu0 %v3042_v18  ;;  %v3363_v10 = vld [vmem:[#allocation2 + $0x14] sm:$0xff]  }
 0x11a   : > { %v604_v34 = vpop.f32.mrf.mxu0  ;;  %2752 = vmatmul.mubr.msk.bf16.gmra.mxu1 %vm880_vm6, %v851_v35  ;;  %2911 = vmatprep.subr.bf16.mxu0 %v3084_v39  ;;  %v854_v0 = vor.u32 %v852_v54, %v850_v29  ;;  %v1420_v23 = vshrl.u32 %v3363_v10, 16  ;;  %v1423_v24 = vshll.u32 %v3363_v10, 16 }
 0x11b   : > { %v2660_v40 = vpack.c.bf16 %v716_v32, %v716_v32  ;;  %v626_v41 = vmax.f32 %v603_v33, 0.0  ;;  %v1243_v47 = vsel %vm1080_vm4, %v1240_v2, %v1242_v36  ;;  %2755 = vmatprep.mubr.msk.bf16.mxu1 %vm3085_vm2, %v3084_v39 }
 0x11c   : > { %v605_v46 = vpop.f32.mrf.mxu0  ;;  %v3346_v48 = vld [vmem:[#allocation2 + $0x18] sm:$0xff]   ;;  %2824 = vmatmul.mubr.msk.bf16.gmra.mxu0 %vm880_vm6, %v1243_v47  ;;  %v1422_v38 = vrot.slane %v1420_v23, 1 }
 0x11d   : > { %783 = vst.msk [vmem:[#allocation2 + $0x24] sm:$0xf] %vm773_vm3, %v2660_v40  ;;  %v717_v50 = vmul.f32 %v695_v44, %v626_v41  ;;  %v606_v51 = vadd.f32 %v3265_v45, %v605_v46  ;;  %v856_v55 = vshll.u32 %v3346_v48, 16  ;;  %2827 = vmatprep.mubr.msk.bf16.mxu0 %vm3085_vm2, %v3084_v39  ;;  %v1086_v56 = vrot.slane %v3346_v48, 1 }
 0x11e   : > { %v607_v52 = vpop.f32.mrf.mxu0  ;;  %v860_v27 = vshrl.u32 %v3346_v48, 16  ;;  %v1425_v40 = vrot.slane %v1423_v24, 2 }
 0x11f   : > { %v2661_v58 = vpack.c.bf16 %v717_v50, %v717_v50  ;;  %v627_v60 = vmax.f32 %v606_v51, 0.0  ;;  %v858_v1 = vrot.slane %v856_v55, 1  ;;  %v3358_v3 = vsel %vm1080_vm4, %v1084_v19, %v1086_v56  ;;  %v3403_v50 = vld [vmem:[#allocation2 + $0x10] sm:$0xff]  }
 0x120   : > { %v610_v63 = vpop.f32.mrf.mxu0  ;;  %v3037_v2 = vld [vmem:[#allocation2 + $0x1c] sm:$0xff]   ;;  %v1426_v49 = vor.u32 %v1425_v40, %v1422_v38  ;;  %v3410_v55 = vcombine.low %v1691_v42, %v1692_v43  ;;  %v1571_v40 = vrot.slane %v3313_v8, 2 }
 0x121   : > { %784 = vst.msk [vmem:[#allocation2 + $0x28] sm:$0xf] %vm773_vm3, %v2661_v58  ;;  %v718_v5 = vmul.f32 %v700_v62, %v627_v60  ;;  %v611_v6 = vadd.f32 %v3265_v45, %v610_v63  ;;  %v859_v7 = vsel %vm831_vm5, %v854_v0, %v858_v1  ;;  %v1244_v9 = vrot.slane %v3037_v2, 1  ;;  %v3369_v16 = vld [vmem:[#allocation2 + $0x20] sm:$0xf] }
 0x122   : > { %v612_v13 = vpop.f32.mrf.mxu0  ;;  %2756 = vmatmul.mubr.msk.bf16.gmra.mxu1 %vm880_vm6, %v859_v7  ;;  %v862_v30 = vor.u32 %v860_v27, %v858_v1  ;;  %v3385_v33 = vld [vmem:[#allocation2 + $0x1c] sm:$0xff]   ;;  %v3418_v60 = vsel %vm1401_vm7, %v1417_v4, %v1426_v49  ;;  %v1735_v7 = vrot.slane %v3403_v50, 2 }
 0x123   : > { %v2662_v14 = vpack.c.bf16 %v718_v5, %v718_v5  ;;  %v628_v15 = vmax.f32 %v611_v6, 0.0  ;;  %v1245_v18 = vsel %vm1080_vm4, %v1242_v36, %v1244_v9  ;;  %2759 = vmatprep.mubr.msk.bf16.mxu1 %vm3085_vm2, %v3084_v39  ;;  %v1429_v51 = vshrl.u32 %v3385_v33, 16 }
 0x124   : > { %v801_v45 = vld [vmem:[#allocation2 + $0x24] sm:$0xf]  ;;  %v613_v19 = vpop.f32.mrf.mxu0  ;;  %2828 = vmatmul.mubr.msk.bf16.gmra.mxu0 %vm880_vm6, %v1245_v18  ;;  %v1432_v52 = vshll.u32 %v3385_v33, 16 }
 0x125   : > { %785 = vst.msk [vmem:[#allocation2 + $0x2c] sm:$0xf] %vm773_vm3, %v2662_v14  ;;  %v719_v21 = vmul.f32 %v705_v17, %v628_v15  ;;  %v3377_v22 = vcombine.low %v3369_v16, %v801_v45  ;;  %2831 = vmatprep.mubr.msk.bf16.mxu0 %vm3085_vm2, %v3084_v39  ;;  %v3414_v57 = vld [vmem:[#allocation2 + $0x20] sm:$0xff]   ;;  %v1431_v61 = vrot.slane %v1429_v51, 1  ;;  %v1734_v14 = vrot.slane %v3410_v55, 2 }
 0x126   : > { %v614_v25 = vpop.f32.mrf.mxu0  ;;  %v1434_v62 = vrot.slane %v1432_v52, 2  ;;  %v1739_v15 = vrot.slane %v3414_v57, 2  ;;  %v2041_v51 = vrot.slane %v3414_v57, 3 }
 0x127   : > { %v2663_v26 = vpack.c.bf16 %v719_v21, %v719_v21  ;;  %v864_v28 = vshll.u32 %v3377_v22, 16  ;;  %v1088_v35 = vrot.slane %v3377_v22, 1  ;;  %v868_v58 = vshrl.u32 %v3377_v22, 16  ;;  %v3043_v21 = vld [vmem:[%s3936_s4 + $0x20] ss:$0 sps:$4 sm:$0xff]  }
 0x128   : > { %v3040_v29 = vld [vmem:[#allocation2 + $0x24] sm:$0xff]   ;;  %v1435_v5 = vor.u32 %v1434_v62, %v1431_v61  ;;  %v3436_v24 = vsel %vm1569_vm9, %v1734_v14, %v1735_v7  ;;  %v1115_v8 = vsel %vm896_vm1, %v3043_v21, 0 }
 0x129   : > { %787 = vst.msk [vmem:[#allocation2 + $0x30] sm:$0x3] %vm786_vm8, %v2663_v26  ;;  %v866_v32 = vrot.slane %v864_v28, 1  ;;  %v3387_v34 = vld [vmem:[#allocation2 + $0x24] sm:$0xff]   ;;  %v1246_v36 = vrot.slane %v3040_v29, 1  ;;  %v3394_v44 = vsel %vm1080_vm4, %v1086_v56, %v1088_v35  ;;  %v3412_v56 = vld [vmem:[#allocation2 + $0x18] sm:$0xff]  }
 0x12a   : > { %v1438_v54 = vshrl.u32 %v3387_v34, 16  ;;  %v1441_v0 = vshll.u32 %v3387_v34, 16  ;;  %v1737_v4 = vrot.slane %v3412_v56, 2  ;;  %v3429_v17 = vsel %vm1401_vm7, %v1426_v49, %v1435_v5  ;;  %v1561_v26 = vld [vmem:[#allocation2 + $0x4] sm:$0xc] }
 0x12b   : > { %v867_v41 = vsel %vm831_vm5, %v862_v30, %v866_v32  ;;  %v1247_v46 = vsel %vm1080_vm4, %v1244_v9, %v1246_v36  ;;  %v870_v1 = vor.u32 %v868_v58, %v866_v32  ;;  %v2027_v9 = vld [vmem:[#allocation2 + $0x8] sm:$0x8]  ;;  %v2580_v30 = vcombine.low %v1561_v26, %v3296_v53  ;;  %v3069_v22 = vld [vmem:[%s3548_s13] sm:$0xff]  }
 0x12c   : > { %2760 = vmatmul.mubr.msk.bf16.gmra.mxu1 %vm880_vm6, %v867_v41  ;;  %v3398_v47 = vld [vmem:[#allocation2 + $0x2c] ss:$0 sps:$4 sm:$0x11]   ;;  %2832 = vmatmul.mubr.msk.bf16.gmra.mxu0 %vm880_vm6, %v1247_v46  ;;  %v1440_v63 = vrot.slane %v1438_v54, 1  ;;  %v1443_v13 = vrot.slane %v1441_v0, 2  ;;  %v2618_v19 = vcombine.low %v2027_v9, %v1692_v43  ;;  %v3439_v25 = vsel %vm1569_vm9, %v1735_v7, %v1737_v4  ;;  %v3049_v7 = vld [vmem:[%s3936_s4 + $0x18] sm:$0xff]  }
 0x12d   : > { %2763 = vmatprep.mubr.msk.bf16.mxu1 %vm3085_vm2, %v3084_v39  ;;  %2835 = vmatprep.mubr.msk.bf16.mxu0 %vm3085_vm2, %v3084_v39  ;;  %v3421_v2 = vld [vmem:[#allocation2 + $0x28] sm:$0xff]   ;;  %v1447_v6 = vshll.u32 %v3398_v47, 16  ;;  %v3447_v28 = vsel %vm1569_vm9, %v1737_v4, %v1739_v15  ;;  %v2037_v43 = vrot.slane %v3403_v50, 3  ;;  %v3053_v46 = vld [vmem:[%s3936_s4 + $0x5c] ss:$0 sps:$4 sm:$0xff]   ;;  %v2039_v49 = vrot.slane %v3412_v56, 3 }
 0x12e   : > { %v1444_v23 = vor.u32 %v1443_v13, %v1440_v63  ;;  %v1741_v29 = vrot.slane %v3421_v2, 2  ;;  %v2036_v42 = vrot.slane %v2618_v19, 3  ;;  %v2043_v52 = vrot.slane %v3421_v2, 3 }
 0x12f   : > { %v1449_v18 = vrot.slane %v1447_v6, 2  ;;  %v1570_v61 = vrot.slane %v2580_v30, 2  ;;  %v3479_v62 = vsel %vm2035_vm10, %v2037_v43, %v2039_v49  ;;  %v3482_v63 = vsel %vm2035_vm10, %v2039_v49, %v2041_v51 }
 0x130   : > { %v3068_v45 = vld [vmem:[#allocation2 + $0x30] ss:$0 sps:$4 sm:$0x11]   ;;  %v3454_v32 = vsel %vm1401_vm7, %v1435_v5, %v1444_v23  ;;  %v3461_v41 = vsel %vm1569_vm9, %v1739_v15, %v1741_v29  ;;  %v3475_v54 = vsel %vm2035_vm10, %v2036_v42, %v2037_v43  ;;  %v3485_v0 = vsel %vm2035_vm10, %v2041_v51, %v2043_v52 }
 0x131   : > { %v3444_v27 = vld [vmem:[#allocation2 + $0x30] ss:$0 sps:$4 sm:$0x33]   ;;  %v1743_v38 = vrot.slane %v3068_v45, 2  ;;  %v1572_v5 = vsel %vm1569_vm9, %v1570_v61, %v1571_v40  ;;  %v1942_v6 = vsel %vm896_vm1, %v3053_v46, 0  ;;  %v1573_v9 = vrot.slane %v3363_v10, 2 }
 0x132   : > { %v2045_v58 = vrot.slane %v3444_v27, 3  ;;  %v1575_v10 = vrot.slane %v3385_v33, 2  ;;  %v1865_v4 = vshrl.u32 %v3410_v55, 16  ;;  %v1868_v15 = vshll.u32 %v3410_v55, 16 }
 0x133   : > { %v3468_v53 = vsel %vm1569_vm9, %v1741_v29, %v1743_v38  ;;  %v1574_v13 = vsel %vm1569_vm9, %v1571_v40, %v1573_v9  ;;  %v1882_v26 = vshrl.u32 %v3412_v56, 16  ;;  %v1885_v29 = vshll.u32 %v3412_v56, 16  ;;  %v3066_v40 = vld [vmem:[%s3939_s7] sm:$0xff]   ;;  %v3060_v56 = vld [vmem:[%s3936_s4 + $0x30] sm:$0xff]  }
 0x134   : > { %2764 = vmatmul.mubr.msk.bf16.gmra.mxu1 %vm880_vm6, %v870_v1  ;;  %2836 = vmatmul.mubr.msk.bf16.gmra.mxu0 %vm880_vm6, %v1246_v36  ;;  %v3457_v36 = vsel %vm1401_vm7, %v1444_v23, %v1449_v18  ;;  %v3488_v1 = vsel %vm2035_vm10, %v2043_v52, %v2045_v58  ;;  %v1576_v14 = vsel %vm1569_vm9, %v1573_v9, %v1575_v10  ;;  %v1873_v18 = vshrl.u32 %v3403_v50, 16 }
 0x135   : > { %2771 = vmatprep.mubr.msk.bf16.mxu1 %vm3085_vm2, %v3084_v39  ;;  %2867 = vmatprep.mubr.msk.bf16.mxu0 %vm3085_vm2, %v3084_v39  ;;  %v1867_v19 = vrot.slane %v1865_v4, 2  ;;  %v1870_v21 = vrot.slane %v1868_v15, 3  ;;  %v1884_v43 = vrot.slane %v1882_v26, 2  ;;  %v1887_v46 = vrot.slane %v1885_v29, 3 }
 0x136   : > { %v1891_v49 = vshrl.u32 %v3414_v57, 16  ;;  %v1894_v51 = vshll.u32 %v3414_v57, 16  ;;  %v1900_v57 = vshrl.u32 %v3421_v2, 16  ;;  %v1909_v9 = vshrl.u32 %v3444_v27, 16 }
 0x137   : > { %v1871_v38 = vor.u32 %v1870_v21, %v1867_v19 }
 0x138   : > { %v1896_v58 = vrot.slane %v1894_v51, 3 }
 0x13c   : > { %2772 = vmatmul.mubr.msk.bf16.vlgmr.msra.gmra.mxu1 %vm880_vm6, %v3277_v20  ;;  %2868 = vmatmul.mubr.msk.bf16.vlgmr.msra.gmra.mxu0 %vm880_vm6, %v1572_v5  ;;  %v3054_v20 = vld [vmem:[%s3936_s4 + $0x54] sm:$0xff]   ;;  %v1903_v5 = vshll.u32 %v3421_v2, 16  ;;  %v1912_v2 = vshll.u32 %v3444_v27, 16 }
 0x13d   : > { %2792 = vmatpush3.bf16.msra.mxu1 %v1115_v8  ;;  %2775 = vmatprep.mubr.msk.bf16.mxu1 %vm3085_vm2, %v3084_v39  ;;  %v1893_v8 = vrot.slane %v1891_v49, 2 }
 0x13e   : > { %2871 = vmatprep.mubr.msk.bf16.mxu0 %vm3085_vm2, %v3084_v39  ;;  %2793 = vmatprep.subr.bf16.mxu1 %v3084_v39 }
 0x13f   : > { %2912 = vmatpush3.bf16.msra.mxu0 %v1942_v6  ;;  %v1897_v61 = vor.u32 %v1896_v58, %v1893_v8  ;;  %v1902_v6 = vrot.slane %v1900_v57, 2 }
 0x140   : > { %2913 = vmatprep.subr.bf16.mxu0 %v3084_v39 }
 0x141   : > { %2794 = vmatpush3.bf16.msra.mxu1 %v3049_v7  ;;  %v1905_v7 = vrot.slane %v1903_v5, 3 }
 0x142   : > { %2839 = vmatprep.subr.bf16.mxu1 %v3084_v39 }
 0x143   : > { %2914 = vmatpush3.bf16.msra.mxu0 %v3054_v20  ;;  %v1906_v20 = vor.u32 %v1905_v7, %v1902_v6 }
 0x144   : > { %2776 = vmatmul.mubr.msk.bf16.gmra.mxu1 %vm880_vm6, %v3285_v37  ;;  %2959 = vmatprep.subr.bf16.mxu0 %v3084_v39  ;;  %v1577_v37 = vrot.slane %v3387_v34, 2  ;;  %v1579_v34 = vrot.slane %v3398_v47, 2  ;;  %v3055_v47 = vld [vmem:[%s3936_s4 + $0x38] ss:$0 sps:$4 sm:$0xff]  }
 0x145   : > { %2872 = vmatmul.mubr.msk.bf16.gmra.mxu0 %vm880_vm6, %v1574_v13  ;;  %2779 = vmatprep.mubr.msk.bf16.mxu1 %vm3085_vm2, %v3084_v39  ;;  %v1476_v30 = vsel %vm896_vm1, %v3055_v47, 0  ;;  %v1911_v13 = vrot.slane %v1909_v9, 2 }
 0x146   : > { %2875 = vmatprep.mubr.msk.bf16.mxu0 %vm3085_vm2, %v3084_v39  ;;  %v1578_v33 = vsel %vm1569_vm9, %v1575_v10, %v1577_v37  ;;  %v1580_v55 = vsel %vm1569_vm9, %v1577_v37, %v1579_v34  ;;  %v1914_v10 = vrot.slane %v1912_v2, 3 }
 0x14c   : > { %2780 = vmatmul.mubr.msk.bf16.gmra.mxu1 %vm880_vm6, %v3318_v12  ;;  %v797_v12 = vld [vmem:[#allocation2 + $0x24] sm:$0x7] }
 0x14d   : > { %2876 = vmatmul.mubr.msk.bf16.gmra.mxu0 %vm880_vm6, %v1576_v14  ;;  %2783 = vmatprep.mubr.msk.bf16.mxu1 %vm3085_vm2, %v3084_v39  ;;  %v2527_v45 = vcombine.low %v3369_v16, %v797_v12  ;;  %v1915_v14 = vor.u32 %v1914_v10, %v1911_v13  ;;  %v3065_v12 = vld [vmem:[%s3936_s4 + $0x68] ss:$0 sps:$4 sm:$0xff]  }
 0x14e   : > { %2879 = vmatprep.mubr.msk.bf16.mxu0 %vm3085_vm2, %v3084_v39 }
 0x14f   : > { %v1916_v27 = vsel %vm1863_vm11, %v1906_v20, %v1915_v14 }
 0x154   : > { %2784 = vmatmul.mubr.msk.bf16.gmra.mxu1 %vm880_vm6, %v3346_v48  ;;  %v1876_v48 = vshll.u32 %v3403_v50, 16  ;;  %v1875_v50 = vrot.slane %v1873_v18, 2 }
 0x155   : > { %2880 = vmatmul.mubr.msk.bf16.gmra.mxu0 %vm880_vm6, %v1578_v33  ;;  %2787 = vmatprep.mubr.msk.bf16.mxu1 %vm3085_vm2, %v3084_v39  ;;  %v3072_v33 = vld [vmem:[%s3548_s13 + $0x10] sm:$0xff]  }
 0x156   : > { %2883 = vmatprep.mubr.msk.bf16.mxu0 %vm3085_vm2, %v3084_v39  ;;  %v1878_v23 = vrot.slane %v1876_v48, 3 }
 0x158   : > { %v1879_v16 = vor.u32 %v1878_v23, %v1875_v50 }
 0x15a   : > { %v1880_v42 = vsel %vm1863_vm11, %v1871_v38, %v1879_v16 }
 0x15c   : > { %2788 = vmatmul.mubr.msk.bf16.gmra.mxu1 %vm880_vm6, %v2527_v45 }
 0x15d   : > { %2884 = vmatmul.mubr.msk.bf16.gmra.mxu0 %vm880_vm6, %v1580_v55  ;;  %2795 = vmatprep.mubr.msk.bf16.mxu1 %vm3085_vm2, %v3084_v39 }
 0x15e   : > { %2915 = vmatprep.mubr.msk.bf16.mxu0 %vm3085_vm2, %v3084_v39 }
 0x164   : > { %2796 = vmatmul.mubr.msk.bf16.vlgmr.msra.gmra.mxu1 %vm880_vm6, %v3301_v59  ;;  %v1888_v59 = vor.u32 %v1887_v46, %v1884_v43 }
 0x165   : > { %2840 = vmatpush3.bf16.msra.mxu1 %v1476_v30  ;;  %2916 = vmatmul.mubr.msk.bf16.vlgmr.msra.gmra.mxu0 %vm880_vm6, %v1880_v42 }
 0x166   : > { %2799 = vmatprep.mubr.msk.bf16.mxu1 %vm3085_vm2, %v3084_v39  ;;  %2919 = vmatprep.mubr.msk.bf16.mxu0 %vm3085_vm2, %v3084_v39  ;;  %v1889_v52 = vsel %vm1863_vm11, %v1879_v16, %v1888_v59 }
 0x167   : > { %2841 = vmatprep.subr.bf16.mxu1 %v3084_v39  ;;  %2960 = vmatpush3.bf16.msra.mxu0 %v3066_v40 }
 0x169   : > { %2842 = vmatpush3.bf16.msra.mxu1 %v3060_v56 }
 0x16a   : > { %2887 = vmatprep.subr.bf16.mxu1 %v3084_v39 }
 0x16c   : > { %2800 = vmatmul.mubr.msk.bf16.gmra.mxu1 %vm880_vm6, %v3335_v31  ;;  %v1898_v31 = vsel %vm1863_vm11, %v1888_v59, %v1897_v61 }
 0x16d   : > { %2920 = vmatmul.mubr.msk.bf16.gmra.mxu0 %vm880_vm6, %v1889_v52  ;;  %2803 = vmatprep.mubr.msk.bf16.mxu1 %vm3085_vm2, %v3084_v39 }
 0x16e   : > { %2923 = vmatprep.mubr.msk.bf16.mxu0 %vm3085_vm2, %v3084_v39 }
 0x174   : > { %2804 = vmatmul.mubr.msk.bf16.gmra.mxu1 %vm880_vm6, %v3358_v3  ;;  %v1907_v3 = vsel %vm1863_vm11, %v1897_v61, %v1906_v20 }
 0x175   : > { %2924 = vmatmul.mubr.msk.bf16.gmra.mxu0 %vm880_vm6, %v1898_v31  ;;  %2807 = vmatprep.mubr.msk.bf16.mxu1 %vm3085_vm2, %v3084_v39 }
 0x176   : > { %2927 = vmatprep.mubr.msk.bf16.mxu0 %vm3085_vm2, %v3084_v39 }
 0x17c   : > { %2808 = vmatmul.mubr.msk.bf16.gmra.mxu1 %vm880_vm6, %v3394_v44  ;;  %v3063_v44 = vld [vmem:[%s3936_s4 + $0x50] ss:$0 sps:$4 sm:$0xff]  }
 0x17d   : > { %2928 = vmatmul.mubr.msk.bf16.gmra.mxu0 %vm880_vm6, %v1907_v3  ;;  %2811 = vmatprep.mubr.msk.bf16.mxu1 %vm3085_vm2, %v3084_v39  ;;  %v1770_v37 = vsel %vm896_vm1, %v3063_v44, 0 }
 0x17e   : > { %2931 = vmatprep.mubr.msk.bf16.mxu0 %vm3085_vm2, %v3084_v39 }
 0x184   : > { %2812 = vmatmul.mubr.msk.bf16.gmra.mxu1 %vm880_vm6, %v1088_v35  ;;  %v3064_v35 = vld [vmem:[%s3936_s4 + $0x48] sm:$0xff]  }
 0x185   : > { %2932 = vmatmul.mubr.msk.bf16.gmra.mxu0 %vm880_vm6, %v1916_v27  ;;  %2843 = vmatprep.mubr.msk.bf16.mxu1 %vm3085_vm2, %v3084_v39 }
 0x186   : > { %2961 = vmatprep.mubr.msk.bf16.mxu0 %vm3085_vm2, %v3084_v39 }
 0x18c   : > { %2844 = vmatmul.mubr.msk.bf16.vlgmr.msra.gmra.mxu1 %vm880_vm6, %v3366_v11  ;;  %v3071_v11 = vld [vmem:[%s3548_s13 + $0x8] sm:$0xff]  }
 0x18d   : > { %2888 = vmatpush3.bf16.msra.mxu1 %v1770_v37  ;;  %2847 = vmatprep.mubr.msk.bf16.mxu1 %vm3085_vm2, %v3084_v39 }
 0x18e   : > { %2889 = vmatprep.subr.bf16.mxu1 %v3084_v39  ;;  %2962 = vmatmul.mubr.msk.bf16.vlgmr.msra.gmra.mxu0 %vm506_vm0, %v3069_v22 }
 0x18f   : > { %2965 = vmatprep.mubr.msk.bf16.mxu0 %vm3085_vm2, %v3084_v39 }
 0x191   : > { %2890 = vmatpush3.bf16.msra.mxu1 %v3064_v35 }
 0x192   : > { %2935 = vmatprep.subr.bf16.mxu1 %v3084_v39 }
 0x194   : > { %2848 = vmatmul.mubr.msk.bf16.gmra.mxu1 %vm880_vm6, %v3418_v60  ;;  %v3073_v60 = vld [vmem:[%s3548_s13 + $0x18] sm:$0xff]  }
 0x195   : > { %2851 = vmatprep.mubr.msk.bf16.mxu1 %vm3085_vm2, %v3084_v39 }
 0x196   : > { %2966 = vmatmul.mubr.msk.bf16.gmra.mxu0 %vm506_vm0, %v3071_v11 }
 0x197   : > { %2969 = vmatprep.mubr.msk.bf16.mxu0 %vm3085_vm2, %v3084_v39 }
 0x19c   : > { %2852 = vmatmul.mubr.msk.bf16.gmra.mxu1 %vm880_vm6, %v3429_v17  ;;  %v3074_v17 = vld [vmem:[%s3548_s13 + $0x20] sm:$0x7f]  }
 0x19d   : > { %2855 = vmatprep.mubr.msk.bf16.mxu1 %vm3085_vm2, %v3084_v39 }
 0x19e   : > { %2970 = vmatmul.mubr.msk.bf16.gmra.mxu0 %vm506_vm0, %v3072_v33 }
 0x19f   : > { %2973 = vmatprep.mubr.msk.bf16.mxu0 %vm3085_vm2, %v3084_v39 }
 0x1a4   : > { %2856 = vmatmul.mubr.msk.bf16.gmra.mxu1 %vm880_vm6, %v3454_v32  ;;  %v2072_v32 = vsel %vm896_vm1, %v3065_v12, 0 }
 0x1a5   : > { %2859 = vmatprep.mubr.msk.bf16.mxu1 %vm3085_vm2, %v3084_v39 }
 0x1a6   : > { %2974 = vmatmul.mubr.msk.bf16.gmra.mxu0 %vm506_vm0, %v3073_v60 }
 0x1a7   : > { %2977 = vmatprep.mubr.msk.bf16.mxu0 %vm3085_vm2, %v3084_v39 }
 0x1ac   : > { %2860 = vmatmul.mubr.msk.bf16.gmra.mxu1 %vm880_vm6, %v3457_v36  ;;  %v3067_v36 = vld [vmem:[%s3936_s4 + $0x60] sm:$0xff]  }
 0x1ad   : > { %2891 = vmatprep.mubr.msk.bf16.mxu1 %vm3085_vm2, %v3084_v39 }
 0x1ae   : > { %2978 = vmatmul.mubr.msk.bf16.gmra.mxu0 %vm506_vm0, %v3074_v17 }
 0x1b4   : > { %2892 = vmatmul.mubr.msk.bf16.vlgmr.msra.gmra.mxu1 %vm880_vm6, %v3436_v24 }
 0x1b5   : > { %2936 = vmatpush3.bf16.msra.mxu1 %v2072_v32  ;;  %2895 = vmatprep.mubr.msk.bf16.mxu1 %vm3085_vm2, %v3084_v39 }
 0x1b6   : > { %2937 = vmatprep.subr.bf16.mxu1 %v3084_v39 }
 0x1b9   : > { %2938 = vmatpush3.bf16.msra.mxu1 %v3067_v36 }
 0x1bc   : > { %2896 = vmatmul.mubr.msk.bf16.gmra.mxu1 %vm880_vm6, %v3439_v25 }
 0x1bd   : > { %2899 = vmatprep.mubr.msk.bf16.mxu1 %vm3085_vm2, %v3084_v39 }
 0x1c4   : > { %2900 = vmatmul.mubr.msk.bf16.gmra.mxu1 %vm880_vm6, %v3447_v28 }
 0x1c5   : > { %2903 = vmatprep.mubr.msk.bf16.mxu1 %vm3085_vm2, %v3084_v39 }
 0x1cc   : > { %2904 = vmatmul.mubr.msk.bf16.gmra.mxu1 %vm880_vm6, %v3461_v41 }
 0x1cd   : > { %2907 = vmatprep.mubr.msk.bf16.mxu1 %vm3085_vm2, %v3084_v39 }
 0x1d2   : > { %v934_v24 = vpop.f32.mrf.mxu1 }
 0x1d4   : > { %2908 = vmatmul.mubr.msk.bf16.gmra.mxu1 %vm880_vm6, %v3468_v53  ;;  %v2749_v25 = vpop.f32.mrf.mxu1  ;;  %v3691_v4 = vpop.f32.mrf.mxu0 }
 0x1d5   : > { %2939 = vmatprep.mubr.msk.bf16.mxu1 %vm3085_vm2, %v3084_v39 }
 0x1d6   : > { %v937_v28 = vpop.f32.mrf.mxu1  ;;  %v2821_v15 = vpop.f32.mrf.mxu0 }
 0x1d8   : > { %v2750_v34 = vpop.f32.mrf.mxu1  ;;  %v3695_v18 = vpop.f32.mrf.mxu0 }
 0x1da   : > { %v942_v48 = vpop.f32.mrf.mxu1  ;;  %v2822_v41 = vpop.f32.mrf.mxu0 }
 0x1dc   : > { %2940 = vmatmul.mubr.msk.bf16.vlgmr.msra.gmra.mxu1 %vm880_vm6, %v3475_v54  ;;  %v2753_v45 = vpop.f32.mrf.mxu1  ;;  %v3699_v19 = vpop.f32.mrf.mxu0 }
 0x1dd   : > { %2943 = vmatprep.mubr.msk.bf16.mxu1 %vm3085_vm2, %v3084_v39 }
 0x1de   : > { %v945_v53 = vpop.f32.mrf.mxu1  ;;  %v2825_v21 = vpop.f32.mrf.mxu0 }
 0x1e0   : > { %v2754_v55 = vpop.f32.mrf.mxu1  ;;  %v3703_v47 = vpop.f32.mrf.mxu0 }
 0x1e2   : > { %v950_v50 = vpop.f32.mrf.mxu1  ;;  %v2826_v23 = vpop.f32.mrf.mxu0 }
 0x1e4   : > { %2944 = vmatmul.mubr.msk.bf16.gmra.mxu1 %vm880_vm6, %v3479_v62  ;;  %v2757_v16 = vpop.f32.mrf.mxu1  ;;  %v3707_v26 = vpop.f32.mrf.mxu0 }
 0x1e5   : > { %2947 = vmatprep.mubr.msk.bf16.mxu1 %vm3085_vm2, %v3084_v39 }
 0x1e6   : > { %v953_v54 = vpop.f32.mrf.mxu1  ;;  %v2829_v29 = vpop.f32.mrf.mxu0 }
 0x1e8   : > { %v2758_v30 = vpop.f32.mrf.mxu1  ;;  %v3711_v38 = vpop.f32.mrf.mxu0 }
 0x1ea   : > { %v2830_v40 = vpop.f32.mrf.mxu0 }
 0x1ec   : > { %v958_v42 = vpop.f32.mrf.mxu1  ;;  %2948 = vmatmul.mubr.msk.bf16.gmra.mxu1 %vm880_vm6, %v3482_v63  ;;  %v3715_v43 = vpop.f32.mrf.mxu0 }
 0x1ed   : > { %2951 = vmatprep.mubr.msk.bf16.mxu1 %vm3085_vm2, %v3084_v39 }
 0x1ee   : > { %v2761_v62 = vpop.f32.mrf.mxu1  ;;  %v2833_v46 = vpop.f32.mrf.mxu0 }
 0x1f0   : > { %v961_v56 = vpop.f32.mrf.mxu1  ;;  %v3719_v59 = vpop.f32.mrf.mxu0 }
 0x1f2   : > { %v2762_v49 = vpop.f32.mrf.mxu1  ;;  %v2834_v51 = vpop.f32.mrf.mxu0 }
 0x1f4   : > { %v966_v52 = vpop.f32.mrf.mxu1  ;;  %2952 = vmatmul.mubr.msk.bf16.gmra.mxu1 %vm880_vm6, %v3485_v0  ;;  %v3723_v8 = vpop.f32.mrf.mxu0 }
 0x1f5   : > { %2955 = vmatprep.mubr.msk.bf16.mxu1 %vm3085_vm2, %v3084_v39 }
 0x1f6   : > { %v2765_v63 = vpop.f32.mrf.mxu1  ;;  %v2837_v58 = vpop.f32.mrf.mxu0 }
 0x1f8   : > { %v969_v61 = vpop.f32.mrf.mxu1  ;;  %v3727_v57 = vpop.f32.mrf.mxu0 }
 0x1fa   : > { %v2766_v5 = vpop.f32.mrf.mxu1  ;;  %v2838_v31 = vpop.f32.mrf.mxu0 }
 0x1fc   : > { %v1033_v6 = vpop.f32.mrf.mxu1  ;;  %2956 = vmatmul.mubr.msk.bf16.gmra.mxu1 %vm880_vm6, %v3488_v1  ;;  %v3731_v20 = vpop.f32.mrf.mxu0 }
 0x1fd   : > { %v1034_v7 = vadd.f32 %v1033_v6, %v934_v24 }
 0x1fe   : > { %v2773_v0 = vpop.f32.mrf.mxu1  ;;  %v2869_v9 = vpop.f32.mrf.mxu0 }
 0x200   : > { %v1036_v2 = vpop.f32.mrf.mxu1  ;;  %v3733_v13 = vpop.f32.mrf.mxu0 }
 0x201   : > { %v1037_v3 = vadd.f32 %v1036_v2, %v937_v28 }
 0x202   : > { %v2774_v39 = vpop.f32.mrf.mxu1  ;;  %v2870_v10 = vpop.f32.mrf.mxu0 }
 0x204   : > { %v1041_v14 = vpop.f32.mrf.mxu1 }
 0x205   : > { %v1042_v27 = vadd.f32 %v1041_v14, %v942_v48  ;;  %v3735_v44 = vpop.f32.mrf.mxu0 }
 0x206   : > { %v2777_v37 = vpop.f32.mrf.mxu1 }
 0x207   : > { %v2873_v22 = vpop.f32.mrf.mxu0 }
 0x208   : > { %v1044_v35 = vpop.f32.mrf.mxu1 }
 0x209   : > { %v1045_v11 = vadd.f32 %v1044_v35, %v945_v53  ;;  %v3737_v1 = vpop.f32.mrf.mxu0 }
 0x20a   : > { %v2778_v33 = vpop.f32.mrf.mxu1 }
 0x20b   : > { %v2874_v60 = vpop.f32.mrf.mxu0 }
 0x20c   : > { %v1049_v17 = vpop.f32.mrf.mxu1 }
 0x20d   : > { %v1050_v12 = vadd.f32 %v1049_v17, %v950_v50  ;;  %v3739_v32 = vpop.f32.mrf.mxu0 }
 0x20e   : > { %v2781_v36 = vpop.f32.mrf.mxu1 }
 0x20f   : > { %v2877_v24 = vpop.f32.mrf.mxu0 }
 0x210   : > { %v1052_v25 = vpop.f32.mrf.mxu1 }
 0x211   : > { %v1053_v28 = vadd.f32 %v1052_v25, %v953_v54  ;;  %v3741_v15 = vpop.f32.mrf.mxu0 }
 0x212   : > { %v2782_v34 = vpop.f32.mrf.mxu1 }
 0x213   : > { %v2878_v48 = vpop.f32.mrf.mxu0 }
 0x214   : > { %v1057_v41 = vpop.f32.mrf.mxu1 }
 0x215   : > { %v1058_v45 = vadd.f32 %v1057_v41, %v958_v42  ;;  %v3743_v21 = vpop.f32.mrf.mxu0 }
 0x216   : > { %v2785_v53 = vpop.f32.mrf.mxu1 }
 0x217   : > { %v2881_v55 = vpop.f32.mrf.mxu0 }
 0x218   : > { %v1060_v23 = vpop.f32.mrf.mxu1 }
 0x219   : > { %v1061_v16 = vadd.f32 %v1060_v23, %v961_v56  ;;  %v3745_v29 = vpop.f32.mrf.mxu0 }
 0x21a   : > { %v2786_v50 = vpop.f32.mrf.mxu1 }
 0x21b   : > { %v2882_v30 = vpop.f32.mrf.mxu0 }
 0x21c   : > { %v1065_v40 = vpop.f32.mrf.mxu1 }
 0x21d   : > { %v1066_v62 = vadd.f32 %v1065_v40, %v966_v52  ;;  %v3747_v46 = vpop.f32.mrf.mxu0 }
 0x21e   : > { %v2789_v54 = vpop.f32.mrf.mxu1 }
 0x21f   : > { %v2885_v49 = vpop.f32.mrf.mxu0 }
 0x220   : > { %v1068_v51 = vpop.f32.mrf.mxu1 }
 0x221   : > { %v1069_v63 = vadd.f32 %v1068_v51, %v969_v61  ;;  %v3749_v58 = vpop.f32.mrf.mxu0 }
 0x222   : > { %v2790_v42 = vpop.f32.mrf.mxu1 }
 0x223   : > { %v2886_v5 = vpop.f32.mrf.mxu0 }
 0x224   : > { %v1151_v31 = vpop.f32.mrf.mxu1 }
 0x225   : > { %v1190_v6 = vadd.f32 %v1151_v31, %v1034_v7  ;;  %v3751_v0 = vpop.f32.mrf.mxu0 }
 0x226   : > { %v2797_v56 = vpop.f32.mrf.mxu1 }
 0x227   : > { %v2917_v9 = vpop.f32.mrf.mxu0 }
 0x228   : > { %v1154_v2 = vpop.f32.mrf.mxu1 }
 0x229   : > { %v1191_v39 = vadd.f32 %v1154_v2, %v1037_v3  ;;  %v3753_v10 = vpop.f32.mrf.mxu0 }
 0x22a   : > { %v2798_v52 = vpop.f32.mrf.mxu1 }
 0x22b   : > { %v2918_v14 = vpop.f32.mrf.mxu0 }
 0x22c   : > { %v1159_v37 = vpop.f32.mrf.mxu1 }
 0x22d   : > { %v1192_v22 = vadd.f32 %v1159_v37, %v1042_v27  ;;  %v3755_v35 = vpop.f32.mrf.mxu0 }
 0x22e   : > { %v2801_v61 = vpop.f32.mrf.mxu1 }
 0x22f   : > { %v2921_v33 = vpop.f32.mrf.mxu0 }
 0x230   : > { %v1162_v60 = vpop.f32.mrf.mxu1  ;;  %v1348_v33 = vadd.f32 %v3691_v4, %v1190_v6 }
 0x231   : > { %v1193_v17 = vadd.f32 %v1162_v60, %v1045_v11  ;;  %v3757_v36 = vpop.f32.mrf.mxu0 }
 0x232   : > { %v2802_v7 = vpop.f32.mrf.mxu1 }
 0x233   : > { %v2922_v24 = vpop.f32.mrf.mxu0 }
 0x234   : > { %v1167_v25 = vpop.f32.mrf.mxu1 }
 0x235   : > { %v1194_v34 = vadd.f32 %v1167_v25, %v1050_v12  ;;  %v3759_v48 = vpop.f32.mrf.mxu0 }
 0x236   : > { %v2805_v3 = vpop.f32.mrf.mxu1 }
 0x237   : > { %v2925_v41 = vpop.f32.mrf.mxu0 }
 0x238   : > { %v1170_v53 = vpop.f32.mrf.mxu1 }
 0x239   : > { %v1195_v55 = vadd.f32 %v1170_v53, %v1053_v28  ;;  %v3761_v23 = vpop.f32.mrf.mxu0 }
 0x23a   : > { %v2806_v27 = vpop.f32.mrf.mxu1 }
 0x23b   : > { %v2926_v50 = vpop.f32.mrf.mxu0 }
 0x23c   : > { %v1175_v30 = vpop.f32.mrf.mxu1  ;;  %v1350_v50 = vadd.f32 %v3699_v19, %v1192_v22 }
 0x23d   : > { %v1196_v40 = vadd.f32 %v1175_v30, %v1058_v45  ;;  %v3763_v54 = vpop.f32.mrf.mxu0 }
 0x23e   : > { %v2809_v11 = vpop.f32.mrf.mxu1 }
 0x23f   : > { %v2929_v49 = vpop.f32.mrf.mxu0 }
 0x240   : > { %v1178_v51 = vpop.f32.mrf.mxu1 }
 0x241   : > { %v1197_v42 = vadd.f32 %v1178_v51, %v1061_v16  ;;  %v3765_v5 = vpop.f32.mrf.mxu0  ;;  %v1351_v51 = vadd.f32 %v3703_v47, %v1193_v17 }
 0x242   : > { %v2810_v12 = vpop.f32.mrf.mxu1 }
 0x243   : > { %v2930_v31 = vpop.f32.mrf.mxu0 }
 0x244   : > { %v1183_v56 = vpop.f32.mrf.mxu1 }
 0x245   : > { %v1198_v9 = vadd.f32 %v1183_v56, %v1066_v62  ;;  %v3767_v2 = vpop.f32.mrf.mxu0  ;;  %v1349_v62 = vadd.f32 %v3695_v18, %v1191_v39 }
 0x246   : > { %v2813_v28 = vpop.f32.mrf.mxu1 }
 0x247   : > { %v2933_v52 = vpop.f32.mrf.mxu0  ;;  %v1352_v28 = vadd.f32 %v3707_v26, %v1194_v34 }
 0x248   : > { %v1186_v14 = vpop.f32.mrf.mxu1 }
 0x249   : > { %v1199_v37 = vadd.f32 %v1186_v14, %v1069_v63  ;;  %v3769_v61 = vpop.f32.mrf.mxu0 }
 0x24a   : > { %v2814_v45 = vpop.f32.mrf.mxu1 }
 0x24b   : > { %v2934_v60 = vpop.f32.mrf.mxu0 }
 0x24c   : > { %v1512_v7 = vpop.f32.mrf.mxu1 }
 0x24d   : > { %v3772_v16 = vadd.f32 %v1512_v7, %v1348_v33  ;;  %v1353_v33 = vadd.f32 %v3711_v38, %v1195_v55 }
 0x24e   : > { %v2845_v24 = vpop.f32.mrf.mxu1  ;;  %v3774_v25 = vpop.f32.mrf.mxu0 }
 0x250   : > { %v1515_v3 = vpop.f32.mrf.mxu1  ;;  %v2963_v41 = vpop.f32.mrf.mxu0 }
 0x251   : > { %v3777_v53 = vadd.f32 %v1515_v3, %v1349_v62  ;;  %v1354_v62 = vadd.f32 %v3715_v43, %v1196_v40 }
 0x252   : > { %v2846_v27 = vpop.f32.mrf.mxu1  ;;  %v3779_v63 = vpop.f32.mrf.mxu0 }
 0x254   : > { %v1520_v30 = vpop.f32.mrf.mxu1  ;;  %v2964_v4 = vpop.f32.mrf.mxu0 }
 0x255   : > { %v3782_v6 = vadd.f32 %v1520_v30, %v1350_v50  ;;  %v1355_v50 = vadd.f32 %v3719_v59, %v1197_v42 }
 0x256   : > { %v2849_v11 = vpop.f32.mrf.mxu1  ;;  %v3784_v49 = vpop.f32.mrf.mxu0 }
 0x258   : > { %v1523_v12 = vpop.f32.mrf.mxu1  ;;  %v2967_v18 = vpop.f32.mrf.mxu0 }
 0x259   : > { %v3787_v39 = vadd.f32 %v1523_v12, %v1351_v51  ;;  %v1356_v51 = vadd.f32 %v3723_v8, %v1198_v9 }
 0x25a   : > { %v2850_v31 = vpop.f32.mrf.mxu1  ;;  %v3789_v56 = vpop.f32.mrf.mxu0 }
 0x25c   : > { %v1528_v52 = vpop.f32.mrf.mxu1  ;;  %v2968_v19 = vpop.f32.mrf.mxu0 }
 0x25d   : > { %v3792_v22 = vadd.f32 %v1528_v52, %v1352_v28  ;;  %v1357_v28 = vadd.f32 %v3727_v57, %v1199_v37 }
 0x25e   : > { %v2853_v14 = vpop.f32.mrf.mxu1  ;;  %v3794_v45 = vpop.f32.mrf.mxu0 }
 0x260   : > { %v1531_v60 = vpop.f32.mrf.mxu1  ;;  %v2971_v47 = vpop.f32.mrf.mxu0 }
 0x261   : > { %v3797_v17 = vadd.f32 %v1531_v60, %v1353_v33 }
 0x262   : > { %v2854_v7 = vpop.f32.mrf.mxu1  ;;  %v3799_v24 = vpop.f32.mrf.mxu0 }
 0x264   : > { %v1536_v3 = vpop.f32.mrf.mxu1  ;;  %v2972_v26 = vpop.f32.mrf.mxu0 }
 0x265   : > { %v3802_v34 = vadd.f32 %v1536_v3, %v1354_v62 }
 0x266   : > { %v2857_v41 = vpop.f32.mrf.mxu1  ;;  %v3804_v27 = vpop.f32.mrf.mxu0 }
 0x268   : > { %v1539_v30 = vpop.f32.mrf.mxu1  ;;  %v2975_v38 = vpop.f32.mrf.mxu0 }
 0x269   : > { %v3807_v55 = vadd.f32 %v1539_v30, %v1355_v50 }
 0x26a   : > { %v2858_v4 = vpop.f32.mrf.mxu1  ;;  %v3809_v11 = vpop.f32.mrf.mxu0 }
 0x26c   : > { %v1544_v12 = vpop.f32.mrf.mxu1  ;;  %v2976_v43 = vpop.f32.mrf.mxu0 }
 0x26d   : > { %v3812_v40 = vadd.f32 %v1544_v12, %v1356_v51  ;;  %v1681_v43 = vadd.f32 %v3731_v20, %v3772_v16  ;;  %v3842_v20 = vld [vmem:[%s3937_s5] ss:$0 sm:$0xff]  ;;  %v1683_v16 = vadd.f32 %v3735_v44, %v3782_v6 }
 0x26e   : > { %v2861_v18 = vpop.f32.mrf.mxu1  ;;  %v3814_v31 = vpop.f32.mrf.mxu0 }
 0x270   : > { %v1547_v52 = vpop.f32.mrf.mxu1  ;;  %v2979_v59 = vpop.f32.mrf.mxu0 }
 0x271   : > { %v3817_v42 = vadd.f32 %v1547_v52, %v1357_v28  ;;  %v1682_v59 = vadd.f32 %v3733_v13, %v3777_v53 }
 0x272   : > { %v2862_v19 = vpop.f32.mrf.mxu1  ;;  %v3819_v14 = vpop.f32.mrf.mxu0 }
 0x274   : > { %v1806_v33 = vpop.f32.mrf.mxu1  ;;  %v2980_v60 = vpop.f32.mrf.mxu0 }
 0x275   : > { %v1845_v28 = vadd.f32 %v1806_v33, %v1681_v43 }
 0x276   : > { %v2893_v47 = vpop.f32.mrf.mxu1 }
 0x277   : > { %v2017_v47 = vadd.f32 %v3751_v0, %v1845_v28 }
 0x278   : > { %v1809_v8 = vpop.f32.mrf.mxu1 }
 0x279   : > { %v1846_v60 = vadd.f32 %v1809_v8, %v1682_v59 }
 0x27a   : > { %v2894_v9 = vpop.f32.mrf.mxu1 }
 0x27b   : > { %v3837_v9 = vld [vmem:[%s3940_s8] ss:$0 sm:$0xff] }
 0x27c   : > { %v1814_v7 = vpop.f32.mrf.mxu1  ;;  %v2284_v0 = vadd.f32 %v3837_v9, %v3774_v25  ;;  %v1685_v25 = vadd.f32 %v3739_v32, %v3792_v22 }
 0x27d   : > { %v1847_v53 = vadd.f32 %v1814_v7, %v1683_v16 }
 0x27e   : > { %v2897_v62 = vpop.f32.mrf.mxu1 }
 0x27f   : > { %v2019_v7 = vadd.f32 %v3755_v35, %v1847_v53  ;;  %v2292_v35 = vadd.f32 %v3837_v9, %v3784_v49 }
 0x280   : > { %v1817_v3 = vpop.f32.mrf.mxu1 }
 0x282   : > { %v2898_v26 = vpop.f32.mrf.mxu1 }
 0x283   : > { %v2018_v26 = vadd.f32 %v3753_v10, %v1846_v60  ;;  %v2287_v10 = vadd.f32 %v3837_v9, %v3779_v63 }
 0x284   : > { %v1822_v41 = vpop.f32.mrf.mxu1 }
 0x286   : > { %v2901_v50 = vpop.f32.mrf.mxu1 }
 0x288   : > { %v1825_v30 = vpop.f32.mrf.mxu1 }
 0x28a   : > { %v2902_v57 = vpop.f32.mrf.mxu1 }
 0x28b   : > { %v1684_v57 = vadd.f32 %v3737_v1, %v3787_v39  ;;  %v1849_v1 = vadd.f32 %v1822_v41, %v1685_v25  ;;  %v1686_v41 = vadd.f32 %v3741_v15, %v3797_v17  ;;  %v2295_v17 = vadd.f32 %v3837_v9, %v3789_v56 }
 0x28c   : > { %v3821_v37 = vpop.f32.mrf.mxu1 }
 0x28d   : > { %v2021_v49 = vadd.f32 %v3759_v48, %v1849_v1  ;;  %v1850_v53 = vadd.f32 %v1825_v30, %v1686_v41  ;;  %v2300_v30 = vadd.f32 %v3837_v9, %v3794_v45 }
 0x28e   : > { %v2905_v38 = vpop.f32.mrf.mxu1 }
 0x290   : > { %v3823_v4 = vpop.f32.mrf.mxu1 }
 0x292   : > { %v2906_v51 = vpop.f32.mrf.mxu1 }
 0x294   : > { %v3825_v12 = vpop.f32.mrf.mxu1 }
 0x296   : > { %v2909_v18 = vpop.f32.mrf.mxu1 }
 0x297   : > { %v1848_v18 = vadd.f32 %v1817_v3, %v1684_v57 }
 0x298   : > { %v3829_v52 = vpop.f32.mrf.mxu1 }
 0x299   : > { %v2020_v63 = vadd.f32 %v3757_v36, %v1848_v18  ;;  %v1687_v36 = vadd.f32 %v3743_v21, %v3802_v34  ;;  %v2022_v34 = vadd.f32 %v3761_v23, %v1850_v53  ;;  %v1689_v23 = vadd.f32 %v3747_v46, %v3812_v40 }
 0x29a   : > { %v2910_v19 = vpop.f32.mrf.mxu1 }
 0x29b   : > { %v1851_v48 = vadd.f32 %v3821_v37, %v1687_v36 }
 0x29c   : > { %v2108_v62 = vpop.f32.mrf.mxu1 }
 0x29d   : > { %v2147_v33 = vadd.f32 %v2108_v62, %v2017_v47  ;;  %v2023_v45 = vadd.f32 %v3763_v54, %v1851_v48  ;;  %v1853_v54 = vadd.f32 %v3825_v12, %v1689_v23 }
 0x29e   : > { %v2941_v13 = vpop.f32.mrf.mxu1 }
 0x29f   : > { %v2164_v8 = vadd.f32 %v3842_v20, %v2147_v33 }
 0x2a0   : > { %v2111_v50 = vpop.f32.mrf.mxu1 }
 0x2a1   : > { %v2174_v38 = vmax.f32 %v2164_v8, 0.0  ;;  %v2148_v51 = vadd.f32 %v2111_v50, %v2018_v26 }
 0x2a2   : > { %v2942_v43 = vpop.f32.mrf.mxu1 }
 0x2a3   : > { %v2322_v44 = vadd.f32 %v2284_v0, %v2174_v38  ;;  %v2165_v6 = vadd.f32 %v3842_v20, %v2148_v51 }
 0x2a4   : > { %v2116_v28 = vpop.f32.mrf.mxu1 }
 0x2a5   : > { %v2332_v59 = vmax.f32 %v2322_v44, 0.0  ;;  %v2175_v19 = vmax.f32 %v2165_v6, 0.0  ;;  %v2149_v60 = vadd.f32 %v2116_v28, %v2019_v7  ;;  %v1688_v6 = vadd.f32 %v3745_v29, %v3807_v55 }
 0x2a6   : > { %v2945_v39 = vpop.f32.mrf.mxu1  ;;  %v2303_v55 = vadd.f32 %v3837_v9, %v3799_v24 }
 0x2a7   : > { %v2664_v32 = vpack.c.bf16 %v2332_v59, %v2332_v59  ;;  %v2323_v22 = vadd.f32 %v2287_v10, %v2175_v19  ;;  %v2166_v3 = vadd.f32 %v3842_v20, %v2149_v60  ;;  %v1852_v28 = vadd.f32 %v3823_v4, %v1688_v6 }
 0x2a8   : > { %v2119_v47 = vpop.f32.mrf.mxu1  ;;  %v2308_v4 = vadd.f32 %v3837_v9, %v3804_v27  ;;  %v2025_v27 = vadd.f32 %v3767_v2, %v1853_v54  ;;  %v2316_v2 = vadd.f32 %v3837_v9, %v3814_v31 }
 0x2a9   : > { %2382 = vst.msk [vmem:[%s3863_s16] sm:$0xf] %vm773_vm3, %v2664_v32  ;;  %v2333_v62 = vmax.f32 %v2323_v22, 0.0  ;;  %v2176_v16 = vmax.f32 %v2166_v3, 0.0  ;;  %v2150_v33 = vadd.f32 %v2119_v47, %v2020_v63  ;;  %v2024_v40 = vadd.f32 %v3765_v5, %v1852_v28 }
 0x2aa   : > { %v2946_v13 = vpop.f32.mrf.mxu1  ;;  %v1690_v63 = vadd.f32 %v3749_v58, %v3817_v42  ;;  %v2311_v58 = vadd.f32 %v3837_v9, %v3809_v11 }
 0x2ab   : > { %v2665_v0 = vpack.c.bf16 %v2333_v62, %v2333_v62  ;;  %v2324_v8 = vadd.f32 %v2292_v35, %v2176_v16  ;;  %v2167_v26 = vadd.f32 %v3842_v20, %v2150_v33 }
 0x2ac   : > { %v2124_v50 = vpop.f32.mrf.mxu1  ;;  %v1854_v62 = vadd.f32 %v3829_v52, %v1690_v63 }
 0x2ad   : > { %2383 = vst.msk [vmem:[%s3863_s16 + $0x4] sm:$0xf] %vm773_vm3, %v2665_v0  ;;  %v2334_v15 = vmax.f32 %v2324_v8, 0.0  ;;  %v2177_v57 = vmax.f32 %v2167_v26, 0.0  ;;  %v2151_v38 = vadd.f32 %v2124_v50, %v2021_v49 }
 0x2ae   : > { %v2949_v51 = vpop.f32.mrf.mxu1  ;;  %v2026_v36 = vadd.f32 %v3769_v61, %v1854_v62 }
 0x2af   : > { %v2666_v43 = vpack.c.bf16 %v2334_v15, %v2334_v15  ;;  %v2325_v18 = vadd.f32 %v2295_v17, %v2177_v57  ;;  %v2168_v21 = vadd.f32 %v3842_v20, %v2151_v38  ;;  %v2319_v51 = vadd.f32 %v3837_v9, %v3819_v14 }
 0x2b0   : > { %v2127_v44 = vpop.f32.mrf.mxu1 }
 0x2b1   : > { %2384 = vst.msk [vmem:[%s3863_s16 + $0x8] sm:$0xf] %vm773_vm3, %v2666_v43  ;;  %v2335_v56 = vmax.f32 %v2325_v18, 0.0  ;;  %v2178_v7 = vmax.f32 %v2168_v21, 0.0  ;;  %v2152_v37 = vadd.f32 %v2127_v44, %v2022_v34 }
 0x2b2   : > { %v2950_v25 = vpop.f32.mrf.mxu1 }
 0x2b3   : > { %v2667_v59 = vpack.c.bf16 %v2335_v56, %v2335_v56  ;;  %v2326_v10 = vadd.f32 %v2300_v30, %v2178_v7  ;;  %v2169_v19 = vadd.f32 %v3842_v20, %v2152_v37 }
 0x2b4   : > { %v2132_v60 = vpop.f32.mrf.mxu1 }
 0x2b5   : > { %2385 = vst.msk [vmem:[%s3863_s16 + $0xc] sm:$0xf] %vm773_vm3, %v2667_v59  ;;  %v2336_v29 = vmax.f32 %v2326_v10, 0.0  ;;  %v2179_v1 = vmax.f32 %v2169_v19, 0.0  ;;  %v2153_v35 = vadd.f32 %v2132_v60, %v2023_v45 }
 0x2b6   : > { %v2953_v39 = vpop.f32.mrf.mxu1 }
 0x2b7   : > { %v2668_v32 = vpack.c.bf16 %v2336_v29, %v2336_v29  ;;  %v2327_v22 = vadd.f32 %v2303_v55, %v2179_v1  ;;  %v2170_v46 = vadd.f32 %v3842_v20, %v2153_v35 }
 0x2b8   : > { %v2135_v3 = vpop.f32.mrf.mxu1 }
 0x2b9   : > { %2386 = vst.msk [vmem:[%s3863_s16 + $0x10] sm:$0xf] %vm773_vm3, %v2668_v32  ;;  %v2337_v24 = vmax.f32 %v2327_v22, 0.0  ;;  %v2180_v47 = vmax.f32 %v2170_v46, 0.0  ;;  %v2154_v12 = vadd.f32 %v2135_v3, %v2024_v40 }
 0x2ba   : > { %v2954_v41 = vpop.f32.mrf.mxu1 }
 0x2bb   : > { %v2669_v16 = vpack.c.bf16 %v2337_v24, %v2337_v24  ;;  %v2328_v33 = vadd.f32 %v2308_v4, %v2180_v47  ;;  %v2171_v13 = vadd.f32 %v3842_v20, %v2154_v12 }
 0x2bc   : > { %v2140_v5 = vpop.f32.mrf.mxu1 }
 0x2bd   : > { %2387 = vst.msk [vmem:[%s3863_s16 + $0x14] sm:$0xf] %vm773_vm3, %v2669_v16  ;;  %v2338_v49 = vmax.f32 %v2328_v33, 0.0  ;;  %v2181_v42 = vmax.f32 %v2171_v13, 0.0  ;;  %v2155_v53 = vadd.f32 %v2140_v5, %v2025_v27 }
 0x2be   : > { %v2957_v0 = vpop.f32.mrf.mxu1 }
 0x2bf   : > { %v2670_v52 = vpack.c.bf16 %v2338_v49, %v2338_v49  ;;  %v2329_v8 = vadd.f32 %v2311_v58, %v2181_v42  ;;  %v2172_v26 = vadd.f32 %v3842_v20, %v2155_v53 }
 0x2c0   : > { %v2143_v50 = vpop.f32.mrf.mxu1 }
 0x2c1   : > { %2388 = vst.msk [vmem:[%s3863_s16 + $0x18] sm:$0xf] %vm773_vm3, %v2670_v52  ;;  %v2339_v15 = vmax.f32 %v2329_v8, 0.0  ;;  %v2182_v17 = vmax.f32 %v2172_v26, 0.0  ;;  %v2156_v11 = vadd.f32 %v2143_v50, %v2026_v36 }
 0x2c2   : > { %v2958_v57 = vpop.f32.mrf.mxu1 }
 0x2c3   : > { %v2671_v38 = vpack.c.bf16 %v2339_v15, %v2339_v15  ;;  %v2330_v48 = vadd.f32 %v2316_v2, %v2182_v17  ;;  %v2173_v31 = vadd.f32 %v3842_v20, %v2156_v11 }
 0x2c5   : > { %2389 = vst.msk [vmem:[%s3863_s16 + $0x1c] sm:$0xf] %vm773_vm3, %v2671_v38  ;;  %v2340_v30 = vmax.f32 %v2330_v48, 0.0  ;;  %v2183_v61 = vmax.f32 %v2173_v31, 0.0 }
 0x2c7   : > { %v2672_v43 = vpack.c.bf16 %v2340_v30, %v2340_v30  ;;  %v2331_v18 = vadd.f32 %v2319_v51, %v2183_v61 }
 0x2c9   : > { %2390 = vst.msk [vmem:[%s3863_s16 + $0x20] sm:$0xf] %vm773_vm3, %v2672_v43  ;;  %v2341_v21 = vmax.f32 %v2331_v18, 0.0 }
 0x2cb   : > { %v2673_v34 = vpack.c.bf16 %v2341_v21, %v2341_v21 }
 0x2cd   : > { %2392 = vst.msk [vmem:[%s3863_s16 + $0x24] sm:$0x7] %vm2391_vm12, %v2673_v34 }
 0x2ce PF: > { %s19_s30 = sadd.s32 1, %s3081_s30  }
 0x2cf   : > { %p16_p4 = scmp.ge.s32.totalorder %s19_s30, 4  }
 0x2d1   :  { %18 = sbr.rel (!%p16_p4) target bundleno = 1 (0x1), region = 97 }

// kernel: _lambda_.12
= control target key start
LH: loop header
LB: loop body
LE: loop exit
PB: predicated region body
PF: predicated region fallthrough
CT: control target
= control target key end

     0   :  { %s2980_s24 = smov 0   ;;  %s3767_s0 = inlined_call_operand.vmem [shape: bf16[2,100,216], index: 0, kind: input, shape index: {}]   ;;  %s3768_s1 = inlined_call_operand.vmem [shape: f32[100,1], index: 1, kind: input, shape index: {}]   ;;  %s3769_s2 = inlined_call_operand.vmem [shape: bf16[216,24], index: 2, kind: input, shape index: {}]   ;;  %s3770_s3 = inlined_call_operand.vmem [shape: f32[1,24], index: 3, kind: input, shape index: {}, may-alias: {3,5}]   ;;  %s3771_s4 = inlined_call_operand.vmem [shape: bf16[9,24,24], index: 4, kind: input, shape index: {}]   ;;  %s3772_s5 = inlined_call_operand.vmem [shape: f32[1,24], index: 5, kind: input, shape index: {}, may-alias: {3,5}]   ;;  %s3773_s6 = inlined_call_operand.vmem [shape: bf16[2,78,24], index: 6, kind: input, shape index: {}]   ;;  %s3774_s7 = inlined_call_operand.vmem [shape: bf16[2,78,24], index: 7, kind: output, shape index: {}]  }
   0x1 LB: > { %s2327_s25 = sadd.s32 4294967295, %s2935_s24   ;;  %p2331_p0 = scmp.ge.s32.totalorder %s2935_s24, 1  ;;  %s2935_s24 = sphi %s2980_s24, %s17_s24  }
   0x2   : > { %p247_p1 = scmp.lt.s32.totalorder %s2935_s24, 3 }
   0x4   : > { %p248_p2 = pnand %p2331_p0, %p247_p1 }
   0x5   : > { %p284_p3 = scmp.lt.s32.totalorder (!%p248_p2), %s2327_s25, 1 }
   0x6   : > { %251 = sbr.rel (%p248_p2) target bundleno = 738 (0x2e2), region = 48 }
   0xb   : > { %v2851_v0 = vld [vmem:[%s3769_s2 + $0x38] sm:$0xff]   ;;  %v2937_v1 = vmov 0   ;;  %v2852_v2 = vld [vmem:[%s3769_s2 + $0x30] sm:$0xff]   ;;  %s3776_s25 = smov (!%p284_p3, %s2327_s25), 1  ;;  %v2853_v3 = vld [vmem:[%s3769_s2 + $0x28] sm:$0xff]   ;;  %vm488_vm0 = vcmask 719872  }
   0xc   : > { %514 = vmatprep.subr.bf16.mxu0 %v2937_v1  ;;  %2849 = vset.pattern.permute.xlu0 %v2937_v1  ;;  %s2836_s9 = smul.u32 104, %s3776_s25  ;;  %v2854_v4 = vld [vmem:[%s3769_s2 + $0x20] sm:$0xff]   ;;  %v2855_v5 = vld [vmem:[%s3769_s2 + $0x18] sm:$0xff]   ;;  %v2856_v7 = vld [vmem:[%s3769_s2 + $0x10] sm:$0xff]   ;;  %vm510_vm1 = vcmask 1043456   ;;  %v2938_v45 = vmov 0.0  }
   0xd   : > { %515 = vmatpush1.bf16.msra.mxu0 %v2851_v0  ;;  %2850 = vset.pattern.permute.xlu1 %v2937_v1  ;;  %v2857_v8 = vld [vmem:[%s3769_s2 + $0x8] sm:$0xff]   ;;  %v617_v9 = vld [vmem:[%s3768_s1 + $0x10] sm:$0xff]  ;;  %v619_v10 = vld [vmem:[%s3768_s1 + $0x20] sm:$0xff]  ;;  %vm2939_vm2 = vmmov 0   ;;  %vm759_vm3 = vcmask 191488   ;;  %vm1065_vm4 = vcmask 1046528  }
   0xe   : > { %516 = vmatprep.subr.bf16.mxu0 %v2937_v1  ;;  %s3012_s14 = scalar_lea.vmem %s3767_s0, %s2836_s9  ;;  %640 = vperm.xlu0 %2849, %v617_v9   ;;  %v618_v11 = vld [vmem:[%s3768_s1 + $0x18] sm:$0xff]  ;;  %v2858_v12 = vld [vmem:[%s3769_s2] sm:$0xff]   ;;  %v2859_v13 = vld [vmem:[%s3769_s2 + $0x68] ss:$0 sps:$4 sm:$0xff]   ;;  %vm817_vm5 = vsmask.f32 7424 }
   0xf   : > { %v2867_v6 = vld [vmem:[%s3012_s14 + $0x4] ss:$8 sps:$4 sm:$0xff]   ;;  %650 = vperm.xlu1 %2850, %v619_v10   ;;  %v621_v15 = vld [vmem:[%s3768_s1 + $0x30] sm:$0xff]  ;;  %v622_v16 = vld [vmem:[%s3768_s1 + $0x38] sm:$0xff]  ;;  %v512_v17 = vsel %vm510_vm1, %v2859_v13, 0  ;;  %2832 = vmatprep.subr.bf16.mxu1 %v2938_v45  ;;  %vm866_vm6 = vcmask 195584  }
  0x10   : > { %2364 = vmatprep.mubr.msk.bf16.mxu0 %vm488_vm0, %v2867_v6  ;;  %v620_v14 = vld [vmem:[%s3768_s1 + $0x28] sm:$0xff]  ;;  %v623_v18 = vld [vmem:[%s3768_s1 + $0x40] sm:$0xff]  ;;  %v2861_v23 = vld [vmem:[%s3769_s2 + $0x58] sm:$0xff]   ;;  %2624 = vmatprep.mubr.msk.bf16.mxu1 %vm2939_vm2, %v2938_v45  ;;  %vm1386_vm7 = vsmask.f32 6400  ;;  %vm772_vm8 = vcmask 189440  }
  0x11   : > { %517 = vmatpush1.bf16.msra.mxu0 %v2852_v2  ;;  %v624_v19 = vld [vmem:[%s3768_s1 + $0x48] sm:$0xff]  ;;  %v2860_v20 = vld [vmem:[%s3769_s2 + $0x60] sm:$0xff]   ;;  %v625_v24 = vld [vmem:[%s3768_s1 + $0x50] sm:$0xff]  ;;  %vm1554_vm9 = vcmask 1045504   ;;  %vm2020_vm10 = vcmask 1044480   ;;  %s2837_s17 = smul.u32 40, %s3776_s25 }
  0x12   : > { %518 = vmatprep.subr.bf16.mxu0 %v2937_v1  ;;  %645 = vperm.xlu0 %2849, %v618_v11   ;;  %v615_v21 = vld [vmem:[%s3768_s1] sm:$0xff]  ;;  %v616_v22 = vld [vmem:[%s3768_s1 + $0x8] sm:$0xff]  ;;  %v626_v25 = vld [vmem:[%s3768_s1 + $0x58] sm:$0xff]  ;;  %vm1848_vm11 = vsmask.f32 5376  ;;  %vm2258_vm12 = vcmask 190464  }
  0x13   : > { %655 = vperm.xlu1 %2850, %v620_v14   ;;  %v2862_v26 = vld [vmem:[%s3769_s2 + $0x50] sm:$0xff]   ;;  %v627_v27 = vld [vmem:[%s3768_s1 + $0x60] sm:$0xf]  ;;  %v2863_v28 = vld [vmem:[%s3769_s2 + $0x48] sm:$0xff]   ;;  %s3686_s20 = scalar_lea.vmem %s3773_s6, %s2837_s17  ;;  %s3710_s26 = scalar_lea.vmem %s3774_s7, %s2837_s17 }
  0x14   : > { %v2864_v29 = vld [vmem:[%s3769_s2 + $0x40] sm:$0xff]   ;;  %v2868_v31 = vld [vmem:[%s3012_s14 + $0x14] ss:$8 sps:$4 sm:$0xff]   ;;  %v2870_v32 = vld [vmem:[%s3012_s14 + $0x10] ss:$8 sps:$4 sm:$0xff]  }
  0x15   : > { %519 = vmatpush1.bf16.msra.mxu0 %v2853_v3  ;;  %v2865_v30 = vld [vmem:[%s3012_s14] ss:$8 sps:$4 sm:$0xff]   ;;  %v2871_v33 = vld [vmem:[%s3012_s14 + $0x24] ss:$8 sps:$4 sm:$0xff]   ;;  %v2874_v35 = vld [vmem:[%s3012_s14 + $0x34] ss:$8 sps:$4 sm:$0xff]  }
  0x16   : > { %520 = vmatprep.subr.bf16.mxu0 %v2937_v1  ;;  %660 = vperm.xlu0 %2849, %v621_v15   ;;  %v2873_v34 = vld [vmem:[%s3012_s14 + $0x20] ss:$8 sps:$4 sm:$0xff]   ;;  %v2876_v36 = vld [vmem:[%s3012_s14 + $0x30] ss:$8 sps:$4 sm:$0xff]   ;;  %v2877_v37 = vld [vmem:[%s3012_s14 + $0x44] ss:$8 sps:$4 sm:$0xff]  }
  0x17   : > { %665 = vperm.xlu1 %2850, %v622_v16   ;;  %v2879_v38 = vld [vmem:[%s3012_s14 + $0x40] ss:$8 sps:$4 sm:$0xff]   ;;  %v2880_v39 = vld [vmem:[%s3012_s14 + $0x54] ss:$8 sps:$4 sm:$0xff]   ;;  %v2882_v41 = vld [vmem:[%s3012_s14 + $0x50] ss:$8 sps:$4 sm:$0xff]  }
  0x18   : > { %v312_v40 = vld [vmem:[%s3012_s14 + $0x60] sm:$0x33]  ;;  %v2885_v44 = vld [vmem:[%s3771_s4 + $0x14] ss:$0 sps:$4 sm:$0xff]   ;;  %v2886_v47 = vld [vmem:[%s3771_s4 + $0xc] sm:$0xff]  }
  0x19   : > { %521 = vmatpush1.bf16.msra.mxu0 %v2854_v4  ;;  %v2349_v42 = vcombine.high %v312_v40, %v312_v40  ;;  %v2348_v43 = vcombine.low %v312_v40, %v312_v40  ;;  %v883_v46 = vsel %vm510_vm1, %v2885_v44, 0  ;;  %v3140_v55 = vld [vmem:[%s3770_s3] ss:$0 sm:$0xff] }
  0x1a   : > { %522 = vmatprep.subr.bf16.mxu0 %v2937_v1  ;;  %670 = vperm.xlu0 %2849, %v623_v18  }
  0x1b   : > { %675 = vperm.xlu1 %2850, %v624_v19   ;;  %2834 = vmatpush3.bf16.msra.mxu1 %v883_v46 }
  0x1c   : > { %2833 = vmatprep.subr.bf16.mxu1 %v2938_v45 }
  0x1d   : > { %523 = vmatpush1.bf16.msra.mxu0 %v2855_v5 }
  0x1e   : > { %524 = vmatprep.subr.bf16.mxu0 %v2937_v1  ;;  %630 = vperm.xlu0 %2849, %v615_v21  }
  0x1f   : > { %635 = vperm.xlu1 %2850, %v616_v22   ;;  %2835 = vmatpush3.bf16.msra.mxu1 %v2886_v47 }
  0x20   : > { %2640 = vmatprep.subr.bf16.mxu1 %v2938_v45 }
  0x21   : > { %525 = vmatpush1.bf16.msra.mxu0 %v2856_v7 }
  0x22   : > { %526 = vmatprep.subr.bf16.mxu0 %v2937_v1  ;;  %680 = vperm.xlu0 %2849, %v625_v24  }
  0x23   : > { %685 = vperm.xlu1 %2850, %v626_v25  }
  0x25   : > { %527 = vmatpush1.bf16.msra.mxu0 %v2857_v8 }
  0x26   : > { %528 = vmatprep.subr.bf16.mxu0 %v2937_v1  ;;  %690 = vperm.xlu0 %2849, %v627_v27  }
  0x29   : > { %529 = vmatpush1.bf16.msra.mxu0 %v2858_v12 }
  0x2a   : > { %534 = vmatprep.subr.bf16.mxu0 %v2937_v1 }
  0x2d   : > { %535 = vmatpush2.bf16.msra.mxu0 %v512_v17 }
  0x2e   : > { %536 = vmatprep.subr.bf16.mxu0 %v2937_v1 }
  0x31   : > { %537 = vmatpush2.bf16.msra.mxu0 %v2860_v20 }
  0x32   : > { %538 = vmatprep.subr.bf16.mxu0 %v2937_v1 }
  0x35   : > { %539 = vmatpush2.bf16.msra.mxu0 %v2861_v23 }
  0x36   : > { %540 = vmatprep.subr.bf16.mxu0 %v2937_v1 }
  0x39   : > { %541 = vmatpush2.bf16.msra.mxu0 %v2862_v26 }
  0x3a   : > { %542 = vmatprep.subr.bf16.mxu0 %v2937_v1 }
  0x3d   : > { %543 = vmatpush2.bf16.msra.mxu0 %v2863_v28 }
  0x3e   : > { %544 = vmatprep.subr.bf16.mxu0 %v2937_v1 }
  0x41   : > { %545 = vmatpush2.bf16.msra.mxu0 %v2864_v29 }
  0x42   : > { %2616 = vmatprep.subr.bf16.mxu0 %v2938_v45 }
  0x44   : > { %547 = vmatmul.mubr.bf16.vlgmr.msra.gmra.mxu0 %v2865_v30 }
  0x45   : > { %2365 = vmatprep.mubr.msk.bf16.mxu0 %vm488_vm0, %v2868_v31  ;;  %2617 = vmatpush3.bf16.msra.mxu0 %v883_v46 }
  0x46   : > { %2618 = vmatprep.subr.bf16.mxu0 %v2938_v45 }
  0x49   : > { %2619 = vmatpush3.bf16.msra.mxu0 %v2886_v47  ;;  %v2889_v47 = vld [vmem:[%s3771_s4 + $0x2c] ss:$0 sps:$4 sm:$0xff]  }
  0x4a   : > { %2688 = vmatprep.subr.bf16.mxu0 %v2938_v45 }
  0x4c   : > { %555 = vmatmul.mubr.bf16.gmra.mxu0 %v2870_v32 }
  0x4d   : > { %2366 = vmatprep.mubr.msk.bf16.mxu0 %vm488_vm0, %v2871_v33 }
  0x54   : > { %563 = vmatmul.mubr.bf16.gmra.mxu0 %v2873_v34 }
  0x55   : > { %2367 = vmatprep.mubr.msk.bf16.mxu0 %vm488_vm0, %v2874_v35 }
  0x5c   : > { %571 = vmatmul.mubr.bf16.gmra.mxu0 %v2876_v36 }
  0x5d   : > { %2368 = vmatprep.mubr.msk.bf16.mxu0 %vm488_vm0, %v2877_v37 }
  0x64   : > { %579 = vmatmul.mubr.bf16.gmra.mxu0 %v2879_v38 }
  0x65   : > { %2369 = vmatprep.mubr.msk.bf16.mxu0 %vm488_vm0, %v2880_v39 }
  0x6c   : > { %587 = vmatmul.mubr.bf16.gmra.mxu0 %v2882_v41 }
  0x6d   : > { %2370 = vmatprep.mubr.msk.bf16.mxu0 %vm488_vm0, %v2349_v42 }
  0x74   : > { %595 = vmatmul.mubr.bf16.gmra.mxu0 %v2348_v43 }
  0x75   : > { %2620 = vmatprep.mubr.msk.bf16.mxu0 %vm2939_vm2, %v2938_v45 }
  0x89   : > { %v641_v48 = vpop.permute.xlu0 %640 }
  0x8a   : > { %v651_v49 = vpop.permute.xlu1 %650 }
  0x8d   : > { %v646_v50 = vpop.permute.xlu0 %645 }
  0x8e   : > { %v656_v51 = vpop.permute.xlu1 %655 }
  0x91   : > { %v3131_v52 = vpop.permute.xlu0 %660 }
  0x92   : > { %v3133_v53 = vpop.permute.xlu1 %665 }
  0x95   : > { %v3135_v54 = vpop.permute.xlu0 %670 }
  0x96   : > { %v3142_v57 = vpop.permute.xlu1 %675 }
  0x99   : > { %v631_v60 = vpop.permute.xlu0 %630 }
  0x9a   : > { %v636_v2 = vpop.permute.xlu1 %635 }
 0x104   : > { %v548_v56 = vpop.f32.mrf.mxu0 }
 0x105   : > { %v549_v58 = vadd.f32 %v3140_v55, %v548_v56 }
 0x106   : > { %v550_v59 = vpop.f32.mrf.mxu0 }
 0x107   : > { %v602_v61 = vmax.f32 %v549_v58, 0.0 }
 0x108   : > { %v551_v62 = vpop.f32.mrf.mxu0 }
 0x109   : > { %v693_v63 = vmul.f32 %v631_v60, %v602_v61  ;;  %v552_v0 = vadd.f32 %v3140_v55, %v551_v62 }
 0x10a   : > { %v553_v1 = vpop.f32.mrf.mxu0 }
 0x10b   : > { %v2511_v3 = vpack.c.bf16 %v693_v63, %v693_v63  ;;  %v603_v4 = vmax.f32 %v552_v0, 0.0  ;;  %v1258_v1 = vsel %vm510_vm1, %v2889_v47, 0 }
 0x10c   : > { %v556_v5 = vpop.f32.mrf.mxu0 }
 0x10d   : > { %760 = vst.msk [vmem:[#allocation2] sm:$0xf] %vm759_vm3, %v2511_v3  ;;  %v694_v6 = vmul.f32 %v636_v2, %v603_v4  ;;  %v557_v7 = vadd.f32 %v3140_v55, %v556_v5 }
 0x10e   : > { %v558_v8 = vpop.f32.mrf.mxu0 }
 0x10f   : > { %v2512_v9 = vpack.c.bf16 %v694_v6, %v694_v6  ;;  %v604_v10 = vmax.f32 %v557_v7, 0.0  ;;  %v2890_v7 = vld [vmem:[%s3771_s4 + $0x24] sm:$0xff]  }
 0x110   : > { %v559_v11 = vpop.f32.mrf.mxu0 }
 0x111   : > { %761 = vst.msk [vmem:[#allocation2 + $0x4] sm:$0xf] %vm759_vm3, %v2512_v9  ;;  %v695_v12 = vmul.f32 %v641_v48, %v604_v10  ;;  %v560_v13 = vadd.f32 %v3140_v55, %v559_v11 }
 0x112   : > { %v561_v14 = vpop.f32.mrf.mxu0 }
 0x113   : > { %v2513_v15 = vpack.c.bf16 %v695_v12, %v695_v12  ;;  %v605_v16 = vmax.f32 %v560_v13, 0.0  ;;  %v2902_v14 = vld [vmem:[%s3771_s4 + $0x44] ss:$0 sps:$4 sm:$0xff]  }
 0x114   : > { %v564_v17 = vpop.f32.mrf.mxu0  ;;  %v774_v24 = vld [vmem:[#allocation2] sm:$0xf] }
 0x115   : > { %762 = vst.msk [vmem:[#allocation2 + $0x8] sm:$0xf] %vm759_vm3, %v2513_v15  ;;  %v696_v18 = vmul.f32 %v646_v50, %v605_v16  ;;  %v565_v19 = vadd.f32 %v3140_v55, %v564_v17  ;;  %v1057_v36 = vld [vmem:[#allocation2] sm:$0xe] }
 0x116   : > { %v566_v20 = vpop.f32.mrf.mxu0 }
 0x117   : > { %v2514_v21 = vpack.c.bf16 %v696_v18, %v696_v18  ;;  %v606_v22 = vmax.f32 %v565_v19, 0.0 }
 0x118   : > { %v567_v23 = vpop.f32.mrf.mxu0  ;;  %v775_v25 = vld [vmem:[#allocation2 + $0x4] sm:$0xf] }
 0x119   : > { %763 = vst.msk [vmem:[#allocation2 + $0xc] sm:$0xf] %vm759_vm3, %v2514_v21  ;;  %v697_v26 = vmul.f32 %v651_v49, %v606_v22  ;;  %v568_v27 = vadd.f32 %v3140_v55, %v567_v23  ;;  %v3154_v28 = vcombine.low %v774_v24, %v775_v25  ;;  %v2410_v38 = vcombine.low %v1057_v36, %v775_v25  ;;  %v1343_v19 = vld [vmem:[#allocation2 + $0x4] sm:$0xe] }
 0x11a   : > { %v569_v29 = vpop.f32.mrf.mxu0 }
 0x11b   : > { %v2515_v30 = vpack.c.bf16 %v697_v26, %v697_v26  ;;  %v607_v31 = vmax.f32 %v568_v27, 0.0  ;;  %v821_v33 = vshll.u32 %v3154_v28, 16  ;;  %v819_v49 = vshrl.u32 %v3154_v28, 16 }
 0x11c   : > { %v572_v32 = vpop.f32.mrf.mxu0  ;;  %v2893_v8 = vld [vmem:[#allocation2 + $0x4] sm:$0xfe]  }
 0x11d   : > { %764 = vst.msk [vmem:[#allocation2 + $0x10] sm:$0xf] %vm759_vm3, %v2515_v30  ;;  %v698_v34 = vmul.f32 %v656_v51, %v607_v31  ;;  %v573_v35 = vadd.f32 %v3140_v55, %v572_v32  ;;  %v823_v43 = vrot.slane %v821_v33, 1  ;;  %v1066_v51 = vrot.slane %v2410_v38, 1  ;;  %v3187_v9 = vld [vmem:[#allocation2 + $0x8] sm:$0xf] }
 0x11e   : > { %v574_v37 = vpop.f32.mrf.mxu0  ;;  %v1224_v22 = vrot.slane %v2893_v8, 1  ;;  %v2436_v23 = vcombine.low %v1343_v19, %v3187_v9 }
 0x11f   : > { %v2516_v39 = vpack.c.bf16 %v698_v34, %v698_v34  ;;  %v608_v40 = vmax.f32 %v573_v35, 0.0  ;;  %v1591_v37 = vsel %vm510_vm1, %v2902_v14, 0 }
 0x120   : > { %v575_v41 = vpop.f32.mrf.mxu0  ;;  %v3159_v42 = vld [vmem:[#allocation2 + $0x8] sm:$0xff]  }
 0x121   : > { %765 = vst.msk [vmem:[#allocation2 + $0x14] sm:$0xf] %vm759_vm3, %v2516_v39  ;;  %v699_v44 = vmul.f32 %v3131_v52, %v608_v40  ;;  %v576_v46 = vadd.f32 %v3140_v55, %v575_v41  ;;  %v826_v50 = vshll.u32 %v3159_v42, 16  ;;  %v1067_v56 = vrot.slane %v3159_v42, 1 }
 0x122   : > { %v577_v48 = vpop.f32.mrf.mxu0  ;;  %v824_v52 = vor.u32 %v823_v43, %v819_v49  ;;  %v830_v16 = vshrl.u32 %v3159_v42, 16  ;;  %v1388_v40 = vshrl.u32 %v2436_v23, 16  ;;  %v1391_v41 = vshll.u32 %v2436_v23, 16  ;;  %v681_v43 = vpop.permute.xlu0 %680 }
 0x123   : > { %v2517_v58 = vpack.c.bf16 %v699_v44, %v699_v44  ;;  %v609_v59 = vmax.f32 %v576_v46, 0.0  ;;  %v828_v61 = vrot.slane %v826_v50, 1  ;;  %v3171_v62 = vsel %vm1065_vm4, %v1066_v51, %v1067_v56 }
 0x124   : > { %v580_v60 = vpop.f32.mrf.mxu0  ;;  %v3178_v4 = vld [vmem:[#allocation2 + $0xc] sm:$0xff]  }
 0x125   : > { %766 = vst.msk [vmem:[#allocation2 + $0x18] sm:$0xf] %vm759_vm3, %v2517_v58  ;;  %v700_v63 = vmul.f32 %v3133_v53, %v609_v59  ;;  %v581_v0 = vadd.f32 %v3140_v55, %v580_v60  ;;  %v829_v3 = vsel %vm817_vm5, %v824_v52, %v828_v61  ;;  %v2892_v53 = vld [vmem:[%s3771_s4 + $0x8] ss:$0 sps:$4 sm:$0xff]   ;;  %v1225_v18 = vrot.slane %v3178_v4, 1  ;;  %v3205_v27 = vld [vmem:[#allocation2 + $0xc] sm:$0xff]  }
 0x126   : > { %v582_v2 = vpop.f32.mrf.mxu0  ;;  %2621 = vmatmul.mubr.msk.bf16.vlgmr.msra.gmra.mxu0 %vm866_vm6, %v829_v3  ;;  %v832_v25 = vor.u32 %v830_v16, %v828_v61  ;;  %v982_v32 = vsel %vm510_vm1, %v2892_v53, 0  ;;  %v1396_v47 = vshrl.u32 %v3205_v27, 16  ;;  %v2903_v59 = vld [vmem:[%s3771_s4 + $0x3c] sm:$0xff]   ;;  %v1399_v52 = vshll.u32 %v3205_v27, 16 }
 0x127   : > { %v2518_v5 = vpack.c.bf16 %v700_v63, %v700_v63  ;;  %v610_v6 = vmax.f32 %v581_v0, 0.0  ;;  %2689 = vmatpush3.bf16.msra.mxu0 %v1258_v1  ;;  %2692 = vmatprep.mubr.msk.bf16.mxu0 %vm2939_vm2, %v2938_v45  ;;  %v1226_v35 = vsel %vm1065_vm4, %v1224_v22, %v1225_v18  ;;  %v1390_v0 = vrot.slane %v1388_v40, 1  ;;  %v686_v2 = vpop.permute.xlu1 %685 }
 0x128   : > { %v583_v10 = vpop.f32.mrf.mxu0  ;;  %v3191_v11 = vld [vmem:[#allocation2 + $0x10] sm:$0xff]   ;;  %2690 = vmatprep.subr.bf16.mxu0 %v2938_v45  ;;  %v1393_v1 = vrot.slane %v1391_v41, 2  ;;  %v1398_v53 = vrot.slane %v1396_v47, 1  ;;  %v1401_v16 = vrot.slane %v1399_v52, 2 }
 0x129   : > { %767 = vst.msk [vmem:[#allocation2 + $0x1c] sm:$0xf] %vm759_vm3, %v2518_v5  ;;  %v701_v12 = vmul.f32 %v3135_v54, %v610_v6  ;;  %v584_v13 = vadd.f32 %v3140_v55, %v583_v10  ;;  %v834_v17 = vshll.u32 %v3191_v11, 16  ;;  %v1069_v20 = vrot.slane %v3191_v11, 1 }
 0x12a   : > { %v585_v15 = vpop.f32.mrf.mxu0  ;;  %v838_v50 = vshrl.u32 %v3191_v11, 16 }
 0x12b   : > { %v2519_v21 = vpack.c.bf16 %v701_v12, %v701_v12  ;;  %v611_v54 = vmax.f32 %v584_v13, 0.0  ;;  %2691 = vmatpush3.bf16.msra.mxu0 %v2890_v7  ;;  %v836_v26 = vrot.slane %v834_v17, 1  ;;  %v3208_v29 = vsel %vm1065_vm4, %v1067_v56, %v1069_v20 }
 0x12c   : > { %v588_v24 = vpop.f32.mrf.mxu0  ;;  %2736 = vmatprep.subr.bf16.mxu0 %v2938_v45  ;;  %v3219_v36 = vld [vmem:[#allocation2 + $0x14] sm:$0xff]  }
 0x12d   : > { %768 = vst.msk [vmem:[#allocation2 + $0x20] sm:$0xf] %vm759_vm3, %v2519_v21  ;;  %v702_v30 = vmul.f32 %v3142_v57, %v611_v54  ;;  %v589_v31 = vadd.f32 %v3140_v55, %v588_v24  ;;  %v837_v34 = vsel %vm817_vm5, %v832_v25, %v836_v26  ;;  %v2898_v57 = vld [vmem:[%s3771_s4] sm:$0xff]   ;;  %v1227_v58 = vrot.slane %v3219_v36, 1  ;;  %v3260_v15 = vld [vmem:[#allocation2 + $0x14] sm:$0xff]  }
 0x12e   : > { %v590_v33 = vpop.f32.mrf.mxu0  ;;  %2625 = vmatmul.mubr.msk.bf16.vlgmr.msra.gmra.mxu1 %vm866_vm6, %v837_v34  ;;  %2693 = vmatmul.mubr.msk.bf16.vlgmr.msra.gmra.mxu0 %vm866_vm6, %v1226_v35  ;;  %v840_v5 = vor.u32 %v838_v50, %v836_v26  ;;  %v1394_v21 = vor.u32 %v1393_v1, %v1390_v0  ;;  %v1402_v54 = vor.u32 %v1401_v16, %v1398_v53  ;;  %v3313_v0 = vld [vmem:[#allocation2 + $0x10] sm:$0xff]  }
 0x12f   : > { %v2520_v38 = vpack.c.bf16 %v702_v30, %v702_v30  ;;  %v612_v39 = vmax.f32 %v589_v31, 0.0  ;;  %2641 = vmatpush3.bf16.msra.mxu1 %v982_v32  ;;  %2628 = vmatprep.mubr.msk.bf16.mxu1 %vm2939_vm2, %v2938_v45  ;;  %v1228_v13 = vsel %vm1065_vm4, %v1225_v18, %v1227_v58  ;;  %v1405_v31 = vshrl.u32 %v3260_v15, 16 }
 0x130   : > { %v591_v44 = vpop.f32.mrf.mxu0  ;;  %v3229_v46 = vld [vmem:[#allocation2 + $0x18] sm:$0xff]   ;;  %2696 = vmatprep.mubr.msk.bf16.mxu0 %vm2939_vm2, %v2938_v45  ;;  %2642 = vmatprep.subr.bf16.mxu1 %v2938_v45  ;;  %v3279_v30 = vsel %vm1386_vm7, %v1394_v21, %v1402_v54  ;;  %v1408_v32 = vshll.u32 %v3260_v15, 16 }
 0x131   : > { %769 = vst.msk [vmem:[#allocation2 + $0x24] sm:$0xf] %vm759_vm3, %v2520_v38  ;;  %v703_v48 = vmul.f32 %v681_v43, %v612_v39  ;;  %v592_v49 = vadd.f32 %v3140_v55, %v591_v44  ;;  %v842_v56 = vshll.u32 %v3229_v46, 16  ;;  %2737 = vmatpush3.bf16.msra.mxu0 %v1591_v37  ;;  %v1071_v60 = vrot.slane %v3229_v46, 1  ;;  %v3315_v1 = vld [vmem:[#allocation2 + $0x18] sm:$0xff]  }
 0x132   : > { %v593_v51 = vpop.f32.mrf.mxu0  ;;  %2738 = vmatprep.subr.bf16.mxu0 %v2938_v45  ;;  %v846_v35 = vshrl.u32 %v3229_v46, 16  ;;  %v1407_v43 = vrot.slane %v1405_v31, 1  ;;  %v1410_v47 = vrot.slane %v1408_v32, 2  ;;  %v1722_v21 = vrot.slane %v3315_v1, 2 }
 0x133   : > { %v2521_v61 = vpack.c.bf16 %v703_v48, %v703_v48  ;;  %v613_v63 = vmax.f32 %v592_v49, 0.0  ;;  %v844_v6 = vrot.slane %v842_v56, 1  ;;  %2643 = vmatpush3.bf16.msra.mxu1 %v2898_v57  ;;  %v3247_v7 = vsel %vm1065_vm4, %v1069_v20, %v1071_v60  ;;  %v1676_v51 = vld [vmem:[#allocation2 + $0x8] sm:$0xc]  ;;  %v1677_v56 = vld [vmem:[#allocation2 + $0xc] sm:$0xf] }
 0x134   : > { %v596_v3 = vpop.f32.mrf.mxu0  ;;  %2664 = vmatprep.subr.bf16.mxu1 %v2938_v45  ;;  %v3258_v14 = vld [vmem:[#allocation2 + $0x1c] sm:$0xff]   ;;  %v1411_v36 = vor.u32 %v1410_v47, %v1407_v43  ;;  %v2022_v47 = vrot.slane %v3313_v0, 3 }
 0x135   : > { %770 = vst.msk [vmem:[#allocation2 + $0x28] sm:$0xf] %vm759_vm3, %v2521_v61  ;;  %v704_v8 = vmul.f32 %v686_v2, %v613_v63  ;;  %v597_v10 = vadd.f32 %v3140_v55, %v596_v3  ;;  %v845_v12 = vsel %vm817_vm5, %v840_v5, %v844_v6  ;;  %2739 = vmatpush3.bf16.msra.mxu0 %v2903_v59  ;;  %v691_v55 = vpop.permute.xlu0 %690  ;;  %v3268_v4 = vld [vmem:[#allocation2 + $0x20] sm:$0xf]  ;;  %v1229_v25 = vrot.slane %v3258_v14, 1 }
 0x136   : > { %v598_v17 = vpop.f32.mrf.mxu0  ;;  %2629 = vmatmul.mubr.msk.bf16.gmra.mxu1 %vm866_vm6, %v845_v12  ;;  %2697 = vmatmul.mubr.msk.bf16.gmra.mxu0 %vm866_vm6, %v1228_v13  ;;  %v3276_v26 = vld [vmem:[#allocation2 + $0x1c] sm:$0xff]   ;;  %v848_v39 = vor.u32 %v846_v35, %v844_v6  ;;  %v3311_v63 = vcombine.low %v1676_v51, %v1677_v56  ;;  %v3318_v2 = vsel %vm1386_vm7, %v1402_v54, %v1411_v36 }
 0x137   : > { %v2522_v19 = vpack.c.bf16 %v704_v8, %v704_v8  ;;  %v614_v20 = vmax.f32 %v597_v10, 0.0  ;;  %2632 = vmatprep.mubr.msk.bf16.mxu1 %vm2939_vm2, %v2938_v45  ;;  %2700 = vmatprep.mubr.msk.bf16.mxu0 %vm2939_vm2, %v2938_v45  ;;  %v1230_v44 = vsel %vm1065_vm4, %v1227_v58, %v1229_v25  ;;  %v1414_v48 = vshrl.u32 %v3276_v26, 16 }
 0x138   : > { %v787_v18 = vld [vmem:[#allocation2 + $0x24] sm:$0xf]  ;;  %v599_v22 = vpop.f32.mrf.mxu0  ;;  %2784 = vmatprep.subr.bf16.mxu0 %v2938_v45  ;;  %v1417_v52 = vshll.u32 %v3276_v26, 16 }
 0x139   : > { %771 = vst.msk [vmem:[#allocation2 + $0x2c] sm:$0xf] %vm759_vm3, %v2522_v19  ;;  %v705_v23 = vmul.f32 %v691_v55, %v614_v20  ;;  %v3272_v24 = vcombine.low %v3268_v4, %v787_v18  ;;  %v3322_v8 = vld [vmem:[#allocation2 + $0x20] sm:$0xff]   ;;  %v2012_v19 = vld [vmem:[#allocation2 + $0x8] sm:$0x8]  ;;  %v1719_v55 = vrot.slane %v3311_v63, 2 }
 0x13a   : > { %v600_v33 = vpop.f32.mrf.mxu0  ;;  %v1419_v3 = vrot.slane %v1417_v52, 2  ;;  %v1720_v18 = vrot.slane %v3313_v0, 2 }
 0x13b   : > { %v2523_v34 = vpack.c.bf16 %v705_v23, %v705_v23  ;;  %v850_v37 = vshll.u32 %v3272_v24, 16  ;;  %v1073_v38 = vrot.slane %v3272_v24, 1  ;;  %v854_v61 = vshrl.u32 %v3272_v24, 16  ;;  %v2924_v24 = vld [vmem:[%s3771_s4 + $0x48] sm:$0xff]  }
 0x13c   : > { %v3286_v40 = vld [vmem:[#allocation2 + $0x24] sm:$0xff]   ;;  %v3339_v31 = vsel %vm1554_vm9, %v1719_v55, %v1720_v18  ;;  %v3342_v32 = vsel %vm1554_vm9, %v1720_v18, %v1722_v21  ;;  %v1724_v33 = vrot.slane %v3322_v8, 2 }
 0x13d   : > { %773 = vst.msk [vmem:[#allocation2 + $0x30] sm:$0x3] %vm772_vm8, %v2523_v34  ;;  %v852_v57 = vrot.slane %v850_v37, 1  ;;  %v3291_v41 = vsel %vm1065_vm4, %v1071_v60, %v1073_v38  ;;  %v3299_v50 = vld [vmem:[#allocation2 + $0x24] sm:$0xff]   ;;  %v1231_v58 = vrot.slane %v3286_v40, 1  ;;  %v1416_v60 = vrot.slane %v1414_v48, 1 }
 0x13e   : > { %2701 = vmatmul.mubr.msk.bf16.gmra.mxu0 %vm866_vm6, %v1230_v44  ;;  %v1423_v5 = vshrl.u32 %v3299_v50, 16  ;;  %v1426_v6 = vshll.u32 %v3299_v50, 16  ;;  %v2024_v48 = vrot.slane %v3315_v1, 3  ;;  %v783_v55 = vld [vmem:[#allocation2 + $0x24] sm:$0x7] }
 0x13f   : > { %v853_v49 = vsel %vm817_vm5, %v848_v39, %v852_v57  ;;  %2704 = vmatprep.mubr.msk.bf16.mxu0 %vm2939_vm2, %v2938_v45  ;;  %v856_v53 = vor.u32 %v854_v61, %v852_v57  ;;  %v1232_v12 = vsel %vm1065_vm4, %v1229_v25, %v1231_v58  ;;  %v1420_v14 = vor.u32 %v1419_v3, %v1416_v60  ;;  %v2901_v39 = vld [vmem:[%s3771_s4 + $0x20] ss:$0 sps:$4 sm:$0xff]  }
 0x140   : > { %2633 = vmatmul.mubr.msk.bf16.gmra.mxu1 %vm866_vm6, %v853_v49  ;;  %v3304_v59 = vld [vmem:[#allocation2 + $0x2c] ss:$0 sps:$4 sm:$0x11]   ;;  %v1425_v16 = vrot.slane %v1423_v5, 1  ;;  %v1428_v17 = vrot.slane %v1426_v6, 2  ;;  %v2490_v25 = vcombine.low %v2012_v19, %v1677_v56  ;;  %v3359_v57 = vsel %vm1554_vm9, %v1722_v21, %v1724_v33 }
 0x141   : > { %2636 = vmatprep.mubr.msk.bf16.mxu1 %vm2939_vm2, %v2938_v45  ;;  %v1432_v10 = vshll.u32 %v3304_v59, 16  ;;  %v3326_v13 = vld [vmem:[#allocation2 + $0x28] sm:$0xff]   ;;  %v3333_v54 = vsel %vm1386_vm7, %v1411_v36, %v1420_v14  ;;  %v2026_v56 = vrot.slane %v3322_v8, 3  ;;  %v3376_v52 = vsel %vm2020_vm10, %v2022_v47, %v2024_v48 }
 0x142   : > { %v1429_v22 = vor.u32 %v1428_v17, %v1425_v16  ;;  %v1726_v40 = vrot.slane %v3326_v13, 2  ;;  %v2021_v44 = vrot.slane %v2490_v25, 3  ;;  %v2028_v36 = vrot.slane %v3326_v13, 3 }
 0x143   : > { %v1434_v20 = vrot.slane %v1432_v10, 2  ;;  %v1100_v3 = vsel %vm510_vm1, %v2901_v39, 0  ;;  %v3381_v5 = vsel %vm2020_vm10, %v2024_v48, %v2026_v56  ;;  %v1558_v19 = vrot.slane %v3260_v15, 2 }
 0x144   : > { %v2927_v23 = vld [vmem:[#allocation2 + $0x30] ss:$0 sps:$4 sm:$0x11]   ;;  %v3350_v35 = vsel %vm1386_vm7, %v1420_v14, %v1429_v22  ;;  %v3365_v49 = vsel %vm1554_vm9, %v1724_v33, %v1726_v40  ;;  %v3373_v60 = vsel %vm2020_vm10, %v2021_v44, %v2022_v47  ;;  %v3384_v6 = vsel %vm2020_vm10, %v2026_v56, %v2028_v36 }
 0x145   : > { %v3347_v34 = vld [vmem:[#allocation2 + $0x30] ss:$0 sps:$4 sm:$0x33]   ;;  %v3353_v37 = vsel %vm1386_vm7, %v1429_v22, %v1434_v20  ;;  %v1728_v43 = vrot.slane %v2927_v23, 2  ;;  %v1556_v14 = vrot.slane %v3205_v27, 2  ;;  %v2915_v27 = vld [vmem:[%s3771_s4 + $0x54] sm:$0xff]   ;;  %v2399_v18 = vcombine.low %v3268_v4, %v783_v55 }
 0x146   : > { %2705 = vmatmul.mubr.msk.bf16.gmra.mxu0 %vm866_vm6, %v1232_v12  ;;  %v2030_v61 = vrot.slane %v3347_v34, 3  ;;  %v1858_v4 = vshrl.u32 %v3313_v0, 16  ;;  %v1861_v21 = vshll.u32 %v3313_v0, 16  ;;  %v1850_v22 = vshrl.u32 %v3311_v63, 16 }
 0x147   : > { %2708 = vmatprep.mubr.msk.bf16.mxu0 %vm2939_vm2, %v2938_v45  ;;  %v3368_v51 = vsel %vm1554_vm9, %v1726_v40, %v1728_v43  ;;  %v1559_v20 = vsel %vm1554_vm9, %v1556_v14, %v1558_v19  ;;  %v1853_v23 = vshll.u32 %v3311_v63, 16  ;;  %v2919_v63 = vld [vmem:[%s3771_s4 + $0x30] sm:$0xff]   ;;  %v1867_v44 = vshrl.u32 %v3315_v1, 16 }
 0x148   : > { %2637 = vmatmul.mubr.msk.bf16.gmra.mxu1 %vm866_vm6, %v856_v53  ;;  %v1546_v53 = vld [vmem:[#allocation2 + $0x4] sm:$0xc]  ;;  %v3388_v10 = vsel %vm2020_vm10, %v2028_v36, %v2030_v61  ;;  %v1860_v39 = vrot.slane %v1858_v4, 2  ;;  %v1863_v40 = vrot.slane %v1861_v21, 3  ;;  %v1870_v47 = vshll.u32 %v3315_v1, 16 }
 0x149   : > { %2644 = vmatprep.mubr.msk.bf16.mxu1 %vm2939_vm2, %v2938_v45  ;;  %v2452_v12 = vcombine.low %v1546_v53, %v3187_v9  ;;  %v1855_v0 = vrot.slane %v1853_v23, 3  ;;  %v1869_v56 = vrot.slane %v1867_v44, 2  ;;  %v1876_v61 = vshrl.u32 %v3322_v8, 16 }
 0x14a   : > { %v1864_v43 = vor.u32 %v1863_v40, %v1860_v39  ;;  %v1872_v36 = vrot.slane %v1870_v47, 3 }
 0x14b   : > { %v1555_v16 = vrot.slane %v2452_v12, 2  ;;  %v1878_v12 = vrot.slane %v1876_v61, 2 }
 0x14c   : > { %v1873_v1 = vor.u32 %v1872_v36, %v1869_v56 }
 0x14d   : > { %v1557_v9 = vsel %vm1554_vm9, %v1555_v16, %v1556_v14  ;;  %v1885_v14 = vshrl.u32 %v3326_v13, 16 }
 0x14e   : > { %2709 = vmatmul.mubr.msk.bf16.gmra.mxu0 %vm866_vm6, %v1231_v58  ;;  %v2908_v58 = vld [vmem:[%s3771_s4 + $0x18] sm:$0xff]   ;;  %v1874_v53 = vsel %vm1848_vm11, %v1864_v43, %v1873_v1 }
 0x14f   : > { %2740 = vmatprep.mubr.msk.bf16.mxu0 %vm2939_vm2, %v2938_v45  ;;  %v1887_v16 = vrot.slane %v1885_v14, 2 }
 0x150   : > { %2645 = vmatmul.mubr.msk.bf16.vlgmr.msra.gmra.mxu1 %vm866_vm6, %v3154_v28  ;;  %v2914_v28 = vld [vmem:[%s3771_s4 + $0x5c] ss:$0 sps:$4 sm:$0xff]  }
 0x151   : > { %2665 = vmatpush3.bf16.msra.mxu1 %v1100_v3  ;;  %2648 = vmatprep.mubr.msk.bf16.mxu1 %vm2939_vm2, %v2938_v45  ;;  %v1927_v17 = vsel %vm510_vm1, %v2914_v28, 0  ;;  %v1879_v3 = vshll.u32 %v3322_v8, 16  ;;  %v1888_v8 = vshll.u32 %v3326_v13, 16  ;;  %v1897_v13 = vshll.u32 %v3347_v34, 16 }
 0x152   : > { %2666 = vmatprep.subr.bf16.mxu1 %v2938_v45 }
 0x155   : > { %2667 = vmatpush3.bf16.msra.mxu1 %v2908_v58  ;;  %v1881_v58 = vrot.slane %v1879_v3, 3 }
 0x156   : > { %2712 = vmatprep.subr.bf16.mxu1 %v2938_v45  ;;  %2741 = vmatmul.mubr.msk.bf16.vlgmr.msra.gmra.mxu0 %vm866_vm6, %v1557_v9  ;;  %v1890_v9 = vrot.slane %v1888_v8, 3 }
 0x157   : > { %2744 = vmatprep.mubr.msk.bf16.mxu0 %vm2939_vm2, %v2938_v45  ;;  %2785 = vmatpush3.bf16.msra.mxu0 %v1927_v17  ;;  %v1894_v17 = vshrl.u32 %v3347_v34, 16 }
 0x158   : > { %2649 = vmatmul.mubr.msk.bf16.gmra.mxu1 %vm866_vm6, %v3159_v42  ;;  %2786 = vmatprep.subr.bf16.mxu0 %v2938_v45  ;;  %v1560_v42 = vrot.slane %v3276_v26, 2 }
 0x159   : > { %2652 = vmatprep.mubr.msk.bf16.mxu1 %vm2939_vm2, %v2938_v45 }
 0x15a   : > { %v1561_v15 = vsel %vm1554_vm9, %v1558_v19, %v1560_v42  ;;  %v1896_v19 = vrot.slane %v1894_v17, 2 }
 0x15b   : > { %2787 = vmatpush3.bf16.msra.mxu0 %v2915_v27 }
 0x15e   : > { %2745 = vmatmul.mubr.msk.bf16.gmra.mxu0 %vm866_vm6, %v1559_v20  ;;  %v1899_v20 = vrot.slane %v1897_v13, 3 }
 0x15f   : > { %2748 = vmatprep.mubr.msk.bf16.mxu0 %vm2939_vm2, %v2938_v45 }
 0x160   : > { %2653 = vmatmul.mubr.msk.bf16.gmra.mxu1 %vm866_vm6, %v3191_v11  ;;  %v1562_v11 = vrot.slane %v3299_v50, 2  ;;  %v1564_v50 = vrot.slane %v3304_v59, 2  ;;  %v1852_v59 = vrot.slane %v1850_v22, 2  ;;  %v1900_v34 = vor.u32 %v1899_v20, %v1896_v19 }
 0x161   : > { %2656 = vmatprep.mubr.msk.bf16.mxu1 %vm2939_vm2, %v2938_v45 }
 0x162   : > { %v1563_v26 = vsel %vm1554_vm9, %v1560_v42, %v1562_v11  ;;  %v1565_v33 = vsel %vm1554_vm9, %v1562_v11, %v1564_v50 }
 0x166   : > { %2749 = vmatmul.mubr.msk.bf16.gmra.mxu0 %vm866_vm6, %v1561_v15 }
 0x167   : > { %2752 = vmatprep.mubr.msk.bf16.mxu0 %vm2939_vm2, %v2938_v45 }
 0x168   : > { %2657 = vmatmul.mubr.msk.bf16.gmra.mxu1 %vm866_vm6, %v3229_v46  ;;  %v2912_v46 = vld [vmem:[%s3771_s4 + $0x38] ss:$0 sps:$4 sm:$0xff]  }
 0x169   : > { %2660 = vmatprep.mubr.msk.bf16.mxu1 %vm2939_vm2, %v2938_v45  ;;  %v1461_v25 = vsel %vm510_vm1, %v2912_v46, 0 }
 0x16e   : > { %2753 = vmatmul.mubr.msk.bf16.gmra.mxu0 %vm866_vm6, %v1563_v26 }
 0x16f   : > { %2756 = vmatprep.mubr.msk.bf16.mxu0 %vm2939_vm2, %v2938_v45 }
 0x170   : > { %2661 = vmatmul.mubr.msk.bf16.gmra.mxu1 %vm866_vm6, %v2399_v18 }
 0x171   : > { %2668 = vmatprep.mubr.msk.bf16.mxu1 %vm2939_vm2, %v2938_v45 }
 0x176   : > { %2757 = vmatmul.mubr.msk.bf16.gmra.mxu0 %vm866_vm6, %v1565_v33 }
 0x177   : > { %2788 = vmatprep.mubr.msk.bf16.mxu0 %vm2939_vm2, %v2938_v45 }
 0x178   : > { %2669 = vmatmul.mubr.msk.bf16.vlgmr.msra.gmra.mxu1 %vm866_vm6, %v3171_v62  ;;  %v1856_v62 = vor.u32 %v1855_v0, %v1852_v59 }
 0x179   : > { %2713 = vmatpush3.bf16.msra.mxu1 %v1461_v25  ;;  %2672 = vmatprep.mubr.msk.bf16.mxu1 %vm2939_vm2, %v2938_v45 }
 0x17a   : > { %2714 = vmatprep.subr.bf16.mxu1 %v2938_v45  ;;  %v1865_v48 = vsel %vm1848_vm11, %v1856_v62, %v1864_v43 }
 0x17d   : > { %2715 = vmatpush3.bf16.msra.mxu1 %v2919_v63 }
 0x17e   : > { %2760 = vmatprep.subr.bf16.mxu1 %v2938_v45  ;;  %2789 = vmatmul.mubr.msk.bf16.vlgmr.msra.gmra.mxu0 %vm866_vm6, %v1865_v48 }
 0x17f   : > { %2792 = vmatprep.mubr.msk.bf16.mxu0 %vm2939_vm2, %v2938_v45 }
 0x180   : > { %2673 = vmatmul.mubr.msk.bf16.gmra.mxu1 %vm866_vm6, %v3208_v29  ;;  %v1882_v29 = vor.u32 %v1881_v58, %v1878_v12 }
 0x181   : > { %2676 = vmatprep.mubr.msk.bf16.mxu1 %vm2939_vm2, %v2938_v45 }
 0x182   : > { %v1883_v28 = vsel %vm1848_vm11, %v1873_v1, %v1882_v29 }
 0x186   : > { %2793 = vmatmul.mubr.msk.bf16.gmra.mxu0 %vm866_vm6, %v1874_v53 }
 0x187   : > { %2796 = vmatprep.mubr.msk.bf16.mxu0 %vm2939_vm2, %v2938_v45 }
 0x188   : > { %2677 = vmatmul.mubr.msk.bf16.gmra.mxu1 %vm866_vm6, %v3247_v7  ;;  %v1891_v7 = vor.u32 %v1890_v9, %v1887_v16 }
 0x189   : > { %2680 = vmatprep.mubr.msk.bf16.mxu1 %vm2939_vm2, %v2938_v45 }
 0x18a   : > { %v1892_v27 = vsel %vm1848_vm11, %v1882_v29, %v1891_v7  ;;  %v1901_v15 = vsel %vm1848_vm11, %v1891_v7, %v1900_v34 }
 0x18e   : > { %2797 = vmatmul.mubr.msk.bf16.gmra.mxu0 %vm866_vm6, %v1883_v28 }
 0x18f   : > { %2800 = vmatprep.mubr.msk.bf16.mxu0 %vm2939_vm2, %v2938_v45 }
 0x190   : > { %2681 = vmatmul.mubr.msk.bf16.gmra.mxu1 %vm866_vm6, %v3291_v41  ;;  %v2922_v41 = vld [vmem:[%s3771_s4 + $0x50] ss:$0 sps:$4 sm:$0xff]  }
 0x191   : > { %2684 = vmatprep.mubr.msk.bf16.mxu1 %vm2939_vm2, %v2938_v45  ;;  %v1755_v42 = vsel %vm510_vm1, %v2922_v41, 0 }
 0x196   : > { %2801 = vmatmul.mubr.msk.bf16.gmra.mxu0 %vm866_vm6, %v1892_v27 }
 0x197   : > { %2804 = vmatprep.mubr.msk.bf16.mxu0 %vm2939_vm2, %v2938_v45 }
 0x198   : > { %2685 = vmatmul.mubr.msk.bf16.gmra.mxu1 %vm866_vm6, %v1073_v38 }
 0x199   : > { %2716 = vmatprep.mubr.msk.bf16.mxu1 %vm2939_vm2, %v2938_v45 }
 0x19e   : > { %2805 = vmatmul.mubr.msk.bf16.gmra.mxu0 %vm866_vm6, %v1901_v15 }
 0x1a0   : > { %2717 = vmatmul.mubr.msk.bf16.vlgmr.msra.gmra.mxu1 %vm866_vm6, %v3279_v30  ;;  %v2925_v30 = vld [vmem:[%s3771_s4 + $0x68] ss:$0 sps:$4 sm:$0xff]  }
 0x1a1   : > { %2761 = vmatpush3.bf16.msra.mxu1 %v1755_v42  ;;  %2720 = vmatprep.mubr.msk.bf16.mxu1 %vm2939_vm2, %v2938_v45  ;;  %v2057_v38 = vsel %vm510_vm1, %v2925_v30, 0 }
 0x1a2   : > { %2762 = vmatprep.subr.bf16.mxu1 %v2938_v45 }
 0x1a5   : > { %2763 = vmatpush3.bf16.msra.mxu1 %v2924_v24 }
 0x1a6   : > { %2808 = vmatprep.subr.bf16.mxu1 %v2938_v45 }
 0x1a8   : > { %2721 = vmatmul.mubr.msk.bf16.gmra.mxu1 %vm866_vm6, %v3318_v2  ;;  %v2926_v2 = vld [vmem:[%s3771_s4 + $0x60] sm:$0xff]  }
 0x1a9   : > { %2724 = vmatprep.mubr.msk.bf16.mxu1 %vm2939_vm2, %v2938_v45 }
 0x1b0   : > { %2725 = vmatmul.mubr.msk.bf16.gmra.mxu1 %vm866_vm6, %v3333_v54 }
 0x1b1   : > { %2728 = vmatprep.mubr.msk.bf16.mxu1 %vm2939_vm2, %v2938_v45 }
 0x1b8   : > { %2729 = vmatmul.mubr.msk.bf16.gmra.mxu1 %vm866_vm6, %v3350_v35 }
 0x1b9   : > { %2732 = vmatprep.mubr.msk.bf16.mxu1 %vm2939_vm2, %v2938_v45 }
 0x1c0   : > { %2733 = vmatmul.mubr.msk.bf16.gmra.mxu1 %vm866_vm6, %v3353_v37 }
 0x1c1   : > { %2764 = vmatprep.mubr.msk.bf16.mxu1 %vm2939_vm2, %v2938_v45 }
 0x1c8   : > { %2765 = vmatmul.mubr.msk.bf16.vlgmr.msra.gmra.mxu1 %vm866_vm6, %v3339_v31 }
 0x1c9   : > { %2809 = vmatpush3.bf16.msra.mxu1 %v2057_v38  ;;  %2768 = vmatprep.mubr.msk.bf16.mxu1 %vm2939_vm2, %v2938_v45 }
 0x1ca   : > { %2810 = vmatprep.subr.bf16.mxu1 %v2938_v45 }
 0x1cd   : > { %2811 = vmatpush3.bf16.msra.mxu1 %v2926_v2 }
 0x1d0   : > { %2769 = vmatmul.mubr.msk.bf16.gmra.mxu1 %vm866_vm6, %v3342_v32 }
 0x1d1   : > { %2772 = vmatprep.mubr.msk.bf16.mxu1 %vm2939_vm2, %v2938_v45 }
 0x1d8   : > { %2773 = vmatmul.mubr.msk.bf16.gmra.mxu1 %vm866_vm6, %v3359_v57 }
 0x1d9   : > { %2776 = vmatprep.mubr.msk.bf16.mxu1 %vm2939_vm2, %v2938_v45 }
 0x1e0   : > { %2777 = vmatmul.mubr.msk.bf16.gmra.mxu1 %vm866_vm6, %v3365_v49 }
 0x1e1   : > { %2780 = vmatprep.mubr.msk.bf16.mxu1 %vm2939_vm2, %v2938_v45 }
 0x1e6   : > { %v919_v54 = vpop.f32.mrf.mxu0 }
 0x1e8   : > { %2781 = vmatmul.mubr.msk.bf16.gmra.mxu1 %vm866_vm6, %v3368_v51  ;;  %v2622_v31 = vpop.f32.mrf.mxu0 }
 0x1e9   : > { %2812 = vmatprep.mubr.msk.bf16.mxu1 %vm2939_vm2, %v2938_v45 }
 0x1ea   : > { %v922_v32 = vpop.f32.mrf.mxu0 }
 0x1ec   : > { %v2623_v35 = vpop.f32.mrf.mxu0 }
 0x1ee   : > { %v927_v37 = vpop.f32.mrf.mxu1  ;;  %v3568_v57 = vpop.f32.mrf.mxu0 }
 0x1f0   : > { %2813 = vmatmul.mubr.msk.bf16.vlgmr.msra.gmra.mxu1 %vm866_vm6, %v3373_v60  ;;  %v2626_v49 = vpop.f32.mrf.mxu1  ;;  %v2694_v11 = vpop.f32.mrf.mxu0 }
 0x1f1   : > { %2816 = vmatprep.mubr.msk.bf16.mxu1 %vm2939_vm2, %v2938_v45 }
 0x1f2   : > { %v930_v55 = vpop.f32.mrf.mxu1  ;;  %v3574_v18 = vpop.f32.mrf.mxu0 }
 0x1f4   : > { %v2627_v51 = vpop.f32.mrf.mxu1  ;;  %v2695_v26 = vpop.f32.mrf.mxu0 }
 0x1f6   : > { %v935_v46 = vpop.f32.mrf.mxu1  ;;  %v3576_v50 = vpop.f32.mrf.mxu0 }
 0x1f8   : > { %2817 = vmatmul.mubr.msk.bf16.gmra.mxu1 %vm866_vm6, %v3376_v52  ;;  %v2630_v4 = vpop.f32.mrf.mxu1  ;;  %v2698_v21 = vpop.f32.mrf.mxu0 }
 0x1f9   : > { %2820 = vmatprep.mubr.msk.bf16.mxu1 %vm2939_vm2, %v2938_v45 }
 0x1fa   : > { %v938_v60 = vpop.f32.mrf.mxu1  ;;  %v3582_v22 = vpop.f32.mrf.mxu0 }
 0x1fc   : > { %v2631_v23 = vpop.f32.mrf.mxu1  ;;  %v2699_v25 = vpop.f32.mrf.mxu0 }
 0x1fe   : > { %v3584_v33 = vpop.f32.mrf.mxu0 }
 0x200   : > { %v943_v39 = vpop.f32.mrf.mxu1  ;;  %2821 = vmatmul.mubr.msk.bf16.gmra.mxu1 %vm866_vm6, %v3381_v5  ;;  %v2702_v40 = vpop.f32.mrf.mxu0 }
 0x201   : > { %2824 = vmatprep.mubr.msk.bf16.mxu1 %vm2939_vm2, %v2938_v45 }
 0x202   : > { %v2634_v52 = vpop.f32.mrf.mxu1  ;;  %v3590_v59 = vpop.f32.mrf.mxu0 }
 0x204   : > { %v946_v0 = vpop.f32.mrf.mxu1  ;;  %v2703_v63 = vpop.f32.mrf.mxu0 }
 0x206   : > { %v2635_v43 = vpop.f32.mrf.mxu1  ;;  %v3592_v44 = vpop.f32.mrf.mxu0 }
 0x208   : > { %v951_v47 = vpop.f32.mrf.mxu1  ;;  %2825 = vmatmul.mubr.msk.bf16.gmra.mxu1 %vm866_vm6, %v3384_v6  ;;  %v2706_v62 = vpop.f32.mrf.mxu0 }
 0x209   : > { %2828 = vmatprep.mubr.msk.bf16.mxu1 %vm2939_vm2, %v2938_v45 }
 0x20a   : > { %v2638_v5 = vpop.f32.mrf.mxu1  ;;  %v3598_v48 = vpop.f32.mrf.mxu0 }
 0x20c   : > { %v954_v56 = vpop.f32.mrf.mxu1  ;;  %v2707_v36 = vpop.f32.mrf.mxu0 }
 0x20e   : > { %v2639_v1 = vpop.f32.mrf.mxu1  ;;  %v3600_v61 = vpop.f32.mrf.mxu0 }
 0x210   : > { %v1018_v3 = vpop.f32.mrf.mxu1  ;;  %2829 = vmatmul.mubr.msk.bf16.gmra.mxu1 %vm866_vm6, %v3388_v10  ;;  %v2710_v12 = vpop.f32.mrf.mxu0 }
 0x211   : > { %v1019_v53 = vadd.f32 %v1018_v3, %v919_v54 }
 0x212   : > { %v2646_v58 = vpop.f32.mrf.mxu1  ;;  %v3604_v6 = vpop.f32.mrf.mxu0 }
 0x214   : > { %v1021_v29 = vpop.f32.mrf.mxu1  ;;  %v2711_v45 = vpop.f32.mrf.mxu0 }
 0x215   : > { %v1022_v14 = vadd.f32 %v1021_v29, %v922_v32 }
 0x216   : > { %v2647_v8 = vpop.f32.mrf.mxu1  ;;  %v3606_v28 = vpop.f32.mrf.mxu0 }
 0x218   : > { %v1026_v16 = vpop.f32.mrf.mxu1  ;;  %v2742_v7 = vpop.f32.mrf.mxu0 }
 0x219   : > { %v1027_v9 = vadd.f32 %v1026_v16, %v927_v37 }
 0x21a   : > { %v2650_v17 = vpop.f32.mrf.mxu1  ;;  %v3608_v13 = vpop.f32.mrf.mxu0 }
 0x21c   : > { %v1029_v27 = vpop.f32.mrf.mxu1  ;;  %v2743_v10 = vpop.f32.mrf.mxu0 }
 0x21d   : > { %v1030_v19 = vadd.f32 %v1029_v27, %v930_v55 }
 0x21e   : > { %v2651_v20 = vpop.f32.mrf.mxu1  ;;  %v3610_v41 = vpop.f32.mrf.mxu0 }
 0x220   : > { %v1034_v34 = vpop.f32.mrf.mxu1  ;;  %v2746_v15 = vpop.f32.mrf.mxu0 }
 0x221   : > { %v1035_v42 = vadd.f32 %v1034_v34, %v935_v46 }
 0x222   : > { %v2654_v24 = vpop.f32.mrf.mxu1  ;;  %v3612_v30 = vpop.f32.mrf.mxu0 }
 0x224   : > { %v1037_v38 = vpop.f32.mrf.mxu1  ;;  %v2747_v54 = vpop.f32.mrf.mxu0 }
 0x225   : > { %v1038_v2 = vadd.f32 %v1037_v38, %v938_v60 }
 0x226   : > { %v2655_v31 = vpop.f32.mrf.mxu1  ;;  %v3614_v32 = vpop.f32.mrf.mxu0 }
 0x228   : > { %v1042_v35 = vpop.f32.mrf.mxu1  ;;  %v2750_v49 = vpop.f32.mrf.mxu0 }
 0x229   : > { %v1043_v37 = vadd.f32 %v1042_v35, %v943_v39 }
 0x22a   : > { %v2658_v11 = vpop.f32.mrf.mxu1  ;;  %v3616_v55 = vpop.f32.mrf.mxu0 }
 0x22c   : > { %v1045_v51 = vpop.f32.mrf.mxu1  ;;  %v2751_v4 = vpop.f32.mrf.mxu0 }
 0x22d   : > { %v1046_v26 = vadd.f32 %v1045_v51, %v946_v0 }
 0x22e   : > { %v2659_v46 = vpop.f32.mrf.mxu1  ;;  %v3618_v21 = vpop.f32.mrf.mxu0 }
 0x230   : > { %v1050_v23 = vpop.f32.mrf.mxu1  ;;  %v2754_v40 = vpop.f32.mrf.mxu0 }
 0x231   : > { %v1051_v25 = vadd.f32 %v1050_v23, %v951_v47 }
 0x232   : > { %v2662_v60 = vpop.f32.mrf.mxu1  ;;  %v3620_v52 = vpop.f32.mrf.mxu0 }
 0x234   : > { %v1053_v63 = vpop.f32.mrf.mxu1  ;;  %v2755_v62 = vpop.f32.mrf.mxu0 }
 0x235   : > { %v1054_v43 = vadd.f32 %v1053_v63, %v954_v56 }
 0x236   : > { %v2663_v39 = vpop.f32.mrf.mxu1  ;;  %v3622_v5 = vpop.f32.mrf.mxu0 }
 0x238   : > { %v1136_v36 = vpop.f32.mrf.mxu1  ;;  %v2758_v3 = vpop.f32.mrf.mxu0 }
 0x239   : > { %v1175_v1 = vadd.f32 %v1136_v36, %v1019_v53 }
 0x23a   : > { %v2670_v0 = vpop.f32.mrf.mxu1  ;;  %v3624_v12 = vpop.f32.mrf.mxu0 }
 0x23c   : > { %v1139_v58 = vpop.f32.mrf.mxu1  ;;  %v2759_v45 = vpop.f32.mrf.mxu0 }
 0x23d   : > { %v1176_v29 = vadd.f32 %v1139_v58, %v1022_v14 }
 0x23e   : > { %v2671_v47 = vpop.f32.mrf.mxu1  ;;  %v3626_v8 = vpop.f32.mrf.mxu0 }
 0x240   : > { %v1144_v16 = vpop.f32.mrf.mxu1  ;;  %v2790_v17 = vpop.f32.mrf.mxu0 }
 0x241   : > { %v1177_v7 = vadd.f32 %v1144_v16, %v1027_v9  ;;  %v1333_v17 = vadd.f32 %v3568_v57, %v1175_v1 }
 0x242   : > { %v2674_v56 = vpop.f32.mrf.mxu1  ;;  %v3628_v27 = vpop.f32.mrf.mxu0 }
 0x244   : > { %v1147_v10 = vpop.f32.mrf.mxu1  ;;  %v2791_v34 = vpop.f32.mrf.mxu0 }
 0x245   : > { %v1178_v20 = vadd.f32 %v1147_v10, %v1030_v19 }
 0x246   : > { %v2675_v53 = vpop.f32.mrf.mxu1  ;;  %v3630_v15 = vpop.f32.mrf.mxu0 }
 0x247   : > { %v1336_v57 = vadd.f32 %v3582_v22, %v1178_v20 }
 0x248   : > { %v1152_v24 = vpop.f32.mrf.mxu1  ;;  %v2794_v54 = vpop.f32.mrf.mxu0 }
 0x249   : > { %v1179_v38 = vadd.f32 %v1152_v24, %v1035_v42  ;;  %v1334_v24 = vadd.f32 %v3574_v18, %v1176_v29 }
 0x24a   : > { %v2678_v14 = vpop.f32.mrf.mxu1  ;;  %v3632_v31 = vpop.f32.mrf.mxu0 }
 0x24c   : > { %v1155_v35 = vpop.f32.mrf.mxu1  ;;  %v2795_v11 = vpop.f32.mrf.mxu0 }
 0x24d   : > { %v1180_v49 = vadd.f32 %v1155_v35, %v1038_v2 }
 0x24e   : > { %v2679_v9 = vpop.f32.mrf.mxu1  ;;  %v3634_v51 = vpop.f32.mrf.mxu0 }
 0x250   : > { %v1160_v4 = vpop.f32.mrf.mxu1  ;;  %v2798_v23 = vpop.f32.mrf.mxu0 }
 0x251   : > { %v1181_v46 = vadd.f32 %v1160_v4, %v1043_v37 }
 0x252   : > { %v2682_v19 = vpop.f32.mrf.mxu1  ;;  %v3636_v40 = vpop.f32.mrf.mxu0 }
 0x254   : > { %v1163_v60 = vpop.f32.mrf.mxu1  ;;  %v2799_v62 = vpop.f32.mrf.mxu0 }
 0x255   : > { %v1182_v63 = vadd.f32 %v1163_v60, %v1046_v26  ;;  %v1337_v62 = vadd.f32 %v3584_v33, %v1179_v38 }
 0x256   : > { %v2683_v42 = vpop.f32.mrf.mxu1  ;;  %v3638_v39 = vpop.f32.mrf.mxu0 }
 0x258   : > { %v1168_v36 = vpop.f32.mrf.mxu1  ;;  %v2802_v0 = vpop.f32.mrf.mxu0 }
 0x259   : > { %v1183_v3 = vadd.f32 %v1168_v36, %v1051_v25  ;;  %v1338_v36 = vadd.f32 %v3590_v59, %v1180_v49 }
 0x25a   : > { %v2686_v2 = vpop.f32.mrf.mxu1  ;;  %v3640_v58 = vpop.f32.mrf.mxu0 }
 0x25c   : > { %v1171_v45 = vpop.f32.mrf.mxu1  ;;  %v2803_v16 = vpop.f32.mrf.mxu0 }
 0x25d   : > { %v1184_v47 = vadd.f32 %v1171_v45, %v1054_v43  ;;  %v1335_v43 = vadd.f32 %v3576_v50, %v1177_v7  ;;  %v1339_v7 = vadd.f32 %v3592_v44, %v1181_v46  ;;  %v1340_v16 = vadd.f32 %v3598_v48, %v1182_v63 }
 0x25e   : > { %v2687_v37 = vpop.f32.mrf.mxu1  ;;  %v3643_v56 = vpop.f32.mrf.mxu0 }
 0x260   : > { %v1497_v10 = vpop.f32.mrf.mxu1  ;;  %v2806_v34 = vpop.f32.mrf.mxu0 }
 0x261   : > { %v1536_v26 = vadd.f32 %v1497_v10, %v1333_v17  ;;  %v1341_v17 = vadd.f32 %v3600_v61, %v1183_v3  ;;  %v1342_v34 = vadd.f32 %v3604_v6, %v1184_v47 }
 0x262   : > { %v2718_v53 = vpop.f32.mrf.mxu1  ;;  %v3646_v54 = vpop.f32.mrf.mxu0 }
 0x264   : > { %v1500_v25 = vpop.f32.mrf.mxu1  ;;  %v2807_v35 = vpop.f32.mrf.mxu0 }
 0x265   : > { %v1537_v14 = vadd.f32 %v1500_v25, %v1334_v24 }
 0x266   : > { %v2719_v11 = vpop.f32.mrf.mxu1 }
 0x268   : > { %v1505_v9 = vpop.f32.mrf.mxu1 }
 0x269   : > { %v1538_v4 = vadd.f32 %v1505_v9, %v1335_v43 }
 0x26a   : > { %v2722_v23 = vpop.f32.mrf.mxu1 }
 0x26c   : > { %v1508_v1 = vpop.f32.mrf.mxu1 }
 0x26d   : > { %v3650_v19 = vadd.f32 %v1508_v1, %v1336_v57 }
 0x26e   : > { %v2723_v60 = vpop.f32.mrf.mxu1 }
 0x270   : > { %v1513_v18 = vpop.f32.mrf.mxu1 }
 0x271   : > { %v3653_v29 = vadd.f32 %v1513_v18, %v1337_v62  ;;  %v1666_v18 = vadd.f32 %v3606_v28, %v1536_v26  ;;  %v3692_v28 = vld [vmem:[%s3772_s5] ss:$0 sm:$0xff] }
 0x272   : > { %v2726_v42 = vpop.f32.mrf.mxu1  ;;  %v2535_v26 = vld [vmem:[%s3686_s20] sm:$0xff]  }
 0x274   : > { %v1516_v0 = vpop.f32.mrf.mxu1 }
 0x275   : > { %v3656_v2 = vadd.f32 %v1516_v0, %v1338_v36 }
 0x276   : > { %v2727_v50 = vpop.f32.mrf.mxu1 }
 0x277   : > { %v1667_v50 = vadd.f32 %v3608_v13, %v1537_v14  ;;  %v1668_v13 = vadd.f32 %v3610_v41, %v1538_v4 }
 0x278   : > { %v1521_v45 = vpop.f32.mrf.mxu1 }
 0x279   : > { %v3659_v22 = vadd.f32 %v1521_v45, %v1339_v7 }
 0x27a   : > { %v2730_v20 = vpop.f32.mrf.mxu1 }
 0x27c   : > { %v1524_v37 = vpop.f32.mrf.mxu1 }
 0x27d   : > { %v3662_v33 = vadd.f32 %v1524_v37, %v1340_v16 }
 0x27e   : > { %v2731_v38 = vpop.f32.mrf.mxu1 }
 0x280   : > { %v1529_v10 = vpop.f32.mrf.mxu1 }
 0x281   : > { %v3665_v59 = vadd.f32 %v1529_v10, %v1341_v17  ;;  %v2536_v10 = vunpack.c.l.bf16 %v2535_v26 }
 0x282   : > { %v2734_v49 = vpop.f32.mrf.mxu1 }
 0x284   : > { %v1532_v53 = vpop.f32.mrf.mxu1 }
 0x285   : > { %v3668_v44 = vadd.f32 %v1532_v53, %v1342_v34 }
 0x286   : > { %v2735_v46 = vpop.f32.mrf.mxu1 }
 0x288   : > { %v1791_v24 = vpop.f32.mrf.mxu1 }
 0x289   : > { %v1830_v36 = vadd.f32 %v1791_v24, %v1666_v18  ;;  %v2537_v24 = vunpack.c.h.bf16 %v2535_v26 }
 0x28a   : > { %v2766_v25 = vpop.f32.mrf.mxu1 }
 0x28b   : > { %v2002_v20 = vadd.f32 %v3626_v8, %v1830_v36  ;;  %v1669_v8 = vadd.f32 %v3612_v30, %v3650_v19 }
 0x28c   : > { %v1794_v35 = vpop.f32.mrf.mxu1 }
 0x28d   : > { %v1831_v45 = vadd.f32 %v1794_v35, %v1667_v50 }
 0x28e   : > { %v2767_v48 = vpop.f32.mrf.mxu1 }
 0x28f   : > { %v2003_v49 = vadd.f32 %v3628_v27, %v1831_v45 }
 0x290   : > { %v1799_v63 = vpop.f32.mrf.mxu1 }
 0x291   : > { %v1832_v38 = vadd.f32 %v1799_v63, %v1668_v13  ;;  %v2550_v63 = vld [vmem:[%s3686_s20 + $0x8] sm:$0xff]  }
 0x292   : > { %v2770_v11 = vpop.f32.mrf.mxu1  ;;  %v2540_v19 = vunpack.c.l.bf16 %v2550_v63  ;;  %v2541_v50 = vunpack.c.h.bf16 %v2550_v63  ;;  %v2552_v63 = vld [vmem:[%s3686_s20 + $0x18] sm:$0xff]  }
 0x293   : > { %v2004_v48 = vadd.f32 %v3630_v15, %v1832_v38  ;;  %v1670_v11 = vadd.f32 %v3614_v32, %v3653_v29 }
 0x294   : > { %v1802_v43 = vpop.f32.mrf.mxu1 }
 0x295   : > { %v1833_v35 = vadd.f32 %v1802_v43, %v1669_v8 }
 0x296   : > { %v2771_v9 = vpop.f32.mrf.mxu1 }
 0x297   : > { %v2005_v32 = vadd.f32 %v3632_v31, %v1833_v35  ;;  %v2551_v31 = vld [vmem:[%s3686_s20 + $0x10] sm:$0xff]  }
 0x298   : > { %v1807_v61 = vpop.f32.mrf.mxu1 }
 0x299   : > { %v1834_v30 = vadd.f32 %v1807_v61, %v1670_v11  ;;  %v1671_v61 = vadd.f32 %v3616_v55, %v3656_v2 }
 0x29a   : > { %v2774_v3 = vpop.f32.mrf.mxu1 }
 0x29b   : > { %v2006_v45 = vadd.f32 %v3634_v51, %v1834_v30 }
 0x29c   : > { %v1810_v23 = vpop.f32.mrf.mxu1 }
 0x29e   : > { %v2775_v57 = vpop.f32.mrf.mxu1 }
 0x2a0   : > { %v3670_v1 = vpop.f32.mrf.mxu1 }
 0x2a2   : > { %v2778_v6 = vpop.f32.mrf.mxu1 }
 0x2a4   : > { %v3672_v47 = vpop.f32.mrf.mxu1 }
 0x2a6   : > { %v2779_v60 = vpop.f32.mrf.mxu1 }
 0x2a8   : > { %v3674_v62 = vpop.f32.mrf.mxu1 }
 0x2aa   : > { %v2782_v42 = vpop.f32.mrf.mxu1 }
 0x2ac   : > { %v3678_v0 = vpop.f32.mrf.mxu1 }
 0x2ae   : > { %v2783_v7 = vpop.f32.mrf.mxu1 }
 0x2b0   : > { %v2093_v16 = vpop.f32.mrf.mxu1 }
 0x2b1   : > { %v2132_v14 = vadd.f32 %v2093_v16, %v2002_v20  ;;  %v1835_v20 = vadd.f32 %v1810_v23, %v1671_v61 }
 0x2b2   : > { %v2814_v37 = vpop.f32.mrf.mxu1 }
 0x2b3   : > { %v2149_v17 = vadd.f32 %v3692_v28, %v2132_v14  ;;  %v1672_v14 = vadd.f32 %v3618_v21, %v3659_v22  ;;  %v2007_v8 = vadd.f32 %v3636_v40, %v1835_v20  ;;  %v1673_v21 = vadd.f32 %v3620_v52, %v3662_v33 }
 0x2b4   : > { %v2096_v34 = vpop.f32.mrf.mxu1  ;;  %v1674_v52 = vadd.f32 %v3622_v5, %v3665_v59  ;;  %v1675_v5 = vadd.f32 %v3624_v12, %v3668_v44 }
 0x2b5   : > { %v2159_v53 = vmax.f32 %v2149_v17, 0.0  ;;  %v2133_v46 = vadd.f32 %v2096_v34, %v2003_v49  ;;  %v1836_v17 = vadd.f32 %v3670_v1, %v1672_v14  ;;  %v2545_v1 = vunpack.c.h.bf16 %v2551_v31 }
 0x2b6   : > { %v2815_v25 = vpop.f32.mrf.mxu1  ;;  %v1839_v61 = vadd.f32 %v3678_v0, %v1675_v5 }
 0x2b7   : > { %v2189_v41 = vadd.f32 %v2536_v10, %v2159_v53  ;;  %v2150_v4 = vadd.f32 %v3692_v28, %v2133_v46  ;;  %v2544_v10 = vunpack.c.l.bf16 %v2551_v31  ;;  %v2008_v35 = vadd.f32 %v3638_v39, %v1836_v17  ;;  %v2178_v31 = vld [vmem:[%s3686_s20 + $0x24] sm:$0x7] }
 0x2b8   : > { %v2101_v27 = vpop.f32.mrf.mxu1  ;;  %v2548_v39 = vunpack.c.l.bf16 %v2552_v63 }
 0x2b9   : > { %v2199_v9 = vmax.f32 %v2189_v41, 0.0  ;;  %v2160_v3 = vmax.f32 %v2150_v4, 0.0  ;;  %v2134_v57 = vadd.f32 %v2101_v27, %v2004_v48  ;;  %v1837_v41 = vadd.f32 %v3672_v47, %v1673_v21 }
 0x2ba   : > { %v2818_v43 = vpop.f32.mrf.mxu1 }
 0x2bb   : > { %v2524_v6 = vpack.c.bf16 %v2199_v9, %v2199_v9  ;;  %v2190_v15 = vadd.f32 %v2537_v24, %v2160_v3  ;;  %v2151_v60 = vadd.f32 %v3692_v28, %v2134_v57  ;;  %v1838_v3 = vadd.f32 %v3674_v62, %v1674_v52 }
 0x2bc   : > { %v2104_v29 = vpop.f32.mrf.mxu1  ;;  %v2009_v43 = vadd.f32 %v3640_v58, %v1837_v41  ;;  %v2549_v62 = vunpack.c.h.bf16 %v2552_v63 }
 0x2bd   : > { %2249 = vst.msk [vmem:[%s3710_s26] sm:$0xf] %vm759_vm3, %v2524_v6  ;;  %v2200_v18 = vmax.f32 %v2190_v15, 0.0  ;;  %v2161_v42 = vmax.f32 %v2151_v60, 0.0  ;;  %v2135_v36 = vadd.f32 %v2104_v29, %v2005_v32  ;;  %v2010_v29 = vadd.f32 %v3643_v56, %v1838_v3 }
 0x2be   : > { %v2819_v7 = vpop.f32.mrf.mxu1 }
 0x2bf   : > { %v2525_v16 = vpack.c.bf16 %v2200_v18, %v2200_v18  ;;  %v2191_v26 = vadd.f32 %v2540_v19, %v2161_v42  ;;  %v2152_v13 = vadd.f32 %v3692_v28, %v2135_v36  ;;  %v2177_v36 = vld [vmem:[%s3686_s20 + $0x20] sm:$0xf] }
 0x2c0   : > { %v2109_v55 = vpop.f32.mrf.mxu1 }
 0x2c1   : > { %2250 = vst.msk [vmem:[%s3710_s26 + $0x4] sm:$0xf] %vm759_vm3, %v2525_v16  ;;  %v2201_v2 = vmax.f32 %v2191_v26, 0.0  ;;  %v2162_v37 = vmax.f32 %v2152_v13, 0.0  ;;  %v2136_v38 = vadd.f32 %v2109_v55, %v2006_v45  ;;  %v2187_v45 = vunpack.c.l.bf16 %v2177_v36 }
 0x2c2   : > { %v2822_v51 = vpop.f32.mrf.mxu1  ;;  %v2011_v26 = vadd.f32 %v3646_v54, %v1839_v61 }
 0x2c3   : > { %v2526_v23 = vpack.c.bf16 %v2201_v2, %v2201_v2  ;;  %v2192_v49 = vadd.f32 %v2541_v50, %v2162_v37  ;;  %v2153_v34 = vadd.f32 %v3692_v28, %v2136_v38  ;;  %v2188_v51 = vunpack.c.l.bf16 %v2178_v31 }
 0x2c4   : > { %v2112_v53 = vpop.f32.mrf.mxu1 }
 0x2c5   : > { %2251 = vst.msk [vmem:[%s3710_s26 + $0x8] sm:$0xf] %vm759_vm3, %v2526_v23  ;;  %v2202_v22 = vmax.f32 %v2192_v49, 0.0  ;;  %v2163_v46 = vmax.f32 %v2153_v34, 0.0  ;;  %v2137_v24 = vadd.f32 %v2112_v53, %v2007_v8 }
 0x2c6   : > { %v2823_v25 = vpop.f32.mrf.mxu1 }
 0x2c7   : > { %v2527_v4 = vpack.c.bf16 %v2202_v22, %v2202_v22  ;;  %v2193_v48 = vadd.f32 %v2544_v10, %v2163_v46  ;;  %v2154_v40 = vadd.f32 %v3692_v28, %v2137_v24 }
 0x2c8   : > { %v2117_v33 = vpop.f32.mrf.mxu1 }
 0x2c9   : > { %2252 = vst.msk [vmem:[%s3710_s26 + $0xc] sm:$0xf] %vm759_vm3, %v2527_v4  ;;  %v2203_v11 = vmax.f32 %v2193_v48, 0.0  ;;  %v2164_v27 = vmax.f32 %v2154_v40, 0.0  ;;  %v2138_v9 = vadd.f32 %v2117_v33, %v2008_v35 }
 0x2ca   : > { %v2826_v57 = vpop.f32.mrf.mxu1 }
 0x2cb   : > { %v2528_v47 = vpack.c.bf16 %v2203_v11, %v2203_v11  ;;  %v2194_v30 = vadd.f32 %v2545_v1, %v2164_v27  ;;  %v2155_v19 = vadd.f32 %v3692_v28, %v2138_v9 }
 0x2cc   : > { %v2120_v6 = vpop.f32.mrf.mxu1 }
 0x2cd   : > { %2253 = vst.msk [vmem:[%s3710_s26 + $0x10] sm:$0xf] %vm759_vm3, %v2528_v47  ;;  %v2204_v59 = vmax.f32 %v2194_v30, 0.0  ;;  %v2165_v15 = vmax.f32 %v2155_v19, 0.0  ;;  %v2139_v60 = vadd.f32 %v2120_v6, %v2009_v43 }
 0x2ce   : > { %v2827_v32 = vpop.f32.mrf.mxu1 }
 0x2cf   : > { %v2529_v18 = vpack.c.bf16 %v2204_v59, %v2204_v59  ;;  %v2195_v42 = vadd.f32 %v2548_v39, %v2165_v15  ;;  %v2156_v58 = vadd.f32 %v3692_v28, %v2139_v60 }
 0x2d0   : > { %v2125_v50 = vpop.f32.mrf.mxu1 }
 0x2d1   : > { %2254 = vst.msk [vmem:[%s3710_s26 + $0x14] sm:$0xf] %vm759_vm3, %v2529_v18  ;;  %v2205_v12 = vmax.f32 %v2195_v42, 0.0  ;;  %v2166_v44 = vmax.f32 %v2156_v58, 0.0  ;;  %v2140_v7 = vadd.f32 %v2125_v50, %v2010_v29 }
 0x2d2   : > { %v2830_v20 = vpop.f32.mrf.mxu1 }
 0x2d3   : > { %v2530_v16 = vpack.c.bf16 %v2205_v12, %v2205_v12  ;;  %v2196_v56 = vadd.f32 %v2549_v62, %v2166_v44  ;;  %v2157_v0 = vadd.f32 %v3692_v28, %v2140_v7 }
 0x2d4   : > { %v2128_v13 = vpop.f32.mrf.mxu1 }
 0x2d5   : > { %2255 = vst.msk [vmem:[%s3710_s26 + $0x18] sm:$0xf] %vm759_vm3, %v2530_v16  ;;  %v2206_v14 = vmax.f32 %v2196_v56, 0.0  ;;  %v2167_v55 = vmax.f32 %v2157_v0, 0.0  ;;  %v2141_v2 = vadd.f32 %v2128_v13, %v2011_v26 }
 0x2d6   : > { %v2831_v37 = vpop.f32.mrf.mxu1 }
 0x2d7   : > { %v2531_v38 = vpack.c.bf16 %v2206_v14, %v2206_v14  ;;  %v2197_v17 = vadd.f32 %v2187_v45, %v2167_v55  ;;  %v2158_v10 = vadd.f32 %v3692_v28, %v2141_v2 }
 0x2d9   : > { %2256 = vst.msk [vmem:[%s3710_s26 + $0x1c] sm:$0xf] %vm759_vm3, %v2531_v38  ;;  %v2207_v23 = vmax.f32 %v2197_v17, 0.0  ;;  %v2168_v49 = vmax.f32 %v2158_v10, 0.0 }
 0x2db   : > { %v2532_v54 = vpack.c.bf16 %v2207_v23, %v2207_v23  ;;  %v2198_v34 = vadd.f32 %v2188_v51, %v2168_v49 }
 0x2dd   : > { %2257 = vst.msk [vmem:[%s3710_s26 + $0x20] sm:$0xf] %vm759_vm3, %v2532_v54  ;;  %v2208_v8 = vmax.f32 %v2198_v34, 0.0 }
 0x2df   : > { %v2533_v53 = vpack.c.bf16 %v2208_v8, %v2208_v8 }
 0x2e1   : > { %2259 = vst.msk [vmem:[%s3710_s26 + $0x24] sm:$0x7] %vm2258_vm12, %v2533_v53 }
 0x2e2 PF: > { %s17_s24 = sadd.s32 1, %s2935_s24  }
 0x2e3   : > { %p14_p4 = scmp.ge.s32.totalorder %s17_s24, 4  }
 0x2e5   :  { %16 = sbr.rel (!%p14_p4) target bundleno = 1 (0x1), region = 89 }

// kernel: _lambda_.13
= control target key start
LH: loop header
LB: loop body
LE: loop exit
PB: predicated region body
PF: predicated region fallthrough
CT: control target
= control target key end

     0   :  { %s2003_s30 = smov 0   ;;  %s2208_s0 = inlined_call_operand.vmem [shape: bf16[2,36,216], index: 0, kind: input, shape index: {}]   ;;  %s2209_s1 = inlined_call_operand.vmem [shape: f32[36,1], index: 1, kind: input, shape index: {}]   ;;  %s2210_s2 = inlined_call_operand.vmem [shape: bf16[216,32], index: 2, kind: input, shape index: {}]   ;;  %s2211_s3 = inlined_call_operand.vmem [shape: f32[1,32], index: 3, kind: input, shape index: {}, may-alias: {3,5,8}]   ;;  %s2212_s4 = inlined_call_operand.vmem [shape: bf16[9,32,32], index: 4, kind: input, shape index: {}]   ;;  %s2213_s5 = inlined_call_operand.vmem [shape: f32[1,32], index: 5, kind: input, shape index: {}, may-alias: {3,5,8}]   ;;  %s2214_s6 = inlined_call_operand.vmem [shape: bf16[2,22,24], index: 6, kind: input, shape index: {}]   ;;  %s2215_s7 = inlined_call_operand.vmem [shape: bf16[24,32], index: 7, kind: input, shape index: {}]   ;;  %s2216_s8 = inlined_call_operand.vmem [shape: f32[1,32], index: 8, kind: input, shape index: {}, may-alias: {3,5,8}]   ;;  %s2217_s9 = inlined_call_operand.vmem [shape: bf16[2,22,32], index: 9, kind: output, shape index: {}]  }
   0x1 LB: > { %s1614_s10 = sadd.s32 4294967295, %s1950_s30   ;;  %p1618_p0 = scmp.ge.s32.totalorder %s1950_s30, 1  ;;  %s1950_s30 = sphi %s2003_s30, %s19_s30  }
   0x2   : > { %p297_p1 = scmp.lt.s32.totalorder %s1950_s30, 3 }
   0x4   : > { %p298_p2 = pnand %p1618_p0, %p297_p1 }
   0x5   : > { %p338_p3 = scmp.lt.s32.totalorder (!%p298_p2), %s1614_s10, 1 }
   0x6   : > { %301 = sbr.rel (%p298_p2) target bundleno = 567 (0x237), region = 56 }
   0xb   : > { %v1887_v0 = vld [vmem:[%s2210_s2 + $0x38] sm:$0xff]   ;;  %v1952_v1 = vmov 0   ;;  %v1888_v2 = vld [vmem:[%s2210_s2 + $0x30] sm:$0xff]   ;;  %s2219_s10 = smov (!%p338_p3, %s1614_s10), 1  ;;  %v1889_v3 = vld [vmem:[%s2210_s2 + $0x28] sm:$0xff]   ;;  %vm498_vm0 = vcmask 719872  }
   0xc   : > { %512 = vmatprep.subr.bf16.mxu0 %v1952_v1  ;;  %1885 = vset.pattern.permute.xlu0 %v1952_v1  ;;  %s1874_s17 = smul.u32 40, %s2219_s10  ;;  %v1890_v4 = vld [vmem:[%s2210_s2 + $0x20] sm:$0xff]   ;;  %v1891_v5 = vld [vmem:[%s2210_s2 + $0x18] sm:$0xff]   ;;  %v1892_v8 = vld [vmem:[%s2210_s2 + $0x10] sm:$0xff]   ;;  %vm508_vm1 = vcmask 1043456   ;;  %vm1466_vm2 = vcmask 195584  }
   0xd   : > { %513 = vmatpush1.bf16.msra.mxu0 %v1887_v0  ;;  %1886 = vset.pattern.permute.xlu1 %v1952_v1  ;;  %v573_v7 = vld [vmem:[%s2209_s1] sm:$0xff]  ;;  %v575_v9 = vld [vmem:[%s2209_s1 + $0x10] sm:$0xff]  ;;  %v574_v10 = vld [vmem:[%s2209_s1 + $0x8] sm:$0xff]  ;;  %s1875_s26 = smul.u32 12, %s2219_s10  ;;  %vm629_vm3 = vcmask 257024   ;;  %vm634_vm4 = vcmask 254976  }
   0xe   : > { %514 = vmatprep.subr.bf16.mxu0 %v1952_v1  ;;  %s2029_s22 = scalar_lea.vmem %s2208_s0, %s1874_s17  ;;  %580 = vperm.xlu0 %1885, %v573_v7   ;;  %v576_v11 = vld [vmem:[%s2209_s1 + $0x18] sm:$0xff]  ;;  %v1893_v12 = vld [vmem:[%s2210_s2 + $0x8] sm:$0xff]   ;;  %v577_v13 = vld [vmem:[%s2209_s1 + $0x20] sm:$0xf]  ;;  %vm657_vm5 = vsmask.f32 7424 }
   0xf   : > { %v1903_v6 = vld [vmem:[%s2029_s22 + $0x4] ss:$8 sps:$4 sm:$0xff]   ;;  %590 = vperm.xlu1 %1886, %v575_v9   ;;  %v1895_v15 = vld [vmem:[%s2210_s2 + $0x68] ss:$0 sps:$4 sm:$0xff]   ;;  %v1897_v18 = vld [vmem:[%s2210_s2 + $0x58] sm:$0xff]   ;;  %s347_s29 = scalar_lea.vmem %s2214_s6, %s1875_s26  ;;  %vm685_vm6 = vcmask 261120   ;;  %s352_s13 = scalar_lea.vmem %s2217_s9, %s1875_s26 }
  0x10   : > { %1643 = vmatprep.mubr.msk.bf16.mxu0 %vm498_vm0, %v1903_v6  ;;  %v1894_v14 = vld [vmem:[%s2210_s2] sm:$0xff]   ;;  %v510_v16 = vsel %vm508_vm1, %v1895_v15, 0  ;;  %v1898_v19 = vld [vmem:[%s2210_s2 + $0x50] sm:$0xff]   ;;  %v1899_v20 = vld [vmem:[%s2210_s2 + $0x48] sm:$0xff]   ;;  %vm817_vm7 = vcmask 1046528   ;;  %vm909_vm8 = vcmask 1044480  }
  0x11   : > { %515 = vmatpush1.bf16.msra.mxu0 %v1888_v2  ;;  %v1896_v17 = vld [vmem:[%s2210_s2 + $0x60] sm:$0xff]   ;;  %v1904_v23 = vld [vmem:[%s2029_s22 + $0x14] ss:$8 sps:$4 sm:$0xff]   ;;  %v1906_v25 = vld [vmem:[%s2029_s22 + $0x10] ss:$8 sps:$4 sm:$0xff]   ;;  %vm1173_vm10 = vcmask 1045504  }
  0x12   : > { %516 = vmatprep.subr.bf16.mxu0 %v1952_v1  ;;  %585 = vperm.xlu0 %1885, %v574_v10   ;;  %v1900_v21 = vld [vmem:[%s2210_s2 + $0x40] sm:$0xff]   ;;  %v1909_v28 = vld [vmem:[%s2212_s4 + $0x18] sm:$0xff]   ;;  %v1910_v29 = vld [vmem:[%s2212_s4 + $0x10] sm:$0xff]   ;;  %vm991_vm9 = vsmask.f32 4352  ;;  %vm1545_vm12 = vcmask 256000  }
  0x13   : > { %595 = vperm.xlu1 %1886, %v576_v11   ;;  %v1901_v22 = vld [vmem:[%s2029_s22] ss:$8 sps:$4 sm:$0xff]   ;;  %1793 = vmatprep.subr.bf16.mxu1 %v1909_v28  ;;  %vm1255_vm11 = vsmask.f32 5376 }
  0x14   : > { %v358_v24 = vld [vmem:[%s2029_s22 + $0x20] sm:$0x33]  ;;  %1794 = vmatpush3.bf16.msra.mxu1 %v1909_v28  ;;  %v2094_v30 = vld [vmem:[%s2212_s4 + $0x8] sm:$0xff]  }
  0x15   : > { %517 = vmatpush1.bf16.msra.mxu0 %v1889_v3  ;;  %v1628_v26 = vcombine.high %v358_v24, %v358_v24  ;;  %v1627_v27 = vcombine.low %v358_v24, %v358_v24  ;;  %1795 = vmatprep.subr.bf16.mxu1 %v1910_v29  ;;  %v1935_v31 = vld [vmem:[%s2215_s7 + $0x8] ss:$0 sps:$4 sm:$0xff]   ;;  %v1939_v33 = vld [vmem:[%s2215_s7] sm:$0xff]  }
  0x16   : > { %518 = vmatprep.subr.bf16.mxu0 %v1952_v1  ;;  %600 = vperm.xlu0 %1885, %v577_v13   ;;  %v1474_v32 = vsel %vm508_vm1, %v1935_v31, 0  ;;  %v1942_v34 = vld [vmem:[%s347_s29] sm:$0xff]   ;;  %v1943_v35 = vld [vmem:[%s347_s29 + $0x8] ss:$0 sps:$4 sm:$0x77]  }
  0x17   : > { %v1622_v36 = vld [vmem:[%s2211_s3] ss:$0 sm:$0xff] }
  0x18   : > { %1796 = vmatpush3.bf16.msra.mxu1 %v1910_v29 }
  0x19   : > { %519 = vmatpush1.bf16.msra.mxu0 %v1890_v4  ;;  %1801 = vmatprep.subr.bf16.mxu1 %v2094_v30 }
  0x1a   : > { %520 = vmatprep.subr.bf16.mxu0 %v1952_v1 }
  0x1d   : > { %521 = vmatpush1.bf16.msra.mxu0 %v1891_v5 }
  0x1e   : > { %522 = vmatprep.subr.bf16.mxu0 %v1952_v1 }
  0x21   : > { %523 = vmatpush1.bf16.msra.mxu0 %v1892_v8 }
  0x22   : > { %524 = vmatprep.subr.bf16.mxu0 %v1952_v1 }
  0x25   : > { %525 = vmatpush1.bf16.msra.mxu0 %v1893_v12 }
  0x26   : > { %526 = vmatprep.subr.bf16.mxu0 %v1952_v1 }
  0x29   : > { %527 = vmatpush1.bf16.msra.mxu0 %v1894_v14 }
  0x2a   : > { %532 = vmatprep.subr.bf16.mxu0 %v1952_v1 }
  0x2d   : > { %533 = vmatpush2.bf16.msra.mxu0 %v510_v16 }
  0x2e   : > { %534 = vmatprep.subr.bf16.mxu0 %v1952_v1 }
  0x31   : > { %535 = vmatpush2.bf16.msra.mxu0 %v1896_v17 }
  0x32   : > { %536 = vmatprep.subr.bf16.mxu0 %v1952_v1 }
  0x35   : > { %537 = vmatpush2.bf16.msra.mxu0 %v1897_v18 }
  0x36   : > { %538 = vmatprep.subr.bf16.mxu0 %v1952_v1 }
  0x39   : > { %539 = vmatpush2.bf16.msra.mxu0 %v1898_v19 }
  0x3a   : > { %540 = vmatprep.subr.bf16.mxu0 %v1952_v1 }
  0x3d   : > { %541 = vmatpush2.bf16.msra.mxu0 %v1899_v20 }
  0x3e   : > { %542 = vmatprep.subr.bf16.mxu0 %v1952_v1 }
  0x41   : > { %543 = vmatpush2.bf16.msra.mxu0 %v1900_v21 }
  0x42   : > { %1873 = vmatprep.subr.msk.bf16.mxu0 %vm508_vm1, %v1935_v31 }
  0x44   : > { %545 = vmatmul.mubr.bf16.vlgmr.msra.gmra.mxu0 %v1901_v22 }
  0x45   : > { %1644 = vmatprep.mubr.msk.bf16.mxu0 %vm498_vm0, %v1904_v23  ;;  %1866 = vmatpush3.bf16.msra.mxu0 %v1474_v32  ;;  %v1914_v23 = vld [vmem:[%s2212_s4] sm:$0xff]  }
  0x46   : > { %1867 = vmatprep.subr.bf16.mxu0 %v1939_v33 }
  0x49   : > { %1868 = vmatpush3.bf16.msra.mxu0 %v1939_v33 }
  0x4c   : > { %553 = vmatmul.mubr.bf16.gmra.mxu0 %v1906_v25  ;;  %v1915_v25 = vld [vmem:[%s2212_s4 + $0x28] sm:$0xff]  }
  0x4d   : > { %1645 = vmatprep.mubr.msk.bf16.mxu0 %vm498_vm0, %v1628_v26 }
  0x54   : > { %561 = vmatmul.mubr.bf16.gmra.mxu0 %v1627_v27 }
  0x55   : > { %1869 = vmatprep.mubr.msk.bf16.mxu0 %vm1466_vm2, %v1942_v34 }
  0x5c   : > { %1870 = vmatmul.mubr.msk.bf16.vlgmr.msra.gmra.mxu0 %vm1466_vm2, %v1943_v35 }
  0x89   : > { %v581_v39 = vpop.permute.xlu0 %580 }
  0x8a   : > { %v591_v52 = vpop.permute.xlu1 %590 }
  0x8d   : > { %v586_v48 = vpop.permute.xlu0 %585 }
  0x8e   : > { %v596_v62 = vpop.permute.xlu1 %595 }
  0x91   : > { %v601_v5 = vpop.permute.xlu0 %600 }
 0x104   : > { %v546_v37 = vpop.f32.mrf.mxu0 }
 0x105   : > { %v547_v38 = vadd.f32 %v1622_v36, %v546_v37 }
 0x106   : > { %v548_v40 = vpop.f32.mrf.mxu0 }
 0x107   : > { %v568_v41 = vmax.f32 %v547_v38, 0.0 }
 0x108   : > { %v549_v42 = vpop.f32.mrf.mxu0 }
 0x109   : > { %v603_v43 = vmul.f32 %v581_v39, %v568_v41  ;;  %v550_v44 = vadd.f32 %v1622_v36, %v549_v42  ;;  %v1919_v39 = vld [vmem:[%s2212_s4 + $0x38] sm:$0xff]  }
 0x10a   : > { %v551_v45 = vpop.f32.mrf.mxu0 }
 0x10b   : > { %v1745_v46 = vpack.c.bf16 %v603_v43, %v603_v43  ;;  %v569_v47 = vmax.f32 %v550_v44, 0.0  ;;  %v1922_v45 = vld [vmem:[%s2212_s4 + $0x30] sm:$0xff]  }
 0x10c   : > { %v554_v49 = vpop.f32.mrf.mxu0 }
 0x10d   : > { %630 = vst.msk [vmem:[#allocation2] sm:$0xf] %vm629_vm3, %v1745_v46  ;;  %v604_v50 = vmul.f32 %v586_v48, %v569_v47  ;;  %v555_v51 = vadd.f32 %v1622_v36, %v554_v49 }
 0x10e   : > { %v556_v53 = vpop.f32.mrf.mxu0 }
 0x10f   : > { %v1746_v54 = vpack.c.bf16 %v604_v50, %v604_v50  ;;  %v570_v55 = vmax.f32 %v555_v51, 0.0  ;;  %v1923_v51 = vld [vmem:[%s2212_s4 + $0x48] sm:$0xff]  }
 0x110   : > { %v557_v56 = vpop.f32.mrf.mxu0 }
 0x111   : > { %631 = vst.msk [vmem:[#allocation2 + $0x4] sm:$0xf] %vm629_vm3, %v1746_v54  ;;  %v605_v57 = vmul.f32 %v591_v52, %v570_v55  ;;  %v558_v58 = vadd.f32 %v1622_v36, %v557_v56  ;;  %v1925_v56 = vld [vmem:[%s2212_s4 + $0x40] sm:$0xff]  }
 0x112   : > { %v559_v59 = vpop.f32.mrf.mxu0 }
 0x113   : > { %v1747_v60 = vpack.c.bf16 %v605_v57, %v605_v57  ;;  %v571_v61 = vmax.f32 %v558_v58, 0.0  ;;  %v1926_v58 = vld [vmem:[%s2212_s4 + $0x58] sm:$0xff]  }
 0x114   : > { %v562_v63 = vpop.f32.mrf.mxu0  ;;  %v636_v6 = vld [vmem:[#allocation2] sm:$0xf] }
 0x115   : > { %632 = vst.msk [vmem:[#allocation2 + $0x8] sm:$0xf] %vm629_vm3, %v1747_v60  ;;  %v606_v0 = vmul.f32 %v596_v62, %v571_v61  ;;  %v563_v1 = vadd.f32 %v1622_v36, %v562_v63  ;;  %v808_v24 = vld [vmem:[#allocation2] sm:$0xe]  ;;  %v1928_v61 = vld [vmem:[%s2212_s4 + $0x50] sm:$0xff]  }
 0x116   : > { %v564_v2 = vpop.f32.mrf.mxu0  ;;  %v890_v38 = vld [vmem:[#allocation2] sm:$0x8] }
 0x117   : > { %v1748_v3 = vpack.c.bf16 %v606_v0, %v606_v0  ;;  %v572_v4 = vmax.f32 %v563_v1, 0.0 }
 0x118   : > { %v637_v7 = vld [vmem:[#allocation2 + $0x4] sm:$0xf]  ;;  %v565_v8 = vpop.f32.mrf.mxu0 }
 0x119   : > { %633 = vst.msk [vmem:[#allocation2 + $0xc] sm:$0xf] %vm629_vm3, %v1748_v3  ;;  %v607_v9 = vmul.f32 %v601_v5, %v572_v4  ;;  %v1655_v10 = vcombine.low %v636_v6, %v637_v7  ;;  %v1670_v26 = vcombine.low %v808_v24, %v637_v7  ;;  %v891_v33 = vld [vmem:[#allocation2 + $0x4] sm:$0xf]  ;;  %v1929_v4 = vld [vmem:[%s2212_s4 + $0x68] sm:$0xff]  }
 0x11a   : > { %v566_v11 = vpop.f32.mrf.mxu0  ;;  %v1679_v40 = vcombine.low %v890_v38, %v891_v33  ;;  %v1154_v3 = vld [vmem:[#allocation2 + $0x4] sm:$0xc] }
 0x11b   : > { %v1749_v12 = vpack.c.bf16 %v607_v9, %v607_v9  ;;  %v661_v13 = vshll.u32 %v1655_v10, 16  ;;  %v659_v15 = vshrl.u32 %v1655_v10, 16  ;;  %v818_v32 = vrot.slane %v1670_v26, 1  ;;  %v1934_v11 = vld [vmem:[%s2212_s4 + $0x60] sm:$0xff]  }
 0x11c   : > { %v1912_v14 = vld [vmem:[#allocation2 + $0x8] ss:$0 sps:$4 sm:$0xff]   ;;  %v910_v44 = vrot.slane %v1679_v40, 3  ;;  %v993_v46 = vshrl.u32 %v1679_v40, 16  ;;  %v996_v47 = vshll.u32 %v1679_v40, 16 }
 0x11d   : > { %635 = vst.msk [vmem:[#allocation2 + $0x10] sm:$0x3] %vm634_vm4, %v1749_v12  ;;  %v663_v16 = vrot.slane %v661_v13, 1  ;;  %v666_v17 = vshll.u32 %v1912_v14, 16  ;;  %v670_v20 = vshrl.u32 %v1912_v14, 16  ;;  %v819_v27 = vrot.slane %v1912_v14, 1 }
 0x11e   : > { %v1916_v31 = vld [vmem:[#allocation2 + $0x8] ss:$0 sps:$4 sm:$0x77]   ;;  %v995_v52 = vrot.slane %v993_v46, 3  ;;  %v998_v53 = vrot.slane %v996_v47, 4 }
 0x11f   : > { %v664_v18 = vor.u32 %v663_v16, %v659_v15  ;;  %v668_v19 = vrot.slane %v666_v17, 1  ;;  %v892_v34 = vld [vmem:[#allocation2 + $0x8] sm:$0xf]  ;;  %v820_v35 = vsel %vm817_vm7, %v818_v32, %v819_v27  ;;  %v1936_v17 = vld [vmem:[%s2212_s4 + $0x78] sm:$0xff]   ;;  %v1342_v24 = vld [vmem:[#allocation2 + $0x4] sm:$0x8]  ;;  %v1871_v32 = vpop.f32.mrf.mxu0 }
 0x120   : > { %v893_v28 = vld [vmem:[#allocation2 + $0xc] sm:$0x3]  ;;  %v999_v55 = vor.u32 %v998_v53, %v995_v52  ;;  %v1698_v62 = vcombine.low %v891_v33, %v892_v34  ;;  %v1155_v63 = vld [vmem:[#allocation2 + $0x8] sm:$0xf] }
 0x121   : > { %v669_v21 = vsel %vm657_vm5, %v664_v18, %v668_v19  ;;  %v672_v22 = vor.u32 %v670_v20, %v668_v19  ;;  %v2128_v29 = vld [vmem:[#allocation2 + $0xc] sm:$0x7]  ;;  %v1680_v36 = vcombine.low %v892_v34, %v893_v28  ;;  %v1708_v5 = vcombine.low %v1154_v3, %v1155_v63 }
 0x122   : > { %1797 = vmatprep.mubr.msk.bf16.mxu1 %vm685_vm6, %v669_v21  ;;  %v1689_v37 = vcombine.low %v892_v34, %v2128_v29  ;;  %v1156_v0 = vld [vmem:[#allocation2 + $0xc] sm:$0xf]  ;;  %v1699_v9 = vcombine.low %v2128_v29, %v2128_v29  ;;  %v1727_v26 = vcombine.low %v1342_v24, %v1155_v63  ;;  %v1941_v29 = vld [vmem:[%s2212_s4 + $0x80] sm:$0xff]  }
 0x123   : > { %1798 = vmatmul.mubr.msk.bf16.vlgmr.msra.gmra.mxu1 %vm685_vm6, %v672_v22  ;;  %v911_v41 = vrot.slane %v1680_v36, 3  ;;  %v1257_v12 = vshrl.u32 %v1708_v5, 16  ;;  %v1260_v13 = vshll.u32 %v1708_v5, 16  ;;  %v1937_v22 = vld [vmem:[%s2212_s4 + $0x70] sm:$0xff]  }
 0x124   : > { %1802 = vmatpush3.bf16.msra.mxu1 %v2094_v30  ;;  %1805 = vmatprep.mubr.msk.bf16.mxu1 %vm685_vm6, %v1655_v10  ;;  %v1918_v30 = vld [vmem:[%s2212_s4 + $0x20] sm:$0xff]   ;;  %v1001_v42 = vshrl.u32 %v1689_v37, 16  ;;  %v1004_v43 = vshll.u32 %v1689_v37, 16  ;;  %v1157_v59 = vld [vmem:[#allocation2 + $0x10] sm:$0x1]  ;;  %v1174_v10 = vrot.slane %v1708_v5, 2 }
 0x125   : > { %1803 = vmatprep.subr.bf16.mxu1 %v1914_v23  ;;  %v912_v48 = vsel %vm909_vm8, %v910_v44, %v911_v41  ;;  %v1246_v60 = vld [vmem:[#allocation2 + $0x10] sm:$0x3]  ;;  %v1709_v1 = vcombine.low %v1156_v0, %v1157_v59  ;;  %v1259_v18 = vrot.slane %v1257_v12, 2  ;;  %v1262_v19 = vrot.slane %v1260_v13, 3 }
 0x126   : > { %v1003_v49 = vrot.slane %v1001_v42, 3  ;;  %v1006_v50 = vrot.slane %v1004_v43, 4  ;;  %v1718_v2 = vcombine.low %v1156_v0, %v1246_v60  ;;  %v1351_v28 = vrot.slane %v1727_v26, 3 }
 0x127   : > { %v1175_v6 = vrot.slane %v1709_v1, 2  ;;  %v1263_v21 = vor.u32 %v1262_v19, %v1259_v18  ;;  %v1733_v19 = vld [vmem:[%s2216_s8] ss:$0 sm:$0xff] }
 0x128   : > { %1804 = vmatpush3.bf16.msra.mxu1 %v1914_v23  ;;  %v1007_v54 = vor.u32 %v1006_v50, %v1003_v49  ;;  %v1265_v7 = vshrl.u32 %v1718_v2, 16  ;;  %v1268_v8 = vshll.u32 %v1718_v2, 16 }
 0x129   : > { %1809 = vmatprep.subr.bf16.mxu1 %v1915_v25  ;;  %v1176_v14 = vsel %vm1173_vm10, %v1174_v10, %v1175_v6 }
 0x12a   : > { %v1008_v57 = vsel %vm991_vm9, %v999_v55, %v1007_v54  ;;  %v1267_v15 = vrot.slane %v1265_v7, 2  ;;  %v1270_v16 = vrot.slane %v1268_v8, 3 }
 0x12b   : > { %1806 = vmatmul.mubr.msk.bf16.vlgmr.msra.gmra.mxu1 %vm685_vm6, %v1916_v31 }
 0x12c   : > { %1810 = vmatpush3.bf16.msra.mxu1 %v1915_v25  ;;  %1813 = vmatprep.mubr.msk.bf16.mxu1 %vm685_vm6, %v820_v35  ;;  %v1271_v20 = vor.u32 %v1270_v16, %v1267_v15  ;;  %v1938_v25 = vld [vmem:[%s2212_s4 + $0x88] sm:$0xff]  }
 0x12d   : > { %1811 = vmatprep.subr.bf16.mxu1 %v1918_v30 }
 0x12e   : > { %v1272_v23 = vsel %vm1255_vm11, %v1263_v21, %v1271_v20  ;;  %v1732_v21 = vld [vmem:[%s2213_s5] ss:$0 sm:$0xff] }
 0x130   : > { %1812 = vmatpush3.bf16.msra.mxu1 %v1918_v30  ;;  %v2189_v30 = vpop.f32.mrf.mxu0 }
 0x131   : > { %1817 = vmatprep.subr.bf16.mxu1 %v1919_v39 }
 0x132   : > { %v1872_v33 = vpop.f32.mrf.mxu0 }
 0x133   : > { %1814 = vmatmul.mubr.msk.bf16.vlgmr.msra.gmra.mxu1 %vm685_vm6, %v819_v27  ;;  %v1352_v27 = vrot.slane %v1718_v2, 3 }
 0x134   : > { %1818 = vmatpush3.bf16.msra.mxu1 %v1919_v39  ;;  %1821 = vmatprep.mubr.msk.bf16.mxu1 %vm685_vm6, %v912_v48 }
 0x135   : > { %1819 = vmatprep.subr.bf16.mxu1 %v1922_v45  ;;  %v1353_v31 = vsel %vm909_vm8, %v1351_v28, %v1352_v27 }
 0x138   : > { %1820 = vmatpush3.bf16.msra.mxu1 %v1922_v45 }
 0x139   : > { %1825 = vmatprep.subr.bf16.mxu1 %v1923_v51 }
 0x13b   : > { %1822 = vmatmul.mubr.msk.bf16.vlgmr.msra.gmra.mxu1 %vm685_vm6, %v911_v41 }
 0x13c   : > { %1826 = vmatpush3.bf16.msra.mxu1 %v1923_v51  ;;  %1829 = vmatprep.mubr.msk.bf16.mxu1 %vm685_vm6, %v1008_v57 }
 0x13d   : > { %1827 = vmatprep.subr.bf16.mxu1 %v1925_v56 }
 0x140   : > { %1828 = vmatpush3.bf16.msra.mxu1 %v1925_v56 }
 0x141   : > { %1833 = vmatprep.subr.bf16.mxu1 %v1926_v58 }
 0x143   : > { %1830 = vmatmul.mubr.msk.bf16.vlgmr.msra.gmra.mxu1 %vm685_vm6, %v1007_v54 }
 0x144   : > { %1834 = vmatpush3.bf16.msra.mxu1 %v1926_v58  ;;  %1837 = vmatprep.mubr.msk.bf16.mxu1 %vm685_vm6, %v1698_v62 }
 0x145   : > { %1835 = vmatprep.subr.bf16.mxu1 %v1928_v61 }
 0x148   : > { %1836 = vmatpush3.bf16.msra.mxu1 %v1928_v61 }
 0x149   : > { %1841 = vmatprep.subr.bf16.mxu1 %v1929_v4 }
 0x14b   : > { %1838 = vmatmul.mubr.msk.bf16.vlgmr.msra.gmra.mxu1 %vm685_vm6, %v1699_v9 }
 0x14c   : > { %1842 = vmatpush3.bf16.msra.mxu1 %v1929_v4  ;;  %1845 = vmatprep.mubr.msk.bf16.mxu1 %vm685_vm6, %v1176_v14 }
 0x14d   : > { %1843 = vmatprep.subr.bf16.mxu1 %v1934_v11 }
 0x150   : > { %1844 = vmatpush3.bf16.msra.mxu1 %v1934_v11 }
 0x151   : > { %1849 = vmatprep.subr.bf16.mxu1 %v1936_v17 }
 0x153   : > { %1846 = vmatmul.mubr.msk.bf16.vlgmr.msra.gmra.mxu1 %vm685_vm6, %v1175_v6 }
 0x154   : > { %1850 = vmatpush3.bf16.msra.mxu1 %v1936_v17  ;;  %1853 = vmatprep.mubr.msk.bf16.mxu1 %vm685_vm6, %v1272_v23 }
 0x155   : > { %1851 = vmatprep.subr.bf16.mxu1 %v1937_v22 }
 0x158   : > { %1852 = vmatpush3.bf16.msra.mxu1 %v1937_v22 }
 0x159   : > { %1857 = vmatprep.subr.bf16.mxu1 %v1938_v25 }
 0x15b   : > { %1854 = vmatmul.mubr.msk.bf16.vlgmr.msra.gmra.mxu1 %vm685_vm6, %v1271_v20 }
 0x15c   : > { %1858 = vmatpush3.bf16.msra.mxu1 %v1938_v25  ;;  %1861 = vmatprep.mubr.msk.bf16.mxu1 %vm685_vm6, %v1353_v31 }
 0x15d   : > { %1859 = vmatprep.subr.bf16.mxu1 %v1941_v29 }
 0x160   : > { %1860 = vmatpush3.bf16.msra.mxu1 %v1941_v29 }
 0x163   : > { %1862 = vmatmul.mubr.msk.bf16.vlgmr.msra.gmra.mxu1 %vm685_vm6, %v1352_v27  ;;  %v1519_v27 = vadd.f32 %v1871_v32, %v1733_v19 }
 0x1e3   : > { %v1799_v34 = vpop.f32.mrf.mxu1 }
 0x1e5   : > { %v726_v35 = vpop.f32.mrf.mxu1 }
 0x1e7   : > { %v1800_v36 = vpop.f32.mrf.mxu1 }
 0x1e9   : > { %v729_v37 = vpop.f32.mrf.mxu1 }
 0x1eb   : > { %v1807_v38 = vpop.f32.mrf.mxu1 }
 0x1ec   : > { %v803_v60 = vadd.f32 %v1807_v38, %v1799_v34  ;;  %v1511_v38 = vadd.f32 %v1733_v19, %v2189_v30 }
 0x1ed   : > { %v794_v39 = vpop.f32.mrf.mxu1 }
 0x1ee   : > { %v795_v62 = vadd.f32 %v794_v39, %v726_v35 }
 0x1ef   : > { %v1808_v40 = vpop.f32.mrf.mxu1 }
 0x1f1   : > { %v797_v41 = vpop.f32.mrf.mxu1 }
 0x1f2   : > { %v798_v4 = vadd.f32 %v797_v41, %v729_v37  ;;  %v1513_v41 = vpop.f32.mrf.mxu0 }
 0x1f3   : > { %v1815_v42 = vpop.f32.mrf.mxu1 }
 0x1f4   : > { %v889_v63 = vadd.f32 %v1815_v42, %v803_v60 }
 0x1f5   : > { %v873_v43 = vpop.f32.mrf.mxu1 }
 0x1f6   : > { %v887_v1 = vadd.f32 %v873_v43, %v795_v62 }
 0x1f7   : > { %v1816_v44 = vpop.f32.mrf.mxu1 }
 0x1f9   : > { %v876_v45 = vpop.f32.mrf.mxu1 }
 0x1fa   : > { %v888_v8 = vadd.f32 %v876_v45, %v798_v4 }
 0x1fb   : > { %v1823_v46 = vpop.f32.mrf.mxu1 }
 0x1fc   : > { %v981_v2 = vadd.f32 %v1823_v46, %v889_v63  ;;  %v1514_v46 = vadd.f32 %v1733_v19, %v1513_v41 }
 0x1fd   : > { %v965_v47 = vpop.f32.mrf.mxu1 }
 0x1fe   : > { %v979_v5 = vadd.f32 %v965_v47, %v887_v1 }
 0x1ff   : > { %v1824_v48 = vpop.f32.mrf.mxu1 }
 0x201   : > { %v968_v49 = vpop.f32.mrf.mxu1 }
 0x202   : > { %v980_v12 = vadd.f32 %v968_v49, %v888_v8 }
 0x203   : > { %v1831_v50 = vpop.f32.mrf.mxu1 }
 0x204   : > { %v1077_v6 = vadd.f32 %v1831_v50, %v981_v2 }
 0x205   : > { %v1061_v51 = vpop.f32.mrf.mxu1 }
 0x206   : > { %v1075_v9 = vadd.f32 %v1061_v51, %v979_v5 }
 0x207   : > { %v1832_v52 = vpop.f32.mrf.mxu1 }
 0x209   : > { %v1064_v53 = vpop.f32.mrf.mxu1 }
 0x20a   : > { %v1076_v16 = vadd.f32 %v1064_v53, %v980_v12 }
 0x20b   : > { %v1839_v54 = vpop.f32.mrf.mxu1 }
 0x20c   : > { %v1153_v10 = vadd.f32 %v1839_v54, %v1077_v6 }
 0x20d   : > { %v1137_v55 = vpop.f32.mrf.mxu1 }
 0x20e   : > { %v1151_v13 = vadd.f32 %v1137_v55, %v1075_v9 }
 0x20f   : > { %v1840_v56 = vpop.f32.mrf.mxu1 }
 0x211   : > { %v1140_v57 = vpop.f32.mrf.mxu1 }
 0x212   : > { %v1152_v22 = vadd.f32 %v1140_v57, %v1076_v16 }
 0x213   : > { %v1847_v58 = vpop.f32.mrf.mxu1 }
 0x214   : > { %v1245_v14 = vadd.f32 %v1847_v58, %v1153_v10 }
 0x215   : > { %v1229_v59 = vpop.f32.mrf.mxu1 }
 0x216   : > { %v1243_v17 = vadd.f32 %v1229_v59, %v1151_v13 }
 0x217   : > { %v1848_v61 = vpop.f32.mrf.mxu1 }
 0x219   : > { %v1232_v0 = vpop.f32.mrf.mxu1 }
 0x21a   : > { %v1244_v26 = vadd.f32 %v1232_v0, %v1152_v22 }
 0x21b   : > { %v1855_v3 = vpop.f32.mrf.mxu1 }
 0x21c   : > { %v1341_v18 = vadd.f32 %v1855_v3, %v1245_v14 }
 0x21d   : > { %v1325_v7 = vpop.f32.mrf.mxu1 }
 0x21e   : > { %v1339_v23 = vadd.f32 %v1325_v7, %v1243_v17 }
 0x21f   : > { %v1856_v11 = vpop.f32.mrf.mxu1 }
 0x221   : > { %v1328_v15 = vpop.f32.mrf.mxu1 }
 0x222   : > { %v1340_v33 = vadd.f32 %v1328_v15, %v1244_v26 }
 0x223   : > { %v1863_v20 = vpop.f32.mrf.mxu1 }
 0x224   : > { %v1422_v24 = vadd.f32 %v1863_v20, %v1341_v18 }
 0x225   : > { %v1406_v25 = vpop.f32.mrf.mxu1 }
 0x226   : > { %v1432_v28 = vadd.f32 %v1732_v21, %v1422_v24  ;;  %v1420_v29 = vadd.f32 %v1406_v25, %v1339_v23 }
 0x227   : > { %v1864_v31 = vpop.f32.mrf.mxu1 }
 0x228   : > { %v1435_v34 = vmax.f32 %v1432_v28, 0.0  ;;  %v1430_v35 = vadd.f32 %v1732_v21, %v1420_v29 }
 0x229   : > { %v1409_v36 = vpop.f32.mrf.mxu1 }
 0x22a   : > { %v1526_v37 = vadd.f32 %v1519_v27, %v1435_v34  ;;  %v1433_v39 = vmax.f32 %v1430_v35, 0.0  ;;  %v1421_v40 = vadd.f32 %v1409_v36, %v1340_v33 }
 0x22c   : > { %v1529_v42 = vmax.f32 %v1526_v37, 0.0  ;;  %v1524_v43 = vadd.f32 %v1511_v38, %v1433_v39  ;;  %v1431_v44 = vadd.f32 %v1732_v21, %v1421_v40 }
 0x22e   : > { %v1752_v32 = vpack.c.bf16 %v1529_v42, %v1529_v42  ;;  %v1527_v45 = vmax.f32 %v1524_v43, 0.0  ;;  %v1434_v47 = vmax.f32 %v1431_v44, 0.0 }
 0x230   : > { %1546 = vst.msk [vmem:[%s352_s13 + $0x8] sm:$0x7] %vm1545_vm12, %v1752_v32  ;;  %v1750_v48 = vpack.c.bf16 %v1527_v45, %v1527_v45  ;;  %v1525_v49 = vadd.f32 %v1514_v46, %v1434_v47 }
 0x232   : > { %1543 = vst.msk [vmem:[%s352_s13] sm:$0xf] %vm629_vm3, %v1750_v48  ;;  %v1528_v30 = vmax.f32 %v1525_v49, 0.0 }
 0x234   : > { %v1751_v50 = vpack.c.bf16 %v1528_v30, %v1528_v30 }
 0x236   : > { %1544 = vst.msk [vmem:[%s352_s13 + $0x4] sm:$0xf] %vm629_vm3, %v1751_v50 }
 0x237 PF: > { %s19_s30 = sadd.s32 1, %s1950_s30  }
 0x238   : > { %p16_p4 = scmp.ge.s32.totalorder %s19_s30, 4  }
 0x23a   :  { %18 = sbr.rel (!%p16_p4) target bundleno = 1 (0x1), region = 97 }

// kernel: _lambda_.15
= control target key start
LH: loop header
LB: loop body
LE: loop exit
PB: predicated region body
PF: predicated region fallthrough
CT: control target
= control target key end

     0   :  { %8 = vsyncpa [#allocation3], 0  ;;  %s598_s0 = inlined_call_operand.vmem [shape: bf16[2,16,32], index: 0, kind: input, shape index: {}]   ;;  %s599_s1 = inlined_call_operand.vmem [shape: bf16[32,64], index: 1, kind: input, shape index: {}]   ;;  %s600_s2 = inlined_call_operand.vmem [shape: f32[1,64], index: 2, kind: input, shape index: {}]   ;;  %s601_s3 = inlined_call_operand.hbm [shape: f32[2,16,64], index: 3, kind: output, shape index: {}]  }
   0x1   :  { %10 = vsyncpa [#allocation3 + $0x1], 0  ;;  %s487_s12 = smov 0   ;;  %s489_s13 = smov 0  }
   0x2   :  { %s491_s14 = smov 0   ;;  %s493_s15 = smov 0  }
   0x3 LB: > { %s508_s16 = sadd.s32 4294967295, %s460_s15   ;;  %s324_s17 = sadd.s32 4294967294, %s460_s15   ;;  %s460_s15 = sphi %s493_s15, %s607_s15   ;;  %s456_s14 = sphi %s491_s14, %s606_s14   ;;  %s452_s13 = sphi %s489_s13, %s605_s13   ;;  %s448_s12 = sphi %s487_s12, %s604_s12  }
   0x4   : > { %s512_s18 = sadd.s32 1, %s460_s15   ;;  %s91_s19 = sadd.s32 1, %s456_s14 }
   0x5   : > { %s88_s20 = ssub.s32 %s460_s15, %s512_s18  ;;  %p101_p0 = scmp.ne.s32.totalorder %s456_s14, %s452_s13 }
   0x6   : > { %p89_p1 = scmp.eq.s32.totalorder %s88_s20, 0  ;;  %p102_p2 = scmp.eq.s32.totalorder %s508_s16, 1 }
   0x7   : > { %p107_p3 = scmp.ne.s32.totalorder %s452_s13, %s448_s12  ;;  %p108_p4 = scmp.eq.s32.totalorder %s324_s17, 1 }
   0x8   : > { %s523_s21 = scalar_select %p89_p1, %s456_s14, %s91_s19  }
   0x9   : > { %p525_p5 = por %p102_p2, %p101_p0  ;;  %p529_p6 = por %p108_p4, %p107_p3 }
   0xa   : > { %p327_p7 = scmp.ge.s32.totalorder %s460_s15, 1  ;;  %p140_p8 = scmp.lt.s32.totalorder %s460_s15, 3 }
   0xc   : > { %p141_p9 = pnand %p327_p7, %p140_p8 }
   0xd   : > { %p164_p10 = scmp.lt.s32.totalorder (!%p141_p9), %s508_s16, 1  ;;  %s161_s6 = sand.u32 (!%p141_p9), 1, %s452_s13  }
   0xe   : > { %144 = sbr.rel (%p141_p9) target bundleno = 241 (0xf1), region = 32  ;;  %s328_s7 = sshll.u32 (!%p141_p9), %s161_s6, 4 }
   0xf   : > { %s163_s10 = scalar_lea.vmem (!%p141_p9), [#allocation2], %s328_s7  ;;  %s342_s17 = sshll.u32 (!%p141_p9), %s508_s16, 8 }
  0x10   : > { %s262_s11 = sshll.u32 (!%p141_p9), %s163_s10, 4  ;;  %s556_s24 = scalar_lea.hbm (!%p141_p9), %s601_s3, %s342_s17  ;;  %s551_s11 = int_to_ptr.vmem [resolvable:$true] %s262_s11 }
  0x11   : > { %s558_s25 = scalar_lea.sflag (!%p141_p9), [#allocation3], %s161_s6  ;;  %s400_s26 = scalar_lea.vmem (!%p141_p9), %s551_s11, 256 }
  0x12   : > { %p401_p11 = scmp.ne.s32.totalorder (!%p141_p9), %s551_s11, %s400_s26 }
  0x13   : > { %v397_v0 = vld [vmem:[%s599_s1 + $0x8] sm:$0xff]   ;;  %v462_v1 = vmov 0.0   ;;  %v398_v2 = vld [vmem:[%s599_s1] sm:$0xff]   ;;  %vm463_vm0 = vmmov 0   ;;  %s165_s28 = scalar_select %p164_p10, %s508_s16, 1  ;;  %vm200_vm1 = vcmask 261120  }
  0x14   : > { %346 = vmatprep.subr.bf16.mxu0 %v462_v1  ;;  %350 = vmatprep.mubr.msk.bf16.mxu0 %vm463_vm0, %v462_v1  ;;  %v331_v4 = vld [vmem:[%s600_s2] ss:$0 sm:$0xff]  ;;  %vm245_vm2 = vcmask 523264   ;;  %p402_p12 = pnand %p401_p11, %p525_p5  ;;  %s464_s16 = smov [#allocation2]  }
  0x15   : > { %347 = vmatpush3.bf16.msra.mxu0 %v397_v0  ;;  %s341_s29 = sshll.u32 %s165_s28, 3  ;;  %s404_s27 = sshll.u32 %s464_s16, 4  ;;  %s405_s27 = int_to_ptr.vmem [resolvable:$false] %s404_s27 }
  0x16   : > { %348 = vmatprep.subr.bf16.mxu0 %v462_v1  ;;  %s168_s5 = scalar_lea.vmem %s598_s0, %s341_s29  ;;  %p403_p13 = pneg %p402_p12 }
  0x17   : > { %v399_v3 = vld [vmem:[%s168_s5] sm:$0xff]   ;;  %s406_s28 = scalar_lea.vmem %s405_s27, 512  ;;  %p407_p0 = scmp.lt.s32.totalorder %s551_s11, %s405_s27 }
  0x18   : > { %p408_p1 = scmp.lt.s32.totalorder %s406_s28, %s400_s26 }
  0x19   : > { %349 = vmatpush3.bf16.msra.mxu0 %v398_v2 }
  0x1a   : > { %p409_p2 = por %p408_p1, %p407_p0 }
  0x1c   : > { %351 = vmatmul.mubr.msk.bf16.vlgmr.msra.gmra.mxu0 %vm200_vm1, %v399_v3  ;;  %p410_p3 = pnand %p409_p2, %p403_p13 }
  0xdc   : > { %v238_v5 = vpop.f32.mrf.mxu0 }
  0xdd   : > { %v239_v6 = vadd.f32 %v331_v4, %v238_v5 }
  0xde   : > { %v352_v7 = vpop.f32.mrf.mxu0 }
  0xdf   : > { %246 = vst.msk [vmem:[%s163_s10] sm:$0xff] %vm245_vm2, %v239_v6 }
  0xe0   : > { %v241_v8 = vpop.f32.mrf.mxu0 }
  0xe1   : > { %v242_v9 = vadd.f32 %v331_v4, %v241_v8 }
  0xe2   : > { %v353_v10 = vpop.f32.mrf.mxu0 }
  0xe3   : > { %247 = vst.msk [vmem:[%s163_s10 + $0x8] sm:$0xff] %vm245_vm2, %v242_v9 }
  0xe4   : > { %413 = shalt.err (!%p410_p3)
}
  0xe5   : > { %s414_s29 = scalar_lea.hbm %s556_s24, 256  ;;  %s418_s5 = scalar_lea.hbm %s601_s3, 512 }
  0xe6   : > { %p415_p4 = scmp.ne.s32.totalorder %s556_s24, %s414_s29  ;;  %p419_p9 = scmp.lt.s32.totalorder %s556_s24, %s601_s3 }
  0xe7   : > { %p420_p10 = scmp.lt.s32.totalorder %s418_s5, %s414_s29 }
  0xe8   : > { %p416_p7 = pnand %p415_p4, %p525_p5 }
  0xe9   : > { %p421_p11 = por %p420_p10, %p419_p9 }
  0xea   : > { %p417_p8 = pneg %p416_p7 }
  0xec   : > { %p422_p12 = pnand %p421_p11, %p417_p8 }
  0xee   : > { %425 = shalt.err (!%p422_p12)
}
  0xef   : > { %s465_s8 = smov 128   ;;  %s466_s9 = smov 8  }
  0xf0   : > { %354 = dma.vmem_to_hbm [thread:$0]  (%p525_p5), %s551_s11, 256, %s556_s24, %s558_s25, %s465_s8, %s465_s8, %s466_s9  }
  0xf1 PF: > { %p360_p13 = scmp.ge.s32.totalorder %s460_s15, 2  ;;  %s277_s10 = sand.u32 1, %s448_s12  }
  0xf2   : > { %s278_s17 = scalar_lea.sflag [#allocation3], %s277_s10 }
  0xf3   : > { %p357_p0 = pnand %p360_p13, %p529_p6 }
  0xf5   : > { %p358_p1 = pneg %p357_p0 }
  0xf7   : > { %443 = dma.done.wait (%p358_p1), %s278_s17, 256  }
  0xf8   : > { %445 = vsyncadd (%p358_p1), %s278_s17, 4294967040  ;;  %p13_p2 = scmp.ge.s32.totalorder %s512_s18, 4   ;;  %s604_s12 = smov %s452_s13 }
  0xf9   : > { %s605_s13 = smov %s456_s14  ;;  %s606_s14 = smov %s523_s21 }
  0xfa   : > { %s607_s15 = smov %s512_s18  ;;  %15 = sbr.rel (!%p13_p2) target bundleno = 3 (0x3), region = 67 }
  0xff   :  { %283 = vsyncpa [#allocation3], 1 }
 0x100   :  { %285 = vsyncpa [#allocation3 + $0x1], 1 }

// kernel: _lambda_.14
= control target key start
LH: loop header
LB: loop body
LE: loop exit
PB: predicated region body
PF: predicated region fallthrough
CT: control target
= control target key end

     0   :  { %s2018_s24 = smov 0   ;;  %s2268_s0 = inlined_call_operand.vmem [shape: bf16[2,36,288], index: 0, kind: input, shape index: {}]   ;;  %s2269_s1 = inlined_call_operand.vmem [shape: f32[36,1], index: 1, kind: input, shape index: {}]   ;;  %s2270_s2 = inlined_call_operand.vmem [shape: bf16[288,32], index: 2, kind: input, shape index: {}]   ;;  %s2271_s3 = inlined_call_operand.vmem [shape: f32[1,32], index: 3, kind: input, shape index: {}, may-alias: {3,5}]   ;;  %s2272_s4 = inlined_call_operand.vmem [shape: bf16[9,32,32], index: 4, kind: input, shape index: {}]   ;;  %s2273_s5 = inlined_call_operand.vmem [shape: f32[1,32], index: 5, kind: input, shape index: {}, may-alias: {3,5}]   ;;  %s2274_s6 = inlined_call_operand.vmem [shape: bf16[2,22,32], index: 6, kind: input, shape index: {}]   ;;  %s2275_s7 = inlined_call_operand.vmem [shape: bf16[2,22,32], index: 7, kind: output, shape index: {}]  }
   0x1 LB: > { %s1586_s25 = sadd.s32 4294967295, %s1973_s24   ;;  %p1590_p0 = scmp.ge.s32.totalorder %s1973_s24, 1  ;;  %s1973_s24 = sphi %s2018_s24, %s17_s24  }
   0x2   : > { %p247_p1 = scmp.lt.s32.totalorder %s1973_s24, 3 }
   0x4   : > { %p248_p2 = pnand %p1590_p0, %p247_p1 }
   0x5   : > { %p284_p3 = scmp.lt.s32.totalorder (!%p248_p2), %s1586_s25, 1 }
   0x6   : > { %251 = sbr.rel (%p248_p2) target bundleno = 526 (0x20e), region = 48 }
   0xb   : > { %v1907_v0 = vld [vmem:[%s2270_s2 + $0x78] sm:$0xff]   ;;  %v1975_v2 = vmov 0.0   ;;  %v1909_v3 = vld [vmem:[%s2270_s2 + $0x70] sm:$0xff]   ;;  %vm1976_vm0 = vmmov 0   ;;  %v1911_v5 = vld [vmem:[%s2270_s2 + $0x68] sm:$0xff]   ;;  %v1977_v7 = vmov 0  }
   0xc   : > { %v1908_v1 = vld [vmem:[%s2270_s2 + $0x38] sm:$0xff]   ;;  %1804 = vmatprep.subr.bf16.mxu1 %v1975_v2  ;;  %1729 = vmatprep.subr.bf16.mxu0 %v1907_v0  ;;  %v1910_v4 = vld [vmem:[%s2270_s2 + $0x30] sm:$0xff]   ;;  %v1912_v6 = vld [vmem:[%s2270_s2 + $0x28] sm:$0xff]   ;;  %s2277_s25 = smov (!%p284_p3, %s1586_s25), 1  ;;  %vm501_vm1 = vcmask 261120   ;;  %vm684_vm2 = vcmask 257024  }
   0xd   : > { %1730 = vmatpush3.bf16.msra.mxu0 %v1908_v1  ;;  %1808 = vmatprep.mubr.msk.bf16.mxu1 %vm1976_vm0, %v1975_v2  ;;  %v1913_v8 = vld [vmem:[%s2270_s2 + $0x60] sm:$0xff]   ;;  %v1915_v10 = vld [vmem:[%s2270_s2 + $0x58] sm:$0xff]   ;;  %s1892_s21 = smul.u32 60, %s2277_s25  ;;  %v1921_v11 = vld [vmem:[%s2270_s2 + $0x88] sm:$0xff]   ;;  %vm689_vm3 = vcmask 254976   ;;  %vm963_vm5 = vcmask 1044480  }
   0xe   : > { %1731 = vmatprep.subr.bf16.mxu0 %v1909_v3  ;;  %1905 = vset.pattern.permute.xlu0 %v1977_v7  ;;  %v1914_v9 = vld [vmem:[%s2270_s2 + $0x20] sm:$0xff]   ;;  %v1916_v12 = vld [vmem:[%s2270_s2 + $0x18] sm:$0xff]   ;;  %v1917_v13 = vld [vmem:[%s2270_s2 + $0x50] sm:$0xff]   ;;  %vm712_vm4 = vsmask.f32 7424  ;;  %vm871_vm6 = vcmask 1046528  }
   0xf   : > { %1906 = vset.pattern.permute.xlu1 %v1977_v7  ;;  %1805 = vmatpush3.bf16.msra.mxu1 %v1921_v11  ;;  %s2071_s9 = scalar_lea.vmem %s2268_s0, %s1892_s21  ;;  %v1918_v14 = vld [vmem:[%s2270_s2 + $0x10] sm:$0xff]   ;;  %v1924_v15 = vld [vmem:[%s2270_s2 + $0x80] sm:$0xff]   ;;  %v1919_v16 = vld [vmem:[%s2270_s2 + $0x48] sm:$0xff]   ;;  %vm1309_vm7 = vsmask.f32 5376  ;;  %vm1227_vm9 = vcmask 1045504  }
  0x10   : > { %1806 = vmatprep.subr.bf16.mxu1 %v1975_v2  ;;  %v1927_v17 = vld [vmem:[%s2071_s9 + $0x4] ss:$12 sps:$4 sm:$0xff]   ;;  %v1928_v18 = vld [vmem:[%s2071_s9 + $0x8] ss:$12 sps:$4 sm:$0xff]   ;;  %v1932_v25 = vld [vmem:[%s2071_s9 + $0x20] ss:$12 sps:$4 sm:$0xff]  }
  0x11   : > { %1732 = vmatpush3.bf16.msra.mxu0 %v1910_v4  ;;  %543 = vmatprep.mubr.bf16.mxu0 %v1927_v17  ;;  %v1920_v19 = vld [vmem:[%s2270_s2 + $0x8] sm:$0xff]   ;;  %v628_v20 = vld [vmem:[%s2269_s1] sm:$0xff]  ;;  %v630_v23 = vld [vmem:[%s2269_s1 + $0x10] sm:$0xff]  ;;  %vm1045_vm8 = vsmask.f32 4352  ;;  %s1893_s30 = smul.u32 12, %s2277_s25 }
  0x12   : > { %1733 = vmatprep.subr.bf16.mxu0 %v1911_v5  ;;  %v1922_v21 = vld [vmem:[%s2270_s2 + $0x40] sm:$0xff]   ;;  %v629_v22 = vld [vmem:[%s2269_s1 + $0x8] sm:$0xff]  ;;  %635 = vperm.xlu0 %1905, %v628_v20   ;;  %v631_v26 = vld [vmem:[%s2269_s1 + $0x18] sm:$0xff]  ;;  %vm1517_vm10 = vcmask 256000  }
  0x13   : > { %1807 = vmatpush3.bf16.msra.mxu1 %v1924_v15  ;;  %v1923_v24 = vld [vmem:[%s2270_s2] sm:$0xff]   ;;  %645 = vperm.xlu1 %1906, %v630_v23   ;;  %v1929_v29 = vld [vmem:[%s2071_s9 + $0x1c] ss:$12 sps:$4 sm:$0xff]   ;;  %v1935_v30 = vld [vmem:[%s2071_s9 + $0x38] ss:$0 sps:$4 sm:$0x33]   ;;  %s293_s11 = scalar_lea.vmem %s2274_s6, %s1893_s30  ;;  %s298_s16 = scalar_lea.vmem %s2275_s7, %s1893_s30 }
  0x14   : > { %v1925_v27 = vld [vmem:[%s2071_s9] ss:$12 sps:$4 sm:$0xff]   ;;  %v308_v31 = vld [vmem:[%s2071_s9 + $0x30] sm:$0x33]  ;;  %v1931_v32 = vld [vmem:[%s2071_s9 + $0x18] ss:$12 sps:$4 sm:$0xff]  }
  0x15   : > { %1734 = vmatpush3.bf16.msra.mxu0 %v1912_v6  ;;  %v632_v28 = vld [vmem:[%s2269_s1 + $0x20] sm:$0xf]  ;;  %v1602_v33 = vcombine.high %v308_v31, %v308_v31  ;;  %v1601_v34 = vcombine.low %v308_v31, %v308_v31  ;;  %v1936_v35 = vld [vmem:[%s2272_s4 + $0x18] sm:$0xff]   ;;  %v1937_v36 = vld [vmem:[%s2272_s4 + $0x10] sm:$0xff]  }
  0x16   : > { %1735 = vmatprep.subr.bf16.mxu0 %v1913_v8  ;;  %1809 = vmatmul.mubr.msk.bf16.vlgmr.msra.gmra.mxu1 %vm501_vm1, %v1928_v18  ;;  %v1938_v37 = vld [vmem:[%s2272_s4 + $0x38] sm:$0xff]   ;;  %v1939_v38 = vld [vmem:[%s2272_s4 + $0x30] sm:$0xff]   ;;  %v2137_v39 = vld [vmem:[%s2272_s4 + $0x8] sm:$0xff]  }
  0x17   : > { %1812 = vmatprep.mubr.msk.bf16.mxu1 %vm1976_vm0, %v1975_v2  ;;  %640 = vperm.xlu0 %1905, %v629_v22   ;;  %v2143_v40 = vld [vmem:[%s2272_s4 + $0x58] sm:$0xff]   ;;  %v1594_v49 = vld [vmem:[%s2271_s3] ss:$0 sm:$0xff] }
  0x18   : > { %650 = vperm.xlu1 %1906, %v631_v26   ;;  %1820 = vmatprep.subr.bf16.mxu1 %v1936_v35 }
  0x19   : > { %1736 = vmatpush3.bf16.msra.mxu0 %v1914_v9  ;;  %1821 = vmatpush3.bf16.msra.mxu1 %v1936_v35 }
  0x1a   : > { %1737 = vmatprep.subr.bf16.mxu0 %v1915_v10  ;;  %1822 = vmatprep.subr.bf16.mxu1 %v1937_v36 }
  0x1b   : > { %655 = vperm.xlu0 %1905, %v632_v28  }
  0x1d   : > { %1738 = vmatpush3.bf16.msra.mxu0 %v1916_v12  ;;  %1823 = vmatpush3.bf16.msra.mxu1 %v1937_v36 }
  0x1e   : > { %1739 = vmatprep.subr.bf16.mxu0 %v1917_v13  ;;  %1813 = vmatmul.mubr.msk.bf16.gmra.mxu1 %vm501_vm1, %v1932_v25 }
  0x1f   : > { %1816 = vmatprep.mubr.msk.bf16.mxu1 %vm1976_vm0, %v1975_v2  ;;  %1828 = vmatprep.subr.bf16.mxu1 %v2137_v39 }
  0x21   : > { %1740 = vmatpush3.bf16.msra.mxu0 %v1918_v14 }
  0x22   : > { %1741 = vmatprep.subr.bf16.mxu0 %v1919_v16 }
  0x25   : > { %1742 = vmatpush3.bf16.msra.mxu0 %v1920_v19 }
  0x26   : > { %1743 = vmatprep.subr.bf16.mxu0 %v1922_v21  ;;  %1817 = vmatmul.mubr.msk.bf16.gmra.mxu1 %vm501_vm1, %v1935_v30 }
  0x29   : > { %1744 = vmatpush3.bf16.msra.mxu0 %v1923_v24 }
  0x2a   : > { %1844 = vmatprep.subr.bf16.mxu0 %v1938_v37 }
  0x2c   : > { %544 = vmatmul.mubr.bf16.vlgmr.msra.gmra.mxu0 %v1925_v27 }
  0x2d   : > { %551 = vmatprep.mubr.bf16.mxu0 %v1929_v29  ;;  %1845 = vmatpush3.bf16.msra.mxu0 %v1938_v37 }
  0x2e   : > { %1846 = vmatprep.subr.bf16.mxu0 %v1939_v38 }
  0x31   : > { %1847 = vmatpush3.bf16.msra.mxu0 %v1939_v38 }
  0x32   : > { %1860 = vmatprep.subr.bf16.mxu0 %v2143_v40 }
  0x34   : > { %552 = vmatmul.mubr.bf16.gmra.mxu0 %v1931_v32 }
  0x35   : > { %559 = vmatprep.mubr.bf16.mxu0 %v1602_v33 }
  0x3c   : > { %560 = vmatmul.mubr.bf16.gmra.mxu0 %v1601_v34 }
  0x8d   : > { %v636_v60 = vpop.permute.xlu0 %635 }
  0x8e   : > { %v646_v15 = vpop.permute.xlu1 %645 }
  0x92   : > { %v641_v10 = vpop.permute.xlu0 %640 }
  0x93   : > { %v651_v28 = vpop.permute.xlu1 %650 }
  0x96   : > { %v656_v34 = vpop.permute.xlu0 %655 }
  0xd6   : > { %v601_v41 = vpop.f32.mrf.mxu1 }
  0xd8   : > { %v1810_v42 = vpop.f32.mrf.mxu1 }
  0xda   : > { %v604_v43 = vpop.f32.mrf.mxu1 }
  0xdc   : > { %v1811_v44 = vpop.f32.mrf.mxu1 }
  0xde   : > { %v609_v45 = vpop.f32.mrf.mxu1 }
  0xe0   : > { %v1814_v46 = vpop.f32.mrf.mxu1 }
  0xe2   : > { %v612_v48 = vpop.f32.mrf.mxu1 }
  0xe4   : > { %v1815_v52 = vpop.f32.mrf.mxu1 }
  0xe6   : > { %v617_v55 = vpop.f32.mrf.mxu1 }
  0xe8   : > { %v1818_v59 = vpop.f32.mrf.mxu1 }
  0xea   : > { %v620_v0 = vpop.f32.mrf.mxu1 }
  0xec   : > { %v1745_v47 = vpop.f32.mrf.mxu0  ;;  %v1819_v5 = vpop.f32.mrf.mxu1 }
  0xed   : > { %v1948_v5 = vld [vmem:[%s2272_s4 + $0x50] sm:$0xff]  }
  0xee   : > { %v1746_v50 = vpop.f32.mrf.mxu0 }
  0xef   : > { %v1747_v51 = vadd.f32 %v1746_v50, %v1745_v47 }
  0xf0   : > { %v1748_v53 = vpop.f32.mrf.mxu0 }
  0xf1   : > { %v546_v54 = vadd.f32 %v1747_v51, %v1594_v49 }
  0xf2   : > { %v1749_v56 = vpop.f32.mrf.mxu0 }
  0xf3   : > { %v602_v57 = vadd.f32 %v601_v41, %v546_v54  ;;  %v1750_v58 = vadd.f32 %v1749_v56, %v1748_v53 }
  0xf4   : > { %v1751_v61 = vpop.f32.mrf.mxu0 }
  0xf5   : > { %v623_v62 = vmax.f32 %v602_v57, 0.0  ;;  %v549_v63 = vadd.f32 %v1750_v58, %v1594_v49 }
  0xf6   : > { %v1752_v1 = vpop.f32.mrf.mxu0 }
  0xf7   : > { %v658_v2 = vmul.f32 %v636_v60, %v623_v62  ;;  %v605_v3 = vadd.f32 %v604_v43, %v549_v63  ;;  %v1753_v4 = vadd.f32 %v1752_v1, %v1751_v61  ;;  %v1946_v62 = vld [vmem:[%s2272_s4] sm:$0xff]  }
  0xf8   : > { %v1754_v6 = vpop.f32.mrf.mxu0 }
  0xf9   : > { %v1717_v7 = vpack.c.bf16 %v658_v2, %v658_v2  ;;  %v624_v8 = vmax.f32 %v605_v3, 0.0  ;;  %v554_v9 = vadd.f32 %v1753_v4, %v1594_v49 }
  0xfa   : > { %v1755_v11 = vpop.f32.mrf.mxu0 }
  0xfb   : > { %685 = vst.msk [vmem:[#allocation2] sm:$0xf] %vm684_vm2, %v1717_v7  ;;  %v659_v12 = vmul.f32 %v641_v10, %v624_v8  ;;  %v610_v13 = vadd.f32 %v609_v45, %v554_v9  ;;  %v1756_v14 = vadd.f32 %v1755_v11, %v1754_v6  ;;  %v1949_v10 = vld [vmem:[%s2272_s4 + $0x28] sm:$0xff]  }
  0xfc   : > { %v1757_v16 = vpop.f32.mrf.mxu0 }
  0xfd   : > { %v1718_v17 = vpack.c.bf16 %v659_v12, %v659_v12  ;;  %v625_v18 = vmax.f32 %v610_v13, 0.0  ;;  %v557_v19 = vadd.f32 %v1756_v14, %v1594_v49 }
  0xfe   : > { %v1758_v20 = vpop.f32.mrf.mxu0 }
  0xff   : > { %686 = vst.msk [vmem:[#allocation2 + $0x4] sm:$0xf] %vm684_vm2, %v1718_v17  ;;  %v660_v21 = vmul.f32 %v646_v15, %v625_v18  ;;  %v613_v22 = vadd.f32 %v612_v48, %v557_v19  ;;  %v1759_v23 = vadd.f32 %v1758_v20, %v1757_v16  ;;  %v1953_v17 = vld [vmem:[%s2272_s4 + $0x78] sm:$0xff]   ;;  %v1954_v18 = vld [vmem:[%s2272_s4 + $0x20] sm:$0xff]  }
 0x100   : > { %v1760_v24 = vpop.f32.mrf.mxu0 }
 0x101   : > { %v1719_v25 = vpack.c.bf16 %v660_v21, %v660_v21  ;;  %v626_v26 = vmax.f32 %v613_v22, 0.0  ;;  %v562_v27 = vadd.f32 %v1759_v23, %v1594_v49 }
 0x102   : > { %v1761_v29 = vpop.f32.mrf.mxu0  ;;  %v691_v35 = vld [vmem:[#allocation2] sm:$0xf] }
 0x103   : > { %687 = vst.msk [vmem:[#allocation2 + $0x8] sm:$0xf] %vm684_vm2, %v1719_v25  ;;  %v661_v30 = vmul.f32 %v651_v28, %v626_v26  ;;  %v618_v31 = vadd.f32 %v617_v55, %v562_v27  ;;  %v944_v48 = vld [vmem:[#allocation2] sm:$0x8] }
 0x104   : > { %v862_v6 = vld [vmem:[#allocation2] sm:$0xe] }
 0x105   : > { %v1720_v32 = vpack.c.bf16 %v661_v30, %v661_v30  ;;  %v627_v33 = vmax.f32 %v618_v31, 0.0 }
 0x106   : > { %v2152_v36 = vld [vmem:[#allocation2 + $0x4] sm:$0xf] }
 0x107   : > { %688 = vst.msk [vmem:[#allocation2 + $0xc] sm:$0xf] %vm684_vm2, %v1720_v32  ;;  %v662_v37 = vmul.f32 %v656_v34, %v627_v33  ;;  %v1634_v38 = vcombine.low %v691_v35, %v2152_v36  ;;  %v945_v44 = vld [vmem:[#allocation2 + $0x4] sm:$0xf]  ;;  %v1649_v11 = vcombine.low %v862_v6, %v2152_v36  ;;  %v1957_v32 = vld [vmem:[%s2272_s4 + $0x70] sm:$0xff]   ;;  %v1958_v33 = vld [vmem:[%s2272_s4 + $0x48] sm:$0xff]  }
 0x108   : > { %v2161_v51 = vcombine.low %v944_v48, %v945_v44  ;;  %v1208_v52 = vld [vmem:[#allocation2 + $0x4] sm:$0xc] }
 0x109   : > { %v1721_v41 = vpack.c.bf16 %v662_v37, %v662_v37  ;;  %v716_v42 = vshll.u32 %v1634_v38, 16  ;;  %v714_v45 = vshrl.u32 %v1634_v38, 16  ;;  %v872_v23 = vrot.slane %v1649_v11, 1  ;;  %v1963_v48 = vld [vmem:[%s2272_s4 + $0x60] sm:$0xff]  }
 0x10a   : > { %v2156_v43 = vld [vmem:[#allocation2 + $0x8] ss:$0 sps:$4 sm:$0xff]   ;;  %v964_v63 = vrot.slane %v2161_v51, 3  ;;  %v1047_v24 = vshrl.u32 %v2161_v51, 16  ;;  %v1050_v25 = vshll.u32 %v2161_v51, 16 }
 0x10b   : > { %690 = vst.msk [vmem:[#allocation2 + $0x10] sm:$0x3] %vm689_vm3, %v1721_v41  ;;  %v718_v46 = vrot.slane %v716_v42, 1  ;;  %v721_v47 = vshll.u32 %v2156_v43, 16  ;;  %v2159_v49 = vld [vmem:[#allocation2 + $0x8] sm:$0xf] }
 0x10c   : > { %v725_v54 = vshrl.u32 %v2156_v43, 16  ;;  %v946_v55 = vld [vmem:[#allocation2 + $0x8] sm:$0xf]  ;;  %v2167_v59 = vcombine.low %v1208_v52, %v2159_v49  ;;  %v873_v14 = vrot.slane %v2156_v43, 1  ;;  %v1049_v34 = vrot.slane %v1047_v24, 3  ;;  %v1960_v42 = vld [vmem:[%s2272_s4 + $0x40] sm:$0xff]  }
 0x10d   : > { %v719_v50 = vor.u32 %v718_v46, %v714_v45  ;;  %v723_v53 = vrot.slane %v721_v47, 1  ;;  %v1950_v22 = vld [vmem:[#allocation2 + $0x8] ss:$0 sps:$4 sm:$0x77]   ;;  %v1052_v35 = vrot.slane %v1050_v25, 4 }
 0x10e   : > { %v947_v56 = vld [vmem:[#allocation2 + $0xc] sm:$0x3]  ;;  %v1311_v8 = vshrl.u32 %v2167_v59, 16  ;;  %v1314_v9 = vshll.u32 %v2167_v59, 16  ;;  %v874_v27 = vsel %vm871_vm6, %v872_v23, %v873_v14  ;;  %v1228_v47 = vrot.slane %v2167_v59, 2 }
 0x10f   : > { %v1659_v57 = vcombine.low %v946_v55, %v947_v56  ;;  %v2164_v58 = vld [vmem:[#allocation2 + $0xc] sm:$0x7]  ;;  %v724_v60 = vsel %vm712_vm4, %v719_v50, %v723_v53  ;;  %v727_v61 = vor.u32 %v725_v54, %v723_v53  ;;  %v1053_v41 = vor.u32 %v1052_v35, %v1049_v34  ;;  %v1396_v51 = vld [vmem:[#allocation2 + $0x4] sm:$0x8] }
 0x110   : > { %1824 = vmatprep.mubr.msk.bf16.mxu1 %vm501_vm1, %v724_v60  ;;  %v2175_v1 = vld [vmem:[#allocation2 + $0xc] sm:$0xf]  ;;  %v1668_v3 = vcombine.low %v946_v55, %v2164_v58  ;;  %v1313_v19 = vrot.slane %v1311_v8, 2  ;;  %v1316_v20 = vrot.slane %v1314_v9, 3  ;;  %v1678_v30 = vcombine.low %v2164_v58, %v2164_v58  ;;  %v1966_v56 = vld [vmem:[%s2272_s4 + $0x80] sm:$0xff]  }
 0x111   : > { %v965_v0 = vrot.slane %v1659_v57, 3  ;;  %1825 = vmatmul.mubr.msk.bf16.vlgmr.msra.gmra.mxu1 %vm501_vm1, %v727_v61  ;;  %v1961_v45 = vld [vmem:[%s2272_s4 + $0x68] sm:$0xff]   ;;  %v1706_v53 = vcombine.low %v1396_v51, %v2159_v49 }
 0x112   : > { %v1300_v2 = vld [vmem:[#allocation2 + $0x10] sm:$0x3]  ;;  %1829 = vmatpush3.bf16.msra.mxu1 %v2137_v39  ;;  %1832 = vmatprep.mubr.msk.bf16.mxu1 %vm501_vm1, %v1634_v38  ;;  %v1677_v39 = vcombine.low %v945_v44, %v946_v55  ;;  %v1055_v15 = vshrl.u32 %v1668_v3, 16  ;;  %v1058_v16 = vshll.u32 %v1668_v3, 16  ;;  %v1317_v31 = vor.u32 %v1316_v20, %v1313_v19  ;;  %v1964_v52 = vld [vmem:[%s2272_s4 + $0x88] sm:$0xff]  }
 0x113   : > { %v966_v4 = vsel %vm963_vm5, %v964_v63, %v965_v0  ;;  %v2185_v7 = vcombine.low %v2175_v1, %v1300_v2  ;;  %1830 = vmatprep.subr.bf16.mxu1 %v1946_v62  ;;  %v1211_v38 = vld [vmem:[#allocation2 + $0x10] sm:$0x1]  ;;  %v1405_v55 = vrot.slane %v1706_v53, 3 }
 0x114   : > { %1848 = vmatprep.mubr.msk.bf16.mxu0 %vm501_vm1, %v966_v4  ;;  %v1057_v28 = vrot.slane %v1055_v15, 3  ;;  %v1060_v29 = vrot.slane %v1058_v16, 4  ;;  %v1688_v44 = vcombine.low %v2175_v1, %v1211_v38 }
 0x115   : > { %1849 = vmatmul.mubr.msk.bf16.vlgmr.msra.gmra.mxu0 %vm501_vm1, %v965_v0  ;;  %v1319_v12 = vshrl.u32 %v2185_v7, 16  ;;  %v1322_v13 = vshll.u32 %v2185_v7, 16  ;;  %v1406_v54 = vrot.slane %v2185_v7, 3 }
 0x116   : > { %1861 = vmatpush3.bf16.msra.mxu0 %v2143_v40  ;;  %1864 = vmatprep.mubr.msk.bf16.mxu0 %vm501_vm1, %v1677_v39  ;;  %v1061_v37 = vor.u32 %v1060_v29, %v1057_v28  ;;  %v1229_v46 = vrot.slane %v1688_v44, 2  ;;  %v1492_v44 = vld [vmem:[%s293_s11 + $0x8] sm:$0x7] }
 0x117   : > { %1831 = vmatpush3.bf16.msra.mxu1 %v1946_v62  ;;  %1862 = vmatprep.subr.bf16.mxu0 %v1948_v5  ;;  %v1321_v40 = vrot.slane %v1319_v12, 2  ;;  %v1324_v21 = vrot.slane %v1322_v13, 3  ;;  %v1407_v57 = vsel %vm963_vm5, %v1405_v55, %v1406_v54 }
 0x118   : > { %1836 = vmatprep.subr.bf16.mxu1 %v1949_v10  ;;  %v1062_v43 = vsel %vm1045_vm8, %v1053_v41, %v1061_v37  ;;  %v1230_v50 = vsel %vm1227_vm9, %v1228_v47, %v1229_v46 }
 0x119   : > { %v1325_v26 = vor.u32 %v1324_v21, %v1321_v40 }
 0x11a   : > { %1863 = vmatpush3.bf16.msra.mxu0 %v1948_v5  ;;  %1833 = vmatmul.mubr.msk.bf16.vlgmr.msra.gmra.mxu1 %vm501_vm1, %v1950_v22 }
 0x11b   : > { %1837 = vmatpush3.bf16.msra.mxu1 %v1949_v10  ;;  %1840 = vmatprep.mubr.msk.bf16.mxu1 %vm501_vm1, %v874_v27  ;;  %v1326_v36 = vsel %vm1309_vm7, %v1317_v31, %v1325_v26 }
 0x11c   : > { %1876 = vmatprep.subr.bf16.mxu0 %v1953_v17  ;;  %1838 = vmatprep.subr.bf16.mxu1 %v1954_v18 }
 0x11d   : > { %1865 = vmatmul.mubr.msk.bf16.vlgmr.msra.gmra.mxu0 %vm501_vm1, %v1678_v30 }
 0x11e   : > { %1877 = vmatpush3.bf16.msra.mxu0 %v1953_v17  ;;  %1880 = vmatprep.mubr.msk.bf16.mxu0 %vm501_vm1, %v1326_v36 }
 0x11f   : > { %1839 = vmatpush3.bf16.msra.mxu1 %v1954_v18  ;;  %1878 = vmatprep.subr.bf16.mxu0 %v1957_v32 }
 0x120   : > { %1852 = vmatprep.subr.bf16.mxu1 %v1958_v33 }
 0x122   : > { %1879 = vmatpush3.bf16.msra.mxu0 %v1957_v32  ;;  %1841 = vmatmul.mubr.msk.bf16.vlgmr.msra.gmra.mxu1 %vm501_vm1, %v873_v14 }
 0x123   : > { %1853 = vmatpush3.bf16.msra.mxu1 %v1958_v33  ;;  %1856 = vmatprep.mubr.msk.bf16.mxu1 %vm501_vm1, %v1062_v43  ;;  %v1711_v43 = vld [vmem:[%s2273_s5] ss:$0 sm:$0xff] }
 0x124   : > { %1854 = vmatprep.subr.bf16.mxu1 %v1960_v42 }
 0x125   : > { %1881 = vmatmul.mubr.msk.bf16.vlgmr.msra.gmra.mxu0 %vm501_vm1, %v1325_v26 }
 0x127   : > { %1855 = vmatpush3.bf16.msra.mxu1 %v1960_v42 }
 0x128   : > { %1868 = vmatprep.subr.bf16.mxu1 %v1961_v45 }
 0x12a   : > { %1857 = vmatmul.mubr.msk.bf16.vlgmr.msra.gmra.mxu1 %vm501_vm1, %v1061_v37 }
 0x12b   : > { %1869 = vmatpush3.bf16.msra.mxu1 %v1961_v45  ;;  %1872 = vmatprep.mubr.msk.bf16.mxu1 %vm501_vm1, %v1230_v50  ;;  %v1726_v50 = vld [vmem:[%s293_s11] sm:$0xff]  }
 0x12c   : > { %1870 = vmatprep.subr.bf16.mxu1 %v1963_v48 }
 0x12f   : > { %1871 = vmatpush3.bf16.msra.mxu1 %v1963_v48 }
 0x130   : > { %1884 = vmatprep.subr.bf16.mxu1 %v1964_v52 }
 0x132   : > { %1873 = vmatmul.mubr.msk.bf16.vlgmr.msra.gmra.mxu1 %vm501_vm1, %v1229_v46 }
 0x133   : > { %1885 = vmatpush3.bf16.msra.mxu1 %v1964_v52  ;;  %1888 = vmatprep.mubr.msk.bf16.mxu1 %vm501_vm1, %v1407_v57  ;;  %v1495_v52 = vunpack.c.l.bf16 %v1492_v44 }
 0x134   : > { %1886 = vmatprep.subr.bf16.mxu1 %v1966_v56 }
 0x137   : > { %1887 = vmatpush3.bf16.msra.mxu1 %v1966_v56 }
 0x13a   : > { %1889 = vmatmul.mubr.msk.bf16.vlgmr.msra.gmra.mxu1 %vm501_vm1, %v1406_v54 }
 0x1d1   : > { %v1826_v49 = vpop.f32.mrf.mxu1 }
 0x1d3   : > { %v780_v58 = vpop.f32.mrf.mxu1 }
 0x1d5   : > { %v1850_v59 = vpop.f32.mrf.mxu0  ;;  %v1827_v60 = vpop.f32.mrf.mxu1 }
 0x1d7   : > { %v1019_v61 = vpop.f32.mrf.mxu0  ;;  %v783_v62 = vpop.f32.mrf.mxu1 }
 0x1d9   : > { %v1851_v63 = vpop.f32.mrf.mxu0 }
 0x1da   : > { %v1834_v0 = vpop.f32.mrf.mxu1 }
 0x1db   : > { %v1022_v1 = vpop.f32.mrf.mxu0  ;;  %v857_v12 = vadd.f32 %v1834_v0, %v1826_v49  ;;  %v1727_v49 = vunpack.c.l.bf16 %v1726_v50 }
 0x1dc   : > { %v848_v2 = vpop.f32.mrf.mxu1 }
 0x1dd   : > { %v1866_v3 = vpop.f32.mrf.mxu0  ;;  %v849_v15 = vadd.f32 %v848_v2, %v780_v58  ;;  %v1728_v2 = vunpack.c.h.bf16 %v1726_v50 }
 0x1de   : > { %v1835_v4 = vpop.f32.mrf.mxu1 }
 0x1df   : > { %v1191_v5 = vpop.f32.mrf.mxu0 }
 0x1e0   : > { %v851_v6 = vpop.f32.mrf.mxu1 }
 0x1e1   : > { %v1867_v7 = vpop.f32.mrf.mxu0  ;;  %v852_v40 = vadd.f32 %v851_v6, %v783_v62 }
 0x1e2   : > { %v1842_v8 = vpop.f32.mrf.mxu1 }
 0x1e3   : > { %v1194_v9 = vpop.f32.mrf.mxu0  ;;  %v943_v16 = vadd.f32 %v1842_v8, %v857_v12 }
 0x1e4   : > { %v927_v39 = vpop.f32.mrf.mxu1 }
 0x1e5   : > { %v1882_v10 = vpop.f32.mrf.mxu0  ;;  %v941_v19 = vadd.f32 %v927_v39, %v849_v15  ;;  %v1035_v21 = vadd.f32 %v1850_v59, %v943_v16 }
 0x1e6   : > { %v1843_v11 = vpop.f32.mrf.mxu1 }
 0x1e7   : > { %v1379_v13 = vpop.f32.mrf.mxu0  ;;  %v1033_v25 = vadd.f32 %v1019_v61, %v941_v19 }
 0x1e8   : > { %v930_v14 = vpop.f32.mrf.mxu1 }
 0x1e9   : > { %v1883_v17 = vpop.f32.mrf.mxu0  ;;  %v942_v23 = vadd.f32 %v930_v14, %v852_v40 }
 0x1ea   : > { %v1858_v18 = vpop.f32.mrf.mxu1 }
 0x1eb   : > { %v1131_v24 = vadd.f32 %v1858_v18, %v1035_v21  ;;  %v1034_v29 = vadd.f32 %v1022_v1, %v942_v23  ;;  %v1382_v54 = vpop.f32.mrf.mxu0 }
 0x1ec   : > { %v1115_v20 = vpop.f32.mrf.mxu1 }
 0x1ed   : > { %v1129_v27 = vadd.f32 %v1115_v20, %v1033_v25  ;;  %v1207_v30 = vadd.f32 %v1866_v3, %v1131_v24 }
 0x1ee   : > { %v1859_v22 = vpop.f32.mrf.mxu1 }
 0x1ef   : > { %v1205_v34 = vadd.f32 %v1191_v5, %v1129_v27 }
 0x1f0   : > { %v1118_v26 = vpop.f32.mrf.mxu1 }
 0x1f1   : > { %v1130_v32 = vadd.f32 %v1118_v26, %v1034_v29 }
 0x1f2   : > { %v1874_v28 = vpop.f32.mrf.mxu1 }
 0x1f3   : > { %v1299_v33 = vadd.f32 %v1874_v28, %v1207_v30  ;;  %v1206_v38 = vadd.f32 %v1194_v9, %v1130_v32 }
 0x1f4   : > { %v1283_v31 = vpop.f32.mrf.mxu1 }
 0x1f5   : > { %v1297_v36 = vadd.f32 %v1283_v31, %v1205_v34  ;;  %v1395_v41 = vadd.f32 %v1882_v10, %v1299_v33 }
 0x1f6   : > { %v1875_v35 = vpop.f32.mrf.mxu1 }
 0x1f7   : > { %v1393_v47 = vadd.f32 %v1379_v13, %v1297_v36 }
 0x1f8   : > { %v1286_v37 = vpop.f32.mrf.mxu1 }
 0x1f9   : > { %v1298_v45 = vadd.f32 %v1286_v37, %v1206_v38 }
 0x1fa   : > { %v1890_v42 = vpop.f32.mrf.mxu1 }
 0x1fb   : > { %v1476_v46 = vadd.f32 %v1890_v42, %v1395_v41  ;;  %v1394_v58 = vadd.f32 %v1382_v54, %v1298_v45 }
 0x1fc   : > { %v1460_v48 = vpop.f32.mrf.mxu1 }
 0x1fd   : > { %v1486_v51 = vadd.f32 %v1711_v43, %v1476_v46  ;;  %v1474_v53 = vadd.f32 %v1460_v48, %v1393_v47 }
 0x1fe   : > { %v1891_v55 = vpop.f32.mrf.mxu1 }
 0x1ff   : > { %v1489_v56 = vmax.f32 %v1486_v51, 0.0  ;;  %v1484_v57 = vadd.f32 %v1711_v43, %v1474_v53 }
 0x200   : > { %v1463_v59 = vpop.f32.mrf.mxu1 }
 0x201   : > { %v1498_v60 = vadd.f32 %v1495_v52, %v1489_v56  ;;  %v1487_v61 = vmax.f32 %v1484_v57, 0.0  ;;  %v1475_v62 = vadd.f32 %v1463_v59, %v1394_v58 }
 0x203   : > { %v1501_v63 = vmax.f32 %v1498_v60, 0.0  ;;  %v1496_v0 = vadd.f32 %v1727_v49, %v1487_v61  ;;  %v1485_v1 = vadd.f32 %v1711_v43, %v1475_v62 }
 0x205   : > { %v1724_v3 = vpack.c.bf16 %v1501_v63, %v1501_v63  ;;  %v1499_v4 = vmax.f32 %v1496_v0, 0.0  ;;  %v1488_v5 = vmax.f32 %v1485_v1, 0.0 }
 0x207   : > { %1518 = vst.msk [vmem:[%s298_s16 + $0x8] sm:$0x7] %vm1517_vm10, %v1724_v3  ;;  %v1722_v6 = vpack.c.bf16 %v1499_v4, %v1499_v4  ;;  %v1497_v7 = vadd.f32 %v1728_v2, %v1488_v5 }
 0x209   : > { %1515 = vst.msk [vmem:[%s298_s16] sm:$0xf] %vm684_vm2, %v1722_v6  ;;  %v1500_v8 = vmax.f32 %v1497_v7, 0.0 }
 0x20b   : > { %v1723_v9 = vpack.c.bf16 %v1500_v8, %v1500_v8 }
 0x20d   : > { %1516 = vst.msk [vmem:[%s298_s16 + $0x4] sm:$0xf] %vm684_vm2, %v1723_v9 }
 0x20e PF: > { %s17_s24 = sadd.s32 1, %s1973_s24  }
 0x20f   : > { %p14_p4 = scmp.ge.s32.totalorder %s17_s24, 4  }
 0x211   :  { %16 = sbr.rel (!%p14_p4) target bundleno = 1 (0x1), region = 89 }

</bundles_post_ra>
